<compile_context>
chip_gen: v5e
topology: v5e:2x2
jax: 0.10.0
libtpu: 0.0.40
codegen_flags: <defaults>
</compile_context>

<pallas_src>
import jax
import jax.numpy as jnp
from jax.experimental import pallas as pl
from jax.experimental.pallas import tpu as pltpu


# Whole-array VMEM block (gridless pallas_call; everything here is < 4 MiB).
_VMEM = pl.BlockSpec(memory_space=pltpu.MemorySpace.VMEM)

# M (= N*Ho*Wo) above this switches conv_mm_relu to the gridded path.
_CONV_GRID_MIN_M = 2048
_CONV_BLOCK_M = 512


# ----------------------------- Pallas kernels ------------------------------ #
def _conv_mm_relu_kernel(w_ref, p_ref, b_ref, o_ref):
    """o (O, M) = relu(w (O, K) @ p (K, M) + b (O, 1)), f32 accumulation."""
    acc = jnp.dot(w_ref[...], p_ref[...].astype(w_ref.dtype),
                  preferred_element_type=jnp.float32)
    o_ref[...] = jnp.maximum(acc + b_ref[...], 0.0).astype(o_ref.dtype)


def _fc_fused_kernel(x_ref, w1_ref, b1_ref, w2_ref, b2_ref, o_ref):
    """o (N, A) = relu(x (N, K) @ w1 (K, H) + b1) @ w2 (H, A) + b2.

    The (N, H) hidden activation lives only in VMEM / vregs.
    """
    h = jnp.dot(x_ref[...].astype(w1_ref.dtype), w1_ref[...],
                preferred_element_type=jnp.float32)
    h = jnp.maximum(h + b1_ref[...], 0.0)
    o = jnp.dot(h.astype(w2_ref.dtype), w2_ref[...],
                preferred_element_type=jnp.float32)
    o_ref[...] = (o + b2_ref[...]).astype(o_ref.dtype)


# ------------------------------ Pallas wrappers ----------------------------- #
def conv_mm_relu(w_m, b_col, patches, out_dtype):
    """w_m: (O, K), b_col: (O, 1), patches: (K, M)  ->  (O, M) out_dtype."""
    o, k = w_m.shape
    k2, m = patches.shape
    assert k == k2, (w_m.shape, patches.shape)
    out_itemsize = jnp.dtype(out_dtype).itemsize

    def cost(mm):
        return pl.CostEstimate(
            flops=2 * o * k * mm,
            transcendentals=0,
            bytes_accessed=(w_m.size * w_m.dtype.itemsize
                            + k * mm * patches.dtype.itemsize
                            + b_col.size * b_col.dtype.itemsize
                            + o * mm * out_itemsize))

    if m < _CONV_GRID_MIN_M:
        # Tiny workload: gridless whole-array blocks (launch-overhead bound).
        return pl.pallas_call(
            _conv_mm_relu_kernel,
            out_shape=jax.ShapeDtypeStruct((o, m), out_dtype),
            in_specs=[_VMEM, _VMEM, _VMEM],
            out_specs=_VMEM,
            cost_estimate=cost(m),
        )(w_m, patches, b_col)

    # Batched path: pad M to a lane-dense multiple of the block, grid over M.
    # Keeps per-step VMEM small/double-buffered (safe on v7x's 64 MiB) and
    # shards across v7x's two TensorCores via the parallel grid axis.
    bm = _CONV_BLOCK_M
    m_pad = ((m + bm - 1) // bm) * bm
    if m_pad != m:
        patches = jnp.pad(patches, ((0, 0), (0, m_pad - m)))
    out = pl.pallas_call(
        _conv_mm_relu_kernel,
        out_shape=jax.ShapeDtypeStruct((o, m_pad), out_dtype),
        grid_spec=pltpu.PrefetchScalarGridSpec(
            num_scalar_prefetch=0,
            grid=(m_pad // bm,),
            in_specs=[pl.BlockSpec((o, k), lambda i: (0, 0)),
                      pl.BlockSpec((k, bm), lambda i: (0, i)),
                      pl.BlockSpec((o, 1), lambda i: (0, 0))],
            out_specs=pl.BlockSpec((o, bm), lambda i: (0, i))),
        compiler_params=pltpu.CompilerParams(
            dimension_semantics=("parallel",)),
        cost_estimate=cost(m_pad),
    )(w_m, patches, b_col)
    return out[:, :m] if m_pad != m else out


def fc1_fc2_fused(x, w1t, b1_row, w2t, b2_row):
    """x: (N, K), w1t: (K, H), b1: (1, H), w2t: (H, A), b2: (1, A) -> (N, A)."""
    n, k = x.shape
    k2, h = w1t.shape
    h2, a = w2t.shape
    assert k == k2 and h == h2
    cost = pl.CostEstimate(
        flops=2 * n * (k * h + h * a),
        transcendentals=0,
        bytes_accessed=(x.size * x.dtype.itemsize
                        + w1t.size * w1t.dtype.itemsize
                        + w2t.size * w2t.dtype.itemsize
                        + (h + a + n * a) * 4),
    )
    # Gridless: total VMEM here is ~3.3 MB in bf16 (< v5e's 16 MiB default).
    return pl.pallas_call(
        _fc_fused_kernel,
        out_shape=jax.ShapeDtypeStruct((n, a), jnp.float32),
        in_specs=[_VMEM] * 5,
        out_specs=_VMEM,
        cost_estimate=cost,
    )(x, w1t, b1_row, w2t, b2_row)


# ------------------------------ XLA glue ------------------------------------ #
def _extract_patches(y, k, s, lhs_spec):
    """im2col via one fused XLA op.

    y: 4-D activation laid out per `lhs_spec` ('NCHW' for the network input,
    'CNHW' for the feature-major intermediate activations).
    Returns (C*k*k, N*Ho*Wo) patches with feature order (C, kh, kw) — the same
    order as torch weight.view(O, -1) — plus the output spatial sizes.
    """
    p = jax.lax.conv_general_dilated_patches(
        y, filter_shape=(k, k), window_strides=(s, s), padding='VALID',
        dimension_numbers=(lhs_spec, 'OIHW', 'CNHW'))
    ckk, n, ho, wo = p.shape
    return p.reshape(ckk, n * ho * wo), ho, wo


# --------------------------- Parameter handling ----------------------------- #
def _uniform(key, shape, fan_in):
    bound = 1.0 / jnp.sqrt(jnp.float32(fan_in))
    return jax.random.uniform(key, shape, jnp.float32, -bound, bound)


def init_params(key, in_channels, action_size):
    """PyTorch-layout parameters (same shapes as the nn.Module)."""
    ks = jax.random.split(key, 10)
    return {
        "w1": _uniform(ks[0], (32, in_channels, 8, 8), in_channels * 64),
        "b1": _uniform(ks[1], (32,), in_channels * 64),
        "w2": _uniform(ks[2], (64, 32, 4, 4), 32 * 16),
        "b2": _uniform(ks[3], (64,), 32 * 16),
        "w3": _uniform(ks[4], (64, 64, 3, 3), 64 * 9),
        "b3": _uniform(ks[5], (64,), 64 * 9),
        "wf1": _uniform(ks[6], (512, 64 * 7 * 7), 64 * 7 * 7),
        "bf1": _uniform(ks[7], (512,), 64 * 7 * 7),
        "wf2": _uniform(ks[8], (action_size, 512), 512),
        "bf2": _uniform(ks[9], (action_size,), 512),
    }


def prepare_params(params, weight_dtype=jnp.bfloat16):
    """One-time hoist of every weight reshape / transpose out of the step.

    Default weight_dtype=bf16 halves the HBM traffic of every matmul operand
    (the kernels still accumulate, add bias and apply ReLU in f32).  Pass
    jnp.float32 for bit-closer parity with the PyTorch reference.
    """
    wd = weight_dtype
    return {
        "w1m":  params["w1"].reshape(params["w1"].shape[0], -1).astype(wd),  # (32, C*64)
        "b1c":  params["b1"].reshape(-1, 1),                                 # (32, 1) f32
        "w2m":  params["w2"].reshape(params["w2"].shape[0], -1).astype(wd),  # (64, 512)
        "b2c":  params["b2"].reshape(-1, 1),
        "w3m":  params["w3"].reshape(params["w3"].shape[0], -1).astype(wd),  # (64, 576)
        "b3c":  params["b3"].reshape(-1, 1),
        "wf1t": params["wf1"].T.astype(wd),                                  # (3136, 512)
        "bf1r": params["bf1"].reshape(1, -1),                                # (1, 512) f32
        "wf2t": params["wf2"].T.astype(wd),                                  # (512, A)
        "bf2r": params["bf2"].reshape(1, -1),                                # (1, A) f32
    }


# ------------------------------ Forward pass -------------------------------- #
def qnet2d_conv_forward(prep, x):
    """Mirror of QNet2D_conv.forward.  x: (N, C, 84, 84) or (C, 84, 84), NCHW."""
    if x.ndim == 3:
        x = x[None, ...]
    n = x.shape[0]
    act_dtype = prep["w1m"].dtype           # bf16 by default
    x = x.astype(act_dtype)                 # bf16 patches from the first layer on

    # conv1: 8x8 stride 4  ->  (32, N*20*20), feature-major activation.
    p1, ho1, wo1 = _extract_patches(x, 8, 4, 'NCHW')
    y1 = conv_mm_relu(prep["w1m"], prep["b1c"], p1, act_dtype)
    y1 = y1.reshape(prep["w1m"].shape[0], n, ho1, wo1)

    # conv2: 4x4 stride 2  ->  (64, N*9*9)
    p2, ho2, wo2 = _extract_patches(y1, 4, 2, 'CNHW')
    y2 = conv_mm_relu(prep["w2m"], prep["b2c"], p2, act_dtype)
    y2 = y2.reshape(prep["w2m"].shape[0], n, ho2, wo2)

    # conv3: 3x3 stride 1  ->  (64, N*7*7)
    p3, ho3, wo3 = _extract_patches(y2, 3, 1, 'CNHW')
    y3 = conv_mm_relu(prep["w3m"], prep["b3c"], p3, act_dtype)
    y3 = y3.reshape(prep["w3m"].shape[0], n, ho3, wo3)

    # Flatten to PyTorch order (N, C*H*W); tiny (N*3136-element) XLA transpose.
    x_fc = jnp.transpose(y3, (1, 0, 2, 3)).reshape(n, -1)

    # fc1 + ReLU + fc2 fused in one kernel; hidden (N, 512) never hits HBM.
    return fc1_fc2_fused(x_fc, prep["wf1t"], prep["bf1r"],
                         prep["wf2t"], prep["bf2r"])


if __name__ == "__main__":
    key = jax.random.PRNGKey(0)
    k_x, k_p = jax.random.split(key)

    batch, in_channels, spatial = 2, 4, 84   # 84x84 required by fc1 = 64*7*7
    action_size = 6

    x = jax.random.normal(k_x, (batch, in_channels, spatial, spatial), jnp.float32)
    params = init_params(k_p, in_channels, action_size)

    # Weight reshapes / transposes happen exactly once, outside the step.
    # bf16 by default (perf review); kernels keep f32 accumulation/bias/ReLU.
    prep = prepare_params(params, weight_dtype=jnp.bfloat16)

    fwd = jax.jit(qnet2d_conv_forward)
    out = fwd(prep, x)
    out = jax.block_until_ready(out)

    assert out.shape == (batch, action_size), out.shape
    assert out.dtype == jnp.float32
    assert bool(jnp.isfinite(out).all())
    print("KERNEL_OK")
</pallas_src>

<mosaic_0001>
module attributes {stable_mosaic.version = 11 : i64} {
  func.func @_conv_mm_relu_kernel(%arg0: memref<32x256xbf16, #tpu.memory_space<vmem>>, %arg1: memref<256x800xbf16, #tpu.memory_space<vmem>>, %arg2: memref<32x1xf32, #tpu.memory_space<vmem>>, %arg3: memref<32x800xbf16, #tpu.memory_space<vmem>>) attributes {dimension_semantics = [], scalar_prefetch = 0 : i64, scratch_operands = 0 : i64, tpu.core_type = #tpu.core_type<tc>} {
    %c0 = arith.constant 0 : index
    %c0_0 = arith.constant 0 : index
    %0 = vector.load %arg0[%c0, %c0_0] : memref<32x256xbf16, #tpu.memory_space<vmem>>, vector<32x256xbf16>
    %c0_1 = arith.constant 0 : index
    %c0_2 = arith.constant 0 : index
    %1 = vector.load %arg1[%c0_1, %c0_2] : memref<256x800xbf16, #tpu.memory_space<vmem>>, vector<256x800xbf16>
    %cst = arith.constant dense<0.000000e+00> : vector<32x800xf32>
    %2 = tpu.matmul %0, %1, %cst {dimension_numbers = #tpu.dot_dimension_numbers<[1], [0], [0], [1], [0, 0, 1, 1], [], []>} : vector<32x256xbf16>, vector<256x800xbf16>, vector<32x800xf32> -> vector<32x800xf32>
    %c0_3 = arith.constant 0 : index
    %c0_4 = arith.constant 0 : index
    %3 = vector.load %arg2[%c0_3, %c0_4] : memref<32x1xf32, #tpu.memory_space<vmem>>, vector<32x1xf32>
    %4 = vector.broadcast %3 : vector<32x1xf32> to vector<32x800xf32>
    %5 = arith.addf %2, %4 : vector<32x800xf32>
    %cst_5 = arith.constant 0.000000e+00 : f32
    %6 = vector.broadcast %cst_5 : f32 to vector<32x800xf32>
    %7 = arith.maximumf %5, %6 : vector<32x800xf32>
    %8 = arith.truncf %7 : vector<32x800xf32> to vector<32x800xbf16>
    %c0_6 = arith.constant 0 : index
    %c0_7 = arith.constant 0 : index
    %9 = vector.load %arg3[%c0_6, %c0_7] : memref<32x800xbf16, #tpu.memory_space<vmem>>, vector<32x800xbf16>
    tpu.vector_store %arg3[%c0_6, %c0_7], %8 {strides = array<i32>} : memref<32x800xbf16, #tpu.memory_space<vmem>>, vector<32x800xbf16>,
    return
  }
}

module attributes {stable_mosaic.version = 11 : i64} {
  func.func @_conv_mm_relu_kernel(%arg0: memref<64x512xbf16, #tpu.memory_space<vmem>>, %arg1: memref<512x162xbf16, #tpu.memory_space<vmem>>, %arg2: memref<64x1xf32, #tpu.memory_space<vmem>>, %arg3: memref<64x162xbf16, #tpu.memory_space<vmem>>) attributes {dimension_semantics = [], scalar_prefetch = 0 : i64, scratch_operands = 0 : i64, tpu.core_type = #tpu.core_type<tc>} {
    %c0 = arith.constant 0 : index
    %c0_0 = arith.constant 0 : index
    %0 = vector.load %arg0[%c0, %c0_0] : memref<64x512xbf16, #tpu.memory_space<vmem>>, vector<64x512xbf16>
    %c0_1 = arith.constant 0 : index
    %c0_2 = arith.constant 0 : index
    %1 = vector.load %arg1[%c0_1, %c0_2] : memref<512x162xbf16, #tpu.memory_space<vmem>>, vector<512x162xbf16>
    %cst = arith.constant dense<0.000000e+00> : vector<64x162xf32>
    %2 = tpu.matmul %0, %1, %cst {dimension_numbers = #tpu.dot_dimension_numbers<[1], [0], [0], [1], [0, 0, 1, 1], [], []>} : vector<64x512xbf16>, vector<512x162xbf16>, vector<64x162xf32> -> vector<64x162xf32>
    %c0_3 = arith.constant 0 : index
    %c0_4 = arith.constant 0 : index
    %3 = vector.load %arg2[%c0_3, %c0_4] : memref<64x1xf32, #tpu.memory_space<vmem>>, vector<64x1xf32>
    %4 = vector.broadcast %3 : vector<64x1xf32> to vector<64x162xf32>
    %5 = arith.addf %2, %4 : vector<64x162xf32>
    %cst_5 = arith.constant 0.000000e+00 : f32
    %6 = vector.broadcast %cst_5 : f32 to vector<64x162xf32>
    %7 = arith.maximumf %5, %6 : vector<64x162xf32>
    %8 = arith.truncf %7 : vector<64x162xf32> to vector<64x162xbf16>
    %c0_6 = arith.constant 0 : index
    %c0_7 = arith.constant 0 : index
    %9 = vector.load %arg3[%c0_6, %c0_7] : memref<64x162xbf16, #tpu.memory_space<vmem>>, vector<64x162xbf16>
    tpu.vector_store %arg3[%c0_6, %c0_7], %8 {strides = array<i32>} : memref<64x162xbf16, #tpu.memory_space<vmem>>, vector<64x162xbf16>,
    return
  }
}

module attributes {stable_mosaic.version = 11 : i64} {
  func.func @_conv_mm_relu_kernel(%arg0: memref<64x576xbf16, #tpu.memory_space<vmem>>, %arg1: memref<576x98xbf16, #tpu.memory_space<vmem>>, %arg2: memref<64x1xf32, #tpu.memory_space<vmem>>, %arg3: memref<64x98xbf16, #tpu.memory_space<vmem>>) attributes {dimension_semantics = [], scalar_prefetch = 0 : i64, scratch_operands = 0 : i64, tpu.core_type = #tpu.core_type<tc>} {
    %c0 = arith.constant 0 : index
    %c0_0 = arith.constant 0 : index
    %0 = vector.load %arg0[%c0, %c0_0] : memref<64x576xbf16, #tpu.memory_space<vmem>>, vector<64x576xbf16>
    %c0_1 = arith.constant 0 : index
    %c0_2 = arith.constant 0 : index
    %1 = vector.load %arg1[%c0_1, %c0_2] : memref<576x98xbf16, #tpu.memory_space<vmem>>, vector<576x98xbf16>
    %cst = arith.constant dense<0.000000e+00> : vector<64x98xf32>
    %2 = tpu.matmul %0, %1, %cst {dimension_numbers = #tpu.dot_dimension_numbers<[1], [0], [0], [1], [0, 0, 1, 1], [], []>} : vector<64x576xbf16>, vector<576x98xbf16>, vector<64x98xf32> -> vector<64x98xf32>
    %c0_3 = arith.constant 0 : index
    %c0_4 = arith.constant 0 : index
    %3 = vector.load %arg2[%c0_3, %c0_4] : memref<64x1xf32, #tpu.memory_space<vmem>>, vector<64x1xf32>
    %4 = vector.broadcast %3 : vector<64x1xf32> to vector<64x98xf32>
    %5 = arith.addf %2, %4 : vector<64x98xf32>
    %cst_5 = arith.constant 0.000000e+00 : f32
    %6 = vector.broadcast %cst_5 : f32 to vector<64x98xf32>
    %7 = arith.maximumf %5, %6 : vector<64x98xf32>
    %8 = arith.truncf %7 : vector<64x98xf32> to vector<64x98xbf16>
    %c0_6 = arith.constant 0 : index
    %c0_7 = arith.constant 0 : index
    %9 = vector.load %arg3[%c0_6, %c0_7] : memref<64x98xbf16, #tpu.memory_space<vmem>>, vector<64x98xbf16>
    tpu.vector_store %arg3[%c0_6, %c0_7], %8 {strides = array<i32>} : memref<64x98xbf16, #tpu.memory_space<vmem>>, vector<64x98xbf16>,
    return
  }
}

module attributes {stable_mosaic.version = 11 : i64} {
  func.func @_fc_fused_kernel(%arg0: memref<2x3136xbf16, #tpu.memory_space<vmem>>, %arg1: memref<3136x512xbf16, #tpu.memory_space<vmem>>, %arg2: memref<1x512xf32, #tpu.memory_space<vmem>>, %arg3: memref<512x6xbf16, #tpu.memory_space<vmem>>, %arg4: memref<1x6xf32, #tpu.memory_space<vmem>>, %arg5: memref<2x6xf32, #tpu.memory_space<vmem>>) attributes {dimension_semantics = [], scalar_prefetch = 0 : i64, scratch_operands = 0 : i64, tpu.core_type = #tpu.core_type<tc>} {
    %c0 = arith.constant 0 : index
    %c0_0 = arith.constant 0 : index
    %0 = vector.load %arg0[%c0, %c0_0] : memref<2x3136xbf16, #tpu.memory_space<vmem>>, vector<2x3136xbf16>
    %c0_1 = arith.constant 0 : index
    %c0_2 = arith.constant 0 : index
    %1 = vector.load %arg1[%c0_1, %c0_2] : memref<3136x512xbf16, #tpu.memory_space<vmem>>, vector<3136x512xbf16>
    %cst = arith.constant dense<0.000000e+00> : vector<2x512xf32>
    %2 = tpu.matmul %0, %1, %cst {dimension_numbers = #tpu.dot_dimension_numbers<[1], [0], [0], [1], [0, 0, 1, 1], [], []>} : vector<2x3136xbf16>, vector<3136x512xbf16>, vector<2x512xf32> -> vector<2x512xf32>
    %c0_3 = arith.constant 0 : index
    %c0_4 = arith.constant 0 : index
    %3 = vector.load %arg2[%c0_3, %c0_4] : memref<1x512xf32, #tpu.memory_space<vmem>>, vector<1x512xf32>
    %4 = vector.broadcast %3 : vector<1x512xf32> to vector<2x512xf32>
    %5 = arith.addf %2, %4 : vector<2x512xf32>
    %cst_5 = arith.constant 0.000000e+00 : f32
    %6 = vector.broadcast %cst_5 : f32 to vector<2x512xf32>
    %7 = arith.maximumf %5, %6 : vector<2x512xf32>
    %8 = arith.truncf %7 : vector<2x512xf32> to vector<2x512xbf16>
    %c0_6 = arith.constant 0 : index
    %c0_7 = arith.constant 0 : index
    %9 = vector.load %arg3[%c0_6, %c0_7] : memref<512x6xbf16, #tpu.memory_space<vmem>>, vector<512x6xbf16>
    %cst_8 = arith.constant dense<0.000000e+00> : vector<2x6xf32>
    %10 = tpu.matmul %8, %9, %cst_8 {dimension_numbers = #tpu.dot_dimension_numbers<[1], [0], [0], [1], [0, 0, 1, 1], [], []>} : vector<2x512xbf16>, vector<512x6xbf16>, vector<2x6xf32> -> vector<2x6xf32>
    %c0_9 = arith.constant 0 : index
    %c0_10 = arith.constant 0 : index
    %11 = vector.load %arg4[%c0_9, %c0_10] : memref<1x6xf32, #tpu.memory_space<vmem>>, vector<1x6xf32>
    %12 = vector.broadcast %11 : vector<1x6xf32> to vector<2x6xf32>
    %13 = arith.addf %10, %12 : vector<2x6xf32>
    %c0_11 = arith.constant 0 : index
    %c0_12 = arith.constant 0 : index
    %14 = vector.load %arg5[%c0_11, %c0_12] : memref<2x6xf32, #tpu.memory_space<vmem>>, vector<2x6xf32>
    tpu.vector_store %arg5[%c0_11, %c0_12], %13 {strides = array<i32>} : memref<2x6xf32, #tpu.memory_space<vmem>>, vector<2x6xf32>,
    return
  }
}

</mosaic_0001>

<bundles_post_ra>
// kernel: qnet2d_conv_forward.4
= control target key start
LH: loop header
LB: loop body
LE: loop exit
PB: predicated region body
PF: predicated region fallthrough
CT: control target
= control target key end

     0   :  { %vm1079_vm0 = vcmask 257024   ;;  %s2549_s1 = inlined_call_operand.vmem [shape: bf16[256,800], index: 1, kind: input, shape index: {}]   ;;  %s2550_s0 = inlined_call_operand.vmem [shape: bf16[32,256], index: 0, kind: input, shape index: {}]   ;;  %s2551_s2 = inlined_call_operand.vmem [shape: f32[32,1], index: 2, kind: input, shape index: {}]   ;;  %s2552_s3 = inlined_call_operand.vmem [shape: bf16[32,800], index: 3, kind: output, shape index: {}]  }
   0x1   :  { %v1311_v0 = vld [vmem:[%s2549_s1 + $0x188] sm:$0xf]  ;;  %v1617_v1 = vld [vmem:[%s2549_s1 + $0x1a0] sm:$0xf0]  ;;  %v1614_v5 = vld [vmem:[%s2549_s1 + $0x18c] sm:$0xf] }
   0x2   :  { %v1535_v2 = vld [vmem:[%s2549_s1 + $0x348] sm:$0xf]  ;;  %v1312_v3 = vor.u32 %v1617_v1, %v1311_v0  ;;  %v1673_v4 = vld [vmem:[%s2549_s1 + $0x360] sm:$0xf0]  ;;  %v1670_v9 = vld [vmem:[%s2549_s1 + $0x34c] sm:$0xf] }
   0x3   :  { %v1313_v6 = vld [vmem:[%s2549_s1 + $0x1a4] sm:$0xf0]  ;;  %v1536_v7 = vor.u32 %v1673_v4, %v1535_v2  ;;  %v1283_v11 = vld [vmem:[%s2549_s1 + $0x150] sm:$0xf]  ;;  %v1610_v13 = vld [vmem:[%s2549_s1 + $0x168] sm:$0xf0] }
   0x4   :  { %v1316_v8 = vor.u32 %v1614_v5, %v1313_v6  ;;  %v1537_v10 = vld [vmem:[%s2549_s1 + $0x364] sm:$0xf0]  ;;  %766 = vmatpush.bf16.msra.mxu0 %v1312_v3  ;;  %v1507_v14 = vld [vmem:[%s2549_s1 + $0x310] sm:$0xf]  ;;  %v1666_v15 = vld [vmem:[%s2549_s1 + $0x328] sm:$0xf0]  ;;  %v1284_v16 = vor.u32 %v1610_v13, %v1283_v11 }
   0x5   :  { %v1540_v12 = vor.u32 %v1670_v9, %v1537_v10  ;;  %785 = vmatpush.bf16.msra.mxu1 %v1536_v7  ;;  %v1508_v17 = vor.u32 %v1666_v15, %v1507_v14  ;;  %v1607_v18 = vld [vmem:[%s2549_s1 + $0x154] sm:$0xf]  ;;  %v1285_v19 = vld [vmem:[%s2549_s1 + $0x16c] sm:$0xf0]  ;;  %v1255_v23 = vld [vmem:[%s2549_s1 + $0x118] sm:$0xf] }
   0x6   :  { %804 = vmatpush.bf16.msra.mxu2 %v1316_v8  ;;  %v1663_v20 = vld [vmem:[%s2549_s1 + $0x314] sm:$0xf]  ;;  %v1288_v21 = vor.u32 %v1607_v18, %v1285_v19  ;;  %v1509_v22 = vld [vmem:[%s2549_s1 + $0x32c] sm:$0xf0]  ;;  %v1479_v26 = vld [vmem:[%s2549_s1 + $0x2d8] sm:$0xf] }
   0x7   :  { %823 = vmatpush.bf16.msra.mxu3 %v1540_v12  ;;  %v1603_v24 = vld [vmem:[%s2549_s1 + $0x130] sm:$0xf0]  ;;  %v1512_v25 = vor.u32 %v1663_v20, %v1509_v22  ;;  %v1600_v28 = vld [vmem:[%s2549_s1 + $0x11c] sm:$0xf]  ;;  %v1257_v30 = vld [vmem:[%s2549_s1 + $0x134] sm:$0xf0] }
   0x8   :  { %v1659_v27 = vld [vmem:[%s2549_s1 + $0x2f0] sm:$0xf0]  ;;  %767 = vmatpush.bf16.msra.mxu0 %v1284_v16  ;;  %v1256_v29 = vor.u32 %v1603_v24, %v1255_v23  ;;  %v1656_v31 = vld [vmem:[%s2549_s1 + $0x2dc] sm:$0xf]  ;;  %v1481_v32 = vld [vmem:[%s2549_s1 + $0x2f4] sm:$0xf0]  ;;  %v1260_v34 = vor.u32 %v1600_v28, %v1257_v30 }
   0x9   :  { %786 = vmatpush.bf16.msra.mxu1 %v1508_v17  ;;  %v1480_v33 = vor.u32 %v1659_v27, %v1479_v26  ;;  %v1227_v35 = vld [vmem:[%s2549_s1 + $0xe0] sm:$0xf]  ;;  %v1596_v36 = vld [vmem:[%s2549_s1 + $0xf8] sm:$0xf0]  ;;  %v1484_v38 = vor.u32 %v1656_v31, %v1481_v32  ;;  %v1593_v40 = vld [vmem:[%s2549_s1 + $0xe4] sm:$0xf] }
   0xa   :  { %805 = vmatpush.bf16.msra.mxu2 %v1288_v21  ;;  %v1451_v37 = vld [vmem:[%s2549_s1 + $0x2a0] sm:$0xf]  ;;  %v1652_v39 = vld [vmem:[%s2549_s1 + $0x2b8] sm:$0xf0]  ;;  %v1649_v42 = vld [vmem:[%s2549_s1 + $0x2a4] sm:$0xf]  ;;  %v1228_v44 = vor.u32 %v1596_v36, %v1227_v35 }
   0xb   :  { %824 = vmatpush.bf16.msra.mxu3 %v1512_v25  ;;  %v1229_v41 = vld [vmem:[%s2549_s1 + $0xfc] sm:$0xf0]  ;;  %v1452_v45 = vor.u32 %v1652_v39, %v1451_v37  ;;  %v1199_v47 = vld [vmem:[%s2549_s1 + $0xa8] sm:$0xf]  ;;  %v1589_v48 = vld [vmem:[%s2549_s1 + $0xc0] sm:$0xf0] }
   0xc   :  { %v1453_v43 = vld [vmem:[%s2549_s1 + $0x2bc] sm:$0xf0]  ;;  %768 = vmatpush.bf16.msra.mxu0 %v1256_v29  ;;  %v1232_v46 = vor.u32 %v1593_v40, %v1229_v41  ;;  %v1423_v49 = vld [vmem:[%s2549_s1 + $0x268] sm:$0xf]  ;;  %v1645_v51 = vld [vmem:[%s2549_s1 + $0x280] sm:$0xf0]  ;;  %v1200_v56 = vor.u32 %v1589_v48, %v1199_v47 }
   0xd   :  { %787 = vmatpush.bf16.msra.mxu1 %v1480_v33  ;;  %v1456_v50 = vor.u32 %v1649_v42, %v1453_v43  ;;  %v1586_v52 = vld [vmem:[%s2549_s1 + $0xac] sm:$0xf]  ;;  %v1201_v53 = vld [vmem:[%s2549_s1 + $0xc4] sm:$0xf0]  ;;  %v1424_v57 = vor.u32 %v1645_v51, %v1423_v49  ;;  %v1171_v59 = vld [vmem:[%s2549_s1 + $0x70] sm:$0xf] }
   0xe   :  { %806 = vmatpush.bf16.msra.mxu2 %v1260_v34  ;;  %v1642_v54 = vld [vmem:[%s2549_s1 + $0x26c] sm:$0xf]  ;;  %v1425_v55 = vld [vmem:[%s2549_s1 + $0x284] sm:$0xf0]  ;;  %v1204_v58 = vor.u32 %v1586_v52, %v1201_v53  ;;  %v1395_v61 = vld [vmem:[%s2549_s1 + $0x230] sm:$0xf] }
   0xf   :  { %825 = vmatpush.bf16.msra.mxu3 %v1484_v38  ;;  %v1582_v60 = vld [vmem:[%s2549_s1 + $0x88] sm:$0xf0]  ;;  %v1428_v62 = vor.u32 %v1642_v54, %v1425_v55  ;;  %v1579_v0 = vld [vmem:[%s2549_s1 + $0x74] sm:$0xf]  ;;  %v1173_v1 = vld [vmem:[%s2549_s1 + $0x8c] sm:$0xf0] }
  0x10   :  { %769 = vmatpush.bf16.msra.mxu0 %v1228_v44  ;;  %v1638_v63 = vld [vmem:[%s2549_s1 + $0x248] sm:$0xf0]  ;;  %v1635_v2 = vld [vmem:[%s2549_s1 + $0x234] sm:$0xf]  ;;  %v1397_v3 = vld [vmem:[%s2549_s1 + $0x24c] sm:$0xf0]  ;;  %v1172_v4 = vor.u32 %v1582_v60, %v1171_v59  ;;  %v1176_v6 = vor.u32 %v1579_v0, %v1173_v1 }
  0x11   :  { %788 = vmatpush.bf16.msra.mxu1 %v1452_v45  ;;  %v1396_v5 = vor.u32 %v1638_v63, %v1395_v61  ;;  %v1143_v7 = vld [vmem:[%s2549_s1 + $0x38] sm:$0xf]  ;;  %v1575_v8 = vld [vmem:[%s2549_s1 + $0x50] sm:$0xf0]  ;;  %v1400_v10 = vor.u32 %v1635_v2, %v1397_v3  ;;  %v1572_v12 = vld [vmem:[%s2549_s1 + $0x3c] sm:$0xf] }
  0x12   :  { %807 = vmatpush.bf16.msra.mxu2 %v1232_v46  ;;  %v1367_v9 = vld [vmem:[%s2549_s1 + $0x1f8] sm:$0xf]  ;;  %v1631_v11 = vld [vmem:[%s2549_s1 + $0x210] sm:$0xf0]  ;;  %v1628_v14 = vld [vmem:[%s2549_s1 + $0x1fc] sm:$0xf]  ;;  %v1144_v16 = vor.u32 %v1575_v8, %v1143_v7 }
  0x13   :  { %826 = vmatpush.bf16.msra.mxu3 %v1456_v50  ;;  %v1145_v13 = vld [vmem:[%s2549_s1 + $0x54] sm:$0xf0]  ;;  %v1115_v17 = vld [vmem:[%s2549_s1] sm:$0xf]  ;;  %v1568_v18 = vld [vmem:[%s2549_s1 + $0x18] sm:$0xf0]  ;;  %v1368_v19 = vor.u32 %v1631_v11, %v1367_v9 }
  0x14   :  { %770 = vmatpush.bf16.msra.mxu0 %v1200_v56  ;;  %v1369_v15 = vld [vmem:[%s2549_s1 + $0x214] sm:$0xf0]  ;;  %v1148_v20 = vor.u32 %v1572_v12, %v1145_v13  ;;  %v1339_v21 = vld [vmem:[%s2549_s1 + $0x1c0] sm:$0xf]  ;;  %v1624_v22 = vld [vmem:[%s2549_s1 + $0x1d8] sm:$0xf0]  ;;  %v1116_v31 = vor.u32 %v1568_v18, %v1115_v17 }
  0x15   :  { %789 = vmatpush.bf16.msra.mxu1 %v1424_v57  ;;  %v1565_v23 = vld [vmem:[%s2549_s1 + $0x4] sm:$0xf]  ;;  %v1372_v24 = vor.u32 %v1628_v14, %v1369_v15  ;;  %v1117_v25 = vld [vmem:[%s2549_s1 + $0x1c] sm:$0xf0]  ;;  %v1615_v29 = vld [vmem:[%s2549_s1 + $0x194] sm:$0xf]  ;;  %v1340_v35 = vor.u32 %v1624_v22, %v1339_v21 }
  0x16   :  { %808 = vmatpush.bf16.msra.mxu2 %v1204_v58  ;;  %v1621_v26 = vld [vmem:[%s2549_s1 + $0x1c4] sm:$0xf]  ;;  %v1341_v27 = vld [vmem:[%s2549_s1 + $0x1dc] sm:$0xf0]  ;;  %v1321_v30 = vld [vmem:[%s2549_s1 + $0x1ac] sm:$0xf0]  ;;  %v1120_v36 = vor.u32 %v1565_v23, %v1117_v25 }
  0x17   :  { %827 = vmatpush.bf16.msra.mxu3 %v1428_v62  ;;  %v1099_v28 = vld [vmem:[%s2550_s0] sm:$0xf]  ;;  %v1562_v32 = vld [vmem:[%s2550_s0 + $0x4] sm:$0xf0]  ;;  %v1543_v33 = vld [vmem:[%s2549_s1 + $0x350] sm:$0xf]  ;;  %v1344_v40 = vor.u32 %v1621_v26, %v1341_v27  ;;  %v1324_v41 = vor.u32 %v1615_v29, %v1321_v30 }
  0x18   :  { %771 = vmatpush.bf16.msra.mxu0 %v1172_v4  ;;  %v1674_v34 = vld [vmem:[%s2549_s1 + $0x368] sm:$0xf0]  ;;  %v1561_v37 = vld [vmem:[%s2550_s0 + $0x4] sm:$0xf]  ;;  %v1319_v39 = vld [vmem:[%s2549_s1 + $0x190] sm:$0xf]  ;;  %v1945_v45 = vor.u32 %v1562_v32, %v1099_v28 }
  0x19   :  { %790 = vmatpush.bf16.msra.mxu1 %v1396_v5  ;;  %v1101_v38 = vld [vmem:[%s2550_s0 + $0x8] sm:$0xf0]  ;;  %v1671_v43 = vld [vmem:[%s2549_s1 + $0x354] sm:$0xf]  ;;  %v1545_v44 = vld [vmem:[%s2549_s1 + $0x36c] sm:$0xf0]  ;;  %v1544_v46 = vor.u32 %v1674_v34, %v1543_v33 }
  0x1a   :  { %809 = vmatpush.bf16.msra.mxu2 %v1176_v6  ;;  %v1618_v42 = vld [vmem:[%s2549_s1 + $0x1a8] sm:$0xf0]  ;;  %v1608_v47 = vld [vmem:[%s2549_s1 + $0x15c] sm:$0xf]  ;;  %v1293_v48 = vld [vmem:[%s2549_s1 + $0x174] sm:$0xf0]  ;;  %v1953_v49 = vor.u32 %v1561_v37, %v1101_v38  ;;  %v1548_v54 = vor.u32 %v1671_v43, %v1545_v44 }
  0x1b   :  { %828 = vmatpush.bf16.msra.mxu3 %v1400_v10  ;;  %v1515_v50 = vld [vmem:[%s2549_s1 + $0x318] sm:$0xf]  ;;  %v1667_v51 = vld [vmem:[%s2549_s1 + $0x330] sm:$0xf0]  ;;  %v1696_v52 = vmov 0   ;;  %v1320_v53 = vor.u32 %v1618_v42, %v1319_v39  ;;  %v1296_v55 = vor.u32 %v1608_v47, %v1293_v48  ;;  %v146_v1 = vld [vmem:[%s2551_s2] sm:$0xff] }
  0x1c   :  { %772 = vmatpush.bf16.msra.mxu0 %v1144_v16  ;;  %1694 = vset.pattern.permute.xlu0 %v1696_v52  ;;  %v1291_v56 = vld [vmem:[%s2549_s1 + $0x158] sm:$0xf]  ;;  %v1611_v57 = vld [vmem:[%s2549_s1 + $0x170] sm:$0xf0]  ;;  %v1664_v58 = vld [vmem:[%s2549_s1 + $0x31c] sm:$0xf]  ;;  %v1516_v59 = vor.u32 %v1667_v51, %v1515_v50 }
  0x1d   :  { %791 = vmatpush.bf16.msra.mxu1 %v1368_v19  ;;  %v1517_v60 = vld [vmem:[%s2549_s1 + $0x334] sm:$0xf0]  ;;  %v1601_v61 = vld [vmem:[%s2549_s1 + $0x124] sm:$0xf]  ;;  %v1265_v62 = vld [vmem:[%s2549_s1 + $0x13c] sm:$0xf0]  ;;  %v1292_v2 = vor.u32 %v1611_v57, %v1291_v56  ;;  %152 = vperm.xlu0 %1694, %v146_v1  }
  0x1e   :  { %810 = vmatpush.bf16.msra.mxu2 %v1148_v20  ;;  %v1487_v63 = vld [vmem:[%s2549_s1 + $0x2e0] sm:$0xf]  ;;  %v1660_v0 = vld [vmem:[%s2549_s1 + $0x2f8] sm:$0xf0]  ;;  %v1520_v3 = vor.u32 %v1664_v58, %v1517_v60  ;;  %v1268_v4 = vor.u32 %v1601_v61, %v1265_v62  ;;  %v1657_v7 = vld [vmem:[%s2549_s1 + $0x2e4] sm:$0xf]  ;;  %1695 = vset.pattern.permute.xlu1 %v1696_v52 }
  0x1f   :  { %829 = vmatpush.bf16.msra.mxu3 %v1372_v24  ;;  %v1263_v5 = vld [vmem:[%s2549_s1 + $0x120] sm:$0xf]  ;;  %v1604_v6 = vld [vmem:[%s2549_s1 + $0x138] sm:$0xf0]  ;;  %v1488_v8 = vor.u32 %v1660_v0, %v1487_v63  ;;  %v1594_v10 = vld [vmem:[%s2549_s1 + $0xec] sm:$0xf] }
  0x20   :  { %773 = vmatpush.bf16.msra.mxu0 %v1116_v31  ;;  %v1489_v9 = vld [vmem:[%s2549_s1 + $0x2fc] sm:$0xf0]  ;;  %v1237_v11 = vld [vmem:[%s2549_s1 + $0x104] sm:$0xf0]  ;;  %v1653_v13 = vld [vmem:[%s2549_s1 + $0x2c0] sm:$0xf0]  ;;  %v1264_v14 = vor.u32 %v1604_v6, %v1263_v5 }
  0x21   :  { %792 = vmatpush.bf16.msra.mxu1 %v1340_v35  ;;  %v1459_v12 = vld [vmem:[%s2549_s1 + $0x2a8] sm:$0xf]  ;;  %v1597_v16 = vld [vmem:[%s2549_s1 + $0x100] sm:$0xf0]  ;;  %v1650_v17 = vld [vmem:[%s2549_s1 + $0x2ac] sm:$0xf]  ;;  %v1492_v18 = vor.u32 %v1657_v7, %v1489_v9  ;;  %v1240_v19 = vor.u32 %v1594_v10, %v1237_v11 }
  0x22   :  { %811 = vmatpush.bf16.msra.mxu2 %v1120_v36  ;;  %v1235_v15 = vld [vmem:[%s2549_s1 + $0xe8] sm:$0xf]  ;;  %v1107_v21 = vld [vmem:[%s2550_s0 + $0x10] sm:$0xf]  ;;  %v1564_v22 = vld [vmem:[%s2550_s0 + $0x14] sm:$0xf0]  ;;  %v1460_v23 = vor.u32 %v1653_v13, %v1459_v12 }
  0x23   :  { %830 = vmatpush.bf16.msra.mxu3 %v1344_v40  ;;  %774 = vmatmul.bf16.vlgmr.msra.gmra.mxu0 %v1945_v45  ;;  %v1461_v20 = vld [vmem:[%s2549_s1 + $0x2c4] sm:$0xf0]  ;;  %v1587_v24 = vld [vmem:[%s2549_s1 + $0xb4] sm:$0xf]  ;;  %v1209_v25 = vld [vmem:[%s2549_s1 + $0xcc] sm:$0xf0]  ;;  %v1236_v30 = vor.u32 %v1597_v16, %v1235_v15  ;;  %v2067_v38 = vor.u32 %v1564_v22, %v1107_v21 }
  0x24   :  { %793 = vmatmul.bf16.vlgmr.msra.gmra.mxu1 %v1953_v49  ;;  %842 = vmatpush.bf16.msrb.mxu0 %v1320_v53  ;;  %v1431_v26 = vld [vmem:[%s2549_s1 + $0x270] sm:$0xf]  ;;  %v1646_v27 = vld [vmem:[%s2549_s1 + $0x288] sm:$0xf0]  ;;  %v1563_v31 = vld [vmem:[%s2550_s0 + $0x14] sm:$0xf]  ;;  %v1464_v33 = vor.u32 %v1650_v17, %v1461_v20  ;;  %v1212_v34 = vor.u32 %v1587_v24, %v1209_v25 }
  0x25   :  { %861 = vmatpush.bf16.msrb.mxu1 %v1544_v46  ;;  %812 = vmatmul.bf16.vlgmr.msra.gmra.mxu2 %v1945_v45  ;;  %v147_v28 = vld [vmem:[%s2551_s2 + $0x8] sm:$0xff]  ;;  %v148_v29 = vld [vmem:[%s2551_s2 + $0x10] sm:$0xff]  ;;  %v1109_v32 = vld [vmem:[%s2550_s0 + $0x18] sm:$0xf0]  ;;  %v1432_v39 = vor.u32 %v1646_v27, %v1431_v26 }
  0x26   :  { %880 = vmatpush.bf16.msrb.mxu2 %v1324_v41  ;;  %831 = vmatmul.bf16.vlgmr.msra.gmra.mxu3 %v1953_v49  ;;  %v1207_v35 = vld [vmem:[%s2549_s1 + $0xb0] sm:$0xf]  ;;  %v1590_v36 = vld [vmem:[%s2549_s1 + $0xc8] sm:$0xf0]  ;;  %v1643_v37 = vld [vmem:[%s2549_s1 + $0x274] sm:$0xf]  ;;  %v2078_v43 = vor.u32 %v1563_v31, %v1109_v32 }
  0x27   :  { %899 = vmatpush.bf16.msrb.mxu3 %v1548_v54  ;;  %162 = vperm.xlu1 %1695, %v148_v29   ;;  %v1433_v40 = vld [vmem:[%s2549_s1 + $0x28c] sm:$0xf0]  ;;  %v1580_v41 = vld [vmem:[%s2549_s1 + $0x7c] sm:$0xf]  ;;  %v1181_v42 = vld [vmem:[%s2549_s1 + $0x94] sm:$0xf0]  ;;  %v1208_v47 = vor.u32 %v1590_v36, %v1207_v35 }
  0x28   :  { %843 = vmatpush.bf16.msrb.mxu0 %v1292_v2  ;;  %157 = vperm.xlu0 %1694, %v147_v28   ;;  %v1403_v44 = vld [vmem:[%s2549_s1 + $0x238] sm:$0xf]  ;;  %v1639_v46 = vld [vmem:[%s2549_s1 + $0x250] sm:$0xf0]  ;;  %v1436_v48 = vor.u32 %v1643_v37, %v1433_v40  ;;  %v1184_v50 = vor.u32 %v1580_v41, %v1181_v42  ;;  %v1636_v53 = vld [vmem:[%s2549_s1 + $0x23c] sm:$0xf] }
  0x29   :  { %862 = vmatpush.bf16.msrb.mxu1 %v1516_v59  ;;  %v1179_v51 = vld [vmem:[%s2549_s1 + $0x78] sm:$0xf]  ;;  %v1583_v52 = vld [vmem:[%s2549_s1 + $0x90] sm:$0xf0]  ;;  %v1404_v54 = vor.u32 %v1639_v46, %v1403_v44  ;;  %v1573_v56 = vld [vmem:[%s2549_s1 + $0x44] sm:$0xf] }
  0x2a   :  { %881 = vmatpush.bf16.msrb.mxu2 %v1296_v55  ;;  %v1405_v55 = vld [vmem:[%s2549_s1 + $0x254] sm:$0xf0]  ;;  %v1153_v57 = vld [vmem:[%s2549_s1 + $0x5c] sm:$0xf0]  ;;  %v1632_v59 = vld [vmem:[%s2549_s1 + $0x218] sm:$0xf0]  ;;  %v1180_v61 = vor.u32 %v1583_v52, %v1179_v51 }
  0x2b   :  { %900 = vmatpush.bf16.msrb.mxu3 %v1520_v3  ;;  %v1375_v58 = vld [vmem:[%s2549_s1 + $0x200] sm:$0xf]  ;;  %v149_v60 = vld [vmem:[%s2551_s2 + $0x18] sm:$0xff]  ;;  %v1408_v63 = vor.u32 %v1636_v53, %v1405_v55  ;;  %v1156_v0 = vor.u32 %v1573_v56, %v1153_v57  ;;  %v1629_v2 = vld [vmem:[%s2549_s1 + $0x204] sm:$0xf] }
  0x2c   :  { %844 = vmatpush.bf16.msrb.mxu0 %v1264_v14  ;;  %v1151_v62 = vld [vmem:[%s2549_s1 + $0x40] sm:$0xf]  ;;  %v1576_v1 = vld [vmem:[%s2549_s1 + $0x58] sm:$0xf0]  ;;  %v1566_v5 = vld [vmem:[%s2549_s1 + $0xc] sm:$0xf] }
  0x2d   :  { %863 = vmatpush.bf16.msrb.mxu1 %v1488_v8  ;;  %v1377_v3 = vld [vmem:[%s2549_s1 + $0x21c] sm:$0xf0]  ;;  %v1125_v6 = vld [vmem:[%s2549_s1 + $0x24] sm:$0xf0]  ;;  %v1625_v8 = vld [vmem:[%s2549_s1 + $0x1e0] sm:$0xf0]  ;;  %v1152_v11 = vor.u32 %v1576_v1, %v1151_v62 }
  0x2e   :  { %882 = vmatpush.bf16.msrb.mxu2 %v1268_v4  ;;  %v1376_v4 = vor.u32 %v1632_v59, %v1375_v58  ;;  %v1347_v7 = vld [vmem:[%s2549_s1 + $0x1c8] sm:$0xf]  ;;  %v1616_v9 = vld [vmem:[%s2549_s1 + $0x19c] sm:$0xf]  ;;  %v1329_v10 = vld [vmem:[%s2549_s1 + $0x1b4] sm:$0xf0]  ;;  %v1380_v15 = vor.u32 %v1629_v2, %v1377_v3  ;;  %v1128_v16 = vor.u32 %v1566_v5, %v1125_v6 }
  0x2f   :  { %901 = vmatpush.bf16.msrb.mxu3 %v1492_v18  ;;  %167 = vperm.xlu1 %1695, %v149_v60   ;;  %v1123_v12 = vld [vmem:[%s2549_s1 + $0x8] sm:$0xf]  ;;  %v1551_v13 = vld [vmem:[%s2549_s1 + $0x358] sm:$0xf]  ;;  %v1675_v14 = vld [vmem:[%s2549_s1 + $0x370] sm:$0xf0]  ;;  %v1348_v20 = vor.u32 %v1625_v8, %v1347_v7  ;;  %v1332_v21 = vor.u32 %v1616_v9, %v1329_v10 }
  0x30   :  { %845 = vmatpush.bf16.msrb.mxu0 %v1236_v30  ;;  %v1569_v17 = vld [vmem:[%s2549_s1 + $0x20] sm:$0xf0]  ;;  %v1622_v18 = vld [vmem:[%s2549_s1 + $0x1cc] sm:$0xf]  ;;  %v1327_v22 = vld [vmem:[%s2549_s1 + $0x198] sm:$0xf]  ;;  %v1552_v25 = vor.u32 %v1675_v14, %v1551_v13 }
  0x31   :  { %864 = vmatpush.bf16.msrb.mxu1 %v1460_v23  ;;  %v1619_v23 = vld [vmem:[%s2549_s1 + $0x1b0] sm:$0xf0]  ;;  %v1672_v24 = vld [vmem:[%s2549_s1 + $0x35c] sm:$0xf]  ;;  %v1553_v26 = vld [vmem:[%s2549_s1 + $0x374] sm:$0xf0]  ;;  %v1124_v29 = vor.u32 %v1569_v17, %v1123_v12 }
  0x32   :  { %883 = vmatpush.bf16.msrb.mxu2 %v1240_v19  ;;  %v1349_v19 = vld [vmem:[%s2549_s1 + $0x1e4] sm:$0xf0]  ;;  %v1609_v27 = vld [vmem:[%s2549_s1 + $0x164] sm:$0xf]  ;;  %v1301_v28 = vld [vmem:[%s2549_s1 + $0x17c] sm:$0xf0]  ;;  %v1328_v31 = vor.u32 %v1619_v23, %v1327_v22 }
  0x33   :  { %902 = vmatpush.bf16.msrb.mxu3 %v1464_v33  ;;  %779 = vmatmul.bf16.gmra.mxu0 %v2067_v38  ;;  %v1352_v30 = vor.u32 %v1622_v18, %v1349_v19  ;;  %v1299_v32 = vld [vmem:[%s2549_s1 + $0x160] sm:$0xf]  ;;  %v1612_v33 = vld [vmem:[%s2549_s1 + $0x178] sm:$0xf0]  ;;  %v1304_v35 = vor.u32 %v1609_v27, %v1301_v28  ;;  %v1602_v41 = vld [vmem:[%s2549_s1 + $0x12c] sm:$0xf] }
  0x34   :  { %798 = vmatmul.bf16.gmra.mxu1 %v2078_v43  ;;  %846 = vmatpush.bf16.msrb.mxu0 %v1208_v47  ;;  %v1523_v36 = vld [vmem:[%s2549_s1 + $0x320] sm:$0xf]  ;;  %v1668_v37 = vld [vmem:[%s2549_s1 + $0x338] sm:$0xf0]  ;;  %v1273_v42 = vld [vmem:[%s2549_s1 + $0x144] sm:$0xf0]  ;;  %v1300_v44 = vor.u32 %v1612_v33, %v1299_v32 }
  0x35   :  { %865 = vmatpush.bf16.msrb.mxu1 %v1432_v39  ;;  %817 = vmatmul.bf16.gmra.mxu2 %v2067_v38  ;;  %v1665_v39 = vld [vmem:[%s2549_s1 + $0x324] sm:$0xf]  ;;  %v1525_v40 = vld [vmem:[%s2549_s1 + $0x33c] sm:$0xf0]  ;;  %v1524_v46 = vor.u32 %v1668_v37, %v1523_v36  ;;  %v1271_v47 = vld [vmem:[%s2549_s1 + $0x128] sm:$0xf]  ;;  %v1276_v51 = vor.u32 %v1602_v41, %v1273_v42 }
  0x36   :  { %884 = vmatpush.bf16.msrb.mxu2 %v1212_v34  ;;  %836 = vmatmul.bf16.gmra.mxu3 %v2078_v43  ;;  %v1556_v34 = vor.u32 %v1672_v24, %v1553_v26  ;;  %v1495_v52 = vld [vmem:[%s2549_s1 + $0x2e8] sm:$0xf]  ;;  %v1661_v53 = vld [vmem:[%s2549_s1 + $0x300] sm:$0xf0]  ;;  %v1595_v56 = vld [vmem:[%s2549_s1 + $0xf4] sm:$0xf] }
  0x37   :  { %903 = vmatpush.bf16.msrb.mxu3 %v1436_v48  ;;  %v1605_v48 = vld [vmem:[%s2549_s1 + $0x140] sm:$0xf0]  ;;  %v1497_v55 = vld [vmem:[%s2549_s1 + $0x304] sm:$0xf0]  ;;  %v1245_v57 = vld [vmem:[%s2549_s1 + $0x10c] sm:$0xf0]  ;;  %v1496_v59 = vor.u32 %v1661_v53, %v1495_v52 }
  0x38   :  { %847 = vmatpush.bf16.msrb.mxu0 %v1180_v61  ;;  %v1272_v58 = vor.u32 %v1605_v48, %v1271_v47  ;;  %v1243_v60 = vld [vmem:[%s2549_s1 + $0xf0] sm:$0xf]  ;;  %v1598_v61 = vld [vmem:[%s2549_s1 + $0x108] sm:$0xf0]  ;;  %v1651_v2 = vld [vmem:[%s2549_s1 + $0x2b4] sm:$0xf] }
  0x39   :  { %866 = vmatpush.bf16.msrb.mxu1 %v1404_v54  ;;  %v1658_v54 = vld [vmem:[%s2549_s1 + $0x2ec] sm:$0xf]  ;;  %v1469_v3 = vld [vmem:[%s2549_s1 + $0x2cc] sm:$0xf0]  ;;  %v1217_v5 = vld [vmem:[%s2549_s1 + $0xd4] sm:$0xf0]  ;;  %v1244_v6 = vor.u32 %v1598_v61, %v1243_v60 }
  0x3a   :  { %885 = vmatpush.bf16.msrb.mxu2 %v1184_v50  ;;  %v1528_v50 = vor.u32 %v1665_v39, %v1525_v40  ;;  %v1500_v62 = vor.u32 %v1658_v54, %v1497_v55  ;;  %v1654_v1 = vld [vmem:[%s2549_s1 + $0x2c8] sm:$0xf0]  ;;  %v1215_v8 = vld [vmem:[%s2549_s1 + $0xb8] sm:$0xf]  ;;  %v1591_v9 = vld [vmem:[%s2549_s1 + $0xd0] sm:$0xf0]  ;;  %v1472_v10 = vor.u32 %v1651_v2, %v1469_v3 }
  0x3b   :  { %904 = vmatpush.bf16.msrb.mxu3 %v1408_v63  ;;  %v1248_v63 = vor.u32 %v1595_v56, %v1245_v57  ;;  %v1439_v12 = vld [vmem:[%s2549_s1 + $0x278] sm:$0xf]  ;;  %v1647_v13 = vld [vmem:[%s2549_s1 + $0x290] sm:$0xf0]  ;;  %v1644_v14 = vld [vmem:[%s2549_s1 + $0x27c] sm:$0xf]  ;;  %v1216_v18 = vor.u32 %v1591_v9, %v1215_v8 }
  0x3c   :  { %848 = vmatpush.bf16.msrb.mxu0 %v1152_v11  ;;  %v1189_v17 = vld [vmem:[%s2549_s1 + $0x9c] sm:$0xf0]  ;;  %v1440_v19 = vor.u32 %v1647_v13, %v1439_v12  ;;  %v1637_v26 = vld [vmem:[%s2549_s1 + $0x244] sm:$0xf]  ;;  %v1574_v28 = vld [vmem:[%s2549_s1 + $0x4c] sm:$0xf] }
  0x3d   :  { %867 = vmatpush.bf16.msrb.mxu1 %v1376_v4  ;;  %v1588_v4 = vld [vmem:[%s2549_s1 + $0xbc] sm:$0xf]  ;;  %v1411_v24 = vld [vmem:[%s2549_s1 + $0x240] sm:$0xf]  ;;  %v1159_v32 = vld [vmem:[%s2549_s1 + $0x48] sm:$0xf] }
  0x3e   :  { %886 = vmatpush.bf16.msrb.mxu2 %v1156_v0  ;;  %v1467_v0 = vld [vmem:[%s2549_s1 + $0x2b0] sm:$0xf]  ;;  %v1220_v11 = vor.u32 %v1588_v4, %v1217_v5  ;;  %v1413_v27 = vld [vmem:[%s2549_s1 + $0x25c] sm:$0xf0]  ;;  %v1577_v33 = vld [vmem:[%s2549_s1 + $0x60] sm:$0xf0] }
  0x3f   :  { %905 = vmatpush.bf16.msrb.mxu3 %v1380_v15  ;;  %v1468_v7 = vor.u32 %v1654_v1, %v1467_v0  ;;  %v1441_v15 = vld [vmem:[%s2549_s1 + $0x294] sm:$0xf0]  ;;  %v1383_v36 = vld [vmem:[%s2549_s1 + $0x208] sm:$0xf]  ;;  %v1633_v37 = vld [vmem:[%s2549_s1 + $0x220] sm:$0xf0]  ;;  %v1160_v47 = vor.u32 %v1577_v33, %v1159_v32 }
  0x40   :  { %849 = vmatpush.bf16.msrb.mxu0 %v1124_v29  ;;  %v1444_v22 = vor.u32 %v1644_v14, %v1441_v15  ;;  %v1161_v29 = vld [vmem:[%s2549_s1 + $0x64] sm:$0xf0]  ;;  %v1630_v39 = vld [vmem:[%s2549_s1 + $0x20c] sm:$0xf]  ;;  %v1567_v41 = vld [vmem:[%s2549_s1 + $0x14] sm:$0xf]  ;;  %v1384_v48 = vor.u32 %v1633_v37, %v1383_v36 }
  0x41   :  { %868 = vmatpush.bf16.msrb.mxu1 %v1348_v20  ;;  %v1187_v20 = vld [vmem:[%s2549_s1 + $0x80] sm:$0xf]  ;;  %v1385_v40 = vld [vmem:[%s2549_s1 + $0x224] sm:$0xf0]  ;;  %v1133_v42 = vld [vmem:[%s2549_s1 + $0x2c] sm:$0xf0] }
  0x42   :  { %887 = vmatpush.bf16.msrb.mxu2 %v1128_v16  ;;  %v1581_v16 = vld [vmem:[%s2549_s1 + $0x84] sm:$0xf]  ;;  %v1136_v52 = vor.u32 %v1567_v41, %v1133_v42  ;;  %v1570_v53 = vld [vmem:[%s2549_s1 + $0x28] sm:$0xf0]  ;;  %v1355_v54 = vld [vmem:[%s2549_s1 + $0x1d0] sm:$0xf] }
  0x43   :  { %906 = vmatpush.bf16.msrb.mxu3 %v1352_v30  ;;  %850 = vmatmul.bf16.vlgmr.msrb.gmra.mxu0 %v1945_v45  ;;  %v1192_v23 = vor.u32 %v1581_v16, %v1189_v17  ;;  %v1626_v55 = vld [vmem:[%s2549_s1 + $0x1e8] sm:$0xf0]  ;;  %v1623_v56 = vld [vmem:[%s2549_s1 + $0x1d4] sm:$0xf]  ;;  %v1357_v57 = vld [vmem:[%s2549_s1 + $0x1ec] sm:$0xf0] }
  0x44   :  { %918 = vmatpush.bf16.msra.mxu0 %v1328_v31  ;;  %869 = vmatmul.bf16.vlgmr.msrb.gmra.mxu1 %v1953_v49  ;;  %v1676_v60 = vld [vmem:[%s2549_s1 + $0x378] sm:$0xf0]  ;;  %v1613_v0 = vld [vmem:[%s2549_s1 + $0x180] sm:$0xf0]  ;;  %v1360_v1 = vor.u32 %v1623_v56, %v1357_v57  ;;  %v1531_v4 = vld [vmem:[%s2549_s1 + $0x328] sm:$0xf] }
  0x45   :  { %937 = vmatpush.bf16.msra.mxu1 %v1552_v25  ;;  %888 = vmatmul.bf16.vlgmr.msrb.gmra.mxu2 %v1945_v45  ;;  %v1640_v25 = vld [vmem:[%s2549_s1 + $0x258] sm:$0xf0]  ;;  %v1669_v5 = vld [vmem:[%s2549_s1 + $0x340] sm:$0xf0]  ;;  %v1251_v12 = vld [vmem:[%s2549_s1 + $0xf8] sm:$0xf] }
  0x46   :  { %956 = vmatpush.bf16.msra.mxu2 %v1332_v21  ;;  %907 = vmatmul.bf16.vlgmr.msrb.gmra.mxu3 %v1953_v49  ;;  %v1584_v21 = vld [vmem:[%s2549_s1 + $0x98] sm:$0xf0]  ;;  %v1412_v31 = vor.u32 %v1640_v25, %v1411_v24  ;;  %v1532_v8 = vor.u32 %v1669_v5, %v1531_v4  ;;  %v1599_v13 = vld [vmem:[%s2549_s1 + $0x110] sm:$0xf0]  ;;  %v1475_v16 = vld [vmem:[%s2549_s1 + $0x2b8] sm:$0xf] }
  0x47   :  { %975 = vmatpush.bf16.msra.mxu3 %v1556_v34  ;;  %v1188_v30 = vor.u32 %v1584_v21, %v1187_v20  ;;  %v1416_v34 = vor.u32 %v1637_v26, %v1413_v27  ;;  %v1252_v15 = vor.u32 %v1599_v13, %v1251_v12  ;;  %v1655_v17 = vld [vmem:[%s2549_s1 + $0x2d0] sm:$0xf0]  ;;  %v1195_v24 = vld [vmem:[%s2549_s1 + $0x88] sm:$0xf]  ;;  %v1585_v25 = vld [vmem:[%s2549_s1 + $0xa0] sm:$0xf0] }
  0x48   :  { %919 = vmatpush.bf16.msra.mxu0 %v1300_v44  ;;  %v1335_v44 = vld [vmem:[%s2549_s1 + $0x1a0] sm:$0xf]  ;;  %v1476_v20 = vor.u32 %v1655_v17, %v1475_v16  ;;  %v1196_v27 = vor.u32 %v1585_v25, %v1195_v24  ;;  %v1139_v36 = vld [vmem:[%s2549_s1 + $0x18] sm:$0xf]  ;;  %v1571_v37 = vld [vmem:[%s2549_s1 + $0x30] sm:$0xf0] }
  0x49   :  { %938 = vmatpush.bf16.msra.mxu1 %v1524_v46  ;;  %v1620_v46 = vld [vmem:[%s2549_s1 + $0x1b8] sm:$0xf0]  ;;  %v1363_v41 = vld [vmem:[%s2549_s1 + $0x1d8] sm:$0xf]  ;;  %v1627_v42 = vld [vmem:[%s2549_s1 + $0x1f0] sm:$0xf0] }
  0x4a   :  { %957 = vmatpush.bf16.msra.mxu2 %v1304_v35  ;;  %v1164_v35 = vor.u32 %v1574_v28, %v1161_v29  ;;  %v1419_v28 = vld [vmem:[%s2549_s1 + $0x248] sm:$0xf]  ;;  %v1641_v29 = vld [vmem:[%s2549_s1 + $0x260] sm:$0xf0] }
  0x4b   :  { %976 = vmatpush.bf16.msra.mxu3 %v1528_v50  ;;  %v1131_v50 = vld [vmem:[%s2549_s1 + $0x10] sm:$0xf]  ;;  %v1420_v32 = vor.u32 %v1641_v29, %v1419_v28 }
  0x4c   :  { %920 = vmatpush.bf16.msra.mxu0 %v1272_v58  ;;  %v1336_v58 = vor.u32 %v1620_v46, %v1335_v44  ;;  %v1132_v61 = vor.u32 %v1570_v53, %v1131_v50  ;;  %v1364_v44 = vor.u32 %v1627_v42, %v1363_v41 }
  0x4d   :  { %939 = vmatpush.bf16.msra.mxu1 %v1496_v59  ;;  %v1559_v59 = vld [vmem:[%s2549_s1 + $0x360] sm:$0xf] }
  0x4e   :  { %958 = vmatpush.bf16.msra.mxu2 %v1276_v51  ;;  %v1388_v51 = vor.u32 %v1630_v39, %v1385_v40  ;;  %v1560_v2 = vor.u32 %v1676_v60, %v1559_v59  ;;  %v1140_v40 = vor.u32 %v1571_v37, %v1139_v36 }
  0x4f   :  { %977 = vmatpush.bf16.msra.mxu3 %v1500_v62  ;;  %v1356_v62 = vor.u32 %v1626_v55, %v1355_v54 }
  0x50   :  { %921 = vmatpush.bf16.msra.mxu0 %v1244_v6  ;;  %v1279_v6 = vld [vmem:[%s2549_s1 + $0x130] sm:$0xf] }
  0x51   :  { %940 = vmatpush.bf16.msra.mxu1 %v1468_v7  ;;  %v1606_v7 = vld [vmem:[%s2549_s1 + $0x148] sm:$0xf0] }
  0x52   :  { %959 = vmatpush.bf16.msra.mxu2 %v1248_v63  ;;  %v1307_v63 = vld [vmem:[%s2549_s1 + $0x168] sm:$0xf]  ;;  %v1280_v9 = vor.u32 %v1606_v7, %v1279_v6 }
  0x53   :  { %978 = vmatpush.bf16.msra.mxu3 %v1472_v10  ;;  %855 = vmatmul.bf16.gmra.mxu0 %v2067_v38  ;;  %v1308_v3 = vor.u32 %v1613_v0, %v1307_v63  ;;  %v1503_v10 = vld [vmem:[%s2549_s1 + $0x2f0] sm:$0xf] }
  0x54   :  { %922 = vmatpush.bf16.msra.mxu0 %v1216_v18  ;;  %874 = vmatmul.bf16.gmra.mxu1 %v2078_v43  ;;  %v1223_v18 = vld [vmem:[%s2549_s1 + $0xc0] sm:$0xf] }
  0x55   :  { %941 = vmatpush.bf16.msra.mxu1 %v1440_v19  ;;  %893 = vmatmul.bf16.gmra.mxu2 %v2067_v38  ;;  %v1592_v19 = vld [vmem:[%s2549_s1 + $0xd8] sm:$0xf0] }
  0x56   :  { %960 = vmatpush.bf16.msra.mxu2 %v1220_v11  ;;  %912 = vmatmul.bf16.gmra.mxu3 %v2078_v43  ;;  %v1662_v11 = vld [vmem:[%s2549_s1 + $0x308] sm:$0xf0]  ;;  %v1224_v21 = vor.u32 %v1592_v19, %v1223_v18 }
  0x57   :  { %979 = vmatpush.bf16.msra.mxu3 %v1444_v22  ;;  %v1504_v14 = vor.u32 %v1662_v11, %v1503_v10  ;;  %v1447_v22 = vld [vmem:[%s2549_s1 + $0x280] sm:$0xf] }
  0x58   :  { %923 = vmatpush.bf16.msra.mxu0 %v1188_v30  ;;  %v1167_v30 = vld [vmem:[%s2549_s1 + $0x50] sm:$0xf] }
  0x59   :  { %942 = vmatpush.bf16.msra.mxu1 %v1412_v31  ;;  %v1578_v31 = vld [vmem:[%s2549_s1 + $0x68] sm:$0xf0] }
  0x5a   :  { %961 = vmatpush.bf16.msra.mxu2 %v1192_v23  ;;  %v1648_v23 = vld [vmem:[%s2549_s1 + $0x298] sm:$0xf0]  ;;  %v1168_v33 = vor.u32 %v1578_v31, %v1167_v30 }
  0x5b   :  { %980 = vmatpush.bf16.msra.mxu3 %v1416_v34  ;;  %v1448_v26 = vor.u32 %v1648_v23, %v1447_v22  ;;  %v1391_v34 = vld [vmem:[%s2549_s1 + $0x210] sm:$0xf] }
  0x5c   :  { %924 = vmatpush.bf16.msra.mxu0 %v1160_v47 }
  0x5d   :  { %943 = vmatpush.bf16.msra.mxu1 %v1384_v48 }
  0x5e   :  { %962 = vmatpush.bf16.msra.mxu2 %v1164_v35  ;;  %v1634_v35 = vld [vmem:[%s2549_s1 + $0x228] sm:$0xf0] }
  0x5f   :  { %981 = vmatpush.bf16.msra.mxu3 %v1388_v51  ;;  %v1392_v39 = vor.u32 %v1634_v35, %v1391_v34 }
  0x60   :  { %925 = vmatpush.bf16.msra.mxu0 %v1132_v61 }
  0x61   :  { %944 = vmatpush.bf16.msra.mxu1 %v1356_v62 }
  0x62   :  { %963 = vmatpush.bf16.msra.mxu2 %v1136_v52 }
  0x63   :  { %982 = vmatpush.bf16.msra.mxu3 %v1360_v1  ;;  %926 = vmatmul.bf16.vlgmr.msra.gmra.mxu0 %v1945_v45 }
  0x64   :  { %994 = vmatpush.bf16.msrb.mxu0 %v1336_v58  ;;  %945 = vmatmul.bf16.vlgmr.msra.gmra.mxu1 %v1953_v49 }
  0x65   :  { %1013 = vmatpush.bf16.msrb.mxu1 %v1560_v2  ;;  %964 = vmatmul.bf16.vlgmr.msra.gmra.mxu2 %v1945_v45 }
  0x66   :  { %1677 = vmatpush.bf16.msrb.mxu2 %v1336_v58  ;;  %983 = vmatmul.bf16.vlgmr.msra.gmra.mxu3 %v1953_v49 }
  0x67   :  { %1685 = vmatpush.bf16.msrb.mxu3 %v1560_v2 }
  0x68   :  { %995 = vmatpush.bf16.msrb.mxu0 %v1308_v3 }
  0x69   :  { %1014 = vmatpush.bf16.msrb.mxu1 %v1532_v8 }
  0x6a   :  { %1678 = vmatpush.bf16.msrb.mxu2 %v1308_v3 }
  0x6b   :  { %1686 = vmatpush.bf16.msrb.mxu3 %v1532_v8 }
  0x6c   :  { %996 = vmatpush.bf16.msrb.mxu0 %v1280_v9 }
  0x6d   :  { %1015 = vmatpush.bf16.msrb.mxu1 %v1504_v14 }
  0x6e   :  { %1679 = vmatpush.bf16.msrb.mxu2 %v1280_v9 }
  0x6f   :  { %1687 = vmatpush.bf16.msrb.mxu3 %v1504_v14 }
  0x70   :  { %997 = vmatpush.bf16.msrb.mxu0 %v1252_v15 }
  0x71   :  { %1016 = vmatpush.bf16.msrb.mxu1 %v1476_v20 }
  0x72   :  { %1680 = vmatpush.bf16.msrb.mxu2 %v1252_v15 }
  0x73   :  { %1688 = vmatpush.bf16.msrb.mxu3 %v1476_v20  ;;  %931 = vmatmul.bf16.gmra.mxu0 %v2067_v38 }
  0x74   :  { %998 = vmatpush.bf16.msrb.mxu0 %v1224_v21  ;;  %950 = vmatmul.bf16.gmra.mxu1 %v2078_v43 }
  0x75   :  { %1017 = vmatpush.bf16.msrb.mxu1 %v1448_v26  ;;  %969 = vmatmul.bf16.gmra.mxu2 %v2067_v38 }
  0x76   :  { %1681 = vmatpush.bf16.msrb.mxu2 %v1224_v21  ;;  %988 = vmatmul.bf16.gmra.mxu3 %v2078_v43 }
  0x77   :  { %1689 = vmatpush.bf16.msrb.mxu3 %v1448_v26 }
  0x78   :  { %999 = vmatpush.bf16.msrb.mxu0 %v1196_v27 }
  0x79   :  { %1018 = vmatpush.bf16.msrb.mxu1 %v1420_v32 }
  0x7a   :  { %1682 = vmatpush.bf16.msrb.mxu2 %v1196_v27 }
  0x7b   :  { %1690 = vmatpush.bf16.msrb.mxu3 %v1420_v32 }
  0x7c   :  { %1000 = vmatpush.bf16.msrb.mxu0 %v1168_v33 }
  0x7d   :  { %1019 = vmatpush.bf16.msrb.mxu1 %v1392_v39 }
  0x7e   :  { %1683 = vmatpush.bf16.msrb.mxu2 %v1168_v33 }
  0x7f   :  { %1691 = vmatpush.bf16.msrb.mxu3 %v1392_v39 }
  0x80   :  { %1001 = vmatpush.bf16.msrb.mxu0 %v1140_v40 }
  0x81   :  { %1020 = vmatpush.bf16.msrb.mxu1 %v1364_v44 }
  0x82   :  { %1684 = vmatpush.bf16.msrb.mxu2 %v1140_v40 }
  0x83   :  { %1692 = vmatpush.bf16.msrb.mxu3 %v1364_v44  ;;  %1002 = vmatmul.bf16.vlgmr.msrb.gmra.mxu0 %v1945_v45 }
  0x84   :  { %1021 = vmatmul.bf16.vlgmr.msrb.gmra.mxu1 %v1953_v49 }
  0x85   :  { %1007 = vmatmul.bf16.vlgmr.msrb.gmra.mxu2 %v2067_v38 }
  0x86   :  { %1026 = vmatmul.bf16.vlgmr.msrb.gmra.mxu3 %v2078_v43 }
  0x8f   :  { %v2461_v46 = vpop.permute.xlu0 %152 }
  0x99   :  { %v2468_v60 = vpop.permute.xlu1 %162 }
  0x9a   :  { %v2465_v56 = vpop.permute.xlu0 %157 }
  0xa0   :  { %v775_v47 = vpop.f32.mrf.mxu0 }
  0xa1   :  { %v794_v48 = vpop.f32.mrf.mxu1  ;;  %v776_v50 = vadd.f32 %v775_v47, %v2461_v46  ;;  %v2479_v12 = vpop.permute.xlu1 %167 }
  0xa3   :  { %v795_v51 = vadd.f32 %v794_v48, %v776_v50 }
  0xa5   :  { %v1032_v49 = vmax.f32 %v795_v51, 0.0 }
  0xa8   :  { %v813_v52 = vpop.f32.mrf.mxu2  ;;  %v777_v55 = vpop.f32.mrf.mxu0 }
  0xa9   :  { %v814_v53 = vadd.f32 %v813_v52, %v2461_v46  ;;  %v832_v54 = vpop.f32.mrf.mxu3  ;;  %v796_v45 = vpop.f32.mrf.mxu1  ;;  %v778_v43 = vadd.f32 %v777_v55, %v2465_v56 }
  0xab   :  { %v833_v57 = vadd.f32 %v832_v54, %v814_v53  ;;  %v797_v61 = vadd.f32 %v796_v45, %v778_v43 }
  0xad   :  { %v1033_v38 = vmax.f32 %v833_v57, 0.0  ;;  %v1039_v4 = vmax.f32 %v797_v61, 0.0 }
  0xaf   :  { %v1060_v58 = vpack.c.bf16 %v1033_v38, %v1032_v49 }
  0xb0   :  { %v815_v59 = vpop.f32.mrf.mxu2  ;;  %v780_v0 = vpop.f32.mrf.mxu0 }
  0xb1   :  { %1076 = vst [vmem:[%s2552_s3] sm:$0xff] %v1060_v58  ;;  %v816_v62 = vadd.f32 %v815_v59, %v2465_v56  ;;  %v834_v63 = vpop.f32.mrf.mxu3  ;;  %v799_v1 = vpop.f32.mrf.mxu1  ;;  %v781_v3 = vadd.f32 %v780_v0, %v2468_v60 }
  0xb3   :  { %v835_v2 = vadd.f32 %v834_v63, %v816_v62  ;;  %v800_v7 = vadd.f32 %v799_v1, %v781_v3 }
  0xb5   :  { %v1040_v5 = vmax.f32 %v835_v2, 0.0  ;;  %v1046_v14 = vmax.f32 %v800_v7, 0.0 }
  0xb7   :  { %v1064_v6 = vpack.c.bf16 %v1040_v5, %v1039_v4 }
  0xb8   :  { %v818_v8 = vpop.f32.mrf.mxu2  ;;  %v782_v11 = vpop.f32.mrf.mxu0 }
  0xb9   :  { %1081 = vst [vmem:[%s2552_s3 + $0x1c] sm:$0xff] %v1064_v6  ;;  %v819_v9 = vadd.f32 %v818_v8, %v2468_v60  ;;  %v837_v10 = vpop.f32.mrf.mxu3  ;;  %v801_v13 = vpop.f32.mrf.mxu1  ;;  %v783_v17 = vadd.f32 %v782_v11, %v2479_v12 }
  0xbb   :  { %v838_v15 = vadd.f32 %v837_v10, %v819_v9  ;;  %v802_v20 = vadd.f32 %v801_v13, %v783_v17 }
  0xbd   :  { %v1047_v16 = vmax.f32 %v838_v15, 0.0  ;;  %v1053_v27 = vmax.f32 %v802_v20, 0.0 }
  0xbf   :  { %v1068_v18 = vpack.c.bf16 %v1047_v16, %v1046_v14 }
  0xc0   :  { %v820_v19 = vpop.f32.mrf.mxu2  ;;  %v851_v23 = vpop.f32.mrf.mxu0 }
  0xc1   :  { %1085 = vst [vmem:[%s2552_s3 + $0x38] sm:$0xff] %v1068_v18  ;;  %v821_v21 = vadd.f32 %v820_v19, %v2479_v12  ;;  %v839_v22 = vpop.f32.mrf.mxu3  ;;  %v870_v24 = vpop.f32.mrf.mxu1  ;;  %v852_v26 = vadd.f32 %v851_v23, %v2461_v46 }
  0xc3   :  { %v840_v25 = vadd.f32 %v839_v22, %v821_v21  ;;  %v871_v30 = vadd.f32 %v870_v24, %v852_v26 }
  0xc5   :  { %v1054_v28 = vmax.f32 %v840_v25, 0.0  ;;  %v1034_v36 = vmax.f32 %v871_v30, 0.0 }
  0xc7   :  { %v1072_v29 = vpack.c.bf16 %v1054_v28, %v1053_v27 }
  0xc8   :  { %v889_v31 = vpop.f32.mrf.mxu2  ;;  %v853_v34 = vpop.f32.mrf.mxu0 }
  0xc9   :  { %1089 = vst [vmem:[%s2552_s3 + $0x54] sm:$0xff] %v1072_v29  ;;  %v908_v32 = vpop.f32.mrf.mxu3  ;;  %v890_v33 = vadd.f32 %v889_v31, %v2461_v46  ;;  %v872_v35 = vpop.f32.mrf.mxu1  ;;  %v854_v40 = vadd.f32 %v853_v34, %v2465_v56 }
  0xcb   :  { %v909_v37 = vadd.f32 %v908_v32, %v890_v33  ;;  %v873_v47 = vadd.f32 %v872_v35, %v854_v40 }
  0xcd   :  { %v1035_v39 = vmax.f32 %v909_v37, 0.0  ;;  %v1041_v54 = vmax.f32 %v873_v47, 0.0 }
  0xcf   :  { %v1061_v41 = vpack.c.bf16 %v1035_v39, %v1034_v36 }
  0xd0   :  { %v891_v42 = vpop.f32.mrf.mxu2  ;;  %v856_v50 = vpop.f32.mrf.mxu0 }
  0xd1   :  { %v910_v44 = vpop.f32.mrf.mxu3  ;;  %1077 = vst [vmem:[%s2552_s3 + $0x8] sm:$0xff] %v1061_v41  ;;  %v892_v48 = vadd.f32 %v891_v42, %v2465_v56  ;;  %v875_v51 = vpop.f32.mrf.mxu1  ;;  %v857_v53 = vadd.f32 %v856_v50, %v2468_v60 }
  0xd3   :  { %v911_v52 = vadd.f32 %v910_v44, %v892_v48  ;;  %v876_v49 = vadd.f32 %v875_v51, %v857_v53 }
  0xd5   :  { %v1042_v55 = vmax.f32 %v911_v52, 0.0  ;;  %v1048_v61 = vmax.f32 %v876_v49, 0.0 }
  0xd7   :  { %v1065_v45 = vpack.c.bf16 %v1042_v55, %v1041_v54 }
  0xd8   :  { %v894_v57 = vpop.f32.mrf.mxu2  ;;  %v858_v58 = vpop.f32.mrf.mxu0 }
  0xd9   :  { %v913_v38 = vpop.f32.mrf.mxu3  ;;  %1082 = vst [vmem:[%s2552_s3 + $0x24] sm:$0xff] %v1065_v45  ;;  %v895_v43 = vadd.f32 %v894_v57, %v2468_v60  ;;  %v877_v59 = vpop.f32.mrf.mxu1  ;;  %v859_v0 = vadd.f32 %v858_v58, %v2479_v12 }
  0xdb   :  { %v914_v62 = vadd.f32 %v913_v38, %v895_v43  ;;  %v878_v4 = vadd.f32 %v877_v59, %v859_v0 }
  0xdd   :  { %v1049_v63 = vmax.f32 %v914_v62, 0.0  ;;  %v1055_v10 = vmax.f32 %v878_v4, 0.0 }
  0xdf   :  { %v1069_v1 = vpack.c.bf16 %v1049_v63, %v1048_v61 }
  0xe0   :  { %v896_v2 = vpop.f32.mrf.mxu2  ;;  %v927_v6 = vpop.f32.mrf.mxu0 }
  0xe1   :  { %v915_v3 = vpop.f32.mrf.mxu3  ;;  %1086 = vst [vmem:[%s2552_s3 + $0x40] sm:$0xff] %v1069_v1  ;;  %v897_v5 = vadd.f32 %v896_v2, %v2479_v12  ;;  %v946_v7 = vpop.f32.mrf.mxu1  ;;  %v928_v9 = vadd.f32 %v927_v6, %v2461_v46 }
  0xe3   :  { %v916_v8 = vadd.f32 %v915_v3, %v897_v5  ;;  %v947_v14 = vadd.f32 %v946_v7, %v928_v9 }
  0xe5   :  { %v1056_v11 = vmax.f32 %v916_v8, 0.0  ;;  %v1036_v20 = vmax.f32 %v947_v14, 0.0 }
  0xe7   :  { %v1073_v13 = vpack.c.bf16 %v1056_v11, %v1055_v10 }
  0xe8   :  { %v965_v15 = vpop.f32.mrf.mxu2  ;;  %v929_v18 = vpop.f32.mrf.mxu0 }
  0xe9   :  { %v984_v16 = vpop.f32.mrf.mxu3  ;;  %1090 = vst [vmem:[%s2552_s3 + $0x5c] sm:$0xff] %v1073_v13  ;;  %v966_v17 = vadd.f32 %v965_v15, %v2461_v46  ;;  %v948_v19 = vpop.f32.mrf.mxu1  ;;  %v930_v23 = vadd.f32 %v929_v18, %v2465_v56 }
  0xeb   :  { %v985_v21 = vadd.f32 %v984_v16, %v966_v17  ;;  %v949_v27 = vadd.f32 %v948_v19, %v930_v23 }
  0xed   :  { %v1037_v22 = vmax.f32 %v985_v21, 0.0  ;;  %v1043_v33 = vmax.f32 %v949_v27, 0.0 }
  0xef   :  { %v1062_v24 = vpack.c.bf16 %v1037_v22, %v1036_v20 }
  0xf0   :  { %v967_v25 = vpop.f32.mrf.mxu2  ;;  %v932_v29 = vpop.f32.mrf.mxu0 }
  0xf1   :  { %v986_v26 = vpop.f32.mrf.mxu3  ;;  %1078 = vst [vmem:[%s2552_s3 + $0x10] sm:$0xff] %v1062_v24  ;;  %v968_v28 = vadd.f32 %v967_v25, %v2465_v56  ;;  %v951_v30 = vpop.f32.mrf.mxu1  ;;  %v933_v32 = vadd.f32 %v932_v29, %v2468_v60 }
  0xf3   :  { %v987_v31 = vadd.f32 %v986_v26, %v968_v28  ;;  %v952_v36 = vadd.f32 %v951_v30, %v933_v32 }
  0xf5   :  { %v1044_v34 = vmax.f32 %v987_v31, 0.0  ;;  %v1050_v44 = vmax.f32 %v952_v36, 0.0 }
  0xf7   :  { %v1066_v35 = vpack.c.bf16 %v1044_v34, %v1043_v33 }
  0xf8   :  { %v970_v37 = vpop.f32.mrf.mxu2  ;;  %v934_v41 = vpop.f32.mrf.mxu0 }
  0xf9   :  { %v989_v39 = vpop.f32.mrf.mxu3  ;;  %1083 = vst [vmem:[%s2552_s3 + $0x2c] sm:$0xff] %v1066_v35  ;;  %v971_v40 = vadd.f32 %v970_v37, %v2468_v60  ;;  %v953_v42 = vpop.f32.mrf.mxu1  ;;  %v935_v50 = vadd.f32 %v934_v41, %v2479_v12 }
  0xfb   :  { %v990_v47 = vadd.f32 %v989_v39, %v971_v40  ;;  %v954_v54 = vadd.f32 %v953_v42, %v935_v50 }
  0xfd   :  { %v1051_v48 = vmax.f32 %v990_v47, 0.0  ;;  %v1057_v58 = vmax.f32 %v954_v54, 0.0 }
  0xff   :  { %v1070_v51 = vpack.c.bf16 %v1051_v48, %v1050_v44 }
 0x100   :  { %v972_v52 = vpop.f32.mrf.mxu2  ;;  %v1003_v45 = vpop.f32.mrf.mxu0 }
 0x101   :  { %v991_v53 = vpop.f32.mrf.mxu3  ;;  %1087 = vst [vmem:[%s2552_s3 + $0x48] sm:$0xff] %v1070_v51  ;;  %v973_v55 = vadd.f32 %v972_v52, %v2479_v12  ;;  %v1022_v49 = vpop.f32.mrf.mxu1  ;;  %v1004_v57 = vadd.f32 %v1003_v45, %v2461_v46 }
 0x103   :  { %v992_v38 = vadd.f32 %v991_v53, %v973_v55  ;;  %v1023_v43 = vadd.f32 %v1022_v49, %v1004_v57 }
 0x105   :  { %v1058_v59 = vmax.f32 %v992_v38, 0.0  ;;  %v1038_v61 = vmax.f32 %v1023_v43, 0.0 }
 0x107   :  { %v1074_v62 = vpack.c.bf16 %v1058_v59, %v1057_v58  ;;  %v1063_v63 = vpack.c.bf16 %v1038_v61, %v1038_v61 }
 0x108   :  { %v1008_v0 = vpop.f32.mrf.mxu2  ;;  %v1005_v3 = vpop.f32.mrf.mxu0 }
 0x109   :  { %v1027_v1 = vpop.f32.mrf.mxu3  ;;  %1091 = vst [vmem:[%s2552_s3 + $0x64] sm:$0xff] %v1074_v62  ;;  %v1009_v2 = vadd.f32 %v1008_v0, %v2468_v60  ;;  %v1006_v46 = vadd.f32 %v1005_v3, %v2465_v56  ;;  %v1024_v5 = vpop.f32.mrf.mxu1 }
 0x10a   :  { %1080 = vst.msk [vmem:[%s2552_s3 + $0x18] sm:$0xf] %vm1079_vm0, %v1063_v63 }
 0x10b   :  { %v1028_v4 = vadd.f32 %v1027_v1, %v1009_v2  ;;  %v1025_v6 = vadd.f32 %v1024_v5, %v1006_v46 }
 0x10d   :  { %v1052_v7 = vmax.f32 %v1028_v4, 0.0  ;;  %v1045_v8 = vmax.f32 %v1025_v6, 0.0 }
 0x10f   :  { %v1071_v9 = vpack.c.bf16 %v1052_v7, %v1052_v7  ;;  %v1067_v10 = vpack.c.bf16 %v1045_v8, %v1045_v8 }
 0x110   :  { %v1010_v11 = vpop.f32.mrf.mxu2 }
 0x111   :  { %1088 = vst.msk [vmem:[%s2552_s3 + $0x50] sm:$0xf] %vm1079_vm0, %v1071_v9  ;;  %v1011_v60 = vadd.f32 %v1010_v11, %v2479_v12  ;;  %v1029_v56 = vpop.f32.mrf.mxu3 }
 0x112   :  { %1084 = vst.msk [vmem:[%s2552_s3 + $0x34] sm:$0xf] %vm1079_vm0, %v1067_v10 }
 0x113   :  { %v1030_v13 = vadd.f32 %v1029_v56, %v1011_v60 }
 0x115   :  { %v1059_v14 = vmax.f32 %v1030_v13, 0.0 }
 0x117   :  { %v1075_v15 = vpack.c.bf16 %v1059_v14, %v1059_v14 }
 0x119   :  { %1092 = vst.msk [vmem:[%s2552_s3 + $0x6c] sm:$0xf] %vm1079_vm0, %v1075_v15 }

// kernel: qnet2d_conv_forward.5
= control target key start
LH: loop header
LB: loop body
LE: loop exit
PB: predicated region body
PF: predicated region fallthrough
CT: control target
= control target key end

     0   :  { %vm798_vm0 = vcmask 1043456   ;;  %vm799_vm1 = vcmask 277508   ;;  %s1874_s1 = inlined_call_operand.vmem [shape: bf16[512,162], index: 1, kind: input, shape index: {}]   ;;  %s1875_s0 = inlined_call_operand.vmem [shape: bf16[64,512], index: 0, kind: input, shape index: {}]   ;;  %s1876_s2 = inlined_call_operand.vmem [shape: f32[64,1], index: 2, kind: input, shape index: {}]   ;;  %s1877_s3 = inlined_call_operand.vmem [shape: bf16[64,162], index: 3, kind: output, shape index: {}]  }
   0x1   :  { %v935_v0 = vld [vmem:[%s1874_s1 + $0x70] sm:$0xf]  ;;  %v1164_v1 = vld [vmem:[%s1874_s1 + $0x74] sm:$0xf0]  ;;  %v927_v11 = vld [vmem:[%s1874_s1 + $0x60] sm:$0xf] }
   0x2   :  { %v999_v2 = vld [vmem:[%s1874_s1 + $0xf0] sm:$0xf]  ;;  %v936_v3 = vor.u32 %v1164_v1, %v935_v0  ;;  %v1180_v4 = vld [vmem:[%s1874_s1 + $0xf4] sm:$0xf0]  ;;  %v1162_v13 = vld [vmem:[%s1874_s1 + $0x64] sm:$0xf0] }
   0x3   :  { %v1063_v5 = vld [vmem:[%s1874_s1 + $0x170] sm:$0xf]  ;;  %v1196_v6 = vld [vmem:[%s1874_s1 + $0x174] sm:$0xf0]  ;;  %v1000_v7 = vor.u32 %v1180_v4, %v999_v2  ;;  %v991_v14 = vld [vmem:[%s1874_s1 + $0xe0] sm:$0xf]  ;;  %v928_v16 = vor.u32 %v1162_v13, %v927_v11 }
   0x4   :  { %v1064_v8 = vor.u32 %v1196_v6, %v1063_v5  ;;  %v1127_v9 = vld [vmem:[%s1874_s1 + $0x1f0] sm:$0xf]  ;;  %v1212_v10 = vld [vmem:[%s1874_s1 + $0x1f4] sm:$0xf0]  ;;  %542 = vmatpush.bf16.msra.mxu0 %v936_v3  ;;  %v1178_v15 = vld [vmem:[%s1874_s1 + $0xe4] sm:$0xf0] }
   0x5   :  { %v1128_v12 = vor.u32 %v1212_v10, %v1127_v9  ;;  %571 = vmatpush.bf16.msra.mxu1 %v1000_v7  ;;  %v992_v17 = vor.u32 %v1178_v15, %v991_v14  ;;  %v1055_v18 = vld [vmem:[%s1874_s1 + $0x160] sm:$0xf]  ;;  %v1194_v19 = vld [vmem:[%s1874_s1 + $0x164] sm:$0xf0]  ;;  %v919_v23 = vld [vmem:[%s1874_s1 + $0x50] sm:$0xf] }
   0x6   :  { %600 = vmatpush.bf16.msra.mxu2 %v1064_v8  ;;  %v1119_v20 = vld [vmem:[%s1874_s1 + $0x1e0] sm:$0xf]  ;;  %v1056_v21 = vor.u32 %v1194_v19, %v1055_v18  ;;  %v1210_v22 = vld [vmem:[%s1874_s1 + $0x1e4] sm:$0xf0]  ;;  %v1160_v24 = vld [vmem:[%s1874_s1 + $0x54] sm:$0xf0] }
   0x7   :  { %629 = vmatpush.bf16.msra.mxu3 %v1128_v12  ;;  %v1120_v25 = vor.u32 %v1210_v22, %v1119_v20  ;;  %v983_v26 = vld [vmem:[%s1874_s1 + $0xd0] sm:$0xf]  ;;  %v1176_v27 = vld [vmem:[%s1874_s1 + $0xd4] sm:$0xf0]  ;;  %v920_v29 = vor.u32 %v1160_v24, %v919_v23  ;;  %v911_v35 = vld [vmem:[%s1874_s1 + $0x40] sm:$0xf] }
   0x8   :  { %v1047_v28 = vld [vmem:[%s1874_s1 + $0x150] sm:$0xf]  ;;  %543 = vmatpush.bf16.msra.mxu0 %v928_v16  ;;  %v1192_v30 = vld [vmem:[%s1874_s1 + $0x154] sm:$0xf0]  ;;  %v984_v33 = vor.u32 %v1176_v27, %v983_v26  ;;  %v1158_v36 = vld [vmem:[%s1874_s1 + $0x44] sm:$0xf0] }
   0x9   :  { %v1111_v31 = vld [vmem:[%s1874_s1 + $0x1d0] sm:$0xf]  ;;  %v1208_v32 = vld [vmem:[%s1874_s1 + $0x1d4] sm:$0xf0]  ;;  %572 = vmatpush.bf16.msra.mxu1 %v992_v17  ;;  %v1048_v34 = vor.u32 %v1192_v30, %v1047_v28  ;;  %v975_v37 = vld [vmem:[%s1874_s1 + $0xc0] sm:$0xf]  ;;  %v912_v44 = vor.u32 %v1158_v36, %v911_v35 }
   0xa   :  { %601 = vmatpush.bf16.msra.mxu2 %v1056_v21  ;;  %v1112_v38 = vor.u32 %v1208_v32, %v1111_v31  ;;  %v1174_v39 = vld [vmem:[%s1874_s1 + $0xc4] sm:$0xf0]  ;;  %v1039_v40 = vld [vmem:[%s1874_s1 + $0x140] sm:$0xf]  ;;  %v903_v47 = vld [vmem:[%s1874_s1 + $0x30] sm:$0xf] }
   0xb   :  { %630 = vmatpush.bf16.msra.mxu3 %v1120_v25  ;;  %v1190_v41 = vld [vmem:[%s1874_s1 + $0x144] sm:$0xf0]  ;;  %v1103_v42 = vld [vmem:[%s1874_s1 + $0x1c0] sm:$0xf]  ;;  %v976_v45 = vor.u32 %v1174_v39, %v975_v37  ;;  %v1156_v48 = vld [vmem:[%s1874_s1 + $0x34] sm:$0xf0] }
   0xc   :  { %v1206_v43 = vld [vmem:[%s1874_s1 + $0x1c4] sm:$0xf0]  ;;  %544 = vmatpush.bf16.msra.mxu0 %v920_v29  ;;  %v1040_v46 = vor.u32 %v1190_v41, %v1039_v40  ;;  %v967_v49 = vld [vmem:[%s1874_s1 + $0xb0] sm:$0xf]  ;;  %v1172_v51 = vld [vmem:[%s1874_s1 + $0xb4] sm:$0xf0]  ;;  %v904_v56 = vor.u32 %v1156_v48, %v903_v47 }
   0xd   :  { %573 = vmatpush.bf16.msra.mxu1 %v984_v33  ;;  %v1104_v50 = vor.u32 %v1206_v43, %v1103_v42  ;;  %v1031_v52 = vld [vmem:[%s1874_s1 + $0x130] sm:$0xf]  ;;  %v1188_v53 = vld [vmem:[%s1874_s1 + $0x134] sm:$0xf0]  ;;  %v968_v57 = vor.u32 %v1172_v51, %v967_v49  ;;  %v895_v59 = vld [vmem:[%s1874_s1 + $0x20] sm:$0xf] }
   0xe   :  { %602 = vmatpush.bf16.msra.mxu2 %v1048_v34  ;;  %v1095_v54 = vld [vmem:[%s1874_s1 + $0x1b0] sm:$0xf]  ;;  %v1204_v55 = vld [vmem:[%s1874_s1 + $0x1b4] sm:$0xf0]  ;;  %v1032_v58 = vor.u32 %v1188_v53, %v1031_v52  ;;  %v1154_v60 = vld [vmem:[%s1874_s1 + $0x24] sm:$0xf0] }
   0xf   :  { %631 = vmatpush.bf16.msra.mxu3 %v1112_v38  ;;  %v959_v61 = vld [vmem:[%s1874_s1 + $0xa0] sm:$0xf]  ;;  %v1096_v62 = vor.u32 %v1204_v55, %v1095_v54  ;;  %v1170_v63 = vld [vmem:[%s1874_s1 + $0xa4] sm:$0xf0]  ;;  %v896_v4 = vor.u32 %v1154_v60, %v895_v59  ;;  %v887_v7 = vld [vmem:[%s1874_s1 + $0x10] sm:$0xf] }
  0x10   :  { %545 = vmatpush.bf16.msra.mxu0 %v912_v44  ;;  %v1023_v0 = vld [vmem:[%s1874_s1 + $0x120] sm:$0xf]  ;;  %v1186_v1 = vld [vmem:[%s1874_s1 + $0x124] sm:$0xf0]  ;;  %v960_v5 = vor.u32 %v1170_v63, %v959_v61  ;;  %v1152_v8 = vld [vmem:[%s1874_s1 + $0x14] sm:$0xf0] }
  0x11   :  { %574 = vmatpush.bf16.msra.mxu1 %v976_v45  ;;  %v1087_v2 = vld [vmem:[%s1874_s1 + $0x1a0] sm:$0xf]  ;;  %v1202_v3 = vld [vmem:[%s1874_s1 + $0x1a4] sm:$0xf0]  ;;  %v1024_v6 = vor.u32 %v1186_v1, %v1023_v0  ;;  %v951_v9 = vld [vmem:[%s1874_s1 + $0x90] sm:$0xf]  ;;  %v888_v17 = vor.u32 %v1152_v8, %v887_v7 }
  0x12   :  { %603 = vmatpush.bf16.msra.mxu2 %v1040_v46  ;;  %v1088_v10 = vor.u32 %v1202_v3, %v1087_v2  ;;  %v1168_v11 = vld [vmem:[%s1874_s1 + $0x94] sm:$0xf0]  ;;  %v1015_v12 = vld [vmem:[%s1874_s1 + $0x110] sm:$0xf]  ;;  %v879_v16 = vld [vmem:[%s1874_s1] sm:$0xf] }
  0x13   :  { %632 = vmatpush.bf16.msra.mxu3 %v1104_v50  ;;  %v1184_v13 = vld [vmem:[%s1874_s1 + $0x114] sm:$0xf0]  ;;  %v1079_v14 = vld [vmem:[%s1874_s1 + $0x190] sm:$0xf]  ;;  %v1150_v18 = vld [vmem:[%s1874_s1 + $0x4] sm:$0xf0]  ;;  %v952_v21 = vor.u32 %v1168_v11, %v951_v9 }
  0x14   :  { %546 = vmatpush.bf16.msra.mxu0 %v904_v56  ;;  %v1200_v15 = vld [vmem:[%s1874_s1 + $0x194] sm:$0xf0]  ;;  %v943_v19 = vld [vmem:[%s1874_s1 + $0x80] sm:$0xf]  ;;  %v1166_v20 = vld [vmem:[%s1874_s1 + $0x84] sm:$0xf0]  ;;  %v1016_v22 = vor.u32 %v1184_v13, %v1015_v12  ;;  %v880_v35 = vor.u32 %v1150_v18, %v879_v16 }
  0x15   :  { %575 = vmatpush.bf16.msra.mxu1 %v968_v57  ;;  %v1007_v23 = vld [vmem:[%s1874_s1 + $0x100] sm:$0xf]  ;;  %v1182_v24 = vld [vmem:[%s1874_s1 + $0x104] sm:$0xf0]  ;;  %v1080_v26 = vor.u32 %v1200_v15, %v1079_v14  ;;  %v1135_v29 = vld [vmem:[%s1875_s0 + $0xc] sm:$0xf0]  ;;  %v944_v39 = vor.u32 %v1166_v20, %v943_v19 }
  0x16   :  { %604 = vmatpush.bf16.msra.mxu2 %v1032_v58  ;;  %v1071_v25 = vld [vmem:[%s1874_s1 + $0x180] sm:$0xf]  ;;  %v1198_v27 = vld [vmem:[%s1874_s1 + $0x184] sm:$0xf0]  ;;  %v1133_v30 = vld [vmem:[%s1875_s0 + $0x4] sm:$0xf]  ;;  %v1008_v40 = vor.u32 %v1182_v24, %v1007_v23 }
  0x17   :  { %633 = vmatpush.bf16.msra.mxu3 %v1096_v62  ;;  %v815_v28 = vld [vmem:[%s1875_s0] sm:$0xf]  ;;  %v817_v31 = vld [vmem:[%s1875_s0 + $0x10] sm:$0xf0]  ;;  %v823_v32 = vld [vmem:[%s1875_s0 + $0x8] sm:$0xf]  ;;  %v1072_v44 = vor.u32 %v1198_v27, %v1071_v25 }
  0x18   :  { %547 = vmatpush.bf16.msra.mxu0 %v896_v4  ;;  %v1195_v33 = vld [vmem:[%s1874_s1 + $0x174] sm:$0xf]  ;;  %v1065_v34 = vld [vmem:[%s1874_s1 + $0x178] sm:$0xf0]  ;;  %v94_v38 = vld [vmem:[%s1876_s2] sm:$0xff]  ;;  %v1217_v49 = vmov 0   ;;  %v1478_v50 = vor.u32 %v1135_v29, %v815_v28  ;;  %v1489_v55 = vor.u32 %v1133_v30, %v817_v31 }
  0x19   :  { %576 = vmatpush.bf16.msra.mxu1 %v960_v5  ;;  %v1211_v36 = vld [vmem:[%s1874_s1 + $0x1f4] sm:$0xf]  ;;  %v1129_v37 = vld [vmem:[%s1874_s1 + $0x1f8] sm:$0xf0]  ;;  %v1136_v41 = vld [vmem:[%s1875_s0 + $0x14] sm:$0xf0]  ;;  %v1068_v45 = vor.u32 %v1195_v33, %v1065_v34  ;;  %1214 = vset.pattern.permute.xlu0 %v1217_v49 }
  0x1a   :  { %605 = vmatpush.bf16.msra.mxu2 %v1024_v6  ;;  %v1134_v42 = vld [vmem:[%s1875_s0 + $0xc] sm:$0xf]  ;;  %v825_v43 = vld [vmem:[%s1875_s0 + $0x18] sm:$0xf0]  ;;  %v1163_v46 = vld [vmem:[%s1874_s1 + $0x74] sm:$0xf]  ;;  %v1132_v51 = vor.u32 %v1211_v36, %v1129_v37  ;;  %104 = vperm.xlu0 %1214, %v94_v38   ;;  %v1491_v56 = vor.u32 %v1136_v41, %v823_v32 }
  0x1b   :  { %634 = vmatpush.bf16.msra.mxu3 %v1088_v10  ;;  %v937_v47 = vld [vmem:[%s1874_s1 + $0x78] sm:$0xf0]  ;;  %v1179_v48 = vld [vmem:[%s1874_s1 + $0xf4] sm:$0xf]  ;;  %v1193_v53 = vld [vmem:[%s1874_s1 + $0x164] sm:$0xf]  ;;  %1215 = vset.pattern.permute.xlu1 %v1217_v49  ;;  %v1499_v59 = vor.u32 %v1134_v42, %v825_v43 }
  0x1c   :  { %548 = vmatpush.bf16.msra.mxu0 %v888_v17  ;;  %v1001_v52 = vld [vmem:[%s1874_s1 + $0xf8] sm:$0xf0]  ;;  %v1057_v54 = vld [vmem:[%s1874_s1 + $0x168] sm:$0xf0]  ;;  %v1209_v57 = vld [vmem:[%s1874_s1 + $0x1e4] sm:$0xf]  ;;  %1216 = vset.pattern.permute.xlu2 %v1217_v49  ;;  %v940_v60 = vor.u32 %v1163_v46, %v937_v47 }
  0x1d   :  { %577 = vmatpush.bf16.msra.mxu1 %v952_v21  ;;  %v1121_v58 = vld [vmem:[%s1874_s1 + $0x1e8] sm:$0xf0]  ;;  %v1004_v61 = vor.u32 %v1179_v48, %v1001_v52  ;;  %v1060_v62 = vor.u32 %v1193_v53, %v1057_v54  ;;  %v1161_v63 = vld [vmem:[%s1874_s1 + $0x64] sm:$0xf]  ;;  %v1191_v4 = vld [vmem:[%s1874_s1 + $0x154] sm:$0xf] }
  0x1e   :  { %606 = vmatpush.bf16.msra.mxu2 %v1016_v22  ;;  %v929_v0 = vld [vmem:[%s1874_s1 + $0x68] sm:$0xf0]  ;;  %v1177_v1 = vld [vmem:[%s1874_s1 + $0xe4] sm:$0xf]  ;;  %v1124_v2 = vor.u32 %v1209_v57, %v1121_v58  ;;  %v1049_v5 = vld [vmem:[%s1874_s1 + $0x158] sm:$0xf0] }
  0x1f   :  { %635 = vmatpush.bf16.msra.mxu3 %v1080_v26  ;;  %v993_v3 = vld [vmem:[%s1874_s1 + $0xe8] sm:$0xf0]  ;;  %v1207_v6 = vld [vmem:[%s1874_s1 + $0x1d4] sm:$0xf]  ;;  %v1113_v7 = vld [vmem:[%s1874_s1 + $0x1d8] sm:$0xf0]  ;;  %v932_v9 = vor.u32 %v1161_v63, %v929_v0  ;;  %v1052_v12 = vor.u32 %v1191_v4, %v1049_v5 }
  0x20   :  { %549 = vmatpush.bf16.msra.mxu0 %v880_v35  ;;  %v95_v8 = vld [vmem:[%s1876_s2 + $0x8] sm:$0xff]  ;;  %v1159_v10 = vld [vmem:[%s1874_s1 + $0x54] sm:$0xf]  ;;  %v996_v11 = vor.u32 %v1177_v1, %v993_v3  ;;  %v921_v13 = vld [vmem:[%s1874_s1 + $0x58] sm:$0xf0]  ;;  %v1116_v16 = vor.u32 %v1207_v6, %v1113_v7 }
  0x21   :  { %578 = vmatpush.bf16.msra.mxu1 %v944_v39  ;;  %v1175_v14 = vld [vmem:[%s1874_s1 + $0xd4] sm:$0xf]  ;;  %v985_v17 = vld [vmem:[%s1874_s1 + $0xd8] sm:$0xf0]  ;;  %v1189_v18 = vld [vmem:[%s1874_s1 + $0x144] sm:$0xf]  ;;  %v924_v22 = vor.u32 %v1159_v10, %v921_v13 }
  0x22   :  { %607 = vmatpush.bf16.msra.mxu2 %v1008_v40  ;;  %v96_v15 = vld [vmem:[%s1876_s2 + $0x10] sm:$0xff]  ;;  %109 = vperm.xlu0 %1214, %v95_v8   ;;  %v1041_v19 = vld [vmem:[%s1874_s1 + $0x148] sm:$0xf0]  ;;  %v1205_v20 = vld [vmem:[%s1874_s1 + $0x1c4] sm:$0xf]  ;;  %v988_v25 = vor.u32 %v1175_v14, %v985_v17 }
  0x23   :  { %636 = vmatpush.bf16.msra.mxu3 %v1072_v44  ;;  %550 = vmatmul.bf16.vlgmr.msra.gmra.mxu0 %v1478_v50  ;;  %v1105_v21 = vld [vmem:[%s1874_s1 + $0x1c8] sm:$0xf0]  ;;  %v831_v23 = vld [vmem:[%s1875_s0 + $0x20] sm:$0xf]  ;;  %v1139_v24 = vld [vmem:[%s1875_s0 + $0x2c] sm:$0xf0]  ;;  %v1044_v26 = vor.u32 %v1189_v18, %v1041_v19 }
  0x24   :  { %579 = vmatmul.bf16.vlgmr.msra.gmra.mxu1 %v1489_v55  ;;  %658 = vmatpush.bf16.msrb.mxu0 %v940_v60  ;;  %v1157_v27 = vld [vmem:[%s1874_s1 + $0x44] sm:$0xf]  ;;  %v913_v28 = vld [vmem:[%s1874_s1 + $0x48] sm:$0xf0]  ;;  %v833_v31 = vld [vmem:[%s1875_s0 + $0x30] sm:$0xf0]  ;;  %v1108_v33 = vor.u32 %v1205_v20, %v1105_v21  ;;  %v1619_v49 = vor.u32 %v1139_v24, %v831_v23 }
  0x25   :  { %608 = vmatmul.bf16.vlgmr.msra.gmra.mxu2 %v1491_v56  ;;  %687 = vmatpush.bf16.msrb.mxu1 %v1004_v61  ;;  %v1173_v29 = vld [vmem:[%s1874_s1 + $0xc4] sm:$0xf]  ;;  %v839_v32 = vld [vmem:[%s1875_s0 + $0x28] sm:$0xf]  ;;  %v977_v34 = vld [vmem:[%s1874_s1 + $0xc8] sm:$0xf0]  ;;  %v916_v42 = vor.u32 %v1157_v27, %v913_v28 }
  0x26   :  { %716 = vmatpush.bf16.msrb.mxu2 %v1068_v45  ;;  %637 = vmatmul.bf16.vlgmr.msra.gmra.mxu3 %v1499_v59  ;;  %v1137_v30 = vld [vmem:[%s1875_s0 + $0x24] sm:$0xf]  ;;  %v1187_v35 = vld [vmem:[%s1874_s1 + $0x134] sm:$0xf]  ;;  %v1033_v36 = vld [vmem:[%s1874_s1 + $0x138] sm:$0xf0]  ;;  %v980_v44 = vor.u32 %v1173_v29, %v977_v34 }
  0x27   :  { %745 = vmatpush.bf16.msrb.mxu3 %v1132_v51  ;;  %114 = vperm.xlu1 %1215, %v96_v15   ;;  %v1140_v37 = vld [vmem:[%s1875_s0 + $0x34] sm:$0xf0]  ;;  %v1203_v38 = vld [vmem:[%s1874_s1 + $0x1b4] sm:$0xf]  ;;  %v1097_v39 = vld [vmem:[%s1874_s1 + $0x1b8] sm:$0xf0]  ;;  %v1036_v45 = vor.u32 %v1187_v35, %v1033_v36  ;;  %v1630_v57 = vor.u32 %v1137_v30, %v833_v31 }
  0x28   :  { %659 = vmatpush.bf16.msrb.mxu0 %v932_v9  ;;  %v1138_v40 = vld [vmem:[%s1875_s0 + $0x2c] sm:$0xf]  ;;  %v841_v41 = vld [vmem:[%s1875_s0 + $0x38] sm:$0xf0]  ;;  %v1155_v46 = vld [vmem:[%s1874_s1 + $0x34] sm:$0xf]  ;;  %v1100_v51 = vor.u32 %v1203_v38, %v1097_v39  ;;  %v1632_v58 = vor.u32 %v1140_v37, %v839_v32 }
  0x29   :  { %688 = vmatpush.bf16.msrb.mxu1 %v996_v11  ;;  %v97_v43 = vld [vmem:[%s1876_s2 + $0x18] sm:$0xff]  ;;  %v1171_v48 = vld [vmem:[%s1874_s1 + $0xb4] sm:$0xf]  ;;  %v1185_v53 = vld [vmem:[%s1874_s1 + $0x124] sm:$0xf] }
  0x2a   :  { %717 = vmatpush.bf16.msrb.mxu2 %v1060_v62  ;;  %v905_v47 = vld [vmem:[%s1874_s1 + $0x38] sm:$0xf0]  ;;  %v1025_v54 = vld [vmem:[%s1874_s1 + $0x128] sm:$0xf0]  ;;  %v1201_v60 = vld [vmem:[%s1874_s1 + $0x1a4] sm:$0xf]  ;;  %v1640_v62 = vor.u32 %v1138_v40, %v841_v41 }
  0x2b   :  { %746 = vmatpush.bf16.msrb.mxu3 %v1124_v2  ;;  %v969_v52 = vld [vmem:[%s1874_s1 + $0xb8] sm:$0xf0]  ;;  %v1089_v61 = vld [vmem:[%s1874_s1 + $0x1a8] sm:$0xf0]  ;;  %v908_v63 = vor.u32 %v1155_v46, %v905_v47  ;;  %v1028_v1 = vor.u32 %v1185_v53, %v1025_v54  ;;  %v1153_v2 = vld [vmem:[%s1874_s1 + $0x24] sm:$0xf] }
  0x2c   :  { %660 = vmatpush.bf16.msrb.mxu0 %v924_v22  ;;  %v972_v0 = vor.u32 %v1171_v48, %v969_v52  ;;  %v897_v3 = vld [vmem:[%s1874_s1 + $0x28] sm:$0xf0]  ;;  %v1092_v4 = vor.u32 %v1201_v60, %v1089_v61  ;;  %v1169_v5 = vld [vmem:[%s1874_s1 + $0xa4] sm:$0xf]  ;;  %v1183_v8 = vld [vmem:[%s1874_s1 + $0x114] sm:$0xf] }
  0x2d   :  { %689 = vmatpush.bf16.msrb.mxu1 %v988_v25  ;;  %v961_v6 = vld [vmem:[%s1874_s1 + $0xa8] sm:$0xf0]  ;;  %v900_v7 = vor.u32 %v1153_v2, %v897_v3  ;;  %v1017_v9 = vld [vmem:[%s1874_s1 + $0x118] sm:$0xf0]  ;;  %v1151_v10 = vld [vmem:[%s1874_s1 + $0x14] sm:$0xf] }
  0x2e   :  { %718 = vmatpush.bf16.msrb.mxu2 %v1052_v12  ;;  %v964_v11 = vor.u32 %v1169_v5, %v961_v6  ;;  %v1020_v12 = vor.u32 %v1183_v8, %v1017_v9  ;;  %v889_v13 = vld [vmem:[%s1874_s1 + $0x18] sm:$0xf0]  ;;  %v1199_v14 = vld [vmem:[%s1874_s1 + $0x194] sm:$0xf]  ;;  %v1181_v19 = vld [vmem:[%s1874_s1 + $0x104] sm:$0xf] }
  0x2f   :  { %747 = vmatpush.bf16.msrb.mxu3 %v1116_v16  ;;  %119 = vperm.xlu1 %1215, %v97_v43   ;;  %v1081_v15 = vld [vmem:[%s1874_s1 + $0x198] sm:$0xf0]  ;;  %v1167_v17 = vld [vmem:[%s1874_s1 + $0x94] sm:$0xf]  ;;  %v1009_v20 = vld [vmem:[%s1874_s1 + $0x108] sm:$0xf0]  ;;  %v892_v21 = vor.u32 %v1151_v10, %v889_v13 }
  0x30   :  { %661 = vmatpush.bf16.msrb.mxu0 %v916_v42  ;;  %v1084_v16 = vor.u32 %v1199_v14, %v1081_v15  ;;  %v953_v18 = vld [vmem:[%s1874_s1 + $0x98] sm:$0xf0]  ;;  %v1197_v22 = vld [vmem:[%s1874_s1 + $0x184] sm:$0xf]  ;;  %v1073_v23 = vld [vmem:[%s1874_s1 + $0x188] sm:$0xf0]  ;;  %v1012_v25 = vor.u32 %v1181_v19, %v1009_v20 }
  0x31   :  { %690 = vmatpush.bf16.msrb.mxu1 %v980_v44  ;;  %v956_v24 = vor.u32 %v1167_v17, %v953_v18  ;;  %v881_v27 = vld [vmem:[%s1874_s1 + $0x8] sm:$0xf0]  ;;  %v100_v28 = vld [vmem:[%s1876_s2 + $0x30] sm:$0xff]  ;;  %v1076_v29 = vor.u32 %v1197_v22, %v1073_v23  ;;  %v1165_v30 = vld [vmem:[%s1874_s1 + $0x84] sm:$0xf] }
  0x32   :  { %719 = vmatpush.bf16.msrb.mxu2 %v1044_v26  ;;  %v1149_v26 = vld [vmem:[%s1874_s1 + $0x4] sm:$0xf]  ;;  %v945_v31 = vld [vmem:[%s1874_s1 + $0x88] sm:$0xf0]  ;;  %134 = vperm.xlu0 %1214, %v100_v28   ;;  %v847_v32 = vld [vmem:[%s1875_s0 + $0x40] sm:$0xf] }
  0x33   :  { %748 = vmatpush.bf16.msrb.mxu3 %v1108_v33  ;;  %555 = vmatmul.bf16.gmra.mxu0 %v1619_v49  ;;  %v1143_v33 = vld [vmem:[%s1875_s0 + $0x4c] sm:$0xf0]  ;;  %v1141_v34 = vld [vmem:[%s1875_s0 + $0x44] sm:$0xf]  ;;  %v849_v35 = vld [vmem:[%s1875_s0 + $0x50] sm:$0xf0]  ;;  %v884_v38 = vor.u32 %v1149_v26, %v881_v27  ;;  %v948_v41 = vor.u32 %v1165_v30, %v945_v31 }
  0x34   :  { %584 = vmatmul.bf16.gmra.mxu1 %v1630_v57  ;;  %662 = vmatpush.bf16.msrb.mxu0 %v908_v63  ;;  %v855_v36 = vld [vmem:[%s1875_s0 + $0x48] sm:$0xf]  ;;  %v1144_v37 = vld [vmem:[%s1875_s0 + $0x54] sm:$0xf0]  ;;  %v1142_v39 = vld [vmem:[%s1875_s0 + $0x4c] sm:$0xf]  ;;  %v848_v42 = vor.u32 %v1143_v33, %v847_v32  ;;  %v852_v43 = vor.u32 %v1141_v34, %v849_v35 }
  0x35   :  { %613 = vmatmul.bf16.gmra.mxu2 %v1632_v58  ;;  %691 = vmatpush.bf16.msrb.mxu1 %v972_v0  ;;  %v857_v40 = vld [vmem:[%s1875_s0 + $0x58] sm:$0xf0]  ;;  %v856_v44 = vor.u32 %v1144_v37, %v855_v36  ;;  %v98_v46 = vld [vmem:[%s1876_s2 + $0x20] sm:$0xff]  ;;  %v99_v48 = vld [vmem:[%s1876_s2 + $0x28] sm:$0xff] }
  0x36   :  { %720 = vmatpush.bf16.msrb.mxu2 %v1036_v45  ;;  %642 = vmatmul.bf16.gmra.mxu3 %v1640_v62  ;;  %v860_v45 = vor.u32 %v1142_v39, %v857_v40  ;;  %v101_v47 = vld [vmem:[%s1876_s2 + $0x38] sm:$0xff]  ;;  %v1147_v52 = vld [vmem:[%s1875_s0 + $0x6c] sm:$0xf0]  ;;  %v1145_v53 = vld [vmem:[%s1875_s0 + $0x64] sm:$0xf] }
  0x37   :  { %749 = vmatpush.bf16.msrb.mxu3 %v1100_v51  ;;  %124 = vperm.xlu2 %1216, %v98_v46   ;;  %v863_v51 = vld [vmem:[%s1875_s0 + $0x60] sm:$0xf]  ;;  %v865_v54 = vld [vmem:[%s1875_s0 + $0x70] sm:$0xf0]  ;;  %v871_v60 = vld [vmem:[%s1875_s0 + $0x68] sm:$0xf] }
  0x38   :  { %663 = vmatpush.bf16.msrb.mxu0 %v900_v7  ;;  %139 = vperm.xlu1 %1215, %v101_v47   ;;  %v1148_v61 = vld [vmem:[%s1875_s0 + $0x74] sm:$0xf0]  ;;  %v1146_v63 = vld [vmem:[%s1875_s0 + $0x6c] sm:$0xf]  ;;  %v873_v0 = vld [vmem:[%s1875_s0 + $0x78] sm:$0xf0]  ;;  %v868_v2 = vor.u32 %v1145_v53, %v865_v54 }
  0x39   :  { %692 = vmatpush.bf16.msrb.mxu1 %v964_v11  ;;  %v872_v3 = vor.u32 %v1148_v61, %v871_v60  ;;  %vm1817_vm2 = vmor %vm799_vm1, %vm798_vm0 }
  0x3a   :  { %721 = vmatpush.bf16.msrb.mxu2 %v1028_v1  ;;  %v864_v1 = vor.u32 %v1147_v52, %v863_v51 }
  0x3b   :  { %750 = vmatpush.bf16.msrb.mxu3 %v1092_v4  ;;  %v876_v4 = vor.u32 %v1146_v63, %v873_v0 }
  0x3c   :  { %664 = vmatpush.bf16.msrb.mxu0 %v892_v21 }
  0x3d   :  { %693 = vmatpush.bf16.msrb.mxu1 %v956_v24 }
  0x3e   :  { %722 = vmatpush.bf16.msrb.mxu2 %v1020_v12 }
  0x3f   :  { %751 = vmatpush.bf16.msrb.mxu3 %v1084_v16  ;;  %129 = vperm.xlu2 %1216, %v99_v48  }
  0x40   :  { %665 = vmatpush.bf16.msrb.mxu0 %v884_v38 }
  0x41   :  { %694 = vmatpush.bf16.msrb.mxu1 %v948_v41 }
  0x42   :  { %723 = vmatpush.bf16.msrb.mxu2 %v1012_v25 }
  0x43   :  { %752 = vmatpush.bf16.msrb.mxu3 %v1076_v29  ;;  %560 = vmatmul.bf16.gmra.mxu0 %v848_v42 }
  0x44   :  { %589 = vmatmul.bf16.gmra.mxu1 %v852_v43 }
  0x45   :  { %618 = vmatmul.bf16.gmra.mxu2 %v856_v44 }
  0x46   :  { %647 = vmatmul.bf16.gmra.mxu3 %v860_v45 }
  0x53   :  { %565 = vmatmul.bf16.gmra.mxu0 %v864_v1 }
  0x54   :  { %594 = vmatmul.bf16.gmra.mxu1 %v868_v2 }
  0x55   :  { %623 = vmatmul.bf16.gmra.mxu2 %v872_v3 }
  0x56   :  { %652 = vmatmul.bf16.gmra.mxu3 %v876_v4 }
  0x63   :  { %666 = vmatmul.bf16.vlgmr.msrb.gmra.mxu0 %v1478_v50 }
  0x64   :  { %695 = vmatmul.bf16.vlgmr.msrb.gmra.mxu1 %v1489_v55 }
  0x65   :  { %724 = vmatmul.bf16.vlgmr.msrb.gmra.mxu2 %v1491_v56 }
  0x66   :  { %753 = vmatmul.bf16.vlgmr.msrb.gmra.mxu3 %v1499_v59 }
  0x73   :  { %671 = vmatmul.bf16.gmra.mxu0 %v1619_v49 }
  0x74   :  { %700 = vmatmul.bf16.gmra.mxu1 %v1630_v57 }
  0x75   :  { %729 = vmatmul.bf16.gmra.mxu2 %v1632_v58 }
  0x76   :  { %758 = vmatmul.bf16.gmra.mxu3 %v1640_v62 }
  0x83   :  { %676 = vmatmul.bf16.gmra.mxu0 %v848_v42 }
  0x84   :  { %705 = vmatmul.bf16.gmra.mxu1 %v852_v43 }
  0x85   :  { %734 = vmatmul.bf16.gmra.mxu2 %v856_v44 }
  0x86   :  { %763 = vmatmul.bf16.gmra.mxu3 %v860_v45 }
  0x8c   :  { %v1774_v50 = vpop.permute.xlu0 %104 }
  0x91   :  { %v1792_v29 = vpop.permute.xlu2 %124 }
  0x93   :  { %681 = vmatmul.bf16.gmra.mxu0 %v864_v1 }
  0x94   :  { %710 = vmatmul.bf16.gmra.mxu1 %v868_v2  ;;  %v1777_v57 = vpop.permute.xlu0 %109 }
  0x95   :  { %739 = vmatmul.bf16.gmra.mxu2 %v872_v3 }
  0x96   :  { %768 = vmatmul.bf16.gmra.mxu3 %v876_v4 }
  0x99   :  { %v1782_v11 = vpop.permute.xlu1 %114  ;;  %v1797_v38 = vpop.permute.xlu2 %129 }
  0xa0   :  { %v551_v55 = vpop.f32.mrf.mxu0 }
  0xa1   :  { %v552_v56 = vadd.f32 %v551_v55, %v1774_v50  ;;  %v580_v59 = vpop.f32.mrf.mxu1  ;;  %v1787_v20 = vpop.permute.xlu1 %119 }
  0xa3   :  { %v581_v49 = vadd.f32 %v580_v59, %v552_v56 }
  0xa4   :  { %v1802_v47 = vpop.permute.xlu0 %134 }
  0xa8   :  { %v609_v58 = vpop.f32.mrf.mxu2  ;;  %v553_v6 = vpop.f32.mrf.mxu0 }
  0xa9   :  { %v610_v5 = vadd.f32 %v609_v58, %v581_v49  ;;  %v638_v62 = vpop.f32.mrf.mxu3  ;;  %v554_v7 = vadd.f32 %v553_v6, %v1777_v57  ;;  %v582_v8 = vpop.f32.mrf.mxu1 }
  0xaa   :  { %v1807_v0 = vpop.permute.xlu1 %139 }
  0xab   :  { %v1780_v9 = vadd.f32 %v638_v62, %v610_v5  ;;  %v583_v10 = vadd.f32 %v582_v8, %v554_v7 }
  0xb0   :  { %v611_v12 = vpop.f32.mrf.mxu2  ;;  %v556_v15 = vpop.f32.mrf.mxu0 }
  0xb1   :  { %v612_v13 = vadd.f32 %v611_v12, %v583_v10  ;;  %v640_v14 = vpop.f32.mrf.mxu3  ;;  %v557_v16 = vadd.f32 %v556_v15, %v1782_v11  ;;  %v585_v17 = vpop.f32.mrf.mxu1 }
  0xb3   :  { %v1785_v18 = vadd.f32 %v640_v14, %v612_v13  ;;  %v586_v19 = vadd.f32 %v585_v17, %v557_v16 }
  0xb8   :  { %v614_v21 = vpop.f32.mrf.mxu2  ;;  %v558_v24 = vpop.f32.mrf.mxu0 }
  0xb9   :  { %v615_v22 = vadd.f32 %v614_v21, %v586_v19  ;;  %v643_v23 = vpop.f32.mrf.mxu3  ;;  %v559_v25 = vadd.f32 %v558_v24, %v1787_v20  ;;  %v587_v26 = vpop.f32.mrf.mxu1 }
  0xbb   :  { %v1790_v27 = vadd.f32 %v643_v23, %v615_v22  ;;  %v588_v28 = vadd.f32 %v587_v26, %v559_v25  ;;  %v774_v22 = vmax.f32 %v1780_v9, 0.0 }
  0xc0   :  { %v616_v30 = vpop.f32.mrf.mxu2  ;;  %v561_v33 = vpop.f32.mrf.mxu0 }
  0xc1   :  { %v617_v31 = vadd.f32 %v616_v30, %v588_v28  ;;  %v645_v32 = vpop.f32.mrf.mxu3  ;;  %v562_v34 = vadd.f32 %v561_v33, %v1792_v29  ;;  %v590_v35 = vpop.f32.mrf.mxu1  ;;  %v776_v33 = vmax.f32 %v1785_v18, 0.0 }
  0xc3   :  { %v1795_v36 = vadd.f32 %v645_v32, %v617_v31  ;;  %v591_v37 = vadd.f32 %v590_v35, %v562_v34 }
  0xc8   :  { %v619_v39 = vpop.f32.mrf.mxu2  ;;  %v563_v42 = vpop.f32.mrf.mxu0 }
  0xc9   :  { %v620_v40 = vadd.f32 %v619_v39, %v591_v37  ;;  %v648_v41 = vpop.f32.mrf.mxu3  ;;  %v564_v43 = vadd.f32 %v563_v42, %v1797_v38  ;;  %v592_v44 = vpop.f32.mrf.mxu1 }
  0xcb   :  { %v1800_v45 = vadd.f32 %v648_v41, %v620_v40  ;;  %v593_v46 = vadd.f32 %v592_v44, %v564_v43 }
  0xd0   :  { %v621_v48 = vpop.f32.mrf.mxu2  ;;  %v566_v53 = vpop.f32.mrf.mxu0 }
  0xd1   :  { %v622_v51 = vadd.f32 %v621_v48, %v593_v46  ;;  %v650_v52 = vpop.f32.mrf.mxu3  ;;  %v595_v54 = vpop.f32.mrf.mxu1  ;;  %v567_v60 = vadd.f32 %v566_v53, %v1802_v47  ;;  %v778_v46 = vmax.f32 %v1790_v27, 0.0 }
  0xd3   :  { %v1805_v61 = vadd.f32 %v650_v52, %v622_v51  ;;  %v596_v63 = vadd.f32 %v595_v54, %v567_v60 }
  0xd8   :  { %v624_v1 = vpop.f32.mrf.mxu2  ;;  %v568_v4 = vpop.f32.mrf.mxu0 }
  0xd9   :  { %v625_v2 = vadd.f32 %v624_v1, %v596_v63  ;;  %v653_v3 = vpop.f32.mrf.mxu3  ;;  %v569_v55 = vadd.f32 %v568_v4, %v1807_v0  ;;  %v597_v56 = vpop.f32.mrf.mxu1 }
  0xdb   :  { %v1810_v59 = vadd.f32 %v653_v3, %v625_v2  ;;  %v598_v49 = vadd.f32 %v597_v56, %v569_v55 }
  0xe0   :  { %v626_v58 = vpop.f32.mrf.mxu2  ;;  %v667_v6 = vpop.f32.mrf.mxu0 }
  0xe1   :  { %v627_v5 = vadd.f32 %v626_v58, %v598_v49  ;;  %v655_v62 = vpop.f32.mrf.mxu3  ;;  %v668_v7 = vadd.f32 %v667_v6, %v1774_v50  ;;  %v696_v8 = vpop.f32.mrf.mxu1  ;;  %v782_v6 = vmax.f32 %v1800_v45, 0.0 }
  0xe3   :  { %v1813_v10 = vadd.f32 %v655_v62, %v627_v5  ;;  %v697_v12 = vadd.f32 %v696_v8, %v668_v7 }
  0xe8   :  { %v725_v13 = vpop.f32.mrf.mxu2  ;;  %v669_v16 = vpop.f32.mrf.mxu0 }
  0xe9   :  { %v726_v14 = vadd.f32 %v725_v13, %v697_v12  ;;  %v754_v15 = vpop.f32.mrf.mxu3  ;;  %v698_v17 = vpop.f32.mrf.mxu1  ;;  %v670_v21 = vadd.f32 %v669_v16, %v1777_v57 }
  0xeb   :  { %v755_v19 = vadd.f32 %v754_v15, %v726_v14  ;;  %v699_v25 = vadd.f32 %v698_v17, %v670_v21 }
  0xed   :  { %v775_v23 = vmax.f32 %v755_v19, 0.0 }
  0xef   :  { %v790_v50 = vpack.c.bf16 %v775_v23, %v774_v22 }
  0xf0   :  { %v727_v26 = vpop.f32.mrf.mxu2  ;;  %v672_v31 = vpop.f32.mrf.mxu0 }
  0xf1   :  { %801 = vst.msk [vmem:[%s1877_s3] sm:$0xff] %vm1817_vm2, %v790_v50  ;;  %v728_v28 = vadd.f32 %v727_v26, %v699_v25  ;;  %v756_v30 = vpop.f32.mrf.mxu3  ;;  %v673_v57 = vadd.f32 %v672_v31, %v1782_v11  ;;  %v701_v9 = vpop.f32.mrf.mxu1 }
  0xf3   :  { %v757_v32 = vadd.f32 %v756_v30, %v728_v28  ;;  %v702_v35 = vadd.f32 %v701_v9, %v673_v57 }
  0xf5   :  { %v777_v34 = vmax.f32 %v757_v32, 0.0 }
  0xf7   :  { %v791_v37 = vpack.c.bf16 %v777_v34, %v776_v33 }
  0xf8   :  { %v730_v39 = vpop.f32.mrf.mxu2  ;;  %v674_v42 = vpop.f32.mrf.mxu0 }
  0xf9   :  { %802 = vst.msk [vmem:[%s1877_s3 + $0x8] sm:$0xff] %vm1817_vm2, %v791_v37  ;;  %v731_v40 = vadd.f32 %v730_v39, %v702_v35  ;;  %v759_v41 = vpop.f32.mrf.mxu3  ;;  %v703_v43 = vpop.f32.mrf.mxu1  ;;  %v675_v11 = vadd.f32 %v674_v42, %v1787_v20  ;;  %v780_v20 = vmax.f32 %v1795_v36, 0.0  ;;  %v788_v37 = vmax.f32 %v1813_v10, 0.0 }
  0xfb   :  { %v760_v44 = vadd.f32 %v759_v41, %v731_v40  ;;  %v704_v51 = vadd.f32 %v703_v43, %v675_v11 }
  0xfd   :  { %v779_v18 = vmax.f32 %v760_v44, 0.0 }
  0xff   :  { %v792_v48 = vpack.c.bf16 %v779_v18, %v778_v46 }
 0x100   :  { %v732_v52 = vpop.f32.mrf.mxu2  ;;  %v677_v60 = vpop.f32.mrf.mxu0 }
 0x101   :  { %803 = vst.msk [vmem:[%s1877_s3 + $0x10] sm:$0xff] %vm1817_vm2, %v792_v48  ;;  %v733_v53 = vadd.f32 %v732_v52, %v704_v51  ;;  %v761_v54 = vpop.f32.mrf.mxu3  ;;  %v678_v63 = vadd.f32 %v677_v60, %v1792_v29  ;;  %v706_v1 = vpop.f32.mrf.mxu1 }
 0x103   :  { %v762_v2 = vadd.f32 %v761_v54, %v733_v53  ;;  %v707_v3 = vadd.f32 %v706_v1, %v678_v63 }
 0x105   :  { %v781_v27 = vmax.f32 %v762_v2, 0.0 }
 0x107   :  { %v793_v4 = vpack.c.bf16 %v781_v27, %v780_v20 }
 0x108   :  { %v735_v55 = vpop.f32.mrf.mxu2  ;;  %v679_v58 = vpop.f32.mrf.mxu0 }
 0x109   :  { %804 = vst.msk [vmem:[%s1877_s3 + $0x18] sm:$0xff] %vm1817_vm2, %v793_v4  ;;  %v736_v56 = vadd.f32 %v735_v55, %v707_v3  ;;  %v764_v49 = vpop.f32.mrf.mxu3  ;;  %v708_v5 = vpop.f32.mrf.mxu1  ;;  %v680_v29 = vadd.f32 %v679_v58, %v1797_v38  ;;  %v784_v38 = vmax.f32 %v1805_v61, 0.0 }
 0x10b   :  { %v765_v62 = vadd.f32 %v764_v49, %v736_v56  ;;  %v709_v8 = vadd.f32 %v708_v5, %v680_v29 }
 0x10d   :  { %v783_v36 = vmax.f32 %v765_v62, 0.0 }
 0x10f   :  { %v794_v7 = vpack.c.bf16 %v783_v36, %v782_v6 }
 0x110   :  { %v737_v12 = vpop.f32.mrf.mxu2  ;;  %v682_v15 = vpop.f32.mrf.mxu0 }
 0x111   :  { %805 = vst.msk [vmem:[%s1877_s3 + $0x20] sm:$0xff] %vm1817_vm2, %v794_v7  ;;  %v738_v13 = vadd.f32 %v737_v12, %v709_v8  ;;  %v766_v14 = vpop.f32.mrf.mxu3  ;;  %v683_v17 = vadd.f32 %v682_v15, %v1802_v47  ;;  %v711_v19 = vpop.f32.mrf.mxu1  ;;  %v786_v47 = vmax.f32 %v1810_v59, 0.0 }
 0x113   :  { %v767_v16 = vadd.f32 %v766_v14, %v738_v13  ;;  %v712_v22 = vadd.f32 %v711_v19, %v683_v17 }
 0x115   :  { %v785_v45 = vmax.f32 %v767_v16, 0.0 }
 0x117   :  { %v795_v21 = vpack.c.bf16 %v785_v45, %v784_v38 }
 0x118   :  { %v740_v23 = vpop.f32.mrf.mxu2  ;;  %v684_v26 = vpop.f32.mrf.mxu0 }
 0x119   :  { %806 = vst.msk [vmem:[%s1877_s3 + $0x28] sm:$0xff] %vm1817_vm2, %v795_v21  ;;  %v741_v50 = vadd.f32 %v740_v23, %v712_v22  ;;  %v769_v25 = vpop.f32.mrf.mxu3  ;;  %v685_v30 = vadd.f32 %v684_v26, %v1807_v0  ;;  %v713_v61 = vpop.f32.mrf.mxu1 }
 0x11b   :  { %v770_v28 = vadd.f32 %v769_v25, %v741_v50  ;;  %v714_v9 = vadd.f32 %v713_v61, %v685_v30 }
 0x11d   :  { %v787_v31 = vmax.f32 %v770_v28, 0.0 }
 0x11f   :  { %v796_v57 = vpack.c.bf16 %v787_v31, %v786_v47 }
 0x120   :  { %v742_v32 = vpop.f32.mrf.mxu2 }
 0x121   :  { %807 = vst.msk [vmem:[%s1877_s3 + $0x30] sm:$0xff] %vm1817_vm2, %v796_v57  ;;  %v743_v33 = vadd.f32 %v742_v32, %v714_v9  ;;  %v771_v34 = vpop.f32.mrf.mxu3 }
 0x123   :  { %v772_v35 = vadd.f32 %v771_v34, %v743_v33 }
 0x125   :  { %v789_v39 = vmax.f32 %v772_v35, 0.0 }
 0x127   :  { %v797_v0 = vpack.c.bf16 %v789_v39, %v788_v37 }
 0x129   :  { %808 = vst.msk [vmem:[%s1877_s3 + $0x38] sm:$0xff] %vm1817_vm2, %v797_v0 }

// kernel: qnet2d_conv_forward.6
= control target key start
LH: loop header
LB: loop body
LE: loop exit
PB: predicated region body
PF: predicated region fallthrough
CT: control target
= control target key end

     0   :  { %v966_v6 = vmov 0   ;;  %vm475_vm0 = vcmask 523264   ;;  %vm649_vm1 = vcmask 797696   ;;  %s1284_s1 = inlined_call_operand.vmem [shape: bf16[576,98], index: 1, kind: input, shape index: {}]   ;;  %s1285_s2 = inlined_call_operand.vmem [shape: f32[64,1], index: 2, kind: input, shape index: {}]   ;;  %s1286_s0 = inlined_call_operand.vmem [shape: bf16[64,576], index: 0, kind: input, shape index: {}]   ;;  %s1287_s3 = inlined_call_operand.vmem [shape: bf16[64,98], index: 3, kind: output, shape index: {}]  }
   0x1   :  { %v917_v0 = vld [vmem:[%s1284_s1 + $0x38] sm:$0xff]  ;;  %v916_v1 = vld [vmem:[%s1284_s1 + $0x30] sm:$0xff]  ;;  %v915_v4 = vld [vmem:[%s1284_s1 + $0x28] sm:$0xff]  ;;  %964 = vset.pattern.permute.xlu1 %v966_v6  ;;  %963 = vset.pattern.permute.xlu0 %v966_v6 }
   0x2   :  { %946 = vmatpush.bf16.msra.mxu1 %v917_v0  ;;  %947 = vmatpush.bf16.msra.mxu2 %v917_v0  ;;  %v941_v2 = vld [vmem:[%s1284_s1 + $0xf8] sm:$0xff]  ;;  %v940_v3 = vld [vmem:[%s1284_s1 + $0xf0] sm:$0xff]  ;;  %v939_v5 = vld [vmem:[%s1284_s1 + $0xe8] sm:$0xff] }
   0x3   :  { %488 = vmatpush.bf16.msra.mxu0 %v917_v0  ;;  %575 = vmatpush.bf16.msra.mxu3 %v941_v2  ;;  %v914_v7 = vld [vmem:[%s1284_s1 + $0x20] sm:$0xff]  ;;  %v113_v8 = vld [vmem:[%s1285_s2 + $0x10] sm:$0xff]  ;;  %v913_v11 = vld [vmem:[%s1284_s1 + $0x18] sm:$0xff] }
   0x4   :  { %965 = vset.pattern.permute.xlu2 %v966_v6  ;;  %v938_v9 = vld [vmem:[%s1284_s1 + $0xe0] sm:$0xff]  ;;  %131 = vperm.xlu1 %964, %v113_v8   ;;  %v937_v12 = vld [vmem:[%s1284_s1 + $0xd8] sm:$0xff]  ;;  %v912_v13 = vld [vmem:[%s1284_s1 + $0x10] sm:$0xff] }
   0x5   :  { %v111_v10 = vld [vmem:[%s1285_s2] sm:$0xff]  ;;  %v114_v14 = vld [vmem:[%s1285_s2 + $0x18] sm:$0xff]  ;;  %v936_v15 = vld [vmem:[%s1284_s1 + $0xd0] sm:$0xff] }
   0x6   :  { %948 = vmatpush.bf16.msra.mxu1 %v916_v1  ;;  %949 = vmatpush.bf16.msra.mxu2 %v916_v1  ;;  %v112_v16 = vld [vmem:[%s1285_s2 + $0x8] sm:$0xff]  ;;  %v910_v19 = vld [vmem:[%s1284_s1] sm:$0xff]  ;;  %v897_v21 = vld [vmem:[%s1286_s0 + $0x38] sm:$0xf0] }
   0x7   :  { %489 = vmatpush.bf16.msra.mxu0 %v916_v1  ;;  %576 = vmatpush.bf16.msra.mxu3 %v940_v3  ;;  %v911_v17 = vld [vmem:[%s1284_s1 + $0x8] sm:$0xff]  ;;  %v724_v22 = vld [vmem:[%s1286_s0 + $0x78] sm:$0xf]  ;;  %v664_v26 = vld [vmem:[%s1286_s0] sm:$0xf] }
   0x8   :  { %121 = vperm.xlu0 %963, %v111_v10   ;;  %v935_v18 = vld [vmem:[%s1284_s1 + $0xc8] sm:$0xff]  ;;  %v933_v24 = vld [vmem:[%s1284_s1 + $0xb8] sm:$0xff]  ;;  %v934_v27 = vld [vmem:[%s1284_s1 + $0xc0] sm:$0xff] }
   0x9   :  { %v684_v20 = vld [vmem:[%s1286_s0 + $0x28] sm:$0xf]  ;;  %v907_v23 = vld [vmem:[%s1286_s0 + $0x88] sm:$0xf0]  ;;  %v925_v25 = vld [vmem:[%s1284_s1 + $0x78] sm:$0xff] }
   0xa   :  { %950 = vmatpush.bf16.msra.mxu1 %v915_v4  ;;  %951 = vmatpush.bf16.msra.mxu2 %v915_v4  ;;  %v685_v28 = vor.u32 %v897_v21, %v684_v20  ;;  %v725_v29 = vor.u32 %v907_v23, %v724_v22  ;;  %v892_v30 = vld [vmem:[%s1286_s0 + $0x10] sm:$0xf0]  ;;  %v891_v31 = vld [vmem:[%s1286_s0 + $0xc] sm:$0xf]  ;;  %v674_v32 = vld [vmem:[%s1286_s0 + $0x1c] sm:$0xf0] }
   0xb   :  { %490 = vmatpush.bf16.msra.mxu0 %v915_v4  ;;  %577 = vmatpush.bf16.msra.mxu3 %v939_v5  ;;  %v945_v33 = vld [vmem:[%s1284_s1 + $0x118] sm:$0xff]  ;;  %v932_v34 = vld [vmem:[%s1284_s1 + $0xb0] sm:$0xff]  ;;  %v665_v37 = vor.u32 %v892_v30, %v664_v26  ;;  %v677_v38 = vor.u32 %v891_v31, %v674_v32  ;;  %v931_v41 = vld [vmem:[%s1284_s1 + $0xa8] sm:$0xff] }
   0xc   :  { %136 = vperm.xlu1 %964, %v114_v14   ;;  %v924_v35 = vld [vmem:[%s1284_s1 + $0x70] sm:$0xff]  ;;  %v118_v36 = vld [vmem:[%s1285_s2 + $0x38] sm:$0xff]  ;;  %v923_v42 = vld [vmem:[%s1284_s1 + $0x68] sm:$0xff] }
   0xd   :  { %v944_v39 = vld [vmem:[%s1284_s1 + $0x110] sm:$0xff]  ;;  %v943_v43 = vld [vmem:[%s1284_s1 + $0x108] sm:$0xff]  ;;  %v930_v44 = vld [vmem:[%s1284_s1 + $0xa0] sm:$0xff] }
   0xe   :  { %952 = vmatpush.bf16.msra.mxu1 %v914_v7  ;;  %953 = vmatpush.bf16.msra.mxu2 %v914_v7  ;;  %v117_v40 = vld [vmem:[%s1285_s2 + $0x30] sm:$0xff]  ;;  %v922_v45 = vld [vmem:[%s1284_s1 + $0x60] sm:$0xff]  ;;  %v929_v49 = vld [vmem:[%s1284_s1 + $0x98] sm:$0xff] }
   0xf   :  { %491 = vmatpush.bf16.msra.mxu0 %v914_v7  ;;  %578 = vmatpush.bf16.msra.mxu3 %v938_v9  ;;  %v704_v46 = vld [vmem:[%s1286_s0 + $0x50] sm:$0xf]  ;;  %v902_v47 = vld [vmem:[%s1286_s0 + $0x60] sm:$0xf0]  ;;  %v921_v50 = vld [vmem:[%s1284_s1 + $0x58] sm:$0xff] }
  0x10   :  { %126 = vperm.xlu0 %963, %v112_v16   ;;  %v942_v48 = vld [vmem:[%s1284_s1 + $0x100] sm:$0xff]  ;;  %v680_v51 = vld [vmem:[%s1286_s0 + $0x10] sm:$0xf]  ;;  %v705_v52 = vor.u32 %v902_v47, %v704_v46  ;;  %v896_v54 = vld [vmem:[%s1286_s0 + $0x34] sm:$0xf] }
  0x11   :  { %v894_v53 = vld [vmem:[%s1286_s0 + $0x20] sm:$0xf0]  ;;  %v694_v55 = vld [vmem:[%s1286_s0 + $0x44] sm:$0xf0]  ;;  %v928_v56 = vld [vmem:[%s1284_s1 + $0x90] sm:$0xff] }
  0x12   :  { %954 = vmatpush.bf16.msra.mxu1 %v913_v11  ;;  %955 = vmatpush.bf16.msra.mxu2 %v913_v11  ;;  %v920_v57 = vld [vmem:[%s1284_s1 + $0x50] sm:$0xff]  ;;  %v681_v58 = vor.u32 %v894_v53, %v680_v51  ;;  %v697_v59 = vor.u32 %v896_v54, %v694_v55  ;;  %v115_v60 = vld [vmem:[%s1285_s2 + $0x20] sm:$0xff]  ;;  %v927_v61 = vld [vmem:[%s1284_s1 + $0x88] sm:$0xff] }
  0x13   :  { %492 = vmatpush.bf16.msra.mxu0 %v913_v11  ;;  %579 = vmatpush.bf16.msra.mxu3 %v937_v12  ;;  %v919_v62 = vld [vmem:[%s1284_s1 + $0x48] sm:$0xff]  ;;  %v926_v63 = vld [vmem:[%s1284_s1 + $0x80] sm:$0xff]  ;;  %v893_v2 = vld [vmem:[%s1286_s0 + $0x18] sm:$0xf0] }
  0x14   :  { %156 = vperm.xlu1 %964, %v118_v36   ;;  %141 = vperm.xlu2 %965, %v115_v60   ;;  %v918_v0 = vld [vmem:[%s1284_s1 + $0x40] sm:$0xff]  ;;  %v672_v1 = vld [vmem:[%s1286_s0 + $0x8] sm:$0xf]  ;;  %v666_v6 = vld [vmem:[%s1286_s0 + $0x14] sm:$0xf0] }
  0x15   :  { %v116_v3 = vld [vmem:[%s1285_s2 + $0x28] sm:$0xff]  ;;  %v673_v4 = vor.u32 %v893_v2, %v672_v1  ;;  %v890_v5 = vld [vmem:[%s1286_s0 + $0x4] sm:$0xf]  ;;  %v700_v7 = vld [vmem:[%s1286_s0 + $0x38] sm:$0xf] }
  0x16   :  { %956 = vmatpush.bf16.msra.mxu1 %v912_v13  ;;  %957 = vmatpush.bf16.msra.mxu2 %v912_v13  ;;  %v669_v8 = vor.u32 %v890_v5, %v666_v6  ;;  %v899_v9 = vld [vmem:[%s1286_s0 + $0x48] sm:$0xf0]  ;;  %v901_v10 = vld [vmem:[%s1286_s0 + $0x5c] sm:$0xf]  ;;  %v714_v11 = vld [vmem:[%s1286_s0 + $0x6c] sm:$0xf0] }
  0x17   :  { %493 = vmatpush.bf16.msra.mxu0 %v912_v13  ;;  %580 = vmatpush.bf16.msra.mxu3 %v936_v15  ;;  %v701_v12 = vor.u32 %v899_v9, %v700_v7  ;;  %v717_v13 = vor.u32 %v901_v10, %v714_v11  ;;  %v692_v14 = vld [vmem:[%s1286_s0 + $0x30] sm:$0xf]  ;;  %v898_v15 = vld [vmem:[%s1286_s0 + $0x40] sm:$0xf0]  ;;  %v904_v21 = vld [vmem:[%s1286_s0 + $0x70] sm:$0xf0] }
  0x18   :  { %151 = vperm.xlu0 %963, %v117_v40   ;;  %v693_v16 = vor.u32 %v898_v15, %v692_v14  ;;  %v906_v22 = vld [vmem:[%s1286_s0 + $0x84] sm:$0xf]  ;;  %v734_v23 = vld [vmem:[%s1286_s0 + $0x94] sm:$0xf0]  ;;  %v706_v30 = vld [vmem:[%s1286_s0 + $0x64] sm:$0xf0] }
  0x19   :  { %v712_v26 = vld [vmem:[%s1286_s0 + $0x58] sm:$0xf]  ;;  %v740_v32 = vld [vmem:[%s1286_s0 + $0x88] sm:$0xf]  ;;  %v908_v36 = vld [vmem:[%s1286_s0 + $0x90] sm:$0xf0] }
  0x1a   :  { %958 = vmatpush.bf16.msra.mxu1 %v911_v17  ;;  %959 = vmatpush.bf16.msra.mxu2 %v911_v17 }
  0x1b   :  { %494 = vmatpush.bf16.msra.mxu0 %v911_v17  ;;  %581 = vmatpush.bf16.msra.mxu3 %v935_v18  ;;  %v895_v17 = vld [vmem:[%s1286_s0 + $0x2c] sm:$0xf]  ;;  %v686_v18 = vld [vmem:[%s1286_s0 + $0x3c] sm:$0xf0] }
  0x1c   :  { %146 = vperm.xlu2 %965, %v116_v3   ;;  %v689_v20 = vor.u32 %v895_v17, %v686_v18 }
  0x1e   :  { %960 = vmatpush.bf16.msra.mxu1 %v910_v19  ;;  %961 = vmatpush.bf16.msra.mxu2 %v910_v19 }
  0x1f   :  { %495 = vmatpush.bf16.msra.mxu0 %v910_v19  ;;  %582 = vmatpush.bf16.msra.mxu3 %v934_v27  ;;  %v720_v19 = vld [vmem:[%s1286_s0 + $0x60] sm:$0xf]  ;;  %v903_v27 = vld [vmem:[%s1286_s0 + $0x68] sm:$0xf0] }
  0x21   :  { %501 = vmatmul.bf16.vlgmr.msra.gmra.mxu1 %v685_v28  ;;  %511 = vmatmul.bf16.vlgmr.msra.gmra.mxu2 %v725_v29  ;;  %v713_v28 = vor.u32 %v903_v27, %v712_v26  ;;  %v900_v29 = vld [vmem:[%s1286_s0 + $0x54] sm:$0xf] }
  0x22   :  { %546 = vmatpush.bf16.msrb.mxu2 %v933_v24  ;;  %517 = vmatpush.bf16.msrb.mxu1 %v925_v25  ;;  %v721_v24 = vor.u32 %v904_v21, %v720_v19  ;;  %v737_v25 = vor.u32 %v906_v22, %v734_v23  ;;  %v709_v31 = vor.u32 %v900_v29, %v706_v30 }
  0x23   :  { %608 = vmatpush.bf16.msrb.mxu0 %v945_v33  ;;  %583 = vmatmul.bf16.vlgmr.msra.gmra.mxu3 %v677_v38  ;;  %v909_v33 = vld [vmem:[%s1286_s0 + $0x98] sm:$0xf0] }
  0x24   :  { %496 = vmatmul.bf16.vlgmr.msra.gmra.mxu0 %v665_v37  ;;  %v905_v38 = vld [vmem:[%s1286_s0 + $0x7c] sm:$0xf] }
  0x26   :  { %547 = vmatpush.bf16.msrb.mxu2 %v932_v34  ;;  %518 = vmatpush.bf16.msrb.mxu1 %v924_v35  ;;  %v741_v34 = vor.u32 %v909_v33, %v740_v32  ;;  %v732_v35 = vld [vmem:[%s1286_s0 + $0x80] sm:$0xf] }
  0x27   :  { %609 = vmatpush.bf16.msrb.mxu0 %v944_v39  ;;  %v733_v37 = vor.u32 %v908_v36, %v732_v35  ;;  %v726_v39 = vld [vmem:[%s1286_s0 + $0x8c] sm:$0xf0] }
  0x28   :  { %v729_v40 = vor.u32 %v905_v38, %v726_v39 }
  0x2a   :  { %548 = vmatpush.bf16.msrb.mxu2 %v931_v41  ;;  %519 = vmatpush.bf16.msrb.mxu1 %v923_v42 }
  0x2b   :  { %610 = vmatpush.bf16.msrb.mxu0 %v943_v43 }
  0x2e   :  { %549 = vmatpush.bf16.msrb.mxu2 %v930_v44  ;;  %520 = vmatpush.bf16.msrb.mxu1 %v922_v45 }
  0x2f   :  { %611 = vmatpush.bf16.msrb.mxu0 %v942_v48 }
  0x31   :  { %506 = vmatmul.bf16.gmra.mxu1 %v705_v52 }
  0x32   :  { %550 = vmatpush.bf16.msrb.mxu2 %v929_v49  ;;  %521 = vmatpush.bf16.msrb.mxu1 %v921_v50 }
  0x33   :  { %588 = vmatmul.bf16.gmra.mxu3 %v697_v59 }
  0x34   :  { %886 = vmatmul.msk.bf16.vlgmr.msrb.gmra.mxu0 %vm475_vm0, %v681_v58 }
  0x36   :  { %551 = vmatpush.bf16.msrb.mxu2 %v928_v56  ;;  %522 = vmatpush.bf16.msrb.mxu1 %v920_v57 }
  0x3a   :  { %552 = vmatpush.bf16.msrb.mxu2 %v927_v61  ;;  %523 = vmatpush.bf16.msrb.mxu1 %v919_v62 }
  0x3e   :  { %553 = vmatpush.bf16.msrb.mxu2 %v926_v63  ;;  %524 = vmatpush.bf16.msrb.mxu1 %v918_v0 }
  0x41   :  { %554 = vmatmul.bf16.vlgmr.msrb.gmra.mxu2 %v673_v4  ;;  %525 = vmatmul.bf16.vlgmr.msrb.gmra.mxu1 %v669_v8 }
  0x43   :  { %593 = vmatmul.bf16.gmra.mxu3 %v717_v13 }
  0x44   :  { %887 = vmatmul.msk.bf16.gmra.mxu0 %vm475_vm0, %v701_v12 }
  0x51   :  { %559 = vmatmul.bf16.gmra.mxu2 %v693_v16  ;;  %530 = vmatmul.bf16.gmra.mxu1 %v689_v20 }
  0x53   :  { %598 = vmatmul.bf16.gmra.mxu3 %v737_v25 }
  0x54   :  { %888 = vmatmul.msk.bf16.gmra.mxu0 %vm475_vm0, %v721_v24 }
  0x61   :  { %564 = vmatmul.bf16.gmra.mxu2 %v713_v28  ;;  %535 = vmatmul.bf16.gmra.mxu1 %v709_v31 }
  0x64   :  { %889 = vmatmul.msk.bf16.gmra.mxu0 %vm475_vm0, %v741_v34 }
  0x6e   :  { %v142_v25 = vpop.permute.xlu2 %141 }
  0x71   :  { %569 = vmatmul.bf16.gmra.mxu2 %v733_v37  ;;  %540 = vmatmul.bf16.gmra.mxu1 %v729_v40 }
  0x76   :  { %v132_v1 = vpop.permute.xlu1 %131  ;;  %v147_v39 = vpop.permute.xlu2 %146 }
  0x7a   :  { %v122_v51 = vpop.permute.xlu0 %121 }
  0x7e   :  { %v137_v15 = vpop.permute.xlu1 %136 }
  0x82   :  { %v127_v59 = vpop.permute.xlu0 %126 }
  0x9e   :  { %v502_v41 = vpop.f32.mrf.mxu1 }
  0x9f   :  { %v503_v9 = vadd.f32 %v502_v41, %v132_v1 }
  0xa1   :  { %v497_v42 = vpop.f32.mrf.mxu0 }
  0xa2   :  { %v498_v52 = vadd.f32 %v497_v42, %v122_v51 }
  0xa4   :  { %v1243_v46 = vpop.f32.mrf.mxu2 }
  0xa6   :  { %v504_v43 = vpop.f32.mrf.mxu1  ;;  %v584_v47 = vpop.f32.mrf.mxu3 }
  0xa7   :  { %v505_v20 = vadd.f32 %v504_v43, %v137_v15 }
  0xa9   :  { %v499_v44 = vpop.f32.mrf.mxu0 }
  0xaa   :  { %v500_v61 = vadd.f32 %v499_v44, %v127_v59 }
  0xac   :  { %v1247_v50 = vpop.f32.mrf.mxu2 }
  0xae   :  { %v507_v45 = vpop.f32.mrf.mxu1  ;;  %v586_v55 = vpop.f32.mrf.mxu3 }
  0xaf   :  { %v508_v31 = vadd.f32 %v507_v45, %v142_v25 }
  0xb1   :  { %v613_v49 = vpop.f32.mrf.mxu0 }
  0xb6   :  { %v1245_v48 = vpop.f32.mrf.mxu1  ;;  %v589_v4 = vpop.f32.mrf.mxu3 }
  0xb7   :  { %v510_v43 = vadd.f32 %v1245_v48, %v147_v39 }
  0xb9   :  { %v615_v57 = vpop.f32.mrf.mxu0 }
  0xbe   :  { %v526_v53 = vpop.f32.mrf.mxu1  ;;  %v591_v18 = vpop.f32.mrf.mxu3 }
  0xbf   :  { %v527_v54 = vadd.f32 %v526_v53, %v498_v52 }
  0xc1   :  { %v618_v7 = vpop.f32.mrf.mxu0 }
  0xc4   :  { %v555_v56 = vpop.f32.mrf.mxu2 }
  0xc5   :  { %v556_v58 = vadd.f32 %v555_v56, %v527_v54  ;;  %v152_v54 = vpop.permute.xlu0 %151 }
  0xc6   :  { %v528_v63 = vpop.f32.mrf.mxu1  ;;  %v594_v32 = vpop.f32.mrf.mxu3 }
  0xc7   :  { %v585_v60 = vadd.f32 %v584_v47, %v556_v58  ;;  %v529_v0 = vadd.f32 %v528_v63, %v500_v61  ;;  %v513_v58 = vadd.f32 %v1243_v46, %v152_v54 }
  0xc9   :  { %v614_v62 = vadd.f32 %v613_v49, %v585_v60  ;;  %v620_v21 = vpop.f32.mrf.mxu0 }
  0xcb   :  { %v633_v2 = vmax.f32 %v614_v62, 0.0 }
  0xcc   :  { %v557_v3 = vpop.f32.mrf.mxu2 }
  0xcd   :  { %v641_v5 = vpack.c.bf16 %v633_v2, %v633_v2  ;;  %v558_v6 = vadd.f32 %v557_v3, %v529_v0  ;;  %v157_v0 = vpop.permute.xlu1 %156 }
  0xce   :  { %v531_v11 = vpop.f32.mrf.mxu1  ;;  %v596_v47 = vpop.f32.mrf.mxu3 }
  0xcf   :  { %650 = vst.msk [vmem:[%s1287_s3] sm:$0xf] %vm649_vm1, %v641_v5  ;;  %v587_v8 = vadd.f32 %v586_v55, %v558_v6  ;;  %v532_v12 = vadd.f32 %v531_v11, %v503_v9  ;;  %v515_v5 = vadd.f32 %v1247_v50, %v157_v0 }
  0xd1   :  { %v616_v10 = vadd.f32 %v615_v57, %v587_v8  ;;  %v623_v35 = vpop.f32.mrf.mxu0 }
  0xd3   :  { %v634_v13 = vmax.f32 %v616_v10, 0.0 }
  0xd4   :  { %v560_v14 = vpop.f32.mrf.mxu2 }
  0xd5   :  { %v642_v16 = vpack.c.bf16 %v634_v13, %v634_v13  ;;  %v561_v17 = vadd.f32 %v560_v14, %v532_v12 }
  0xd6   :  { %v533_v23 = vpop.f32.mrf.mxu1  ;;  %v599_v62 = vpop.f32.mrf.mxu3 }
  0xd7   :  { %651 = vst.msk [vmem:[%s1287_s3 + $0x4] sm:$0xf] %vm649_vm1, %v642_v16  ;;  %v590_v19 = vadd.f32 %v589_v4, %v561_v17  ;;  %v534_v24 = vadd.f32 %v533_v23, %v505_v20 }
  0xd9   :  { %v619_v22 = vadd.f32 %v618_v7, %v590_v19  ;;  %v625_v52 = vpop.f32.mrf.mxu0 }
  0xdb   :  { %v635_v26 = vmax.f32 %v619_v22, 0.0 }
  0xdc   :  { %v562_v27 = vpop.f32.mrf.mxu2 }
  0xdd   :  { %v643_v28 = vpack.c.bf16 %v635_v26, %v635_v26  ;;  %v563_v29 = vadd.f32 %v562_v27, %v534_v24 }
  0xde   :  { %v536_v34 = vpop.f32.mrf.mxu1  ;;  %v601_v12 = vpop.f32.mrf.mxu3 }
  0xdf   :  { %652 = vst.msk [vmem:[%s1287_s3 + $0x8] sm:$0xf] %vm649_vm1, %v643_v28  ;;  %v592_v30 = vadd.f32 %v591_v18, %v563_v29  ;;  %v537_v36 = vadd.f32 %v536_v34, %v508_v31 }
  0xe1   :  { %v621_v33 = vadd.f32 %v620_v21, %v592_v30  ;;  %v628_v3 = vpop.f32.mrf.mxu0 }
  0xe3   :  { %v636_v37 = vmax.f32 %v621_v33, 0.0 }
  0xe4   :  { %v565_v38 = vpop.f32.mrf.mxu2 }
  0xe5   :  { %v644_v40 = vpack.c.bf16 %v636_v37, %v636_v37  ;;  %v566_v41 = vadd.f32 %v565_v38, %v537_v36 }
  0xe6   :  { %v538_v45 = vpop.f32.mrf.mxu1 }
  0xe7   :  { %653 = vst.msk [vmem:[%s1287_s3 + $0xc] sm:$0xf] %vm649_vm1, %v644_v40  ;;  %v595_v42 = vadd.f32 %v594_v32, %v566_v41  ;;  %v539_v49 = vadd.f32 %v538_v45, %v510_v43 }
  0xe9   :  { %v624_v44 = vadd.f32 %v623_v35, %v595_v42  ;;  %v630_v14 = vpop.f32.mrf.mxu0 }
  0xeb   :  { %v637_v51 = vmax.f32 %v624_v44, 0.0 }
  0xec   :  { %v567_v53 = vpop.f32.mrf.mxu2 }
  0xed   :  { %v645_v55 = vpack.c.bf16 %v637_v51, %v637_v51  ;;  %v568_v56 = vadd.f32 %v567_v53, %v539_v49 }
  0xee   :  { %v541_v48 = vpop.f32.mrf.mxu1 }
  0xef   :  { %654 = vst.msk [vmem:[%s1287_s3 + $0x10] sm:$0xf] %vm649_vm1, %v645_v55  ;;  %v597_v57 = vadd.f32 %v596_v47, %v568_v56  ;;  %v542_v60 = vadd.f32 %v541_v48, %v513_v58 }
  0xf1   :  { %v626_v59 = vadd.f32 %v625_v52, %v597_v57 }
  0xf3   :  { %v638_v61 = vmax.f32 %v626_v59, 0.0 }
  0xf4   :  { %v570_v63 = vpop.f32.mrf.mxu2 }
  0xf5   :  { %v646_v1 = vpack.c.bf16 %v638_v61, %v638_v61  ;;  %v571_v2 = vadd.f32 %v570_v63, %v542_v60 }
  0xf6   :  { %v543_v46 = vpop.f32.mrf.mxu1 }
  0xf7   :  { %655 = vst.msk [vmem:[%s1287_s3 + $0x14] sm:$0xf] %vm649_vm1, %v646_v1  ;;  %v600_v4 = vadd.f32 %v599_v62, %v571_v2  ;;  %v544_v7 = vadd.f32 %v543_v46, %v515_v5 }
  0xf9   :  { %v629_v6 = vadd.f32 %v628_v3, %v600_v4 }
  0xfb   :  { %v639_v8 = vmax.f32 %v629_v6, 0.0 }
  0xfc   :  { %v572_v9 = vpop.f32.mrf.mxu2 }
  0xfd   :  { %v647_v10 = vpack.c.bf16 %v639_v8, %v639_v8  ;;  %v573_v11 = vadd.f32 %v572_v9, %v544_v7 }
  0xff   :  { %656 = vst.msk [vmem:[%s1287_s3 + $0x18] sm:$0xf] %vm649_vm1, %v647_v10  ;;  %v602_v13 = vadd.f32 %v601_v12, %v573_v11 }
 0x101   :  { %v631_v15 = vadd.f32 %v630_v14, %v602_v13 }
 0x103   :  { %v640_v16 = vmax.f32 %v631_v15, 0.0 }
 0x105   :  { %v648_v17 = vpack.c.bf16 %v640_v16, %v640_v16 }
 0x107   :  { %657 = vst.msk [vmem:[%s1287_s3 + $0x1c] sm:$0xf] %vm649_vm1, %v648_v17 }

// kernel: qnet2d_conv_forward.7
= control target key start
LH: loop header
LB: loop body
LE: loop exit
PB: predicated region body
PF: predicated region fallthrough
CT: control target
= control target key end

     0   :  { %s15619_s0 = inlined_call_operand.vmem [shape: bf16[2,3136], index: 0, kind: input, shape index: {}]   ;;  %s15620_s1 = inlined_call_operand.vmem [shape: bf16[3136,512], index: 1, kind: input, shape index: {}]   ;;  %s15621_s2 = inlined_call_operand.vmem [shape: f32[1,512], index: 2, kind: input, shape index: {}]   ;;  %s15622_s3 = inlined_call_operand.vmem [shape: bf16[512,6], index: 3, kind: input, shape index: {}]   ;;  %s15623_s4 = inlined_call_operand.vmem [shape: f32[1,6], index: 4, kind: input, shape index: {}]   ;;  %s15624_s5 = inlined_call_operand.hbm [shape: f32[2,6], index: 5, kind: output, shape index: {}]  }
   0x1   :  { %v6552_v0 = vld [vmem:[%s15620_s1 + $0xe0] sm:$0xf]  ;;  %v9736_v1 = vld [vmem:[%s15620_s1 + $0xec] sm:$0xf0] }
   0x2   :  { %v6680_v2 = vld [vmem:[%s15620_s1 + $0x1e0] sm:$0xf]  ;;  %v6553_v3 = vor.u32 %v9736_v1, %v6552_v0  ;;  %v9768_v4 = vld [vmem:[%s15620_s1 + $0x1ec] sm:$0xf0] }
   0x3   :  { %v6808_v5 = vld [vmem:[%s15620_s1 + $0x2e0] sm:$0xf]  ;;  %v9800_v6 = vld [vmem:[%s15620_s1 + $0x2ec] sm:$0xf0]  ;;  %v6681_v7 = vor.u32 %v9768_v4, %v6680_v2 }
   0x4   :  { %v6809_v8 = vor.u32 %v9800_v6, %v6808_v5  ;;  %v6936_v9 = vld [vmem:[%s15620_s1 + $0x3e0] sm:$0xf]  ;;  %v9832_v10 = vld [vmem:[%s15620_s1 + $0x3ec] sm:$0xf0]  ;;  %4800 = vmatpush.bf16.msra.mxu0 %v6553_v3 }
   0x5   :  { %v6536_v11 = vld [vmem:[%s15620_s1 + $0xc0] sm:$0xf]  ;;  %v6937_v12 = vor.u32 %v9832_v10, %v6936_v9  ;;  %v9732_v13 = vld [vmem:[%s15620_s1 + $0xcc] sm:$0xf0]  ;;  %4813 = vmatpush.bf16.msra.mxu1 %v6681_v7 }
   0x6   :  { %v6664_v14 = vld [vmem:[%s15620_s1 + $0x1c0] sm:$0xf]  ;;  %v9764_v15 = vld [vmem:[%s15620_s1 + $0x1cc] sm:$0xf0]  ;;  %4826 = vmatpush.bf16.msra.mxu2 %v6809_v8  ;;  %v6537_v16 = vor.u32 %v9732_v13, %v6536_v11 }
   0x7   :  { %v6665_v17 = vor.u32 %v9764_v15, %v6664_v14  ;;  %v6792_v18 = vld [vmem:[%s15620_s1 + $0x2c0] sm:$0xf]  ;;  %v9796_v19 = vld [vmem:[%s15620_s1 + $0x2cc] sm:$0xf0]  ;;  %4839 = vmatpush.bf16.msra.mxu3 %v6937_v12 }
   0x8   :  { %v6920_v20 = vld [vmem:[%s15620_s1 + $0x3c0] sm:$0xf]  ;;  %v6793_v21 = vor.u32 %v9796_v19, %v6792_v18  ;;  %v9828_v22 = vld [vmem:[%s15620_s1 + $0x3cc] sm:$0xf0]  ;;  %4801 = vmatpush.bf16.msra.mxu0 %v6537_v16 }
   0x9   :  { %v6520_v23 = vld [vmem:[%s15620_s1 + $0xa0] sm:$0xf]  ;;  %v9728_v24 = vld [vmem:[%s15620_s1 + $0xac] sm:$0xf0]  ;;  %v6921_v25 = vor.u32 %v9828_v22, %v6920_v20  ;;  %4814 = vmatpush.bf16.msra.mxu1 %v6665_v17 }
   0xa   :  { %v6648_v26 = vld [vmem:[%s15620_s1 + $0x1a0] sm:$0xf]  ;;  %v9760_v27 = vld [vmem:[%s15620_s1 + $0x1ac] sm:$0xf0]  ;;  %v6521_v29 = vor.u32 %v9728_v24, %v6520_v23  ;;  %4827 = vmatpush.bf16.msra.mxu2 %v6793_v21 }
   0xb   :  { %v6776_v28 = vld [vmem:[%s15620_s1 + $0x2a0] sm:$0xf]  ;;  %v9792_v30 = vld [vmem:[%s15620_s1 + $0x2ac] sm:$0xf0]  ;;  %v6649_v33 = vor.u32 %v9760_v27, %v6648_v26  ;;  %4840 = vmatpush.bf16.msra.mxu3 %v6921_v25 }
   0xc   :  { %v6904_v31 = vld [vmem:[%s15620_s1 + $0x3a0] sm:$0xf]  ;;  %v9824_v32 = vld [vmem:[%s15620_s1 + $0x3ac] sm:$0xf0]  ;;  %v6777_v34 = vor.u32 %v9792_v30, %v6776_v28  ;;  %4802 = vmatpush.bf16.msra.mxu0 %v6521_v29 }
   0xd   :  { %v6504_v35 = vld [vmem:[%s15620_s1 + $0x80] sm:$0xf]  ;;  %v9724_v36 = vld [vmem:[%s15620_s1 + $0x8c] sm:$0xf0]  ;;  %v6905_v38 = vor.u32 %v9824_v32, %v6904_v31  ;;  %4815 = vmatpush.bf16.msra.mxu1 %v6649_v33 }
   0xe   :  { %v6632_v37 = vld [vmem:[%s15620_s1 + $0x180] sm:$0xf]  ;;  %v9756_v39 = vld [vmem:[%s15620_s1 + $0x18c] sm:$0xf0]  ;;  %v6505_v44 = vor.u32 %v9724_v36, %v6504_v35  ;;  %4828 = vmatpush.bf16.msra.mxu2 %v6777_v34 }
   0xf   :  { %v6760_v40 = vld [vmem:[%s15620_s1 + $0x280] sm:$0xf]  ;;  %v9788_v41 = vld [vmem:[%s15620_s1 + $0x28c] sm:$0xf0]  ;;  %v6633_v45 = vor.u32 %v9756_v39, %v6632_v37  ;;  %4841 = vmatpush.bf16.msra.mxu3 %v6905_v38 }
  0x10   :  { %v6888_v42 = vld [vmem:[%s15620_s1 + $0x380] sm:$0xf]  ;;  %v9820_v43 = vld [vmem:[%s15620_s1 + $0x38c] sm:$0xf0]  ;;  %v6761_v46 = vor.u32 %v9788_v41, %v6760_v40  ;;  %4803 = vmatpush.bf16.msra.mxu0 %v6505_v44 }
  0x11   :  { %v6488_v47 = vld [vmem:[%s15620_s1 + $0x60] sm:$0xf]  ;;  %v9720_v48 = vld [vmem:[%s15620_s1 + $0x6c] sm:$0xf0]  ;;  %v6889_v50 = vor.u32 %v9820_v43, %v6888_v42  ;;  %4816 = vmatpush.bf16.msra.mxu1 %v6633_v45 }
  0x12   :  { %v6616_v49 = vld [vmem:[%s15620_s1 + $0x160] sm:$0xf]  ;;  %v9752_v51 = vld [vmem:[%s15620_s1 + $0x16c] sm:$0xf0]  ;;  %v6489_v56 = vor.u32 %v9720_v48, %v6488_v47  ;;  %4829 = vmatpush.bf16.msra.mxu2 %v6761_v46 }
  0x13   :  { %v6744_v52 = vld [vmem:[%s15620_s1 + $0x260] sm:$0xf]  ;;  %v9784_v53 = vld [vmem:[%s15620_s1 + $0x26c] sm:$0xf0]  ;;  %v6617_v57 = vor.u32 %v9752_v51, %v6616_v49  ;;  %4842 = vmatpush.bf16.msra.mxu3 %v6889_v50 }
  0x14   :  { %v6872_v54 = vld [vmem:[%s15620_s1 + $0x360] sm:$0xf]  ;;  %v9816_v55 = vld [vmem:[%s15620_s1 + $0x36c] sm:$0xf0]  ;;  %v6745_v58 = vor.u32 %v9784_v53, %v6744_v52  ;;  %4804 = vmatpush.bf16.msra.mxu0 %v6489_v56 }
  0x15   :  { %v6472_v59 = vld [vmem:[%s15620_s1 + $0x40] sm:$0xf]  ;;  %v9716_v60 = vld [vmem:[%s15620_s1 + $0x4c] sm:$0xf0]  ;;  %v6873_v62 = vor.u32 %v9816_v55, %v6872_v54  ;;  %4817 = vmatpush.bf16.msra.mxu1 %v6617_v57 }
  0x16   :  { %v6600_v61 = vld [vmem:[%s15620_s1 + $0x140] sm:$0xf]  ;;  %v9748_v63 = vld [vmem:[%s15620_s1 + $0x14c] sm:$0xf0]  ;;  %v6473_v4 = vor.u32 %v9716_v60, %v6472_v59  ;;  %4830 = vmatpush.bf16.msra.mxu2 %v6745_v58 }
  0x17   :  { %v6728_v0 = vld [vmem:[%s15620_s1 + $0x240] sm:$0xf]  ;;  %v9780_v1 = vld [vmem:[%s15620_s1 + $0x24c] sm:$0xf0]  ;;  %v6601_v5 = vor.u32 %v9748_v63, %v6600_v61  ;;  %4843 = vmatpush.bf16.msra.mxu3 %v6873_v62 }
  0x18   :  { %v6856_v2 = vld [vmem:[%s15620_s1 + $0x340] sm:$0xf]  ;;  %v9812_v3 = vld [vmem:[%s15620_s1 + $0x34c] sm:$0xf0]  ;;  %v6729_v6 = vor.u32 %v9780_v1, %v6728_v0  ;;  %4805 = vmatpush.bf16.msra.mxu0 %v6473_v4 }
  0x19   :  { %v6456_v7 = vld [vmem:[%s15620_s1 + $0x20] sm:$0xf]  ;;  %v9712_v8 = vld [vmem:[%s15620_s1 + $0x2c] sm:$0xf0]  ;;  %v6857_v10 = vor.u32 %v9812_v3, %v6856_v2  ;;  %4818 = vmatpush.bf16.msra.mxu1 %v6601_v5 }
  0x1a   :  { %v6584_v9 = vld [vmem:[%s15620_s1 + $0x120] sm:$0xf]  ;;  %v9744_v11 = vld [vmem:[%s15620_s1 + $0x12c] sm:$0xf0]  ;;  %v6457_v16 = vor.u32 %v9712_v8, %v6456_v7  ;;  %4831 = vmatpush.bf16.msra.mxu2 %v6729_v6 }
  0x1b   :  { %v6712_v12 = vld [vmem:[%s15620_s1 + $0x220] sm:$0xf]  ;;  %v9776_v13 = vld [vmem:[%s15620_s1 + $0x22c] sm:$0xf0]  ;;  %v6585_v19 = vor.u32 %v9744_v11, %v6584_v9  ;;  %4844 = vmatpush.bf16.msra.mxu3 %v6857_v10 }
  0x1c   :  { %v6840_v14 = vld [vmem:[%s15620_s1 + $0x320] sm:$0xf]  ;;  %v9808_v15 = vld [vmem:[%s15620_s1 + $0x32c] sm:$0xf0]  ;;  %v6713_v20 = vor.u32 %v9776_v13, %v6712_v12  ;;  %4806 = vmatpush.bf16.msra.mxu0 %v6457_v16 }
  0x1d   :  { %v6440_v17 = vld [vmem:[%s15620_s1] sm:$0xf]  ;;  %v9708_v18 = vld [vmem:[%s15620_s1 + $0xc] sm:$0xf0]  ;;  %v6841_v24 = vor.u32 %v9808_v15, %v6840_v14  ;;  %4819 = vmatpush.bf16.msra.mxu1 %v6585_v19 }
  0x1e   :  { %v6568_v21 = vld [vmem:[%s15620_s1 + $0x100] sm:$0xf]  ;;  %v9740_v22 = vld [vmem:[%s15620_s1 + $0x10c] sm:$0xf0]  ;;  %v6441_v31 = vor.u32 %v9708_v18, %v6440_v17  ;;  %4832 = vmatpush.bf16.msra.mxu2 %v6713_v20 }
  0x1f   :  { %v6696_v23 = vld [vmem:[%s15620_s1 + $0x200] sm:$0xf]  ;;  %v9772_v25 = vld [vmem:[%s15620_s1 + $0x20c] sm:$0xf0]  ;;  %v6569_v35 = vor.u32 %v9740_v22, %v6568_v21  ;;  %4845 = vmatpush.bf16.msra.mxu3 %v6841_v24 }
  0x20   :  { %v6824_v26 = vld [vmem:[%s15620_s1 + $0x300] sm:$0xf]  ;;  %v9804_v27 = vld [vmem:[%s15620_s1 + $0x30c] sm:$0xf0]  ;;  %v6697_v36 = vor.u32 %v9772_v25, %v6696_v23  ;;  %4807 = vmatpush.bf16.msra.mxu0 %v6441_v31 }
  0x21   :  { %v7064_v28 = vld [vmem:[%s15620_s1 + $0x4e0] sm:$0xf]  ;;  %v9864_v29 = vld [vmem:[%s15620_s1 + $0x4ec] sm:$0xf0]  ;;  %v6825_v39 = vor.u32 %v9804_v27, %v6824_v26  ;;  %4820 = vmatpush.bf16.msra.mxu1 %v6569_v35 }
  0x22   :  { %v7192_v30 = vld [vmem:[%s15620_s1 + $0x5e0] sm:$0xf]  ;;  %v9896_v32 = vld [vmem:[%s15620_s1 + $0x5ec] sm:$0xf0]  ;;  %v7065_v40 = vor.u32 %v9864_v29, %v7064_v28  ;;  %4833 = vmatpush.bf16.msra.mxu2 %v6697_v36 }
  0x23   :  { %v7320_v33 = vld [vmem:[%s15620_s1 + $0x6e0] sm:$0xf]  ;;  %v9928_v34 = vld [vmem:[%s15620_s1 + $0x6ec] sm:$0xf0]  ;;  %v7193_v41 = vor.u32 %v9896_v32, %v7192_v30  ;;  %4846 = vmatpush.bf16.msra.mxu3 %v6825_v39 }
  0x24   :  { %v7448_v37 = vld [vmem:[%s15620_s1 + $0x7e0] sm:$0xf]  ;;  %v9960_v38 = vld [vmem:[%s15620_s1 + $0x7ec] sm:$0xf0]  ;;  %v7321_v42 = vor.u32 %v9928_v34, %v7320_v33  ;;  %4852 = vmatpush.bf16.msrb.mxu0 %v7065_v40 }
  0x25   :  { %v7048_v43 = vld [vmem:[%s15620_s1 + $0x4c0] sm:$0xf]  ;;  %v9860_v44 = vld [vmem:[%s15620_s1 + $0x4cc] sm:$0xf0]  ;;  %v7449_v46 = vor.u32 %v9960_v38, %v7448_v37  ;;  %4865 = vmatpush.bf16.msrb.mxu1 %v7193_v41 }
  0x26   :  { %v7176_v45 = vld [vmem:[%s15620_s1 + $0x5c0] sm:$0xf]  ;;  %v9892_v47 = vld [vmem:[%s15620_s1 + $0x5cc] sm:$0xf0]  ;;  %v7049_v52 = vor.u32 %v9860_v44, %v7048_v43  ;;  %4878 = vmatpush.bf16.msrb.mxu2 %v7321_v42 }
  0x27   :  { %v7304_v48 = vld [vmem:[%s15620_s1 + $0x6c0] sm:$0xf]  ;;  %v9924_v49 = vld [vmem:[%s15620_s1 + $0x6cc] sm:$0xf0]  ;;  %v7177_v55 = vor.u32 %v9892_v47, %v7176_v45  ;;  %4891 = vmatpush.bf16.msrb.mxu3 %v7449_v46 }
  0x28   :  { %v7432_v50 = vld [vmem:[%s15620_s1 + $0x7c0] sm:$0xf]  ;;  %v9956_v51 = vld [vmem:[%s15620_s1 + $0x7cc] sm:$0xf0]  ;;  %v7305_v56 = vor.u32 %v9924_v49, %v7304_v48  ;;  %4853 = vmatpush.bf16.msrb.mxu0 %v7049_v52 }
  0x29   :  { %v7032_v53 = vld [vmem:[%s15620_s1 + $0x4a0] sm:$0xf]  ;;  %v9856_v54 = vld [vmem:[%s15620_s1 + $0x4ac] sm:$0xf0]  ;;  %v7433_v60 = vor.u32 %v9956_v51, %v7432_v50  ;;  %4866 = vmatpush.bf16.msrb.mxu1 %v7177_v55 }
  0x2a   :  { %v7160_v57 = vld [vmem:[%s15620_s1 + $0x5a0] sm:$0xf]  ;;  %v9888_v58 = vld [vmem:[%s15620_s1 + $0x5ac] sm:$0xf0]  ;;  %v7033_v1 = vor.u32 %v9856_v54, %v7032_v53  ;;  %4879 = vmatpush.bf16.msrb.mxu2 %v7305_v56 }
  0x2b   :  { %v22_v59 = vld [vmem:[%s15619_s0] sm:$0xff]  ;;  %v9920_v62 = vld [vmem:[%s15620_s1 + $0x6ac] sm:$0xf0]  ;;  %v7161_v2 = vor.u32 %v9888_v58, %v7160_v57  ;;  %4892 = vmatpush.bf16.msrb.mxu3 %v7433_v60 }
  0x2c   :  { %v7288_v61 = vld [vmem:[%s15620_s1 + $0x6a0] sm:$0xf]  ;;  %821 = vst [vmem:[#allocation1] ss:$9 sm:$0xff] %v22_v59  ;;  %v9952_v0 = vld [vmem:[%s15620_s1 + $0x7ac] sm:$0xf0]  ;;  %4854 = vmatpush.bf16.msrb.mxu0 %v7033_v1 }
  0x2d   :  { %v7416_v63 = vld [vmem:[%s15620_s1 + $0x7a0] sm:$0xf]  ;;  %v7289_v3 = vor.u32 %v9920_v62, %v7288_v61  ;;  %v9852_v5 = vld [vmem:[%s15620_s1 + $0x48c] sm:$0xf0]  ;;  %4867 = vmatpush.bf16.msrb.mxu1 %v7161_v2  ;;  %v23_v61 = vld [vmem:[%s15619_s0 + $0x8] sm:$0xff] }
  0x2e   :  { %v7016_v4 = vld [vmem:[%s15620_s1 + $0x480] sm:$0xf]  ;;  %v7417_v7 = vor.u32 %v9952_v0, %v7416_v63  ;;  %v9884_v8 = vld [vmem:[%s15620_s1 + $0x58c] sm:$0xf0] }
  0x2f   :  { %v7144_v6 = vld [vmem:[%s15620_s1 + $0x580] sm:$0xf]  ;;  %v9916_v10 = vld [vmem:[%s15620_s1 + $0x68c] sm:$0xf0]  ;;  %v7017_v14 = vor.u32 %v9852_v5, %v7016_v4  ;;  %4880 = vmatpush.bf16.msrb.mxu2 %v7289_v3 }
  0x30   :  { %v7272_v9 = vld [vmem:[%s15620_s1 + $0x680] sm:$0xf]  ;;  %v9948_v12 = vld [vmem:[%s15620_s1 + $0x78c] sm:$0xf0]  ;;  %v7145_v18 = vor.u32 %v9884_v8, %v7144_v6  ;;  %4893 = vmatpush.bf16.msrb.mxu3 %v7417_v7 }
  0x31   :  { %v7400_v11 = vld [vmem:[%s15620_s1 + $0x780] sm:$0xf]  ;;  %v9848_v15 = vld [vmem:[%s15620_s1 + $0x46c] sm:$0xf0]  ;;  %v7273_v19 = vor.u32 %v9916_v10, %v7272_v9  ;;  %4855 = vmatpush.bf16.msrb.mxu0 %v7017_v14 }
  0x32   :  { %v7000_v13 = vld [vmem:[%s15620_s1 + $0x460] sm:$0xf]  ;;  %v9880_v17 = vld [vmem:[%s15620_s1 + $0x56c] sm:$0xf0]  ;;  %v7401_v23 = vor.u32 %v9948_v12, %v7400_v11  ;;  %4868 = vmatpush.bf16.msrb.mxu1 %v7145_v18 }
  0x33   :  { %v7128_v16 = vld [vmem:[%s15620_s1 + $0x560] sm:$0xf]  ;;  %v10890_v20 = vld [vmem:[#allocation1 + $0x12] sm:$0xff]  ;;  %v10903_v26 = vld [vmem:[#allocation1 + $0x9] sm:$0xff]  ;;  %v7001_v29 = vor.u32 %v9848_v15, %v7000_v13  ;;  %4881 = vmatpush.bf16.msrb.mxu2 %v7273_v19 }
  0x34   :  { %v10892_v21 = vld [vmem:[#allocation1] sm:$0xff]  ;;  %v9912_v25 = vld [vmem:[%s15620_s1 + $0x66c] sm:$0xf0]  ;;  %4834 = vmatmul.bf16.vlgmr.msra.gmra.mxu2 %v10890_v20  ;;  %4821 = vmatmul.bf16.vlgmr.msra.gmra.mxu1 %v10903_v26  ;;  %v7129_v30 = vor.u32 %v9880_v17, %v7128_v16  ;;  %v10980_v60 = vld [vmem:[#allocation1 + $0x36] sm:$0xff] }
  0x35   :  { %v10894_v22 = vld [vmem:[#allocation1 + $0x1b] sm:$0xff]  ;;  %v9944_v28 = vld [vmem:[%s15620_s1 + $0x76c] sm:$0xf0]  ;;  %4808 = vmatmul.bf16.vlgmr.msra.gmra.mxu0 %v10892_v21  ;;  %4894 = vmatpush.bf16.msrb.mxu3 %v7401_v23  ;;  %v10985_v0 = vld [vmem:[#allocation1 + $0x24] sm:$0xff] }
  0x36   :  { %v7256_v24 = vld [vmem:[%s15620_s1 + $0x660] sm:$0xf]  ;;  %4847 = vmatmul.bf16.vlgmr.msra.gmra.mxu3 %v10894_v22  ;;  %v9844_v33 = vld [vmem:[%s15620_s1 + $0x44c] sm:$0xf0]  ;;  %4856 = vmatpush.bf16.msrb.mxu0 %v7001_v29 }
  0x37   :  { %v7384_v27 = vld [vmem:[%s15620_s1 + $0x760] sm:$0xf]  ;;  %v7257_v31 = vor.u32 %v9912_v25, %v7256_v24  ;;  %v9876_v36 = vld [vmem:[%s15620_s1 + $0x54c] sm:$0xf0]  ;;  %4869 = vmatpush.bf16.msrb.mxu1 %v7129_v30 }
  0x38   :  { %v6984_v32 = vld [vmem:[%s15620_s1 + $0x440] sm:$0xf]  ;;  %v7385_v35 = vor.u32 %v9944_v28, %v7384_v27  ;;  %v9908_v38 = vld [vmem:[%s15620_s1 + $0x64c] sm:$0xf0] }
  0x39   :  { %v7112_v34 = vld [vmem:[%s15620_s1 + $0x540] sm:$0xf]  ;;  %v9940_v40 = vld [vmem:[%s15620_s1 + $0x74c] sm:$0xf0]  ;;  %v6985_v41 = vor.u32 %v9844_v33, %v6984_v32  ;;  %4882 = vmatpush.bf16.msrb.mxu2 %v7257_v31 }
  0x3a   :  { %v7240_v37 = vld [vmem:[%s15620_s1 + $0x640] sm:$0xf]  ;;  %v7113_v43 = vor.u32 %v9876_v36, %v7112_v34  ;;  %v9840_v45 = vld [vmem:[%s15620_s1 + $0x42c] sm:$0xf0]  ;;  %4895 = vmatpush.bf16.msrb.mxu3 %v7385_v35 }
  0x3b   :  { %v7368_v39 = vld [vmem:[%s15620_s1 + $0x740] sm:$0xf]  ;;  %v7241_v44 = vor.u32 %v9908_v38, %v7240_v37  ;;  %v9872_v47 = vld [vmem:[%s15620_s1 + $0x52c] sm:$0xf0]  ;;  %4857 = vmatpush.bf16.msrb.mxu0 %v6985_v41 }
  0x3c   :  { %v6968_v42 = vld [vmem:[%s15620_s1 + $0x420] sm:$0xf]  ;;  %v7369_v48 = vor.u32 %v9940_v40, %v7368_v39  ;;  %v9904_v50 = vld [vmem:[%s15620_s1 + $0x62c] sm:$0xf0]  ;;  %4870 = vmatpush.bf16.msrb.mxu1 %v7113_v43 }
  0x3d   :  { %v7096_v46 = vld [vmem:[%s15620_s1 + $0x520] sm:$0xf]  ;;  %v9936_v52 = vld [vmem:[%s15620_s1 + $0x72c] sm:$0xf0]  ;;  %v6969_v55 = vor.u32 %v9840_v45, %v6968_v42  ;;  %4883 = vmatpush.bf16.msrb.mxu2 %v7241_v44 }
  0x3e   :  { %v7224_v49 = vld [vmem:[%s15620_s1 + $0x620] sm:$0xf]  ;;  %v9836_v54 = vld [vmem:[%s15620_s1 + $0x40c] sm:$0xf0]  ;;  %v7097_v62 = vor.u32 %v9872_v47, %v7096_v46  ;;  %4896 = vmatpush.bf16.msrb.mxu3 %v7369_v48 }
  0x3f   :  { %v7352_v51 = vld [vmem:[%s15620_s1 + $0x720] sm:$0xf]  ;;  %v9868_v57 = vld [vmem:[%s15620_s1 + $0x50c] sm:$0xf0]  ;;  %v7225_v63 = vor.u32 %v9904_v50, %v7224_v49  ;;  %4858 = vmatpush.bf16.msrb.mxu0 %v6969_v55 }
  0x40   :  { %v6952_v53 = vld [vmem:[%s15620_s1 + $0x400] sm:$0xf]  ;;  %v9900_v59 = vld [vmem:[%s15620_s1 + $0x60c] sm:$0xf0]  ;;  %v7353_v3 = vor.u32 %v9936_v52, %v7352_v51  ;;  %4871 = vmatpush.bf16.msrb.mxu1 %v7097_v62 }
  0x41   :  { %v7080_v56 = vld [vmem:[%s15620_s1 + $0x500] sm:$0xf]  ;;  %v10989_v2 = vld [vmem:[#allocation1 + $0x2d] sm:$0xff]  ;;  %v6953_v9 = vor.u32 %v9836_v54, %v6952_v53  ;;  %4884 = vmatpush.bf16.msrb.mxu2 %v7225_v63 }
  0x42   :  { %v7208_v58 = vld [vmem:[%s15620_s1 + $0x600] sm:$0xf]  ;;  %v9932_v5 = vld [vmem:[%s15620_s1 + $0x70c] sm:$0xf0]  ;;  %v7081_v13 = vor.u32 %v9868_v57, %v7080_v56  ;;  %4897 = vmatpush.bf16.msrb.mxu3 %v7353_v3 }
  0x43   :  { %v10987_v1 = vld [vmem:[#allocation1 + $0x3f] sm:$0xff]  ;;  %v9992_v7 = vld [vmem:[%s15620_s1 + $0x8ec] sm:$0xf0]  ;;  %v7209_v14 = vor.u32 %v9900_v59, %v7208_v58  ;;  %4859 = vmatpush.bf16.msrb.mxu0 %v6953_v9 }
  0x44   :  { %v7336_v4 = vld [vmem:[%s15620_s1 + $0x700] sm:$0xf]  ;;  %831 = vst [vmem:[#allocation1] ss:$9 sm:$0xff] %v23_v61  ;;  %v10024_v10 = vld [vmem:[%s15620_s1 + $0x9ec] sm:$0xf0]  ;;  %4872 = vmatpush.bf16.msrb.mxu1 %v7081_v13 }
  0x45   :  { %v7576_v6 = vld [vmem:[%s15620_s1 + $0x8e0] sm:$0xf]  ;;  %v10056_v12 = vld [vmem:[%s15620_s1 + $0xaec] sm:$0xf0]  ;;  %v7337_v17 = vor.u32 %v9932_v5, %v7336_v4  ;;  %4885 = vmatpush.bf16.msrb.mxu2 %v7209_v14 }
  0x46   :  { %v7704_v8 = vld [vmem:[%s15620_s1 + $0x9e0] sm:$0xf]  ;;  %v10088_v16 = vld [vmem:[%s15620_s1 + $0xbec] sm:$0xf0]  ;;  %v7577_v18 = vor.u32 %v9992_v7, %v7576_v6  ;;  %4860 = vmatmul.bf16.vlgmr.msrb.gmra.mxu0 %v10985_v0 }
  0x47   :  { %v7832_v11 = vld [vmem:[%s15620_s1 + $0xae0] sm:$0xf]  ;;  %v7705_v19 = vor.u32 %v10024_v10, %v7704_v8  ;;  %v9988_v25 = vld [vmem:[%s15620_s1 + $0x8cc] sm:$0xf0]  ;;  %4898 = vmatpush.bf16.msrb.mxu3 %v7337_v17  ;;  %4873 = vmatmul.bf16.vlgmr.msrb.gmra.mxu1 %v10989_v2 }
  0x48   :  { %v7960_v15 = vld [vmem:[%s15620_s1 + $0xbe0] sm:$0xf]  ;;  %v7833_v23 = vor.u32 %v10056_v12, %v7832_v11  ;;  %v10020_v29 = vld [vmem:[%s15620_s1 + $0x9cc] sm:$0xf0]  ;;  %4904 = vmatpush.bf16.msra.mxu0 %v7577_v18  ;;  %4886 = vmatmul.bf16.vlgmr.msrb.gmra.mxu2 %v10980_v60 }
  0x49   :  { %v7560_v24 = vld [vmem:[%s15620_s1 + $0x8c0] sm:$0xf]  ;;  %v7961_v28 = vor.u32 %v10088_v16, %v7960_v15  ;;  %v10052_v31 = vld [vmem:[%s15620_s1 + $0xacc] sm:$0xf0]  ;;  %4917 = vmatpush.bf16.msra.mxu1 %v7705_v19 }
  0x4a   :  { %v7688_v27 = vld [vmem:[%s15620_s1 + $0x9c0] sm:$0xf]  ;;  %v10084_v33 = vld [vmem:[%s15620_s1 + $0xbcc] sm:$0xf0]  ;;  %v7561_v34 = vor.u32 %v9988_v25, %v7560_v24  ;;  %4930 = vmatpush.bf16.msra.mxu2 %v7833_v23  ;;  %4899 = vmatmul.bf16.vlgmr.msrb.gmra.mxu3 %v10987_v1 }
  0x4b   :  { %v7816_v30 = vld [vmem:[%s15620_s1 + $0xac0] sm:$0xf]  ;;  %v7689_v35 = vor.u32 %v10020_v29, %v7688_v27  ;;  %v9984_v38 = vld [vmem:[%s15620_s1 + $0x8ac] sm:$0xf0]  ;;  %4943 = vmatpush.bf16.msra.mxu3 %v7961_v28 }
  0x4c   :  { %v7944_v32 = vld [vmem:[%s15620_s1 + $0xbc0] sm:$0xf]  ;;  %v7817_v36 = vor.u32 %v10052_v31, %v7816_v30  ;;  %v10016_v41 = vld [vmem:[%s15620_s1 + $0x9ac] sm:$0xf0]  ;;  %4905 = vmatpush.bf16.msra.mxu0 %v7561_v34 }
  0x4d   :  { %v7544_v37 = vld [vmem:[%s15620_s1 + $0x8a0] sm:$0xf]  ;;  %v7945_v40 = vor.u32 %v10084_v33, %v7944_v32  ;;  %v10048_v43 = vld [vmem:[%s15620_s1 + $0xaac] sm:$0xf0]  ;;  %4918 = vmatpush.bf16.msra.mxu1 %v7689_v35 }
  0x4e   :  { %v7672_v39 = vld [vmem:[%s15620_s1 + $0x9a0] sm:$0xf]  ;;  %v10080_v45 = vld [vmem:[%s15620_s1 + $0xbac] sm:$0xf0]  ;;  %v7545_v46 = vor.u32 %v9984_v38, %v7544_v37  ;;  %4931 = vmatpush.bf16.msra.mxu2 %v7817_v36 }
  0x4f   :  { %v7800_v42 = vld [vmem:[%s15620_s1 + $0xaa0] sm:$0xf]  ;;  %v7673_v47 = vor.u32 %v10016_v41, %v7672_v39  ;;  %v9980_v50 = vld [vmem:[%s15620_s1 + $0x88c] sm:$0xf0]  ;;  %4944 = vmatpush.bf16.msra.mxu3 %v7945_v40 }
  0x50   :  { %v7928_v44 = vld [vmem:[%s15620_s1 + $0xba0] sm:$0xf]  ;;  %v7801_v48 = vor.u32 %v10048_v43, %v7800_v42  ;;  %v10012_v53 = vld [vmem:[%s15620_s1 + $0x98c] sm:$0xf0]  ;;  %4906 = vmatpush.bf16.msra.mxu0 %v7545_v46 }
  0x51   :  { %v7528_v49 = vld [vmem:[%s15620_s1 + $0x880] sm:$0xf]  ;;  %v7929_v52 = vor.u32 %v10080_v45, %v7928_v44  ;;  %v10044_v55 = vld [vmem:[%s15620_s1 + $0xa8c] sm:$0xf0]  ;;  %4919 = vmatpush.bf16.msra.mxu1 %v7673_v47 }
  0x52   :  { %v7656_v51 = vld [vmem:[%s15620_s1 + $0x980] sm:$0xf]  ;;  %v10076_v57 = vld [vmem:[%s15620_s1 + $0xb8c] sm:$0xf0]  ;;  %v7529_v58 = vor.u32 %v9980_v50, %v7528_v49  ;;  %4932 = vmatpush.bf16.msra.mxu2 %v7801_v48 }
  0x53   :  { %v7784_v54 = vld [vmem:[%s15620_s1 + $0xa80] sm:$0xf]  ;;  %v7657_v59 = vor.u32 %v10012_v53, %v7656_v51  ;;  %v9976_v63 = vld [vmem:[%s15620_s1 + $0x86c] sm:$0xf0]  ;;  %4945 = vmatpush.bf16.msra.mxu3 %v7929_v52 }
  0x54   :  { %v7912_v56 = vld [vmem:[%s15620_s1 + $0xb80] sm:$0xf]  ;;  %v7785_v61 = vor.u32 %v10044_v55, %v7784_v54  ;;  %v10008_v5 = vld [vmem:[%s15620_s1 + $0x96c] sm:$0xf0]  ;;  %4907 = vmatpush.bf16.msra.mxu0 %v7529_v58 }
  0x55   :  { %v7512_v62 = vld [vmem:[%s15620_s1 + $0x860] sm:$0xf]  ;;  %v7913_v4 = vor.u32 %v10076_v57, %v7912_v56  ;;  %v10040_v7 = vld [vmem:[%s15620_s1 + $0xa6c] sm:$0xf0]  ;;  %4920 = vmatpush.bf16.msra.mxu1 %v7657_v59 }
  0x56   :  { %v7640_v3 = vld [vmem:[%s15620_s1 + $0x960] sm:$0xf]  ;;  %v10072_v9 = vld [vmem:[%s15620_s1 + $0xb6c] sm:$0xf0]  ;;  %v7513_v10 = vor.u32 %v9976_v63, %v7512_v62  ;;  %4933 = vmatpush.bf16.msra.mxu2 %v7785_v61 }
  0x57   :  { %v7768_v6 = vld [vmem:[%s15620_s1 + $0xa60] sm:$0xf]  ;;  %v7641_v11 = vor.u32 %v10008_v5, %v7640_v3  ;;  %v9972_v14 = vld [vmem:[%s15620_s1 + $0x84c] sm:$0xf0]  ;;  %4946 = vmatpush.bf16.msra.mxu3 %v7913_v4 }
  0x58   :  { %v7896_v8 = vld [vmem:[%s15620_s1 + $0xb60] sm:$0xf]  ;;  %v7769_v12 = vor.u32 %v10040_v7, %v7768_v6  ;;  %v10004_v17 = vld [vmem:[%s15620_s1 + $0x94c] sm:$0xf0]  ;;  %4908 = vmatpush.bf16.msra.mxu0 %v7513_v10 }
  0x59   :  { %v7496_v13 = vld [vmem:[%s15620_s1 + $0x840] sm:$0xf]  ;;  %v7897_v16 = vor.u32 %v10072_v9, %v7896_v8  ;;  %v10036_v19 = vld [vmem:[%s15620_s1 + $0xa4c] sm:$0xf0]  ;;  %4921 = vmatpush.bf16.msra.mxu1 %v7641_v11 }
  0x5a   :  { %v7624_v15 = vld [vmem:[%s15620_s1 + $0x940] sm:$0xf]  ;;  %v10068_v24 = vld [vmem:[%s15620_s1 + $0xb4c] sm:$0xf0]  ;;  %v7497_v25 = vor.u32 %v9972_v14, %v7496_v13  ;;  %4934 = vmatpush.bf16.msra.mxu2 %v7769_v12 }
  0x5b   :  { %v7752_v18 = vld [vmem:[%s15620_s1 + $0xa40] sm:$0xf]  ;;  %v7625_v27 = vor.u32 %v10004_v17, %v7624_v15  ;;  %v9968_v30 = vld [vmem:[%s15620_s1 + $0x82c] sm:$0xf0]  ;;  %4947 = vmatpush.bf16.msra.mxu3 %v7897_v16 }
  0x5c   :  { %v7880_v23 = vld [vmem:[%s15620_s1 + $0xb40] sm:$0xf]  ;;  %v7753_v28 = vor.u32 %v10036_v19, %v7752_v18  ;;  %v10000_v33 = vld [vmem:[%s15620_s1 + $0x92c] sm:$0xf0]  ;;  %4909 = vmatpush.bf16.msra.mxu0 %v7497_v25 }
  0x5d   :  { %v7480_v29 = vld [vmem:[%s15620_s1 + $0x820] sm:$0xf]  ;;  %v7881_v32 = vor.u32 %v10068_v24, %v7880_v23  ;;  %v10032_v35 = vld [vmem:[%s15620_s1 + $0xa2c] sm:$0xf0]  ;;  %4922 = vmatpush.bf16.msra.mxu1 %v7625_v27 }
  0x5e   :  { %v7608_v31 = vld [vmem:[%s15620_s1 + $0x920] sm:$0xf]  ;;  %v10064_v37 = vld [vmem:[%s15620_s1 + $0xb2c] sm:$0xf0]  ;;  %v7481_v38 = vor.u32 %v9968_v30, %v7480_v29  ;;  %4935 = vmatpush.bf16.msra.mxu2 %v7753_v28 }
  0x5f   :  { %v7736_v34 = vld [vmem:[%s15620_s1 + $0xa20] sm:$0xf]  ;;  %v9964_v40 = vld [vmem:[%s15620_s1 + $0x80c] sm:$0xf0]  ;;  %v7609_v41 = vor.u32 %v10000_v33, %v7608_v31  ;;  %4948 = vmatpush.bf16.msra.mxu3 %v7881_v32 }
  0x60   :  { %v7864_v36 = vld [vmem:[%s15620_s1 + $0xb20] sm:$0xf]  ;;  %v7737_v42 = vor.u32 %v10032_v35, %v7736_v34  ;;  %v9996_v44 = vld [vmem:[%s15620_s1 + $0x90c] sm:$0xf0]  ;;  %4910 = vmatpush.bf16.msra.mxu0 %v7481_v38 }
  0x61   :  { %v7464_v39 = vld [vmem:[%s15620_s1 + $0x800] sm:$0xf]  ;;  %v7865_v46 = vor.u32 %v10064_v37, %v7864_v36  ;;  %v10028_v47 = vld [vmem:[%s15620_s1 + $0xa0c] sm:$0xf0]  ;;  %4923 = vmatpush.bf16.msra.mxu1 %v7609_v41 }
  0x62   :  { %v7592_v43 = vld [vmem:[%s15620_s1 + $0x900] sm:$0xf]  ;;  %v10060_v49 = vld [vmem:[%s15620_s1 + $0xb0c] sm:$0xf0]  ;;  %v7465_v53 = vor.u32 %v9964_v40, %v7464_v39  ;;  %4936 = vmatpush.bf16.msra.mxu2 %v7737_v42 }
  0x63   :  { %v7720_v45 = vld [vmem:[%s15620_s1 + $0xa00] sm:$0xf]  ;;  %v10120_v51 = vld [vmem:[%s15620_s1 + $0xcec] sm:$0xf0]  ;;  %v7593_v57 = vor.u32 %v9996_v44, %v7592_v43  ;;  %4949 = vmatpush.bf16.msra.mxu3 %v7865_v46 }
  0x64   :  { %v7848_v48 = vld [vmem:[%s15620_s1 + $0xb00] sm:$0xf]  ;;  %v10152_v54 = vld [vmem:[%s15620_s1 + $0xdec] sm:$0xf0]  ;;  %v7721_v58 = vor.u32 %v10028_v47, %v7720_v45  ;;  %4911 = vmatpush.bf16.msra.mxu0 %v7465_v53 }
  0x65   :  { %v8088_v50 = vld [vmem:[%s15620_s1 + $0xce0] sm:$0xf]  ;;  %v10184_v56 = vld [vmem:[%s15620_s1 + $0xeec] sm:$0xf0]  ;;  %v7849_v62 = vor.u32 %v10060_v49, %v7848_v48  ;;  %4924 = vmatpush.bf16.msra.mxu1 %v7593_v57 }
  0x66   :  { %v8216_v52 = vld [vmem:[%s15620_s1 + $0xde0] sm:$0xf]  ;;  %v10216_v61 = vld [vmem:[%s15620_s1 + $0xfec] sm:$0xf0]  ;;  %v8089_v63 = vor.u32 %v10120_v51, %v8088_v50  ;;  %4937 = vmatpush.bf16.msra.mxu2 %v7721_v58 }
  0x67   :  { %v8344_v55 = vld [vmem:[%s15620_s1 + $0xee0] sm:$0xf]  ;;  %v8217_v3 = vor.u32 %v10152_v54, %v8216_v52  ;;  %v10116_v6 = vld [vmem:[%s15620_s1 + $0xccc] sm:$0xf0]  ;;  %4950 = vmatpush.bf16.msra.mxu3 %v7849_v62 }
  0x68   :  { %v8472_v59 = vld [vmem:[%s15620_s1 + $0xfe0] sm:$0xf]  ;;  %v8345_v4 = vor.u32 %v10184_v56, %v8344_v55  ;;  %v10148_v9 = vld [vmem:[%s15620_s1 + $0xdcc] sm:$0xf0]  ;;  %4956 = vmatpush.bf16.msrb.mxu0 %v8089_v63 }
  0x69   :  { %v8072_v5 = vld [vmem:[%s15620_s1 + $0xcc0] sm:$0xf]  ;;  %v8473_v8 = vor.u32 %v10216_v61, %v8472_v59  ;;  %v10180_v11 = vld [vmem:[%s15620_s1 + $0xecc] sm:$0xf0]  ;;  %4969 = vmatpush.bf16.msrb.mxu1 %v8217_v3 }
  0x6a   :  { %v8200_v7 = vld [vmem:[%s15620_s1 + $0xdc0] sm:$0xf]  ;;  %v10212_v14 = vld [vmem:[%s15620_s1 + $0xfcc] sm:$0xf0]  ;;  %v8073_v18 = vor.u32 %v10116_v6, %v8072_v5  ;;  %4982 = vmatpush.bf16.msrb.mxu2 %v8345_v4 }
  0x6b   :  { %v8328_v10 = vld [vmem:[%s15620_s1 + $0xec0] sm:$0xf]  ;;  %v11243_v15 = vld [vmem:[#allocation1 + $0x12] sm:$0xff]  ;;  %v11245_v16 = vld [vmem:[#allocation1 + $0x9] sm:$0xff]  ;;  %v8201_v19 = vor.u32 %v10148_v9, %v8200_v7  ;;  %4995 = vmatpush.bf16.msrb.mxu3 %v8473_v8 }
  0x6c   :  { %v11235_v12 = vld [vmem:[#allocation1] sm:$0xff]  ;;  %v8329_v23 = vor.u32 %v10180_v11, %v8328_v10  ;;  %v10112_v25 = vld [vmem:[%s15620_s1 + $0xcac] sm:$0xf0]  ;;  %4938 = vmatmul.bf16.vlgmr.msra.gmra.mxu2 %v11243_v15  ;;  %4925 = vmatmul.bf16.vlgmr.msra.gmra.mxu1 %v11245_v16 }
  0x6d   :  { %v8456_v13 = vld [vmem:[%s15620_s1 + $0xfc0] sm:$0xf]  ;;  %4912 = vmatmul.bf16.vlgmr.msra.gmra.mxu0 %v11235_v12  ;;  %v10144_v29 = vld [vmem:[%s15620_s1 + $0xdac] sm:$0xf0]  ;;  %4970 = vmatpush.bf16.msrb.mxu1 %v8201_v19 }
  0x6e   :  { %v11247_v17 = vld [vmem:[#allocation1 + $0x1b] sm:$0xff]  ;;  %v8457_v28 = vor.u32 %v10212_v14, %v8456_v13  ;;  %v10176_v31 = vld [vmem:[%s15620_s1 + $0xeac] sm:$0xf0]  ;;  %4957 = vmatpush.bf16.msrb.mxu0 %v8073_v18  ;;  %4983 = vmatpush.bf16.msrb.mxu2 %v8329_v23 }
  0x6f   :  { %v8056_v24 = vld [vmem:[%s15620_s1 + $0xca0] sm:$0xf]  ;;  %v10208_v33 = vld [vmem:[%s15620_s1 + $0xfac] sm:$0xf0]  ;;  %4951 = vmatmul.bf16.vlgmr.msra.gmra.mxu3 %v11247_v17 }
  0x70   :  { %v8184_v27 = vld [vmem:[%s15620_s1 + $0xda0] sm:$0xf]  ;;  %v8057_v34 = vor.u32 %v10112_v25, %v8056_v24  ;;  %v10108_v38 = vld [vmem:[%s15620_s1 + $0xc8c] sm:$0xf0]  ;;  %4996 = vmatpush.bf16.msrb.mxu3 %v8457_v28 }
  0x71   :  { %v8312_v30 = vld [vmem:[%s15620_s1 + $0xea0] sm:$0xf]  ;;  %v8185_v36 = vor.u32 %v10144_v29, %v8184_v27  ;;  %v10140_v40 = vld [vmem:[%s15620_s1 + $0xd8c] sm:$0xf0] }
  0x72   :  { %v8440_v32 = vld [vmem:[%s15620_s1 + $0xfa0] sm:$0xf]  ;;  %v8313_v37 = vor.u32 %v10176_v31, %v8312_v30  ;;  %v10172_v43 = vld [vmem:[%s15620_s1 + $0xe8c] sm:$0xf0] }
  0x73   :  { %v8040_v35 = vld [vmem:[%s15620_s1 + $0xc80] sm:$0xf]  ;;  %v8441_v41 = vor.u32 %v10208_v33, %v8440_v32  ;;  %v10204_v45 = vld [vmem:[%s15620_s1 + $0xf8c] sm:$0xf0] }
  0x74   :  { %v8168_v39 = vld [vmem:[%s15620_s1 + $0xd80] sm:$0xf] }
  0x75   :  { %v8296_v42 = vld [vmem:[%s15620_s1 + $0xe80] sm:$0xf] }
  0x76   :  { %v8424_v44 = vld [vmem:[%s15620_s1 + $0xf80] sm:$0xf] }
  0x77   :  { %10 = vsyncpa [#allocation3], 0  ;;  %4958 = vmatpush.bf16.msrb.mxu0 %v8057_v34  ;;  %v8041_v46 = vor.u32 %v10108_v38, %v8040_v35  ;;  %4971 = vmatpush.bf16.msrb.mxu1 %v8185_v36  ;;  %v8169_v47 = vor.u32 %v10140_v40, %v8168_v39  ;;  %v8297_v48 = vor.u32 %v10172_v43, %v8296_v42  ;;  %v8024_v49 = vld [vmem:[%s15620_s1 + $0xc60] sm:$0xf]  ;;  %v10104_v50 = vld [vmem:[%s15620_s1 + $0xc6c] sm:$0xf0] }
  0x78   :  { %4984 = vmatpush.bf16.msrb.mxu2 %v8313_v37  ;;  %v8152_v51 = vld [vmem:[%s15620_s1 + $0xd60] sm:$0xf]  ;;  %4997 = vmatpush.bf16.msrb.mxu3 %v8441_v41  ;;  %v8425_v52 = vor.u32 %v10204_v45, %v8424_v44  ;;  %v10136_v53 = vld [vmem:[%s15620_s1 + $0xd6c] sm:$0xf0]  ;;  %v8025_v58 = vor.u32 %v10104_v50, %v8024_v49  ;;  %vm4797_vm0 = vcmask 523264   ;;  %s10556_s30 = smov [#allocation2]  }
  0x79   :  { %v8280_v54 = vld [vmem:[%s15620_s1 + $0xe60] sm:$0xf]  ;;  %v10168_v55 = vld [vmem:[%s15620_s1 + $0xe6c] sm:$0xf0]  ;;  %v8153_v59 = vor.u32 %v10136_v53, %v8152_v51  ;;  %s6427_s6 = sshll.u32 %s10556_s30, 4  ;;  %s6429_s9 = sshll.u32 %s15624_s5, 4  ;;  %s6428_s6 = int_to_ptr.vmem [resolvable:$true] %s6427_s6  ;;  %s6430_s9 = int_to_ptr.hbm [resolvable:$true] %s6429_s9 }
  0x7a   :  { %v8408_v56 = vld [vmem:[%s15620_s1 + $0xf60] sm:$0xf]  ;;  %v10200_v57 = vld [vmem:[%s15620_s1 + $0xf6c] sm:$0xf0]  ;;  %v8281_v61 = vor.u32 %v10168_v55, %v8280_v54  ;;  %vm6420_vm1 = vcmask 41984  }
  0x7b   :  { %4959 = vmatpush.bf16.msrb.mxu0 %v8041_v46  ;;  %4972 = vmatpush.bf16.msrb.mxu1 %v8169_v47  ;;  %v8008_v62 = vld [vmem:[%s15620_s1 + $0xc40] sm:$0xf]  ;;  %v10100_v63 = vld [vmem:[%s15620_s1 + $0xc4c] sm:$0xf0]  ;;  %v8409_v4 = vor.u32 %v10200_v57, %v8408_v56  ;;  %v11409_v46 = vld [vmem:[#allocation1 + $0x24] sm:$0xff] }
  0x7c   :  { %4985 = vmatpush.bf16.msrb.mxu2 %v8297_v48  ;;  %v8136_v3 = vld [vmem:[%s15620_s1 + $0xd40] sm:$0xf]  ;;  %4998 = vmatpush.bf16.msrb.mxu3 %v8425_v52  ;;  %v10132_v5 = vld [vmem:[%s15620_s1 + $0xd4c] sm:$0xf0]  ;;  %v8009_v10 = vor.u32 %v10100_v63, %v8008_v62  ;;  %v11411_v47 = vld [vmem:[#allocation1 + $0x36] sm:$0xff] }
  0x7d   :  { %v8264_v6 = vld [vmem:[%s15620_s1 + $0xe40] sm:$0xf]  ;;  %v10164_v7 = vld [vmem:[%s15620_s1 + $0xe4c] sm:$0xf0]  ;;  %v8137_v13 = vor.u32 %v10132_v5, %v8136_v3 }
  0x7e   :  { %v8392_v8 = vld [vmem:[%s15620_s1 + $0xf40] sm:$0xf]  ;;  %v10196_v9 = vld [vmem:[%s15620_s1 + $0xf4c] sm:$0xf0]  ;;  %v8265_v14 = vor.u32 %v10164_v7, %v8264_v6 }
  0x7f   :  { %4960 = vmatpush.bf16.msrb.mxu0 %v8025_v58  ;;  %v7992_v11 = vld [vmem:[%s15620_s1 + $0xc20] sm:$0xf]  ;;  %4973 = vmatpush.bf16.msrb.mxu1 %v8153_v59  ;;  %v10096_v18 = vld [vmem:[%s15620_s1 + $0xc2c] sm:$0xf0]  ;;  %v8393_v24 = vor.u32 %v10196_v9, %v8392_v8 }
  0x80   :  { %4986 = vmatpush.bf16.msrb.mxu2 %v8281_v61  ;;  %v8120_v19 = vld [vmem:[%s15620_s1 + $0xd20] sm:$0xf]  ;;  %v10128_v23 = vld [vmem:[%s15620_s1 + $0xd2c] sm:$0xf0]  ;;  %4999 = vmatpush.bf16.msrb.mxu3 %v8409_v4  ;;  %v7993_v32 = vor.u32 %v10096_v18, %v7992_v11 }
  0x81   :  { %v8248_v25 = vld [vmem:[%s15620_s1 + $0xe20] sm:$0xf]  ;;  %v10160_v27 = vld [vmem:[%s15620_s1 + $0xe2c] sm:$0xf0]  ;;  %v8121_v37 = vor.u32 %v10128_v23, %v8120_v19 }
  0x82   :  { %v8376_v28 = vld [vmem:[%s15620_s1 + $0xf20] sm:$0xf]  ;;  %v10192_v29 = vld [vmem:[%s15620_s1 + $0xf2c] sm:$0xf0]  ;;  %v8249_v38 = vor.u32 %v10160_v27, %v8248_v25 }
  0x83   :  { %v7976_v30 = vld [vmem:[%s15620_s1 + $0xc00] sm:$0xf]  ;;  %v10092_v31 = vld [vmem:[%s15620_s1 + $0xc0c] sm:$0xf0]  ;;  %4961 = vmatpush.bf16.msrb.mxu0 %v8009_v10  ;;  %4974 = vmatpush.bf16.msrb.mxu1 %v8137_v13  ;;  %v8377_v43 = vor.u32 %v10192_v29, %v8376_v28 }
  0x84   :  { %v8104_v33 = vld [vmem:[%s15620_s1 + $0xd00] sm:$0xf]  ;;  %v10124_v34 = vld [vmem:[%s15620_s1 + $0xd0c] sm:$0xf0]  ;;  %4987 = vmatpush.bf16.msrb.mxu2 %v8265_v14  ;;  %5000 = vmatpush.bf16.msrb.mxu3 %v8393_v24  ;;  %v7977_v51 = vor.u32 %v10092_v31, %v7976_v30 }
  0x85   :  { %v8232_v35 = vld [vmem:[%s15620_s1 + $0xe00] sm:$0xf]  ;;  %v10156_v36 = vld [vmem:[%s15620_s1 + $0xe0c] sm:$0xf0]  ;;  %v8105_v54 = vor.u32 %v10124_v34, %v8104_v33 }
  0x86   :  { %v8360_v39 = vld [vmem:[%s15620_s1 + $0xf00] sm:$0xf]  ;;  %v10188_v40 = vld [vmem:[%s15620_s1 + $0xf0c] sm:$0xf0]  ;;  %v8233_v55 = vor.u32 %v10156_v36, %v8232_v35 }
  0x87   :  { %v8600_v41 = vld [vmem:[%s15620_s1 + $0x10e0] sm:$0xf]  ;;  %v10248_v42 = vld [vmem:[%s15620_s1 + $0x10ec] sm:$0xf0]  ;;  %4962 = vmatpush.bf16.msrb.mxu0 %v7993_v32  ;;  %4975 = vmatpush.bf16.msrb.mxu1 %v8121_v37  ;;  %v8361_v58 = vor.u32 %v10188_v40, %v8360_v39 }
  0x88   :  { %v8728_v44 = vld [vmem:[%s15620_s1 + $0x11e0] sm:$0xf]  ;;  %v10280_v45 = vld [vmem:[%s15620_s1 + $0x11ec] sm:$0xf0]  ;;  %4988 = vmatpush.bf16.msrb.mxu2 %v8249_v38  ;;  %5001 = vmatpush.bf16.msrb.mxu3 %v8377_v43  ;;  %v8601_v59 = vor.u32 %v10248_v42, %v8600_v41 }
  0x89   :  { %v11413_v48 = vld [vmem:[#allocation1 + $0x2d] sm:$0xff]  ;;  %v11415_v49 = vld [vmem:[#allocation1 + $0x3f] sm:$0xff]  ;;  %v8729_v61 = vor.u32 %v10280_v45, %v8728_v44 }
  0x8a   :  { %v24_v50 = vld [vmem:[%s15619_s0 + $0x10] sm:$0xff]  ;;  %v8856_v52 = vld [vmem:[%s15620_s1 + $0x12e0] sm:$0xf] }
  0x8b   :  { %v10312_v53 = vld [vmem:[%s15620_s1 + $0x12ec] sm:$0xf0]  ;;  %841 = vst [vmem:[#allocation1] ss:$9 sm:$0xff] %v24_v50  ;;  %v8984_v56 = vld [vmem:[%s15620_s1 + $0x13e0] sm:$0xf]  ;;  %4963 = vmatpush.bf16.msrb.mxu0 %v7977_v51  ;;  %4976 = vmatpush.bf16.msrb.mxu1 %v8105_v54 }
  0x8c   :  { %v10344_v57 = vld [vmem:[%s15620_s1 + $0x13ec] sm:$0xf0]  ;;  %v8857_v62 = vor.u32 %v10312_v53, %v8856_v52  ;;  %v8584_v63 = vld [vmem:[%s15620_s1 + $0x10c0] sm:$0xf]  ;;  %4989 = vmatpush.bf16.msrb.mxu2 %v8233_v55  ;;  %5002 = vmatpush.bf16.msrb.mxu3 %v8361_v58 }
  0x8d   :  { %v10244_v3 = vld [vmem:[%s15620_s1 + $0x10cc] sm:$0xf0]  ;;  %v8712_v4 = vld [vmem:[%s15620_s1 + $0x11c0] sm:$0xf]  ;;  %v8985_v5 = vor.u32 %v10344_v57, %v8984_v56 }
  0x8e   :  { %v10276_v6 = vld [vmem:[%s15620_s1 + $0x11cc] sm:$0xf0]  ;;  %v8840_v7 = vld [vmem:[%s15620_s1 + $0x12c0] sm:$0xf]  ;;  %v8585_v11 = vor.u32 %v10244_v3, %v8584_v63  ;;  %4964 = vmatmul.bf16.vlgmr.msrb.gmra.mxu0 %v11409_v46  ;;  %4977 = vmatmul.bf16.vlgmr.msrb.gmra.mxu1 %v11413_v48 }
  0x8f   :  { %v10308_v8 = vld [vmem:[%s15620_s1 + $0x12cc] sm:$0xf0]  ;;  %v8968_v9 = vld [vmem:[%s15620_s1 + $0x13c0] sm:$0xf]  ;;  %5008 = vmatpush.bf16.msra.mxu0 %v8601_v59  ;;  %5021 = vmatpush.bf16.msra.mxu1 %v8729_v61  ;;  %v8713_v13 = vor.u32 %v10276_v6, %v8712_v4 }
  0x90   :  { %v10340_v10 = vld [vmem:[%s15620_s1 + $0x13cc] sm:$0xf0]  ;;  %5034 = vmatpush.bf16.msra.mxu2 %v8857_v62  ;;  %v8841_v14 = vor.u32 %v10308_v8, %v8840_v7  ;;  %v8568_v18 = vld [vmem:[%s15620_s1 + $0x10a0] sm:$0xf]  ;;  %5047 = vmatpush.bf16.msra.mxu3 %v8985_v5 }
  0x91   :  { %v10240_v19 = vld [vmem:[%s15620_s1 + $0x10ac] sm:$0xf0]  ;;  %v8696_v23 = vld [vmem:[%s15620_s1 + $0x11a0] sm:$0xf]  ;;  %v8969_v24 = vor.u32 %v10340_v10, %v8968_v9  ;;  %4990 = vmatmul.bf16.vlgmr.msrb.gmra.mxu2 %v11411_v47  ;;  %5003 = vmatmul.bf16.vlgmr.msrb.gmra.mxu3 %v11415_v49 }
  0x92   :  { %v10272_v25 = vld [vmem:[%s15620_s1 + $0x11ac] sm:$0xf0]  ;;  %v8824_v27 = vld [vmem:[%s15620_s1 + $0x12a0] sm:$0xf]  ;;  %v8569_v31 = vor.u32 %v10240_v19, %v8568_v18 }
  0x93   :  { %v10304_v28 = vld [vmem:[%s15620_s1 + $0x12ac] sm:$0xf0]  ;;  %v8952_v29 = vld [vmem:[%s15620_s1 + $0x13a0] sm:$0xf]  ;;  %5009 = vmatpush.bf16.msra.mxu0 %v8585_v11  ;;  %5022 = vmatpush.bf16.msra.mxu1 %v8713_v13  ;;  %v8697_v32 = vor.u32 %v10272_v25, %v8696_v23 }
  0x94   :  { %v10336_v30 = vld [vmem:[%s15620_s1 + $0x13ac] sm:$0xf0]  ;;  %5035 = vmatpush.bf16.msra.mxu2 %v8841_v14  ;;  %v8825_v33 = vor.u32 %v10304_v28, %v8824_v27  ;;  %v8552_v34 = vld [vmem:[%s15620_s1 + $0x1080] sm:$0xf]  ;;  %5048 = vmatpush.bf16.msra.mxu3 %v8969_v24 }
  0x95   :  { %v10236_v35 = vld [vmem:[%s15620_s1 + $0x108c] sm:$0xf0]  ;;  %v8680_v36 = vld [vmem:[%s15620_s1 + $0x1180] sm:$0xf]  ;;  %v8953_v37 = vor.u32 %v10336_v30, %v8952_v29 }
  0x96   :  { %v10268_v38 = vld [vmem:[%s15620_s1 + $0x118c] sm:$0xf0]  ;;  %v8808_v39 = vld [vmem:[%s15620_s1 + $0x1280] sm:$0xf]  ;;  %v8553_v43 = vor.u32 %v10236_v35, %v8552_v34 }
  0x97   :  { %v10300_v40 = vld [vmem:[%s15620_s1 + $0x128c] sm:$0xf0]  ;;  %v8936_v41 = vld [vmem:[%s15620_s1 + $0x1380] sm:$0xf]  ;;  %5010 = vmatpush.bf16.msra.mxu0 %v8569_v31  ;;  %5023 = vmatpush.bf16.msra.mxu1 %v8697_v32  ;;  %v8681_v44 = vor.u32 %v10268_v38, %v8680_v36 }
  0x98   :  { %v10332_v42 = vld [vmem:[%s15620_s1 + $0x138c] sm:$0xf0]  ;;  %5036 = vmatpush.bf16.msra.mxu2 %v8825_v33  ;;  %v8809_v45 = vor.u32 %v10300_v40, %v8808_v39  ;;  %v8536_v50 = vld [vmem:[%s15620_s1 + $0x1060] sm:$0xf]  ;;  %5049 = vmatpush.bf16.msra.mxu3 %v8953_v37 }
  0x99   :  { %v10232_v51 = vld [vmem:[%s15620_s1 + $0x106c] sm:$0xf0]  ;;  %v8664_v52 = vld [vmem:[%s15620_s1 + $0x1160] sm:$0xf]  ;;  %v8937_v53 = vor.u32 %v10332_v42, %v8936_v41 }
  0x9a   :  { %v10264_v54 = vld [vmem:[%s15620_s1 + $0x116c] sm:$0xf0]  ;;  %v8792_v55 = vld [vmem:[%s15620_s1 + $0x1260] sm:$0xf]  ;;  %v8537_v59 = vor.u32 %v10232_v51, %v8536_v50 }
  0x9b   :  { %v10296_v56 = vld [vmem:[%s15620_s1 + $0x126c] sm:$0xf0]  ;;  %v8920_v57 = vld [vmem:[%s15620_s1 + $0x1360] sm:$0xf]  ;;  %5011 = vmatpush.bf16.msra.mxu0 %v8553_v43  ;;  %5024 = vmatpush.bf16.msra.mxu1 %v8681_v44  ;;  %v8665_v61 = vor.u32 %v10264_v54, %v8664_v52 }
  0x9c   :  { %v10328_v58 = vld [vmem:[%s15620_s1 + $0x136c] sm:$0xf0]  ;;  %5037 = vmatpush.bf16.msra.mxu2 %v8809_v45  ;;  %v8793_v62 = vor.u32 %v10296_v56, %v8792_v55  ;;  %v8520_v63 = vld [vmem:[%s15620_s1 + $0x1040] sm:$0xf]  ;;  %5050 = vmatpush.bf16.msra.mxu3 %v8937_v53 }
  0x9d   :  { %v10228_v3 = vld [vmem:[%s15620_s1 + $0x104c] sm:$0xf0]  ;;  %v8648_v4 = vld [vmem:[%s15620_s1 + $0x1140] sm:$0xf]  ;;  %v8921_v5 = vor.u32 %v10328_v58, %v8920_v57 }
  0x9e   :  { %v10260_v6 = vld [vmem:[%s15620_s1 + $0x114c] sm:$0xf0]  ;;  %v8776_v7 = vld [vmem:[%s15620_s1 + $0x1240] sm:$0xf]  ;;  %v8521_v11 = vor.u32 %v10228_v3, %v8520_v63 }
  0x9f   :  { %v10292_v8 = vld [vmem:[%s15620_s1 + $0x124c] sm:$0xf0]  ;;  %v8904_v9 = vld [vmem:[%s15620_s1 + $0x1340] sm:$0xf]  ;;  %5012 = vmatpush.bf16.msra.mxu0 %v8537_v59  ;;  %5025 = vmatpush.bf16.msra.mxu1 %v8665_v61  ;;  %v8649_v13 = vor.u32 %v10260_v6, %v8648_v4 }
  0xa0   :  { %v10324_v10 = vld [vmem:[%s15620_s1 + $0x134c] sm:$0xf0]  ;;  %5038 = vmatpush.bf16.msra.mxu2 %v8793_v62  ;;  %v8777_v14 = vor.u32 %v10292_v8, %v8776_v7  ;;  %v8504_v18 = vld [vmem:[%s15620_s1 + $0x1020] sm:$0xf]  ;;  %5051 = vmatpush.bf16.msra.mxu3 %v8921_v5 }
  0xa1   :  { %v10224_v19 = vld [vmem:[%s15620_s1 + $0x102c] sm:$0xf0]  ;;  %v8632_v23 = vld [vmem:[%s15620_s1 + $0x1120] sm:$0xf]  ;;  %v8905_v24 = vor.u32 %v10324_v10, %v8904_v9 }
  0xa2   :  { %v10256_v25 = vld [vmem:[%s15620_s1 + $0x112c] sm:$0xf0]  ;;  %v8760_v27 = vld [vmem:[%s15620_s1 + $0x1220] sm:$0xf]  ;;  %v8505_v31 = vor.u32 %v10224_v19, %v8504_v18 }
  0xa3   :  { %v10288_v28 = vld [vmem:[%s15620_s1 + $0x122c] sm:$0xf0]  ;;  %v8888_v29 = vld [vmem:[%s15620_s1 + $0x1320] sm:$0xf]  ;;  %5013 = vmatpush.bf16.msra.mxu0 %v8521_v11  ;;  %5026 = vmatpush.bf16.msra.mxu1 %v8649_v13  ;;  %v8633_v34 = vor.u32 %v10256_v25, %v8632_v23 }
  0xa4   :  { %v10320_v30 = vld [vmem:[%s15620_s1 + $0x132c] sm:$0xf0]  ;;  %v8488_v32 = vld [vmem:[%s15620_s1 + $0x1000] sm:$0xf]  ;;  %5039 = vmatpush.bf16.msra.mxu2 %v8777_v14  ;;  %v8761_v35 = vor.u32 %v10288_v28, %v8760_v27  ;;  %5052 = vmatpush.bf16.msra.mxu3 %v8905_v24 }
  0xa5   :  { %v10220_v33 = vld [vmem:[%s15620_s1 + $0x100c] sm:$0xf0]  ;;  %v8616_v36 = vld [vmem:[%s15620_s1 + $0x1100] sm:$0xf]  ;;  %v8889_v39 = vor.u32 %v10320_v30, %v8888_v29 }
  0xa6   :  { %v10252_v37 = vld [vmem:[%s15620_s1 + $0x110c] sm:$0xf0]  ;;  %v8744_v38 = vld [vmem:[%s15620_s1 + $0x1200] sm:$0xf]  ;;  %v8489_v50 = vor.u32 %v10220_v33, %v8488_v32 }
  0xa7   :  { %v10284_v40 = vld [vmem:[%s15620_s1 + $0x120c] sm:$0xf0]  ;;  %v8872_v41 = vld [vmem:[%s15620_s1 + $0x1300] sm:$0xf]  ;;  %5014 = vmatpush.bf16.msra.mxu0 %v8505_v31  ;;  %5027 = vmatpush.bf16.msra.mxu1 %v8633_v34  ;;  %v8617_v54 = vor.u32 %v10252_v37, %v8616_v36 }
  0xa8   :  { %v10316_v42 = vld [vmem:[%s15620_s1 + $0x130c] sm:$0xf0]  ;;  %v9112_v43 = vld [vmem:[%s15620_s1 + $0x14e0] sm:$0xf]  ;;  %5040 = vmatpush.bf16.msra.mxu2 %v8761_v35  ;;  %v8745_v55 = vor.u32 %v10284_v40, %v8744_v38  ;;  %5053 = vmatpush.bf16.msra.mxu3 %v8889_v39 }
  0xa9   :  { %v10376_v44 = vld [vmem:[%s15620_s1 + $0x14ec] sm:$0xf0]  ;;  %v9240_v45 = vld [vmem:[%s15620_s1 + $0x15e0] sm:$0xf]  ;;  %v8873_v58 = vor.u32 %v10316_v42, %v8872_v41 }
  0xaa   :  { %v10408_v51 = vld [vmem:[%s15620_s1 + $0x15ec] sm:$0xf0]  ;;  %v9368_v52 = vld [vmem:[%s15620_s1 + $0x16e0] sm:$0xf]  ;;  %v9113_v59 = vor.u32 %v10376_v44, %v9112_v43 }
  0xab   :  { %v10440_v53 = vld [vmem:[%s15620_s1 + $0x16ec] sm:$0xf0]  ;;  %v9496_v56 = vld [vmem:[%s15620_s1 + $0x17e0] sm:$0xf]  ;;  %v9241_v61 = vor.u32 %v10408_v51, %v9240_v45  ;;  %5015 = vmatpush.bf16.msra.mxu0 %v8489_v50  ;;  %5028 = vmatpush.bf16.msra.mxu1 %v8617_v54 }
  0xac   :  { %v10472_v57 = vld [vmem:[%s15620_s1 + $0x17ec] sm:$0xf0]  ;;  %v9369_v62 = vor.u32 %v10440_v53, %v9368_v52  ;;  %v9096_v63 = vld [vmem:[%s15620_s1 + $0x14c0] sm:$0xf]  ;;  %5041 = vmatpush.bf16.msra.mxu2 %v8745_v55  ;;  %5054 = vmatpush.bf16.msra.mxu3 %v8873_v58 }
  0xad   :  { %v10372_v3 = vld [vmem:[%s15620_s1 + $0x14cc] sm:$0xf0]  ;;  %v9224_v4 = vld [vmem:[%s15620_s1 + $0x15c0] sm:$0xf]  ;;  %v9497_v5 = vor.u32 %v10472_v57, %v9496_v56 }
  0xae   :  { %v10404_v6 = vld [vmem:[%s15620_s1 + $0x15cc] sm:$0xf0]  ;;  %v9352_v7 = vld [vmem:[%s15620_s1 + $0x16c0] sm:$0xf]  ;;  %v9097_v19 = vor.u32 %v10372_v3, %v9096_v63 }
  0xaf   :  { %v10436_v8 = vld [vmem:[%s15620_s1 + $0x16cc] sm:$0xf0]  ;;  %v11646_v9 = vld [vmem:[#allocation1] sm:$0xff]  ;;  %5060 = vmatpush.bf16.msrb.mxu0 %v9113_v59  ;;  %5073 = vmatpush.bf16.msrb.mxu1 %v9241_v61  ;;  %v9225_v23 = vor.u32 %v10404_v6, %v9224_v4 }
  0xb0   :  { %v9480_v10 = vld [vmem:[%s15620_s1 + $0x17c0] sm:$0xf]  ;;  %v10468_v11 = vld [vmem:[%s15620_s1 + $0x17cc] sm:$0xf0]  ;;  %5086 = vmatpush.bf16.msrb.mxu2 %v9369_v62  ;;  %v9353_v24 = vor.u32 %v10436_v8, %v9352_v7  ;;  %5099 = vmatpush.bf16.msrb.mxu3 %v9497_v5  ;;  %v11739_v4 = vld [vmem:[#allocation1 + $0x24] sm:$0xff] }
  0xb1   :  { %v11654_v13 = vld [vmem:[#allocation1 + $0x12] sm:$0xff]  ;;  %v11656_v14 = vld [vmem:[#allocation1 + $0x9] sm:$0xff]  ;;  %v11658_v18 = vld [vmem:[#allocation1 + $0x1b] sm:$0xff]  ;;  %5016 = vmatmul.bf16.vlgmr.msra.gmra.mxu0 %v11646_v9  ;;  %v9481_v29 = vor.u32 %v10468_v11, %v9480_v10 }
  0xb2   :  { %v9080_v25 = vld [vmem:[%s15620_s1 + $0x14a0] sm:$0xf]  ;;  %v10368_v27 = vld [vmem:[%s15620_s1 + $0x14ac] sm:$0xf0]  ;;  %5042 = vmatmul.bf16.vlgmr.msra.gmra.mxu2 %v11654_v13  ;;  %5029 = vmatmul.bf16.vlgmr.msra.gmra.mxu1 %v11656_v14  ;;  %v11741_v5 = vld [vmem:[#allocation1 + $0x36] sm:$0xff] }
  0xb3   :  { %v9208_v28 = vld [vmem:[%s15620_s1 + $0x15a0] sm:$0xf]  ;;  %v10400_v30 = vld [vmem:[%s15620_s1 + $0x15ac] sm:$0xf0]  ;;  %5055 = vmatmul.bf16.vlgmr.msra.gmra.mxu3 %v11658_v18  ;;  %5061 = vmatpush.bf16.msrb.mxu0 %v9097_v19  ;;  %v9081_v35 = vor.u32 %v10368_v27, %v9080_v25  ;;  %v25_v8 = vld [vmem:[%s15619_s0 + $0x18] sm:$0x1] }
  0xb4   :  { %v9336_v31 = vld [vmem:[%s15620_s1 + $0x16a0] sm:$0xf]  ;;  %v10432_v32 = vld [vmem:[%s15620_s1 + $0x16ac] sm:$0xf0]  ;;  %5074 = vmatpush.bf16.msrb.mxu1 %v9225_v23  ;;  %5087 = vmatpush.bf16.msrb.mxu2 %v9353_v24  ;;  %v9209_v37 = vor.u32 %v10400_v30, %v9208_v28 }
  0xb5   :  { %v9464_v33 = vld [vmem:[%s15620_s1 + $0x17a0] sm:$0xf]  ;;  %v10464_v34 = vld [vmem:[%s15620_s1 + $0x17ac] sm:$0xf0]  ;;  %v9337_v38 = vor.u32 %v10432_v32, %v9336_v31  ;;  %5100 = vmatpush.bf16.msrb.mxu3 %v9481_v29 }
  0xb6   :  { %v9064_v36 = vld [vmem:[%s15620_s1 + $0x1480] sm:$0xf]  ;;  %v10364_v39 = vld [vmem:[%s15620_s1 + $0x148c] sm:$0xf0]  ;;  %v9465_v42 = vor.u32 %v10464_v34, %v9464_v33 }
  0xb7   :  { %v9192_v40 = vld [vmem:[%s15620_s1 + $0x1580] sm:$0xf]  ;;  %v10396_v41 = vld [vmem:[%s15620_s1 + $0x158c] sm:$0xf0]  ;;  %5062 = vmatpush.bf16.msrb.mxu0 %v9081_v35  ;;  %v9065_v53 = vor.u32 %v10364_v39, %v9064_v36  ;;  %v4809_v35 = vpop.f32.mrf.mxu0 }
  0xb8   :  { %v9320_v43 = vld [vmem:[%s15620_s1 + $0x1680] sm:$0xf]  ;;  %v10428_v44 = vld [vmem:[%s15620_s1 + $0x168c] sm:$0xf0]  ;;  %5075 = vmatpush.bf16.msrb.mxu1 %v9209_v37  ;;  %5088 = vmatpush.bf16.msrb.mxu2 %v9337_v38  ;;  %v9193_v57 = vor.u32 %v10396_v41, %v9192_v40 }
  0xb9   :  { %v9448_v45 = vld [vmem:[%s15620_s1 + $0x1780] sm:$0xf]  ;;  %v10460_v50 = vld [vmem:[%s15620_s1 + $0x178c] sm:$0xf0]  ;;  %v9321_v58 = vor.u32 %v10428_v44, %v9320_v43  ;;  %5101 = vmatpush.bf16.msrb.mxu3 %v9465_v42  ;;  %v4822_v42 = vpop.f32.mrf.mxu1 }
  0xba   :  { %v9048_v51 = vld [vmem:[%s15620_s1 + $0x1460] sm:$0xf]  ;;  %v10360_v52 = vld [vmem:[%s15620_s1 + $0x146c] sm:$0xf0]  ;;  %v9449_v63 = vor.u32 %v10460_v50, %v9448_v45 }
  0xbb   :  { %v9176_v54 = vld [vmem:[%s15620_s1 + $0x1560] sm:$0xf]  ;;  %v10392_v55 = vld [vmem:[%s15620_s1 + $0x156c] sm:$0xf0]  ;;  %5063 = vmatpush.bf16.msrb.mxu0 %v9065_v53  ;;  %v9049_v10 = vor.u32 %v10360_v52, %v9048_v51 }
  0xbc   :  { %v9304_v56 = vld [vmem:[%s15620_s1 + $0x1660] sm:$0xf]  ;;  %v10424_v59 = vld [vmem:[%s15620_s1 + $0x166c] sm:$0xf0]  ;;  %5076 = vmatpush.bf16.msrb.mxu1 %v9193_v57  ;;  %5089 = vmatpush.bf16.msrb.mxu2 %v9321_v58  ;;  %v9177_v19 = vor.u32 %v10392_v55, %v9176_v54 }
  0xbd   :  { %v9432_v61 = vld [vmem:[%s15620_s1 + $0x1760] sm:$0xf]  ;;  %v10456_v62 = vld [vmem:[%s15620_s1 + $0x176c] sm:$0xf0]  ;;  %v9305_v23 = vor.u32 %v10424_v59, %v9304_v56  ;;  %5102 = vmatpush.bf16.msrb.mxu3 %v9449_v63  ;;  %v4835_v63 = vpop.f32.mrf.mxu2 }
  0xbe   :  { %v810_v3 = vld [vmem:[%s15621_s2] sm:$0xf]  ;;  %v11743_v6 = vld [vmem:[#allocation1 + $0x2d] sm:$0xff]  ;;  %v9433_v28 = vor.u32 %v10456_v62, %v9432_v61 }
  0xbf   :  { %v11745_v7 = vld [vmem:[#allocation1 + $0x3f] sm:$0xff]  ;;  %v10356_v24 = vld [vmem:[%s15620_s1 + $0x144c] sm:$0xf0]  ;;  %v812_v27 = vperm.slane %v810_v3, 0  ;;  %5064 = vmatpush.bf16.msrb.mxu0 %v9049_v10 }
  0xc0   :  { %v9032_v11 = vld [vmem:[%s15620_s1 + $0x1440] sm:$0xf]  ;;  %851 = vst [vmem:[#allocation1] ss:$9 sm:$0xff] %v25_v8  ;;  %v10388_v29 = vld [vmem:[%s15620_s1 + $0x154c] sm:$0xf0]  ;;  %5077 = vmatpush.bf16.msrb.mxu1 %v9177_v19  ;;  %5090 = vmatpush.bf16.msrb.mxu2 %v9305_v23  ;;  %v4848_v23 = vpop.f32.mrf.mxu3 }
  0xc1   :  { %v9160_v25 = vld [vmem:[%s15620_s1 + $0x1540] sm:$0xf]  ;;  %v10420_v31 = vld [vmem:[%s15620_s1 + $0x164c] sm:$0xf0]  ;;  %v9033_v34 = vor.u32 %v10356_v24, %v9032_v11  ;;  %v4810_v41 = vadd.f32 %v4809_v35, %v812_v27  ;;  %5103 = vmatpush.bf16.msrb.mxu3 %v9433_v28  ;;  %v9734_v27 = vld [vmem:[%s15620_s1 + $0xe4] sm:$0xf] }
  0xc2   :  { %v9288_v30 = vld [vmem:[%s15620_s1 + $0x1640] sm:$0xf]  ;;  %v10452_v33 = vld [vmem:[%s15620_s1 + $0x174c] sm:$0xf0]  ;;  %v9161_v36 = vor.u32 %v10388_v29, %v9160_v25  ;;  %v6554_v29 = vld [vmem:[%s15620_s1 + $0xf0] sm:$0xf0] }
  0xc3   :  { %v9416_v32 = vld [vmem:[%s15620_s1 + $0x1740] sm:$0xf]  ;;  %v9289_v37 = vor.u32 %v10420_v31, %v9288_v30  ;;  %v10352_v39 = vld [vmem:[%s15620_s1 + $0x142c] sm:$0xf0]  ;;  %v4823_v53 = vadd.f32 %v4822_v42, %v4810_v41  ;;  %5065 = vmatpush.bf16.msrb.mxu0 %v9033_v34  ;;  %v9766_v30 = vld [vmem:[%s15620_s1 + $0x1e4] sm:$0xf]  ;;  %v6557_v41 = vor.u32 %v9734_v27, %v6554_v29 }
  0xc4   :  { %v9016_v38 = vld [vmem:[%s15620_s1 + $0x1420] sm:$0xf]  ;;  %v9417_v43 = vor.u32 %v10452_v33, %v9416_v32  ;;  %v10384_v44 = vld [vmem:[%s15620_s1 + $0x152c] sm:$0xf0]  ;;  %5078 = vmatpush.bf16.msrb.mxu1 %v9161_v36  ;;  %v6682_v31 = vld [vmem:[%s15620_s1 + $0x1f0] sm:$0xf0]  ;;  %v4811_v33 = vpop.f32.mrf.mxu0 }
  0xc5   :  { %v9144_v40 = vld [vmem:[%s15620_s1 + $0x1520] sm:$0xf]  ;;  %v10416_v50 = vld [vmem:[%s15620_s1 + $0x162c] sm:$0xf0]  ;;  %v9017_v54 = vor.u32 %v10352_v39, %v9016_v38  ;;  %5091 = vmatpush.bf16.msrb.mxu2 %v9289_v37  ;;  %v4836_v19 = vadd.f32 %v4835_v63, %v4823_v53  ;;  %v9798_v36 = vld [vmem:[%s15620_s1 + $0x2e4] sm:$0xf]  ;;  %v4824_v38 = vpop.f32.mrf.mxu1  ;;  %v6685_v42 = vor.u32 %v9766_v30, %v6682_v31 }
  0xc6   :  { %v9272_v45 = vld [vmem:[%s15620_s1 + $0x1620] sm:$0xf]  ;;  %v10448_v52 = vld [vmem:[%s15620_s1 + $0x172c] sm:$0xf0]  ;;  %v9145_v57 = vor.u32 %v10384_v44, %v9144_v40  ;;  %5104 = vmatpush.bf16.msrb.mxu3 %v9417_v43  ;;  %v6810_v37 = vld [vmem:[%s15620_s1 + $0x2f0] sm:$0xf0] }
  0xc7   :  { %v9400_v51 = vld [vmem:[%s15620_s1 + $0x1720] sm:$0xf]  ;;  %v10348_v56 = vld [vmem:[%s15620_s1 + $0x140c] sm:$0xf0]  ;;  %v9273_v58 = vor.u32 %v10416_v50, %v9272_v45  ;;  %5066 = vmatpush.bf16.msrb.mxu0 %v9017_v54  ;;  %v11840_v32 = vadd.f32 %v4848_v23, %v4836_v19  ;;  %v9730_v45 = vld [vmem:[%s15620_s1 + $0xc4] sm:$0xf]  ;;  %v6813_v50 = vor.u32 %v9798_v36, %v6810_v37 }
  0xc8   :  { %v9000_v55 = vld [vmem:[%s15620_s1 + $0x1400] sm:$0xf]  ;;  %v10380_v61 = vld [vmem:[%s15620_s1 + $0x150c] sm:$0xf0]  ;;  %v9401_v3 = vor.u32 %v10448_v52, %v9400_v51  ;;  %5079 = vmatpush.bf16.msrb.mxu1 %v9145_v57  ;;  %v6538_v51 = vld [vmem:[%s15620_s1 + $0xd0] sm:$0xf0] }
  0xc9   :  { %v9128_v59 = vld [vmem:[%s15620_s1 + $0x1500] sm:$0xf]  ;;  %v10412_v8 = vld [vmem:[%s15620_s1 + $0x160c] sm:$0xf0]  ;;  %v9001_v28 = vor.u32 %v10348_v56, %v9000_v55  ;;  %5092 = vmatpush.bf16.msrb.mxu2 %v9273_v58  ;;  %v9762_v52 = vld [vmem:[%s15620_s1 + $0x1c4] sm:$0xf]  ;;  %v4837_v56 = vpop.f32.mrf.mxu2  ;;  %v4850_v58 = vpop.f32.mrf.mxu3 }
  0xca   :  { %v9256_v62 = vld [vmem:[%s15620_s1 + $0x1600] sm:$0xf]  ;;  %v10444_v11 = vld [vmem:[%s15620_s1 + $0x170c] sm:$0xf0]  ;;  %v9129_v34 = vor.u32 %v10380_v61, %v9128_v59  ;;  %5105 = vmatpush.bf16.msrb.mxu3 %v9401_v3  ;;  %v6666_v53 = vld [vmem:[%s15620_s1 + $0x1d0] sm:$0xf0]  ;;  %v6541_v59 = vor.u32 %v9730_v45, %v6538_v51 }
  0xcb   :  { %v9384_v10 = vld [vmem:[%s15620_s1 + $0x1700] sm:$0xf]  ;;  %v10488_v25 = vld [vmem:[%s15620_s1 + $0x186c] sm:$0xf0]  ;;  %v9257_v35 = vor.u32 %v10412_v8, %v9256_v62  ;;  %5067 = vmatpush.bf16.msrb.mxu0 %v9001_v28  ;;  %v9794_v54 = vld [vmem:[%s15620_s1 + $0x2c4] sm:$0xf]  ;;  %v6669_v61 = vor.u32 %v9762_v52, %v6666_v53 }
  0xcc   :  { %v9560_v24 = vld [vmem:[%s15620_s1 + $0x1860] sm:$0xf]  ;;  %v9385_v39 = vor.u32 %v10444_v11, %v9384_v10  ;;  %v10484_v44 = vld [vmem:[%s15620_s1 + $0x184c] sm:$0xf0]  ;;  %5080 = vmatpush.bf16.msrb.mxu1 %v9129_v34  ;;  %v6794_v55 = vld [vmem:[%s15620_s1 + $0x2d0] sm:$0xf0] }
  0xcd   :  { %v9561_v40 = vor.u32 %v10488_v25, %v9560_v24  ;;  %v9544_v43 = vld [vmem:[%s15620_s1 + $0x1840] sm:$0xf]  ;;  %5093 = vmatpush.bf16.msrb.mxu2 %v9257_v35  ;;  %v10480_v63 = vld [vmem:[%s15620_s1 + $0x182c] sm:$0xf0]  ;;  %v9726_v3 = vld [vmem:[%s15620_s1 + $0xa4] sm:$0xf]  ;;  %v6797_v8 = vor.u32 %v9794_v54, %v6794_v55  ;;  %v4874_v52 = vpop.f32.mrf.mxu1 }
  0xce   :  { %5106 = vmatpush.bf16.msrb.mxu3 %v9385_v39  ;;  %v9545_v57 = vor.u32 %v10484_v44, %v9544_v43  ;;  %v9528_v62 = vld [vmem:[%s15620_s1 + $0x1820] sm:$0xf]  ;;  %5068 = vmatmul.bf16.vlgmr.msrb.gmra.mxu0 %v11739_v4  ;;  %v6522_v10 = vld [vmem:[%s15620_s1 + $0xb0] sm:$0xf0]  ;;  %v9758_v11 = vld [vmem:[%s15620_s1 + $0x1a4] sm:$0xf] }
  0xcf   :  { %5116 = vmatpush.bf16.msra.mxu0 %v9561_v40  ;;  %v6650_v19 = vld [vmem:[%s15620_s1 + $0x1b0] sm:$0xf0]  ;;  %5081 = vmatmul.bf16.vlgmr.msrb.gmra.mxu1 %v11743_v6  ;;  %v9790_v23 = vld [vmem:[%s15620_s1 + $0x2a4] sm:$0xf]  ;;  %v9529_v25 = vor.u32 %v10480_v63, %v9528_v62  ;;  %v9512_v27 = vld [vmem:[%s15620_s1 + $0x1800] sm:$0xf]  ;;  %v6525_v28 = vor.u32 %v9726_v3, %v6522_v10 }
  0xd0   :  { %5125 = vmatpush.bf16.msra.mxu1 %v6557_v41  ;;  %5094 = vmatmul.bf16.vlgmr.msrb.gmra.mxu2 %v11741_v5  ;;  %v6778_v24 = vld [vmem:[%s15620_s1 + $0x2b0] sm:$0xf0]  ;;  %v6653_v29 = vor.u32 %v9758_v11, %v6650_v19  ;;  %v10476_v30 = vld [vmem:[%s15620_s1 + $0x180c] sm:$0xf0]  ;;  %v9722_v31 = vld [vmem:[%s15620_s1 + $0x84] sm:$0xf] }
  0xd1   :  { %5138 = vmatpush.bf16.msra.mxu2 %v6685_v42  ;;  %5107 = vmatmul.bf16.vlgmr.msrb.gmra.mxu3 %v11745_v7  ;;  %v6506_v33 = vld [vmem:[%s15620_s1 + $0x90] sm:$0xf0]  ;;  %v6781_v34 = vor.u32 %v9790_v23, %v6778_v24  ;;  %v9754_v35 = vld [vmem:[%s15620_s1 + $0x184] sm:$0xf]  ;;  %v9513_v41 = vor.u32 %v10476_v30, %v9512_v27  ;;  %v4861_v42 = vpop.f32.mrf.mxu0  ;;  %v4887_v10 = vpop.f32.mrf.mxu2 }
  0xd2   :  { %5151 = vmatpush.bf16.msra.mxu3 %v6813_v50  ;;  %v6634_v36 = vld [vmem:[%s15620_s1 + $0x190] sm:$0xf0]  ;;  %v9786_v37 = vld [vmem:[%s15620_s1 + $0x284] sm:$0xf]  ;;  %v6509_v43 = vor.u32 %v9722_v31, %v6506_v33  ;;  %v4862_v51 = vadd.f32 %v4861_v42, %v11840_v32 }
  0xd3   :  { %5117 = vmatpush.bf16.msra.mxu0 %v9545_v57  ;;  %v6762_v38 = vld [vmem:[%s15620_s1 + $0x290] sm:$0xf0]  ;;  %v9830_v39 = vld [vmem:[%s15620_s1 + $0x3e4] sm:$0xf]  ;;  %v6637_v44 = vor.u32 %v9754_v35, %v6634_v36 }
  0xd4   :  { %5126 = vmatpush.bf16.msra.mxu1 %v6541_v59  ;;  %v6938_v40 = vld [vmem:[%s15620_s1 + $0x3f0] sm:$0xf0]  ;;  %v9718_v45 = vld [vmem:[%s15620_s1 + $0x64] sm:$0xf]  ;;  %v6765_v53 = vor.u32 %v9786_v37, %v6762_v38 }
  0xd5   :  { %5139 = vmatpush.bf16.msra.mxu2 %v6669_v61  ;;  %v6490_v50 = vld [vmem:[%s15620_s1 + $0x70] sm:$0xf0]  ;;  %v6941_v54 = vor.u32 %v9830_v39, %v6938_v40  ;;  %v9750_v55 = vld [vmem:[%s15620_s1 + $0x164] sm:$0xf]  ;;  %v4875_v61 = vadd.f32 %v4874_v52, %v4862_v51  ;;  %v4876_v40 = vpop.f32.mrf.mxu1 }
  0xd6   :  { %5152 = vmatpush.bf16.msra.mxu3 %v6797_v8  ;;  %v6618_v56 = vld [vmem:[%s15620_s1 + $0x170] sm:$0xf0]  ;;  %v9782_v57 = vld [vmem:[%s15620_s1 + $0x264] sm:$0xf]  ;;  %v6493_v62 = vor.u32 %v9718_v45, %v6490_v50 }
  0xd7   :  { %5118 = vmatpush.bf16.msra.mxu0 %v9529_v25  ;;  %v6746_v32 = vld [vmem:[%s15620_s1 + $0x270] sm:$0xf0]  ;;  %v9826_v58 = vld [vmem:[%s15620_s1 + $0x3c4] sm:$0xf]  ;;  %v6621_v63 = vor.u32 %v9750_v55, %v6618_v56  ;;  %v4888_v27 = vadd.f32 %v4887_v10, %v4875_v61 }
  0xd8   :  { %5127 = vmatpush.bf16.msra.mxu1 %v6525_v28  ;;  %v6922_v59 = vld [vmem:[%s15620_s1 + $0x3d0] sm:$0xf0]  ;;  %v9714_v3 = vld [vmem:[%s15620_s1 + $0x44] sm:$0xf]  ;;  %v6749_v11 = vor.u32 %v9782_v57, %v6746_v32  ;;  %v4900_v28 = vpop.f32.mrf.mxu3 }
  0xd9   :  { %5140 = vmatpush.bf16.msra.mxu2 %v6653_v29  ;;  %v6474_v8 = vld [vmem:[%s15620_s1 + $0x50] sm:$0xf0]  ;;  %v6925_v19 = vor.u32 %v9826_v58, %v6922_v59  ;;  %v9746_v23 = vld [vmem:[%s15620_s1 + $0x144] sm:$0xf]  ;;  %v4863_v35 = vpop.f32.mrf.mxu0  ;;  %v4889_v32 = vpop.f32.mrf.mxu2 }
  0xda   :  { %5153 = vmatpush.bf16.msra.mxu3 %v6781_v34  ;;  %v6602_v24 = vld [vmem:[%s15620_s1 + $0x150] sm:$0xf0]  ;;  %v9778_v25 = vld [vmem:[%s15620_s1 + $0x244] sm:$0xf]  ;;  %v11979_v34 = vadd.f32 %v4900_v28, %v4888_v27  ;;  %v6477_v36 = vor.u32 %v9714_v3, %v6474_v8 }
  0xdb   :  { %5119 = vmatpush.bf16.msra.mxu0 %v9513_v41  ;;  %v6730_v29 = vld [vmem:[%s15620_s1 + $0x250] sm:$0xf0]  ;;  %v9822_v30 = vld [vmem:[%s15620_s1 + $0x3a4] sm:$0xf]  ;;  %v6605_v37 = vor.u32 %v9746_v23, %v6602_v24 }
  0xdc   :  { %5128 = vmatpush.bf16.msra.mxu1 %v6509_v43  ;;  %v6906_v31 = vld [vmem:[%s15620_s1 + $0x3b0] sm:$0xf0]  ;;  %v852_v33 = vld [vmem:[#allocation1] sm:$0xff]  ;;  %v6733_v41 = vor.u32 %v9778_v25, %v6730_v29 }
  0xdd   :  { %5141 = vmatpush.bf16.msra.mxu2 %v6637_v44  ;;  %v9710_v38 = vld [vmem:[%s15620_s1 + $0x24] sm:$0xf]  ;;  %v6458_v39 = vld [vmem:[%s15620_s1 + $0x30] sm:$0xf0]  ;;  %v6909_v42 = vor.u32 %v9822_v30, %v6906_v31 }
  0xde   :  { %5154 = vmatpush.bf16.msra.mxu3 %v6765_v53  ;;  %v9742_v43 = vld [vmem:[%s15620_s1 + $0x124] sm:$0xf]  ;;  %v6586_v44 = vld [vmem:[%s15620_s1 + $0x130] sm:$0xf0]  ;;  %9574 = vmatmul.msk.bf16.vlgmr.msra.gmra.mxu0 %vm4797_vm0, %v852_v33  ;;  %v6461_v53 = vor.u32 %v9710_v38, %v6458_v39 }
  0xdf   :  { %5164 = vmatpush.bf16.msrb.mxu0 %v6941_v54  ;;  %v9774_v45 = vld [vmem:[%s15620_s1 + $0x224] sm:$0xf]  ;;  %v6714_v50 = vld [vmem:[%s15620_s1 + $0x230] sm:$0xf0]  ;;  %v6589_v54 = vor.u32 %v9742_v43, %v6586_v44 }
  0xe0   :  { %5129 = vmatpush.bf16.msra.mxu1 %v6493_v62  ;;  %v9818_v51 = vld [vmem:[%s15620_s1 + $0x384] sm:$0xf]  ;;  %v6890_v52 = vld [vmem:[%s15620_s1 + $0x390] sm:$0xf0]  ;;  %v6717_v58 = vor.u32 %v9774_v45, %v6714_v50  ;;  %v4902_v3 = vpop.f32.mrf.mxu3 }
  0xe1   :  { %5142 = vmatpush.bf16.msra.mxu2 %v6621_v63  ;;  %v9706_v55 = vld [vmem:[%s15620_s1 + $0x4] sm:$0xf]  ;;  %v6442_v56 = vld [vmem:[%s15620_s1 + $0x10] sm:$0xf0]  ;;  %v6893_v59 = vor.u32 %v9818_v51, %v6890_v52 }
  0xe2   :  { %5155 = vmatpush.bf16.msra.mxu3 %v6749_v11  ;;  %v9738_v57 = vld [vmem:[%s15620_s1 + $0x104] sm:$0xf]  ;;  %v6570_v61 = vld [vmem:[%s15620_s1 + $0x110] sm:$0xf0]  ;;  %v6445_v25 = vor.u32 %v9706_v55, %v6442_v56 }
  0xe3   :  { %5165 = vmatpush.bf16.msrb.mxu0 %v6925_v19  ;;  %v9770_v62 = vld [vmem:[%s15620_s1 + $0x204] sm:$0xf]  ;;  %v6698_v63 = vld [vmem:[%s15620_s1 + $0x210] sm:$0xf0]  ;;  %v6573_v27 = vor.u32 %v9738_v57, %v6570_v61 }
  0xe4   :  { %5130 = vmatpush.bf16.msra.mxu1 %v6477_v36  ;;  %v9814_v8 = vld [vmem:[%s15620_s1 + $0x364] sm:$0xf]  ;;  %v6874_v10 = vld [vmem:[%s15620_s1 + $0x370] sm:$0xf0]  ;;  %v6701_v30 = vor.u32 %v9770_v62, %v6698_v63 }
  0xe5   :  { %5143 = vmatpush.bf16.msra.mxu2 %v6605_v37  ;;  %v9862_v11 = vld [vmem:[%s15620_s1 + $0x4e4] sm:$0xf]  ;;  %v7066_v19 = vld [vmem:[%s15620_s1 + $0x4f0] sm:$0xf0]  ;;  %v6877_v31 = vor.u32 %v9814_v8, %v6874_v10 }
  0xe6   :  { %5156 = vmatpush.bf16.msra.mxu3 %v6733_v41  ;;  %v9894_v23 = vld [vmem:[%s15620_s1 + $0x5e4] sm:$0xf]  ;;  %v7194_v24 = vld [vmem:[%s15620_s1 + $0x5f0] sm:$0xf0]  ;;  %v7069_v33 = vor.u32 %v9862_v11, %v7066_v19 }
  0xe7   :  { %5166 = vmatpush.bf16.msrb.mxu0 %v6909_v42  ;;  %v9926_v28 = vld [vmem:[%s15620_s1 + $0x6e4] sm:$0xf]  ;;  %v7322_v29 = vld [vmem:[%s15620_s1 + $0x6f0] sm:$0xf0]  ;;  %v7197_v35 = vor.u32 %v9894_v23, %v7194_v24 }
  0xe8   :  { %5131 = vmatpush.bf16.msra.mxu1 %v6461_v53  ;;  %v9810_v36 = vld [vmem:[%s15620_s1 + $0x344] sm:$0xf]  ;;  %v6858_v37 = vld [vmem:[%s15620_s1 + $0x350] sm:$0xf0]  ;;  %v7325_v39 = vor.u32 %v9926_v28, %v7322_v29 }
  0xe9   :  { %5144 = vmatpush.bf16.msra.mxu2 %v6589_v54  ;;  %v9858_v38 = vld [vmem:[%s15620_s1 + $0x4c4] sm:$0xf]  ;;  %v7050_v40 = vld [vmem:[%s15620_s1 + $0x4d0] sm:$0xf0]  ;;  %v6861_v45 = vor.u32 %v9810_v36, %v6858_v37 }
  0xea   :  { %5157 = vmatpush.bf16.msra.mxu3 %v6717_v58  ;;  %v9890_v41 = vld [vmem:[%s15620_s1 + $0x5c4] sm:$0xf]  ;;  %v7178_v42 = vld [vmem:[%s15620_s1 + $0x5d0] sm:$0xf0]  ;;  %v7053_v50 = vor.u32 %v9858_v38, %v7050_v40 }
  0xeb   :  { %5167 = vmatpush.bf16.msrb.mxu0 %v6893_v59  ;;  %v9922_v43 = vld [vmem:[%s15620_s1 + $0x6c4] sm:$0xf]  ;;  %v7306_v44 = vld [vmem:[%s15620_s1 + $0x6d0] sm:$0xf0]  ;;  %v7181_v51 = vor.u32 %v9890_v41, %v7178_v42 }
  0xec   :  { %5132 = vmatpush.bf16.msra.mxu1 %v6445_v25  ;;  %v9806_v52 = vld [vmem:[%s15620_s1 + $0x324] sm:$0xf]  ;;  %v6842_v53 = vld [vmem:[%s15620_s1 + $0x330] sm:$0xf0]  ;;  %v7309_v55 = vor.u32 %v9922_v43, %v7306_v44 }
  0xed   :  { %5145 = vmatpush.bf16.msra.mxu2 %v6573_v27  ;;  %v9854_v54 = vld [vmem:[%s15620_s1 + $0x4a4] sm:$0xf]  ;;  %v7034_v56 = vld [vmem:[%s15620_s1 + $0x4b0] sm:$0xf0]  ;;  %v6845_v61 = vor.u32 %v9806_v52, %v6842_v53  ;;  %v4913_v27 = vpop.f32.mrf.mxu0 }
  0xee   :  { %5158 = vmatpush.bf16.msra.mxu3 %v6701_v30  ;;  %v9886_v57 = vld [vmem:[%s15620_s1 + $0x5a4] sm:$0xf]  ;;  %v7162_v32 = vld [vmem:[%s15620_s1 + $0x5b0] sm:$0xf0]  ;;  %v7037_v63 = vor.u32 %v9854_v54, %v7034_v56 }
  0xef   :  { %5168 = vmatpush.bf16.msrb.mxu0 %v6877_v31  ;;  %v9918_v58 = vld [vmem:[%s15620_s1 + $0x6a4] sm:$0xf]  ;;  %v7290_v59 = vld [vmem:[%s15620_s1 + $0x6b0] sm:$0xf0]  ;;  %5133 = vmatmul.bf16.vlgmr.msra.gmra.mxu1 %v10892_v21  ;;  %v7165_v3 = vor.u32 %v9886_v57, %v7162_v32  ;;  %v4914_v31 = vadd.f32 %v4913_v27, %v11979_v34  ;;  %v4939_v57 = vpop.f32.mrf.mxu2 }
  0xf0   :  { %5177 = vmatpush.bf16.msrb.mxu1 %v7069_v33  ;;  %5146 = vmatmul.bf16.vlgmr.msra.gmra.mxu2 %v10903_v26  ;;  %v9802_v62 = vld [vmem:[%s15620_s1 + $0x304] sm:$0xf]  ;;  %v6826_v8 = vld [vmem:[%s15620_s1 + $0x310] sm:$0xf0]  ;;  %v7293_v19 = vor.u32 %v9918_v58, %v7290_v59 }
  0xf1   :  { %5190 = vmatpush.bf16.msrb.mxu2 %v7197_v35  ;;  %5159 = vmatmul.bf16.vlgmr.msra.gmra.mxu3 %v10890_v20  ;;  %v9850_v10 = vld [vmem:[%s15620_s1 + $0x484] sm:$0xf]  ;;  %v7018_v11 = vld [vmem:[%s15620_s1 + $0x490] sm:$0xf0]  ;;  %v6829_v33 = vor.u32 %v9802_v62, %v6826_v8  ;;  %v4926_v35 = vpop.f32.mrf.mxu1 }
  0xf2   :  { %5203 = vmatpush.bf16.msrb.mxu3 %v7325_v39  ;;  %v9882_v23 = vld [vmem:[%s15620_s1 + $0x584] sm:$0xf]  ;;  %v7146_v24 = vld [vmem:[%s15620_s1 + $0x590] sm:$0xf0]  ;;  %v7021_v36 = vor.u32 %v9850_v10, %v7018_v11  ;;  %v4927_v41 = vadd.f32 %v4926_v35, %v4914_v31 }
  0xf3   :  { %5169 = vmatpush.bf16.msrb.mxu0 %v6861_v45  ;;  %v9914_v25 = vld [vmem:[%s15620_s1 + $0x684] sm:$0xf]  ;;  %v7274_v28 = vld [vmem:[%s15620_s1 + $0x690] sm:$0xf0]  ;;  %v7149_v37 = vor.u32 %v9882_v23, %v7146_v24 }
  0xf4   :  { %5178 = vmatpush.bf16.msrb.mxu1 %v7053_v50  ;;  %v9958_v29 = vld [vmem:[%s15620_s1 + $0x7e4] sm:$0xf]  ;;  %v7450_v30 = vld [vmem:[%s15620_s1 + $0x7f0] sm:$0xf0]  ;;  %v7277_v40 = vor.u32 %v9914_v25, %v7274_v28  ;;  %v4940_v62 = vadd.f32 %v4939_v57, %v4927_v41 }
  0xf5   :  { %5191 = vmatpush.bf16.msrb.mxu2 %v7181_v51  ;;  %v9846_v38 = vld [vmem:[%s15620_s1 + $0x464] sm:$0xf]  ;;  %v7002_v39 = vld [vmem:[%s15620_s1 + $0x470] sm:$0xf0]  ;;  %v7453_v42 = vor.u32 %v9958_v29, %v7450_v30  ;;  %v4915_v11 = vpop.f32.mrf.mxu0 }
  0xf6   :  { %5204 = vmatpush.bf16.msrb.mxu3 %v7309_v55  ;;  %v9878_v34 = vld [vmem:[%s15620_s1 + $0x564] sm:$0xf]  ;;  %v7130_v43 = vld [vmem:[%s15620_s1 + $0x570] sm:$0xf0]  ;;  %v7005_v52 = vor.u32 %v9846_v38, %v7002_v39 }
  0xf7   :  { %5170 = vmatpush.bf16.msrb.mxu0 %v6845_v61  ;;  %v9910_v44 = vld [vmem:[%s15620_s1 + $0x664] sm:$0xf]  ;;  %v7258_v45 = vld [vmem:[%s15620_s1 + $0x670] sm:$0xf0]  ;;  %v7133_v53 = vor.u32 %v9878_v34, %v7130_v43 }
  0xf8   :  { %5179 = vmatpush.bf16.msrb.mxu1 %v7037_v63  ;;  %v9954_v50 = vld [vmem:[%s15620_s1 + $0x7c4] sm:$0xf]  ;;  %v7434_v51 = vld [vmem:[%s15620_s1 + $0x7d0] sm:$0xf0]  ;;  %v7261_v56 = vor.u32 %v9910_v44, %v7258_v45  ;;  %v4952_v63 = vpop.f32.mrf.mxu3 }
  0xf9   :  { %5192 = vmatpush.bf16.msrb.mxu2 %v7165_v3  ;;  %v9842_v54 = vld [vmem:[%s15620_s1 + $0x444] sm:$0xf]  ;;  %v6986_v55 = vld [vmem:[%s15620_s1 + $0x450] sm:$0xf0]  ;;  %v7437_v32 = vor.u32 %v9954_v50, %v7434_v51  ;;  %v12179_v23 = vadd.f32 %v4952_v63, %v4940_v62 }
  0xfa   :  { %5205 = vmatpush.bf16.msrb.mxu3 %v7293_v19  ;;  %v9874_v58 = vld [vmem:[%s15620_s1 + $0x544] sm:$0xf]  ;;  %v7114_v59 = vld [vmem:[%s15620_s1 + $0x550] sm:$0xf0]  ;;  %v4928_v19 = vpop.f32.mrf.mxu1  ;;  %v6989_v24 = vor.u32 %v9842_v54, %v6986_v55 }
  0xfb   :  { %5171 = vmatpush.bf16.msrb.mxu0 %v6829_v33  ;;  %v9906_v61 = vld [vmem:[%s15620_s1 + $0x644] sm:$0xf]  ;;  %v7242_v3 = vld [vmem:[%s15620_s1 + $0x650] sm:$0xf0]  ;;  %v7117_v25 = vor.u32 %v9874_v58, %v7114_v59 }
  0xfc   :  { %5180 = vmatpush.bf16.msrb.mxu1 %v7021_v36  ;;  %v9950_v8 = vld [vmem:[%s15620_s1 + $0x7a4] sm:$0xf]  ;;  %v7418_v10 = vld [vmem:[%s15620_s1 + $0x7b0] sm:$0xf0]  ;;  %v7245_v29 = vor.u32 %v9906_v61, %v7242_v3 }
  0xfd   :  { %5193 = vmatpush.bf16.msrb.mxu2 %v7149_v37  ;;  %v9838_v27 = vld [vmem:[%s15620_s1 + $0x424] sm:$0xf]  ;;  %v6970_v28 = vld [vmem:[%s15620_s1 + $0x430] sm:$0xf0]  ;;  %v7421_v30 = vor.u32 %v9950_v8, %v7418_v10 }
  0xfe   :  { %5206 = vmatpush.bf16.msrb.mxu3 %v7277_v40  ;;  %5172 = vmatmul.bf16.vlgmr.msrb.gmra.mxu0 %v10894_v22  ;;  %v9870_v31 = vld [vmem:[%s15620_s1 + $0x524] sm:$0xf]  ;;  %v7098_v33 = vld [vmem:[%s15620_s1 + $0x530] sm:$0xf0]  ;;  %v6973_v39 = vor.u32 %v9838_v27, %v6970_v28 }
  0xff   :  { %5216 = vmatpush.bf16.msra.mxu0 %v7453_v42  ;;  %v9902_v35 = vld [vmem:[%s15620_s1 + $0x624] sm:$0xf]  ;;  %v7226_v36 = vld [vmem:[%s15620_s1 + $0x630] sm:$0xf0]  ;;  %v7101_v40 = vor.u32 %v9870_v31, %v7098_v33 }
 0x100   :  { %5181 = vmatpush.bf16.msrb.mxu1 %v7005_v52  ;;  %v9946_v37 = vld [vmem:[%s15620_s1 + $0x784] sm:$0xf]  ;;  %v7402_v38 = vld [vmem:[%s15620_s1 + $0x790] sm:$0xf0]  ;;  %v7229_v43 = vor.u32 %v9902_v35, %v7226_v36  ;;  %v4941_v52 = vpop.f32.mrf.mxu2 }
 0x101   :  { %5194 = vmatpush.bf16.msrb.mxu2 %v7133_v53  ;;  %v9834_v41 = vld [vmem:[%s15620_s1 + $0x404] sm:$0xf]  ;;  %v6954_v42 = vld [vmem:[%s15620_s1 + $0x410] sm:$0xf0]  ;;  %v7405_v44 = vor.u32 %v9946_v37, %v7402_v38 }
 0x102   :  { %5207 = vmatpush.bf16.msrb.mxu3 %v7261_v56  ;;  %v9866_v34 = vld [vmem:[%s15620_s1 + $0x504] sm:$0xf]  ;;  %v7082_v45 = vld [vmem:[%s15620_s1 + $0x510] sm:$0xf0]  ;;  %v4954_v56 = vpop.f32.mrf.mxu3  ;;  %v6957_v59 = vor.u32 %v9834_v41, %v6954_v42 }
 0x103   :  { %5217 = vmatpush.bf16.msra.mxu0 %v7437_v32  ;;  %v9898_v50 = vld [vmem:[%s15620_s1 + $0x604] sm:$0xf]  ;;  %v7210_v51 = vld [vmem:[%s15620_s1 + $0x610] sm:$0xf0]  ;;  %v7085_v61 = vor.u32 %v9866_v34, %v7082_v45 }
 0x104   :  { %5182 = vmatpush.bf16.msrb.mxu1 %v6989_v24  ;;  %v9942_v53 = vld [vmem:[%s15620_s1 + $0x764] sm:$0xf]  ;;  %v7386_v54 = vld [vmem:[%s15620_s1 + $0x770] sm:$0xf0]  ;;  %v7213_v3 = vor.u32 %v9898_v50, %v7210_v51 }
 0x105   :  { %5195 = vmatpush.bf16.msrb.mxu2 %v7117_v25  ;;  %v9990_v55 = vld [vmem:[%s15620_s1 + $0x8e4] sm:$0xf]  ;;  %v7578_v57 = vld [vmem:[%s15620_s1 + $0x8f0] sm:$0xf0]  ;;  %v7389_v8 = vor.u32 %v9942_v53, %v7386_v54 }
 0x106   :  { %5208 = vmatpush.bf16.msrb.mxu3 %v7245_v29  ;;  %v10022_v32 = vld [vmem:[%s15620_s1 + $0x9e4] sm:$0xf]  ;;  %v7706_v58 = vld [vmem:[%s15620_s1 + $0x9f0] sm:$0xf0]  ;;  %v7581_v10 = vor.u32 %v9990_v55, %v7578_v57 }
 0x107   :  { %5218 = vmatpush.bf16.msra.mxu0 %v7421_v30  ;;  %v10054_v62 = vld [vmem:[%s15620_s1 + $0xae4] sm:$0xf]  ;;  %v7834_v63 = vld [vmem:[%s15620_s1 + $0xaf0] sm:$0xf0]  ;;  %v7709_v11 = vor.u32 %v10022_v32, %v7706_v58 }
 0x108   :  { %5183 = vmatpush.bf16.msrb.mxu1 %v6973_v39  ;;  %v9938_v19 = vld [vmem:[%s15620_s1 + $0x744] sm:$0xf]  ;;  %v7370_v24 = vld [vmem:[%s15620_s1 + $0x750] sm:$0xf0]  ;;  %v7837_v27 = vor.u32 %v10054_v62, %v7834_v63 }
 0x109   :  { %5196 = vmatpush.bf16.msrb.mxu2 %v7101_v40  ;;  %v9986_v25 = vld [vmem:[%s15620_s1 + $0x8c4] sm:$0xf]  ;;  %v7562_v28 = vld [vmem:[%s15620_s1 + $0x8d0] sm:$0xf0]  ;;  %v7373_v35 = vor.u32 %v9938_v19, %v7370_v24 }
 0x10a   :  { %5209 = vmatpush.bf16.msrb.mxu3 %v7229_v43  ;;  %v10018_v29 = vld [vmem:[%s15620_s1 + $0x9c4] sm:$0xf]  ;;  %v7690_v30 = vld [vmem:[%s15620_s1 + $0x9d0] sm:$0xf0]  ;;  %v7565_v36 = vor.u32 %v9986_v25, %v7562_v28 }
 0x10b   :  { %5219 = vmatpush.bf16.msra.mxu0 %v7405_v44  ;;  %v10050_v31 = vld [vmem:[%s15620_s1 + $0xac4] sm:$0xf]  ;;  %v7818_v33 = vld [vmem:[%s15620_s1 + $0xad0] sm:$0xf0]  ;;  %v7693_v37 = vor.u32 %v10018_v29, %v7690_v30 }
 0x10c   :  { %5184 = vmatpush.bf16.msrb.mxu1 %v6957_v59  ;;  %v9934_v38 = vld [vmem:[%s15620_s1 + $0x724] sm:$0xf]  ;;  %v7354_v39 = vld [vmem:[%s15620_s1 + $0x730] sm:$0xf0]  ;;  %v7821_v41 = vor.u32 %v10050_v31, %v7818_v33 }
 0x10d   :  { %5197 = vmatpush.bf16.msrb.mxu2 %v7085_v61  ;;  %v9982_v40 = vld [vmem:[%s15620_s1 + $0x8a4] sm:$0xf]  ;;  %v7546_v42 = vld [vmem:[%s15620_s1 + $0x8b0] sm:$0xf0]  ;;  %v7357_v50 = vor.u32 %v9934_v38, %v7354_v39  ;;  %v4965_v61 = vpop.f32.mrf.mxu0 }
 0x10e   :  { %5210 = vmatpush.bf16.msrb.mxu3 %v7213_v3  ;;  %v10014_v34 = vld [vmem:[%s15620_s1 + $0x9a4] sm:$0xf]  ;;  %v7674_v43 = vld [vmem:[%s15620_s1 + $0x9b0] sm:$0xf0]  ;;  %v7549_v52 = vor.u32 %v9982_v40, %v7546_v42 }
 0x10f   :  { %5220 = vmatpush.bf16.msra.mxu0 %v7389_v8  ;;  %v10046_v44 = vld [vmem:[%s15620_s1 + $0xaa4] sm:$0xf]  ;;  %v7802_v45 = vld [vmem:[%s15620_s1 + $0xab0] sm:$0xf0]  ;;  %5185 = vmatmul.bf16.vlgmr.msrb.gmra.mxu1 %v10985_v0  ;;  %v7677_v53 = vor.u32 %v10014_v34, %v7674_v43  ;;  %v4966_v8 = vadd.f32 %v4965_v61, %v12179_v23 }
 0x110   :  { %5229 = vmatpush.bf16.msra.mxu1 %v7581_v10  ;;  %5198 = vmatmul.bf16.vlgmr.msrb.gmra.mxu2 %v10989_v2  ;;  %v9930_v51 = vld [vmem:[%s15620_s1 + $0x704] sm:$0xf]  ;;  %v7338_v54 = vld [vmem:[%s15620_s1 + $0x710] sm:$0xf0]  ;;  %v7805_v57 = vor.u32 %v10046_v44, %v7802_v45 }
 0x111   :  { %5242 = vmatpush.bf16.msra.mxu2 %v7709_v11  ;;  %5211 = vmatmul.bf16.vlgmr.msrb.gmra.mxu3 %v10980_v60  ;;  %v9978_v55 = vld [vmem:[%s15620_s1 + $0x884] sm:$0xf]  ;;  %v7530_v56 = vld [vmem:[%s15620_s1 + $0x890] sm:$0xf0]  ;;  %v7341_v10 = vor.u32 %v9930_v51, %v7338_v54  ;;  %v4978_v11 = vpop.f32.mrf.mxu1 }
 0x112   :  { %5255 = vmatpush.bf16.msra.mxu3 %v7837_v27  ;;  %v10010_v32 = vld [vmem:[%s15620_s1 + $0x984] sm:$0xf]  ;;  %v7658_v58 = vld [vmem:[%s15620_s1 + $0x990] sm:$0xf0]  ;;  %v7533_v19 = vor.u32 %v9978_v55, %v7530_v56  ;;  %v4979_v29 = vadd.f32 %v4978_v11, %v4966_v8 }
 0x113   :  { %5221 = vmatpush.bf16.msra.mxu0 %v7373_v35  ;;  %v10042_v59 = vld [vmem:[%s15620_s1 + $0xa84] sm:$0xf]  ;;  %v7786_v62 = vld [vmem:[%s15620_s1 + $0xa90] sm:$0xf0]  ;;  %v7661_v24 = vor.u32 %v10010_v32, %v7658_v58 }
 0x114   :  { %5230 = vmatpush.bf16.msra.mxu1 %v7565_v36  ;;  %v10086_v63 = vld [vmem:[%s15620_s1 + $0xbe4] sm:$0xf]  ;;  %v7962_v3 = vld [vmem:[%s15620_s1 + $0xbf0] sm:$0xf0]  ;;  %v7789_v28 = vor.u32 %v10042_v59, %v7786_v62  ;;  %v4991_v34 = vpop.f32.mrf.mxu2 }
 0x115   :  { %5243 = vmatpush.bf16.msra.mxu2 %v7693_v37  ;;  %v9974_v25 = vld [vmem:[%s15620_s1 + $0x864] sm:$0xf]  ;;  %v7514_v27 = vld [vmem:[%s15620_s1 + $0x870] sm:$0xf0]  ;;  %v7965_v30 = vor.u32 %v10086_v63, %v7962_v3  ;;  %v4992_v51 = vadd.f32 %v4991_v34, %v4979_v29  ;;  %v4967_v56 = vpop.f32.mrf.mxu0 }
 0x116   :  { %5256 = vmatpush.bf16.msra.mxu3 %v7821_v41  ;;  %v10006_v23 = vld [vmem:[%s15620_s1 + $0x964] sm:$0xf]  ;;  %v7642_v31 = vld [vmem:[%s15620_s1 + $0x970] sm:$0xf0]  ;;  %v7517_v38 = vor.u32 %v9974_v25, %v7514_v27 }
 0x117   :  { %5222 = vmatpush.bf16.msra.mxu0 %v7357_v50  ;;  %v10038_v33 = vld [vmem:[%s15620_s1 + $0xa64] sm:$0xf]  ;;  %v7770_v35 = vld [vmem:[%s15620_s1 + $0xa70] sm:$0xf0]  ;;  %v7645_v39 = vor.u32 %v10006_v23, %v7642_v31 }
 0x118   :  { %5231 = vmatpush.bf16.msra.mxu1 %v7549_v52  ;;  %v10082_v36 = vld [vmem:[%s15620_s1 + $0xbc4] sm:$0xf]  ;;  %v7946_v37 = vld [vmem:[%s15620_s1 + $0xbd0] sm:$0xf0]  ;;  %v7773_v42 = vor.u32 %v10038_v33, %v7770_v35  ;;  %v5004_v52 = vpop.f32.mrf.mxu3 }
 0x119   :  { %5244 = vmatpush.bf16.msra.mxu2 %v7677_v53  ;;  %v9970_v40 = vld [vmem:[%s15620_s1 + $0x844] sm:$0xf]  ;;  %v7498_v41 = vld [vmem:[%s15620_s1 + $0x850] sm:$0xf0]  ;;  %v7949_v43 = vor.u32 %v10082_v36, %v7946_v37  ;;  %v12378_v32 = vadd.f32 %v5004_v52, %v4992_v51 }
 0x11a   :  { %5257 = vmatpush.bf16.msra.mxu3 %v7805_v57  ;;  %v10002_v44 = vld [vmem:[%s15620_s1 + $0x944] sm:$0xf]  ;;  %v7626_v45 = vld [vmem:[%s15620_s1 + $0x950] sm:$0xf0]  ;;  %v4980_v57 = vpop.f32.mrf.mxu1  ;;  %v7501_v58 = vor.u32 %v9970_v40, %v7498_v41 }
 0x11b   :  { %5223 = vmatpush.bf16.msra.mxu0 %v7341_v10  ;;  %v10034_v50 = vld [vmem:[%s15620_s1 + $0xa44] sm:$0xf]  ;;  %v7754_v53 = vld [vmem:[%s15620_s1 + $0xa50] sm:$0xf0]  ;;  %v7629_v59 = vor.u32 %v10002_v44, %v7626_v45 }
 0x11c   :  { %5232 = vmatpush.bf16.msra.mxu1 %v7533_v19  ;;  %v10078_v54 = vld [vmem:[%s15620_s1 + $0xba4] sm:$0xf]  ;;  %v7930_v55 = vld [vmem:[%s15620_s1 + $0xbb0] sm:$0xf0]  ;;  %v7757_v63 = vor.u32 %v10034_v50, %v7754_v53 }
 0x11d   :  { %5245 = vmatpush.bf16.msra.mxu2 %v7661_v24  ;;  %v9966_v61 = vld [vmem:[%s15620_s1 + $0x824] sm:$0xf]  ;;  %v7482_v62 = vld [vmem:[%s15620_s1 + $0x830] sm:$0xf0]  ;;  %v7933_v3 = vor.u32 %v10078_v54, %v7930_v55 }
 0x11e   :  { %5258 = vmatpush.bf16.msra.mxu3 %v7789_v28  ;;  %5224 = vmatmul.bf16.vlgmr.msra.gmra.mxu0 %v10987_v1  ;;  %v9998_v8 = vld [vmem:[%s15620_s1 + $0x924] sm:$0xf]  ;;  %v7610_v10 = vld [vmem:[%s15620_s1 + $0x930] sm:$0xf0]  ;;  %v7485_v27 = vor.u32 %v9966_v61, %v7482_v62 }
 0x11f   :  { %5268 = vmatpush.bf16.msrb.mxu0 %v7965_v30  ;;  %v10030_v11 = vld [vmem:[%s15620_s1 + $0xa24] sm:$0xf]  ;;  %v7738_v19 = vld [vmem:[%s15620_s1 + $0xa30] sm:$0xf0]  ;;  %v7613_v28 = vor.u32 %v9998_v8, %v7610_v10 }
 0x120   :  { %5233 = vmatpush.bf16.msra.mxu1 %v7517_v38  ;;  %v10074_v24 = vld [vmem:[%s15620_s1 + $0xb84] sm:$0xf]  ;;  %v7914_v25 = vld [vmem:[%s15620_s1 + $0xb90] sm:$0xf0]  ;;  %v7741_v31 = vor.u32 %v10030_v11, %v7738_v19  ;;  %v4993_v38 = vpop.f32.mrf.mxu2 }
 0x121   :  { %5246 = vmatpush.bf16.msra.mxu2 %v7645_v39  ;;  %v9962_v29 = vld [vmem:[%s15620_s1 + $0x804] sm:$0xf]  ;;  %v7466_v30 = vld [vmem:[%s15620_s1 + $0x810] sm:$0xf0]  ;;  %v7917_v33 = vor.u32 %v10074_v24, %v7914_v25 }
 0x122   :  { %5259 = vmatpush.bf16.msra.mxu3 %v7773_v42  ;;  %v9994_v23 = vld [vmem:[%s15620_s1 + $0x904] sm:$0xf]  ;;  %v7594_v35 = vld [vmem:[%s15620_s1 + $0x910] sm:$0xf0]  ;;  %v5006_v42 = vpop.f32.mrf.mxu3  ;;  %v7469_v45 = vor.u32 %v9962_v29, %v7466_v30 }
 0x123   :  { %5269 = vmatpush.bf16.msrb.mxu0 %v7949_v43  ;;  %v10026_v36 = vld [vmem:[%s15620_s1 + $0xa04] sm:$0xf]  ;;  %v7722_v37 = vld [vmem:[%s15620_s1 + $0xa10] sm:$0xf0]  ;;  %v7597_v50 = vor.u32 %v9994_v23, %v7594_v35 }
 0x124   :  { %5234 = vmatpush.bf16.msra.mxu1 %v7501_v58  ;;  %v10070_v39 = vld [vmem:[%s15620_s1 + $0xb64] sm:$0xf]  ;;  %v7898_v40 = vld [vmem:[%s15620_s1 + $0xb70] sm:$0xf0]  ;;  %v7725_v53 = vor.u32 %v10026_v36, %v7722_v37 }
 0x125   :  { %5247 = vmatpush.bf16.msra.mxu2 %v7629_v59  ;;  %v10118_v41 = vld [vmem:[%s15620_s1 + $0xce4] sm:$0xf]  ;;  %v8090_v34 = vld [vmem:[%s15620_s1 + $0xcf0] sm:$0xf0]  ;;  %v7901_v54 = vor.u32 %v10070_v39, %v7898_v40 }
 0x126   :  { %5260 = vmatpush.bf16.msra.mxu3 %v7757_v63  ;;  %v10150_v43 = vld [vmem:[%s15620_s1 + $0xde4] sm:$0xf]  ;;  %v8218_v44 = vld [vmem:[%s15620_s1 + $0xdf0] sm:$0xf0]  ;;  %v8093_v55 = vor.u32 %v10118_v41, %v8090_v34 }
 0x127   :  { %5270 = vmatpush.bf16.msrb.mxu0 %v7933_v3  ;;  %v10182_v51 = vld [vmem:[%s15620_s1 + $0xee4] sm:$0xf]  ;;  %v8346_v52 = vld [vmem:[%s15620_s1 + $0xef0] sm:$0xf0]  ;;  %v8221_v56 = vor.u32 %v10150_v43, %v8218_v44 }
 0x128   :  { %5235 = vmatpush.bf16.msra.mxu1 %v7485_v27  ;;  %v10066_v57 = vld [vmem:[%s15620_s1 + $0xb44] sm:$0xf]  ;;  %v7882_v58 = vld [vmem:[%s15620_s1 + $0xb50] sm:$0xf0]  ;;  %v8349_v61 = vor.u32 %v10182_v51, %v8346_v52 }
 0x129   :  { %5248 = vmatpush.bf16.msra.mxu2 %v7613_v28  ;;  %v10114_v59 = vld [vmem:[%s15620_s1 + $0xcc4] sm:$0xf]  ;;  %v8074_v62 = vld [vmem:[%s15620_s1 + $0xcd0] sm:$0xf0]  ;;  %v7885_v11 = vor.u32 %v10066_v57, %v7882_v58 }
 0x12a   :  { %5261 = vmatpush.bf16.msra.mxu3 %v7741_v31  ;;  %v10146_v63 = vld [vmem:[%s15620_s1 + $0xdc4] sm:$0xf]  ;;  %v8202_v3 = vld [vmem:[%s15620_s1 + $0xdd0] sm:$0xf0]  ;;  %v8077_v19 = vor.u32 %v10114_v59, %v8074_v62 }
 0x12b   :  { %5271 = vmatpush.bf16.msrb.mxu0 %v7917_v33  ;;  %v10178_v8 = vld [vmem:[%s15620_s1 + $0xec4] sm:$0xf]  ;;  %v8330_v10 = vld [vmem:[%s15620_s1 + $0xed0] sm:$0xf0]  ;;  %v8205_v24 = vor.u32 %v10146_v63, %v8202_v3 }
 0x12c   :  { %5236 = vmatpush.bf16.msra.mxu1 %v7469_v45  ;;  %v10062_v25 = vld [vmem:[%s15620_s1 + $0xb24] sm:$0xf]  ;;  %v7866_v27 = vld [vmem:[%s15620_s1 + $0xb30] sm:$0xf0]  ;;  %v8333_v29 = vor.u32 %v10178_v8, %v8330_v10 }
 0x12d   :  { %5249 = vmatpush.bf16.msra.mxu2 %v7597_v50  ;;  %v10110_v28 = vld [vmem:[%s15620_s1 + $0xca4] sm:$0xf]  ;;  %v8058_v30 = vld [vmem:[%s15620_s1 + $0xcb0] sm:$0xf0]  ;;  %v7869_v36 = vor.u32 %v10062_v25, %v7866_v27 }
 0x12e   :  { %5262 = vmatpush.bf16.msra.mxu3 %v7725_v53  ;;  %v10142_v23 = vld [vmem:[%s15620_s1 + $0xda4] sm:$0xf]  ;;  %v8186_v31 = vld [vmem:[%s15620_s1 + $0xdb0] sm:$0xf0]  ;;  %v8061_v38 = vor.u32 %v10110_v28, %v8058_v30  ;;  %v5017_v50 = vpop.f32.mrf.mxu0 }
 0x12f   :  { %5272 = vmatpush.bf16.msrb.mxu0 %v7901_v54  ;;  %5237 = vmatmul.bf16.vlgmr.msra.gmra.mxu1 %v11235_v12  ;;  %v10174_v33 = vld [vmem:[%s15620_s1 + $0xea4] sm:$0xf]  ;;  %v8314_v35 = vld [vmem:[%s15620_s1 + $0xeb0] sm:$0xf0]  ;;  %v8189_v39 = vor.u32 %v10142_v23, %v8186_v31  ;;  %v5018_v54 = vadd.f32 %v5017_v50, %v12378_v32 }
 0x130   :  { %5281 = vmatpush.bf16.msrb.mxu1 %v8093_v55  ;;  %5250 = vmatmul.bf16.vlgmr.msra.gmra.mxu2 %v11245_v16  ;;  %v10058_v37 = vld [vmem:[%s15620_s1 + $0xb04] sm:$0xf]  ;;  %v7850_v40 = vld [vmem:[%s15620_s1 + $0xb10] sm:$0xf0]  ;;  %v8317_v34 = vor.u32 %v10174_v33, %v8314_v35 }
 0x131   :  { %5294 = vmatpush.bf16.msrb.mxu2 %v8221_v56  ;;  %5263 = vmatmul.bf16.vlgmr.msra.gmra.mxu3 %v11243_v15  ;;  %v10106_v41 = vld [vmem:[%s15620_s1 + $0xc84] sm:$0xf]  ;;  %v8042_v42 = vld [vmem:[%s15620_s1 + $0xc90] sm:$0xf0]  ;;  %v7853_v55 = vor.u32 %v10058_v37, %v7850_v40  ;;  %v5030_v56 = vpop.f32.mrf.mxu1 }
 0x132   :  { %5307 = vmatpush.bf16.msrb.mxu3 %v8349_v61  ;;  %v10138_v43 = vld [vmem:[%s15620_s1 + $0xd84] sm:$0xf]  ;;  %v8170_v44 = vld [vmem:[%s15620_s1 + $0xd90] sm:$0xf0]  ;;  %v8045_v57 = vor.u32 %v10106_v41, %v8042_v42  ;;  %v5031_v63 = vadd.f32 %v5030_v56, %v5018_v54 }
 0x133   :  { %5273 = vmatpush.bf16.msrb.mxu0 %v7885_v11  ;;  %v10170_v45 = vld [vmem:[%s15620_s1 + $0xe84] sm:$0xf]  ;;  %v8298_v51 = vld [vmem:[%s15620_s1 + $0xe90] sm:$0xf0]  ;;  %v8173_v58 = vor.u32 %v10138_v43, %v8170_v44 }
 0x134   :  { %5282 = vmatpush.bf16.msrb.mxu1 %v8077_v19  ;;  %v10214_v52 = vld [vmem:[%s15620_s1 + $0xfe4] sm:$0xf]  ;;  %v8474_v53 = vld [vmem:[%s15620_s1 + $0xff0] sm:$0xf0]  ;;  %v8301_v62 = vor.u32 %v10170_v45, %v8298_v51 }
 0x135   :  { %5295 = vmatpush.bf16.msrb.mxu2 %v8205_v24  ;;  %v10102_v59 = vld [vmem:[%s15620_s1 + $0xc64] sm:$0xf]  ;;  %v8026_v61 = vld [vmem:[%s15620_s1 + $0xc70] sm:$0xf0]  ;;  %v8477_v3 = vor.u32 %v10214_v52, %v8474_v53  ;;  %v5043_v23 = vpop.f32.mrf.mxu2 }
 0x136   :  { %5308 = vmatpush.bf16.msrb.mxu3 %v8333_v29  ;;  %v10134_v32 = vld [vmem:[%s15620_s1 + $0xd64] sm:$0xf]  ;;  %v8154_v8 = vld [vmem:[%s15620_s1 + $0xd70] sm:$0xf0]  ;;  %v8029_v25 = vor.u32 %v10102_v59, %v8026_v61  ;;  %v5044_v37 = vadd.f32 %v5043_v23, %v5031_v63  ;;  %v5019_v42 = vpop.f32.mrf.mxu0 }
 0x137   :  { %5274 = vmatpush.bf16.msrb.mxu0 %v7869_v36  ;;  %v10166_v10 = vld [vmem:[%s15620_s1 + $0xe64] sm:$0xf]  ;;  %v8282_v11 = vld [vmem:[%s15620_s1 + $0xe70] sm:$0xf0]  ;;  %v8157_v27 = vor.u32 %v10134_v32, %v8154_v8 }
 0x138   :  { %5283 = vmatpush.bf16.msrb.mxu1 %v8061_v38  ;;  %v10210_v19 = vld [vmem:[%s15620_s1 + $0xfc4] sm:$0xf]  ;;  %v8458_v24 = vld [vmem:[%s15620_s1 + $0xfd0] sm:$0xf0]  ;;  %v8285_v30 = vor.u32 %v10166_v10, %v8282_v11  ;;  %v5056_v38 = vpop.f32.mrf.mxu3 }
 0x139   :  { %5296 = vmatpush.bf16.msrb.mxu2 %v8189_v39  ;;  %v10098_v28 = vld [vmem:[%s15620_s1 + $0xc44] sm:$0xf]  ;;  %v8010_v29 = vld [vmem:[%s15620_s1 + $0xc50] sm:$0xf0]  ;;  %v8461_v31 = vor.u32 %v10210_v19, %v8458_v24  ;;  %v12577_v43 = vadd.f32 %v5056_v38, %v5044_v37 }
 0x13a   :  { %5309 = vmatpush.bf16.msrb.mxu3 %v8317_v34  ;;  %v10130_v33 = vld [vmem:[%s15620_s1 + $0xd44] sm:$0xf]  ;;  %v8138_v35 = vld [vmem:[%s15620_s1 + $0xd50] sm:$0xf0]  ;;  %v5032_v34 = vpop.f32.mrf.mxu1  ;;  %v8013_v44 = vor.u32 %v10098_v28, %v8010_v29 }
 0x13b   :  { %5275 = vmatpush.bf16.msrb.mxu0 %v7853_v55  ;;  %v10162_v36 = vld [vmem:[%s15620_s1 + $0xe44] sm:$0xf]  ;;  %v8266_v39 = vld [vmem:[%s15620_s1 + $0xe50] sm:$0xf0]  ;;  %v8141_v45 = vor.u32 %v10130_v33, %v8138_v35 }
 0x13c   :  { %5284 = vmatpush.bf16.msrb.mxu1 %v8045_v57  ;;  %v10206_v40 = vld [vmem:[%s15620_s1 + $0xfa4] sm:$0xf]  ;;  %v8442_v41 = vld [vmem:[%s15620_s1 + $0xfb0] sm:$0xf0]  ;;  %v8269_v52 = vor.u32 %v10162_v36, %v8266_v39 }
 0x13d   :  { %5297 = vmatpush.bf16.msrb.mxu2 %v8173_v58  ;;  %v10094_v50 = vld [vmem:[%s15620_s1 + $0xc24] sm:$0xf]  ;;  %v7994_v51 = vld [vmem:[%s15620_s1 + $0xc30] sm:$0xf0]  ;;  %v8445_v53 = vor.u32 %v10206_v40, %v8442_v41 }
 0x13e   :  { %5310 = vmatpush.bf16.msrb.mxu3 %v8301_v62  ;;  %5276 = vmatmul.bf16.vlgmr.msrb.gmra.mxu0 %v11247_v17  ;;  %v10126_v54 = vld [vmem:[%s15620_s1 + $0xd24] sm:$0xf]  ;;  %v8122_v55 = vld [vmem:[%s15620_s1 + $0xd30] sm:$0xf0]  ;;  %v7997_v61 = vor.u32 %v10094_v50, %v7994_v51 }
 0x13f   :  { %5320 = vmatpush.bf16.msra.mxu0 %v8477_v3  ;;  %v10158_v56 = vld [vmem:[%s15620_s1 + $0xe24] sm:$0xf]  ;;  %v8250_v57 = vld [vmem:[%s15620_s1 + $0xe30] sm:$0xf0]  ;;  %v8125_v62 = vor.u32 %v10126_v54, %v8122_v55 }
 0x140   :  { %5285 = vmatpush.bf16.msrb.mxu1 %v8029_v25  ;;  %v10202_v58 = vld [vmem:[%s15620_s1 + $0xf84] sm:$0xf]  ;;  %v8426_v59 = vld [vmem:[%s15620_s1 + $0xf90] sm:$0xf0]  ;;  %v8253_v8 = vor.u32 %v10158_v56, %v8250_v57  ;;  %v5045_v25 = vpop.f32.mrf.mxu2 }
 0x141   :  { %5298 = vmatpush.bf16.msrb.mxu2 %v8157_v27  ;;  %v10090_v63 = vld [vmem:[%s15620_s1 + $0xc04] sm:$0xf]  ;;  %v7978_v3 = vld [vmem:[%s15620_s1 + $0xc10] sm:$0xf0]  ;;  %v8429_v10 = vor.u32 %v10202_v58, %v8426_v59 }
 0x142   :  { %5311 = vmatpush.bf16.msrb.mxu3 %v8285_v30  ;;  %v10122_v32 = vld [vmem:[%s15620_s1 + $0xd04] sm:$0xf]  ;;  %v8106_v11 = vld [vmem:[%s15620_s1 + $0xd10] sm:$0xf0]  ;;  %v5058_v30 = vpop.f32.mrf.mxu3  ;;  %v7981_v35 = vor.u32 %v10090_v63, %v7978_v3 }
 0x143   :  { %5321 = vmatpush.bf16.msra.mxu0 %v8461_v31  ;;  %v10154_v19 = vld [vmem:[%s15620_s1 + $0xe04] sm:$0xf]  ;;  %v8234_v24 = vld [vmem:[%s15620_s1 + $0xe10] sm:$0xf0]  ;;  %v8109_v36 = vor.u32 %v10122_v32, %v8106_v11 }
 0x144   :  { %5286 = vmatpush.bf16.msrb.mxu1 %v8013_v44  ;;  %v10198_v27 = vld [vmem:[%s15620_s1 + $0xf64] sm:$0xf]  ;;  %v8410_v28 = vld [vmem:[%s15620_s1 + $0xf70] sm:$0xf0]  ;;  %v8237_v39 = vor.u32 %v10154_v19, %v8234_v24 }
 0x145   :  { %5299 = vmatpush.bf16.msrb.mxu2 %v8141_v45  ;;  %v10246_v29 = vld [vmem:[%s15620_s1 + $0x10e4] sm:$0xf]  ;;  %v8602_v23 = vld [vmem:[%s15620_s1 + $0x10f0] sm:$0xf0]  ;;  %v8413_v40 = vor.u32 %v10198_v27, %v8410_v28 }
 0x146   :  { %5312 = vmatpush.bf16.msrb.mxu3 %v8269_v52  ;;  %v10278_v31 = vld [vmem:[%s15620_s1 + $0x11e4] sm:$0xf]  ;;  %v8730_v33 = vld [vmem:[%s15620_s1 + $0x11f0] sm:$0xf0]  ;;  %v8605_v41 = vor.u32 %v10246_v29, %v8602_v23 }
 0x147   :  { %5322 = vmatpush.bf16.msra.mxu0 %v8445_v53  ;;  %v10310_v37 = vld [vmem:[%s15620_s1 + $0x12e4] sm:$0xf]  ;;  %v8858_v38 = vld [vmem:[%s15620_s1 + $0x12f0] sm:$0xf0]  ;;  %v8733_v42 = vor.u32 %v10278_v31, %v8730_v33 }
 0x148   :  { %5287 = vmatpush.bf16.msrb.mxu1 %v7997_v61  ;;  %v10194_v34 = vld [vmem:[%s15620_s1 + $0xf44] sm:$0xf]  ;;  %v8394_v44 = vld [vmem:[%s15620_s1 + $0xf50] sm:$0xf0]  ;;  %v8861_v50 = vor.u32 %v10310_v37, %v8858_v38 }
 0x149   :  { %5300 = vmatpush.bf16.msrb.mxu2 %v8125_v62  ;;  %v10242_v45 = vld [vmem:[%s15620_s1 + $0x10c4] sm:$0xf]  ;;  %v8586_v51 = vld [vmem:[%s15620_s1 + $0x10d0] sm:$0xf0]  ;;  %v8397_v56 = vor.u32 %v10194_v34, %v8394_v44 }
 0x14a   :  { %5313 = vmatpush.bf16.msrb.mxu3 %v8253_v8  ;;  %v10274_v52 = vld [vmem:[%s15620_s1 + $0x11c4] sm:$0xf]  ;;  %v8714_v53 = vld [vmem:[%s15620_s1 + $0x11d0] sm:$0xf0]  ;;  %v8589_v57 = vor.u32 %v10242_v45, %v8586_v51 }
 0x14b   :  { %5323 = vmatpush.bf16.msra.mxu0 %v8429_v10  ;;  %v10306_v54 = vld [vmem:[%s15620_s1 + $0x12c4] sm:$0xf]  ;;  %v8842_v55 = vld [vmem:[%s15620_s1 + $0x12d0] sm:$0xf0]  ;;  %v8717_v58 = vor.u32 %v10274_v52, %v8714_v53 }
 0x14c   :  { %5288 = vmatpush.bf16.msrb.mxu1 %v7981_v35  ;;  %v10190_v59 = vld [vmem:[%s15620_s1 + $0xf24] sm:$0xf]  ;;  %v8378_v61 = vld [vmem:[%s15620_s1 + $0xf30] sm:$0xf0]  ;;  %v8845_v63 = vor.u32 %v10306_v54, %v8842_v55 }
 0x14d   :  { %5301 = vmatpush.bf16.msrb.mxu2 %v8109_v36  ;;  %v10238_v62 = vld [vmem:[%s15620_s1 + $0x10a4] sm:$0xf]  ;;  %v8570_v3 = vld [vmem:[%s15620_s1 + $0x10b0] sm:$0xf0]  ;;  %v8381_v19 = vor.u32 %v10190_v59, %v8378_v61  ;;  %v5069_v36 = vpop.f32.mrf.mxu0 }
 0x14e   :  { %5314 = vmatpush.bf16.msrb.mxu3 %v8237_v39  ;;  %v10270_v32 = vld [vmem:[%s15620_s1 + $0x11a4] sm:$0xf]  ;;  %v8698_v8 = vld [vmem:[%s15620_s1 + $0x11b0] sm:$0xf0]  ;;  %v8573_v25 = vor.u32 %v10238_v62, %v8570_v3 }
 0x14f   :  { %5324 = vmatpush.bf16.msra.mxu0 %v8413_v40  ;;  %5289 = vmatmul.bf16.vlgmr.msrb.gmra.mxu1 %v11409_v46  ;;  %v10302_v10 = vld [vmem:[%s15620_s1 + $0x12a4] sm:$0xf]  ;;  %v8826_v11 = vld [vmem:[%s15620_s1 + $0x12b0] sm:$0xf0]  ;;  %v8701_v27 = vor.u32 %v10270_v32, %v8698_v8  ;;  %v5070_v40 = vadd.f32 %v5069_v36, %v12577_v43 }
 0x150   :  { %5333 = vmatpush.bf16.msra.mxu1 %v8605_v41  ;;  %5302 = vmatmul.bf16.vlgmr.msrb.gmra.mxu2 %v11413_v48  ;;  %v10186_v24 = vld [vmem:[%s15620_s1 + $0xf04] sm:$0xf]  ;;  %v8362_v28 = vld [vmem:[%s15620_s1 + $0xf10] sm:$0xf0]  ;;  %v8829_v23 = vor.u32 %v10302_v10, %v8826_v11 }
 0x151   :  { %5346 = vmatpush.bf16.msra.mxu2 %v8733_v42  ;;  %5315 = vmatmul.bf16.vlgmr.msrb.gmra.mxu3 %v11411_v47  ;;  %v10234_v29 = vld [vmem:[%s15620_s1 + $0x1084] sm:$0xf]  ;;  %v8554_v30 = vld [vmem:[%s15620_s1 + $0x1090] sm:$0xf0]  ;;  %v8365_v41 = vor.u32 %v10186_v24, %v8362_v28  ;;  %v5082_v42 = vpop.f32.mrf.mxu1 }
 0x152   :  { %5359 = vmatpush.bf16.msra.mxu3 %v8861_v50  ;;  %v10266_v31 = vld [vmem:[%s15620_s1 + $0x1184] sm:$0xf]  ;;  %v8682_v33 = vld [vmem:[%s15620_s1 + $0x1190] sm:$0xf0]  ;;  %v8557_v34 = vor.u32 %v10234_v29, %v8554_v30  ;;  %v5083_v52 = vadd.f32 %v5082_v42, %v5070_v40 }
 0x153   :  { %5325 = vmatpush.bf16.msra.mxu0 %v8397_v56  ;;  %v10298_v35 = vld [vmem:[%s15620_s1 + $0x1284] sm:$0xf]  ;;  %v8810_v37 = vld [vmem:[%s15620_s1 + $0x1290] sm:$0xf0]  ;;  %v8685_v44 = vor.u32 %v10266_v31, %v8682_v33  ;;  %v5095_v32 = vpop.f32.mrf.mxu2 }
 0x154   :  { %5334 = vmatpush.bf16.msra.mxu1 %v8589_v57  ;;  %v10342_v38 = vld [vmem:[%s15620_s1 + $0x13e4] sm:$0xf]  ;;  %v8986_v39 = vld [vmem:[%s15620_s1 + $0x13f0] sm:$0xf0]  ;;  %v8813_v51 = vor.u32 %v10298_v35, %v8810_v37  ;;  %v5096_v24 = vadd.f32 %v5095_v32, %v5083_v52 }
 0x155   :  { %5347 = vmatpush.bf16.msra.mxu2 %v8717_v58  ;;  %v10230_v45 = vld [vmem:[%s15620_s1 + $0x1064] sm:$0xf]  ;;  %v8538_v50 = vld [vmem:[%s15620_s1 + $0x1070] sm:$0xf0]  ;;  %v8989_v53 = vor.u32 %v10342_v38, %v8986_v39 }
 0x156   :  { %5360 = vmatpush.bf16.msra.mxu3 %v8845_v63  ;;  %v10262_v43 = vld [vmem:[%s15620_s1 + $0x1164] sm:$0xf]  ;;  %v8666_v54 = vld [vmem:[%s15620_s1 + $0x1170] sm:$0xf0]  ;;  %v8541_v59 = vor.u32 %v10230_v45, %v8538_v50 }
 0x157   :  { %5326 = vmatpush.bf16.msra.mxu0 %v8381_v19  ;;  %v10294_v55 = vld [vmem:[%s15620_s1 + $0x1264] sm:$0xf]  ;;  %v8794_v56 = vld [vmem:[%s15620_s1 + $0x1270] sm:$0xf0]  ;;  %v8669_v61 = vor.u32 %v10262_v43, %v8666_v54 }
 0x158   :  { %5335 = vmatpush.bf16.msra.mxu1 %v8573_v25  ;;  %v10338_v57 = vld [vmem:[%s15620_s1 + $0x13c4] sm:$0xf]  ;;  %v8970_v58 = vld [vmem:[%s15620_s1 + $0x13d0] sm:$0xf0]  ;;  %v8797_v3 = vor.u32 %v10294_v55, %v8794_v56  ;;  %v5071_v25 = vpop.f32.mrf.mxu0 }
 0x159   :  { %5348 = vmatpush.bf16.msra.mxu2 %v8701_v27  ;;  %v10226_v62 = vld [vmem:[%s15620_s1 + $0x1044] sm:$0xf]  ;;  %v8522_v63 = vld [vmem:[%s15620_s1 + $0x1050] sm:$0xf0]  ;;  %v8973_v8 = vor.u32 %v10338_v57, %v8970_v58  ;;  %v5108_v27 = vpop.f32.mrf.mxu3 }
 0x15a   :  { %5361 = vmatpush.bf16.msra.mxu3 %v8829_v23  ;;  %v10258_v10 = vld [vmem:[%s15620_s1 + $0x1144] sm:$0xf]  ;;  %v8650_v11 = vld [vmem:[%s15620_s1 + $0x1150] sm:$0xf0]  ;;  %v5084_v23 = vpop.f32.mrf.mxu1  ;;  %v5109_v31 = vadd.f32 %v5108_v27, %v5096_v24  ;;  %v8525_v33 = vor.u32 %v10226_v62, %v8522_v63 }
 0x15b   :  { %5327 = vmatpush.bf16.msra.mxu0 %v8365_v41  ;;  %v10290_v19 = vld [vmem:[%s15620_s1 + $0x1244] sm:$0xf]  ;;  %v8778_v28 = vld [vmem:[%s15620_s1 + $0x1250] sm:$0xf0]  ;;  %v8653_v35 = vor.u32 %v10258_v10, %v8650_v11 }
 0x15c   :  { %5336 = vmatpush.bf16.msra.mxu1 %v8557_v34  ;;  %v10334_v29 = vld [vmem:[%s15620_s1 + $0x13a4] sm:$0xf]  ;;  %v8954_v30 = vld [vmem:[%s15620_s1 + $0x13b0] sm:$0xf0]  ;;  %v8781_v38 = vor.u32 %v10290_v19, %v8778_v28 }
 0x15d   :  { %5349 = vmatpush.bf16.msra.mxu2 %v8685_v44  ;;  %v10222_v36 = vld [vmem:[%s15620_s1 + $0x1024] sm:$0xf]  ;;  %v8506_v37 = vld [vmem:[%s15620_s1 + $0x1030] sm:$0xf0]  ;;  %v8957_v39 = vor.u32 %v10334_v29, %v8954_v30 }
 0x15e   :  { %5362 = vmatpush.bf16.msra.mxu3 %v8813_v51  ;;  %5328 = vmatmul.bf16.vlgmr.msra.gmra.mxu0 %v11415_v49  ;;  %v10254_v40 = vld [vmem:[%s15620_s1 + $0x1124] sm:$0xf]  ;;  %v8634_v41 = vld [vmem:[%s15620_s1 + $0x1130] sm:$0xf0]  ;;  %v8509_v50 = vor.u32 %v10222_v36, %v8506_v37 }
 0x15f   :  { %5372 = vmatpush.bf16.msrb.mxu0 %v8989_v53  ;;  %v10286_v42 = vld [vmem:[%s15620_s1 + $0x1224] sm:$0xf]  ;;  %v8762_v34 = vld [vmem:[%s15620_s1 + $0x1230] sm:$0xf0]  ;;  %v8637_v51 = vor.u32 %v10254_v40, %v8634_v41 }
 0x160   :  { %5337 = vmatpush.bf16.msra.mxu1 %v8541_v59  ;;  %v10330_v44 = vld [vmem:[%s15620_s1 + $0x1384] sm:$0xf]  ;;  %v8938_v45 = vld [vmem:[%s15620_s1 + $0x1390] sm:$0xf0]  ;;  %v8765_v54 = vor.u32 %v10286_v42, %v8762_v34  ;;  %v5097_v59 = vpop.f32.mrf.mxu2  ;;  %v5121_v32 = vpop.f32.mrf.mxu0 }
 0x161   :  { %5350 = vmatpush.bf16.msra.mxu2 %v8669_v61  ;;  %v10218_v52 = vld [vmem:[%s15620_s1 + $0x1004] sm:$0xf]  ;;  %v8490_v53 = vld [vmem:[%s15620_s1 + $0x1010] sm:$0xf0]  ;;  %v8941_v55 = vor.u32 %v10330_v44, %v8938_v45  ;;  %v12836_v19 = vadd.f32 %v5121_v32, %v5109_v31 }
 0x162   :  { %5363 = vmatpush.bf16.msra.mxu3 %v8797_v3  ;;  %v10250_v43 = vld [vmem:[%s15620_s1 + $0x1104] sm:$0xf]  ;;  %v8618_v56 = vld [vmem:[%s15620_s1 + $0x1110] sm:$0xf0]  ;;  %v5110_v3 = vpop.f32.mrf.mxu3  ;;  %v8493_v24 = vor.u32 %v10218_v52, %v8490_v53 }
 0x163   :  { %5373 = vmatpush.bf16.msrb.mxu0 %v8973_v8  ;;  %v10282_v57 = vld [vmem:[%s15620_s1 + $0x1204] sm:$0xf]  ;;  %v8746_v58 = vld [vmem:[%s15620_s1 + $0x1210] sm:$0xf0]  ;;  %v8621_v25 = vor.u32 %v10250_v43, %v8618_v56 }
 0x164   :  { %5338 = vmatpush.bf16.msra.mxu1 %v8525_v33  ;;  %v10326_v61 = vld [vmem:[%s15620_s1 + $0x1364] sm:$0xf]  ;;  %v8922_v62 = vld [vmem:[%s15620_s1 + $0x1370] sm:$0xf0]  ;;  %v8749_v29 = vor.u32 %v10282_v57, %v8746_v58 }
 0x165   :  { %5351 = vmatpush.bf16.msra.mxu2 %v8653_v35  ;;  %v10374_v63 = vld [vmem:[%s15620_s1 + $0x14e4] sm:$0xf]  ;;  %v9114_v8 = vld [vmem:[%s15620_s1 + $0x14f0] sm:$0xf0]  ;;  %v8925_v30 = vor.u32 %v10326_v61, %v8922_v62 }
 0x166   :  { %5364 = vmatpush.bf16.msra.mxu3 %v8781_v38  ;;  %v10406_v10 = vld [vmem:[%s15620_s1 + $0x15e4] sm:$0xf]  ;;  %v9242_v11 = vld [vmem:[%s15620_s1 + $0x15f0] sm:$0xf0]  ;;  %v9117_v23 = vor.u32 %v10374_v63, %v9114_v8 }
 0x167   :  { %5374 = vmatpush.bf16.msrb.mxu0 %v8957_v39  ;;  %v10438_v27 = vld [vmem:[%s15620_s1 + $0x16e4] sm:$0xf]  ;;  %v9370_v28 = vld [vmem:[%s15620_s1 + $0x16f0] sm:$0xf0]  ;;  %v9245_v33 = vor.u32 %v10406_v10, %v9242_v11 }
 0x168   :  { %5339 = vmatpush.bf16.msra.mxu1 %v8509_v50  ;;  %v10322_v31 = vld [vmem:[%s15620_s1 + $0x1344] sm:$0xf]  ;;  %v8906_v35 = vld [vmem:[%s15620_s1 + $0x1350] sm:$0xf0]  ;;  %v9373_v37 = vor.u32 %v10438_v27, %v9370_v28  ;;  %v5123_v56 = vpop.f32.mrf.mxu0  ;;  %v10524_v27 = vld [vmem:[%s15621_s2] sm:$0xf] }
 0x169   :  { %5352 = vmatpush.bf16.msra.mxu2 %v8637_v51  ;;  %v10370_v36 = vld [vmem:[%s15620_s1 + $0x14c4] sm:$0xf]  ;;  %v9098_v38 = vld [vmem:[%s15620_s1 + $0x14d0] sm:$0xf0]  ;;  %v8909_v34 = vor.u32 %v10322_v31, %v8906_v35  ;;  %v813_v28 = vperm.slane %v10524_v27, 1 }
 0x16a   :  { %5365 = vmatpush.bf16.msra.mxu3 %v8765_v54  ;;  %v10402_v39 = vld [vmem:[%s15620_s1 + $0x15c4] sm:$0xf]  ;;  %v9226_v40 = vld [vmem:[%s15620_s1 + $0x15d0] sm:$0xf0]  ;;  %v9101_v44 = vor.u32 %v10370_v36, %v9098_v38 }
 0x16b   :  { %5375 = vmatpush.bf16.msrb.mxu0 %v8941_v55  ;;  %v10434_v41 = vld [vmem:[%s15620_s1 + $0x16c4] sm:$0xf]  ;;  %v9354_v42 = vld [vmem:[%s15620_s1 + $0x16d0] sm:$0xf0]  ;;  %v9229_v45 = vor.u32 %v10402_v39, %v9226_v40 }
 0x16c   :  { %5340 = vmatpush.bf16.msra.mxu1 %v8493_v24  ;;  %v10318_v50 = vld [vmem:[%s15620_s1 + $0x1324] sm:$0xf]  ;;  %v8890_v51 = vld [vmem:[%s15620_s1 + $0x1330] sm:$0xf0]  ;;  %v9357_v53 = vor.u32 %v10434_v41, %v9354_v42  ;;  %v5134_v31 = vpop.f32.mrf.mxu1 }
 0x16d   :  { %5353 = vmatpush.bf16.msra.mxu2 %v8621_v25  ;;  %v10366_v52 = vld [vmem:[%s15620_s1 + $0x14a4] sm:$0xf]  ;;  %v9082_v43 = vld [vmem:[%s15620_s1 + $0x14b0] sm:$0xf0]  ;;  %v8893_v59 = vor.u32 %v10318_v50, %v8890_v51 }
 0x16e   :  { %5366 = vmatpush.bf16.msra.mxu3 %v8749_v29  ;;  %v10398_v54 = vld [vmem:[%s15620_s1 + $0x15a4] sm:$0xf]  ;;  %v9210_v55 = vld [vmem:[%s15620_s1 + $0x15b0] sm:$0xf0]  ;;  %v9085_v63 = vor.u32 %v10366_v52, %v9082_v43 }
 0x16f   :  { %5376 = vmatpush.bf16.msrb.mxu0 %v8925_v30  ;;  %5341 = vmatmul.bf16.vlgmr.msra.gmra.mxu1 %v11646_v9  ;;  %v10430_v57 = vld [vmem:[%s15620_s1 + $0x16a4] sm:$0xf]  ;;  %v9338_v58 = vld [vmem:[%s15620_s1 + $0x16b0] sm:$0xf0]  ;;  %v9213_v3 = vor.u32 %v10398_v54, %v9210_v55 }
 0x170   :  { %5385 = vmatpush.bf16.msrb.mxu1 %v9117_v23  ;;  %5354 = vmatmul.bf16.vlgmr.msra.gmra.mxu2 %v11656_v14  ;;  %v10314_v61 = vld [vmem:[%s15620_s1 + $0x1304] sm:$0xf]  ;;  %v8874_v62 = vld [vmem:[%s15620_s1 + $0x1310] sm:$0xf0]  ;;  %v9341_v11 = vor.u32 %v10430_v57, %v9338_v58 }
 0x171   :  { %5398 = vmatpush.bf16.msrb.mxu2 %v9245_v33  ;;  %5367 = vmatmul.bf16.vlgmr.msra.gmra.mxu3 %v11654_v13  ;;  %v10362_v32 = vld [vmem:[%s15620_s1 + $0x1484] sm:$0xf]  ;;  %v9066_v8 = vld [vmem:[%s15620_s1 + $0x1490] sm:$0xf0]  ;;  %v8877_v33 = vor.u32 %v10314_v61, %v8874_v62 }
 0x172   :  { %5411 = vmatpush.bf16.msrb.mxu3 %v9373_v37  ;;  %v10394_v10 = vld [vmem:[%s15620_s1 + $0x1584] sm:$0xf]  ;;  %v9194_v24 = vld [vmem:[%s15620_s1 + $0x1590] sm:$0xf0]  ;;  %v9069_v35 = vor.u32 %v10362_v32, %v9066_v8 }
 0x173   :  { %5377 = vmatpush.bf16.msrb.mxu0 %v8909_v34  ;;  %v10426_v25 = vld [vmem:[%s15620_s1 + $0x1684] sm:$0xf]  ;;  %v9322_v29 = vld [vmem:[%s15620_s1 + $0x1690] sm:$0xf0]  ;;  %v9197_v36 = vor.u32 %v10394_v10, %v9194_v24  ;;  %v5147_v55 = vpop.f32.mrf.mxu2 }
 0x174   :  { %5386 = vmatpush.bf16.msrb.mxu1 %v9101_v44  ;;  %v10470_v30 = vld [vmem:[%s15620_s1 + $0x17e4] sm:$0xf]  ;;  %v9498_v23 = vld [vmem:[%s15620_s1 + $0x17f0] sm:$0xf0]  ;;  %v9325_v39 = vor.u32 %v10426_v25, %v9322_v29  ;;  %v5135_v44 = vadd.f32 %v5134_v31, %v813_v28 }
 0x175   :  { %5399 = vmatpush.bf16.msrb.mxu2 %v9229_v45  ;;  %v10358_v37 = vld [vmem:[%s15620_s1 + $0x1464] sm:$0xf]  ;;  %v9050_v38 = vld [vmem:[%s15620_s1 + $0x1470] sm:$0xf0]  ;;  %v9501_v40 = vor.u32 %v10470_v30, %v9498_v23 }
 0x176   :  { %5412 = vmatpush.bf16.msrb.mxu3 %v9357_v53  ;;  %v10390_v41 = vld [vmem:[%s15620_s1 + $0x1564] sm:$0xf]  ;;  %v9178_v42 = vld [vmem:[%s15620_s1 + $0x1570] sm:$0xf0]  ;;  %v9053_v52 = vor.u32 %v10358_v37, %v9050_v38  ;;  %v5148_v62 = vadd.f32 %v5147_v55, %v5135_v44 }
 0x177   :  { %5378 = vmatpush.bf16.msrb.mxu0 %v8893_v59  ;;  %v10422_v34 = vld [vmem:[%s15620_s1 + $0x1664] sm:$0xf]  ;;  %v9306_v45 = vld [vmem:[%s15620_s1 + $0x1670] sm:$0xf0]  ;;  %v9181_v53 = vor.u32 %v10390_v41, %v9178_v42 }
 0x178   :  { %5387 = vmatpush.bf16.msrb.mxu1 %v9085_v63  ;;  %v10466_v50 = vld [vmem:[%s15620_s1 + $0x17c4] sm:$0xf]  ;;  %v9482_v51 = vld [vmem:[%s15620_s1 + $0x17d0] sm:$0xf0]  ;;  %v9309_v56 = vor.u32 %v10422_v34, %v9306_v45  ;;  %v5160_v63 = vpop.f32.mrf.mxu3 }
 0x179   :  { %5400 = vmatpush.bf16.msrb.mxu2 %v9213_v3  ;;  %v10354_v43 = vld [vmem:[%s15620_s1 + $0x1444] sm:$0xf]  ;;  %v9034_v54 = vld [vmem:[%s15620_s1 + $0x1450] sm:$0xf0]  ;;  %v9485_v57 = vor.u32 %v10466_v50, %v9482_v51  ;;  %v5161_v10 = vadd.f32 %v5160_v63, %v5148_v62 }
 0x17a   :  { %5413 = vmatpush.bf16.msrb.mxu3 %v9341_v11  ;;  %v10386_v58 = vld [vmem:[%s15620_s1 + $0x1544] sm:$0xf]  ;;  %v9162_v59 = vld [vmem:[%s15620_s1 + $0x1550] sm:$0xf0]  ;;  %v5136_v11 = vpop.f32.mrf.mxu1  ;;  %v9037_v24 = vor.u32 %v10354_v43, %v9034_v54 }
 0x17b   :  { %5379 = vmatpush.bf16.msrb.mxu0 %v8877_v33  ;;  %v10418_v61 = vld [vmem:[%s15620_s1 + $0x1644] sm:$0xf]  ;;  %v9290_v3 = vld [vmem:[%s15620_s1 + $0x1650] sm:$0xf0]  ;;  %v9165_v25 = vor.u32 %v10386_v58, %v9162_v59  ;;  %v5173_v38 = vpop.f32.mrf.mxu0  ;;  %v5149_v45 = vpop.f32.mrf.mxu2  ;;  %v6560_v59 = vld [vmem:[%s15620_s1 + $0xe8] sm:$0xf] }
 0x17c   :  { %5388 = vmatpush.bf16.msrb.mxu1 %v9069_v35  ;;  %v10462_v32 = vld [vmem:[%s15620_s1 + $0x17a4] sm:$0xf]  ;;  %v9466_v8 = vld [vmem:[%s15620_s1 + $0x17b0] sm:$0xf0]  ;;  %v9293_v29 = vor.u32 %v10418_v61, %v9290_v3  ;;  %v13010_v44 = vadd.f32 %v5173_v38, %v5161_v10  ;;  %v9737_v61 = vld [vmem:[%s15620_s1 + $0xf4] sm:$0xf0] }
 0x17d   :  { %5401 = vmatpush.bf16.msrb.mxu2 %v9197_v36  ;;  %v10350_v27 = vld [vmem:[%s15620_s1 + $0x1424] sm:$0xf]  ;;  %v9018_v28 = vld [vmem:[%s15620_s1 + $0x1430] sm:$0xf0]  ;;  %v9469_v30 = vor.u32 %v10462_v32, %v9466_v8  ;;  %v6688_v3 = vld [vmem:[%s15620_s1 + $0x1e8] sm:$0xf] }
 0x17e   :  { %5414 = vmatpush.bf16.msrb.mxu3 %v9325_v39  ;;  %5380 = vmatmul.bf16.vlgmr.msrb.gmra.mxu0 %v11658_v18  ;;  %v10382_v23 = vld [vmem:[%s15620_s1 + $0x1524] sm:$0xf]  ;;  %v9146_v33 = vld [vmem:[%s15620_s1 + $0x1530] sm:$0xf0]  ;;  %v9021_v39 = vor.u32 %v10350_v27, %v9018_v28  ;;  %v9769_v32 = vld [vmem:[%s15620_s1 + $0x1f4] sm:$0xf0] }
 0x17f   :  { %5424 = vmatpush.bf16.msra.mxu0 %v9501_v40  ;;  %v10414_v31 = vld [vmem:[%s15620_s1 + $0x1624] sm:$0xf]  ;;  %v9274_v35 = vld [vmem:[%s15620_s1 + $0x1630] sm:$0xf0]  ;;  %v9149_v40 = vor.u32 %v10382_v23, %v9146_v33  ;;  %v6544_v23 = vld [vmem:[%s15620_s1 + $0xc8] sm:$0xf] }
 0x180   :  { %5389 = vmatpush.bf16.msrb.mxu1 %v9053_v52  ;;  %v10458_v36 = vld [vmem:[%s15620_s1 + $0x1784] sm:$0xf]  ;;  %v9450_v37 = vld [vmem:[%s15620_s1 + $0x1790] sm:$0xf0]  ;;  %v9277_v50 = vor.u32 %v10414_v31, %v9274_v35  ;;  %v5162_v54 = vpop.f32.mrf.mxu3  ;;  %v9733_v33 = vld [vmem:[%s15620_s1 + $0xd4] sm:$0xf0] }
 0x181   :  { %5402 = vmatpush.bf16.msrb.mxu2 %v9181_v53  ;;  %v10346_v41 = vld [vmem:[%s15620_s1 + $0x1404] sm:$0xf]  ;;  %v9002_v42 = vld [vmem:[%s15620_s1 + $0x1410] sm:$0xf0]  ;;  %v9453_v51 = vor.u32 %v10458_v36, %v9450_v37  ;;  %v6672_v35 = vld [vmem:[%s15620_s1 + $0x1c8] sm:$0xf] }
 0x182   :  { %5415 = vmatpush.bf16.msrb.mxu3 %v9309_v56  ;;  %v10378_v34 = vld [vmem:[%s15620_s1 + $0x1504] sm:$0xf]  ;;  %v9130_v52 = vld [vmem:[%s15620_s1 + $0x1510] sm:$0xf0]  ;;  %v9005_v62 = vor.u32 %v10346_v41, %v9002_v42  ;;  %v9765_v36 = vld [vmem:[%s15620_s1 + $0x1d4] sm:$0xf0] }
 0x183   :  { %5425 = vmatpush.bf16.msra.mxu0 %v9485_v57  ;;  %v10410_v53 = vld [vmem:[%s15620_s1 + $0x1604] sm:$0xf]  ;;  %v9258_v43 = vld [vmem:[%s15620_s1 + $0x1610] sm:$0xf0]  ;;  %v9133_v63 = vor.u32 %v10378_v34, %v9130_v52  ;;  %v5175_v31 = vpop.f32.mrf.mxu0  ;;  %v6673_v34 = vor.u32 %v9765_v36, %v6672_v35  ;;  %v6656_v52 = vld [vmem:[%s15620_s1 + $0x1a8] sm:$0xf] }
 0x184   :  { %5390 = vmatpush.bf16.msrb.mxu1 %v9037_v24  ;;  %v10454_v55 = vld [vmem:[%s15620_s1 + $0x1764] sm:$0xf]  ;;  %v9434_v56 = vld [vmem:[%s15620_s1 + $0x1770] sm:$0xf0]  ;;  %v9261_v8 = vor.u32 %v10410_v53, %v9258_v43  ;;  %v6561_v24 = vor.u32 %v9737_v61, %v6560_v59  ;;  %v9761_v53 = vld [vmem:[%s15620_s1 + $0x1b4] sm:$0xf0] }
 0x185   :  { %5403 = vmatpush.bf16.msrb.mxu2 %v9165_v25  ;;  %v10486_v57 = vld [vmem:[%s15620_s1 + $0x1864] sm:$0xf]  ;;  %v9562_v58 = vld [vmem:[%s15620_s1 + $0x1870] sm:$0xf0]  ;;  %v9437_v10 = vor.u32 %v10454_v55, %v9434_v56  ;;  %v6657_v61 = vor.u32 %v9761_v53, %v6656_v52  ;;  %v6496_v31 = vld [vmem:[%s15620_s1 + $0x68] sm:$0xf] }
 0x186   :  { %5416 = vmatpush.bf16.msrb.mxu3 %v9293_v29  ;;  %v9565_v11 = vor.u32 %v10486_v57, %v9562_v58  ;;  %v10450_v25 = vld [vmem:[%s15620_s1 + $0x1744] sm:$0xf]  ;;  %v9418_v27 = vld [vmem:[%s15620_s1 + $0x1750] sm:$0xf0]  ;;  %v6689_v29 = vor.u32 %v9769_v32, %v6688_v3  ;;  %v6640_v3 = vld [vmem:[%s15620_s1 + $0x188] sm:$0xf] }
 0x187   :  { %5426 = vmatpush.bf16.msra.mxu0 %v9469_v30  ;;  %v10482_v28 = vld [vmem:[%s15620_s1 + $0x1844] sm:$0xf]  ;;  %v9546_v30 = vld [vmem:[%s15620_s1 + $0x1850] sm:$0xf0]  ;;  %v9421_v37 = vor.u32 %v10450_v25, %v9418_v27  ;;  %v9757_v32 = vld [vmem:[%s15620_s1 + $0x194] sm:$0xf0] }
 0x188   :  { %5391 = vmatpush.bf16.msrb.mxu1 %v9021_v39  ;;  %v9549_v38 = vor.u32 %v10482_v28, %v9546_v30  ;;  %v6545_v39 = vor.u32 %v9733_v33, %v6544_v23  ;;  %v9402_v41 = vld [vmem:[%s15620_s1 + $0x1730] sm:$0xf0]  ;;  %v10478_v42 = vld [vmem:[%s15620_s1 + $0x1824] sm:$0xf]  ;;  %v9833_v25 = vld [vmem:[%s15620_s1 + $0x3f4] sm:$0xf0]  ;;  %v6641_v23 = vor.u32 %v9757_v32, %v6640_v3 }
 0x189   :  { %5404 = vmatpush.bf16.msrb.mxu2 %v9149_v40  ;;  %v10446_v40 = vld [vmem:[%s15620_s1 + $0x1724] sm:$0xf]  ;;  %v9530_v45 = vld [vmem:[%s15620_s1 + $0x1830] sm:$0xf0]  ;;  %v9721_v35 = vld [vmem:[%s15620_s1 + $0x74] sm:$0xf0] }
 0x18a   :  { %5417 = vmatpush.bf16.msrb.mxu3 %v9277_v50  ;;  %v6528_v50 = vld [vmem:[%s15620_s1 + $0xa8] sm:$0xf]  ;;  %v9405_v43 = vor.u32 %v10446_v40, %v9402_v41  ;;  %v10442_v54 = vld [vmem:[%s15620_s1 + $0x1704] sm:$0xf]  ;;  %v9533_v55 = vor.u32 %v10478_v42, %v9530_v45  ;;  %v9386_v57 = vld [vmem:[%s15620_s1 + $0x1710] sm:$0xf0]  ;;  %v6497_v42 = vor.u32 %v9721_v35, %v6496_v31 }
 0x18b   :  { %5427 = vmatpush.bf16.msra.mxu0 %v9453_v51  ;;  %v9729_v51 = vld [vmem:[%s15620_s1 + $0xb4] sm:$0xf0]  ;;  %v10474_v58 = vld [vmem:[%s15620_s1 + $0x1804] sm:$0xf]  ;;  %v9514_v59 = vld [vmem:[%s15620_s1 + $0x1810] sm:$0xf0] }
 0x18c   :  { %5392 = vmatpush.bf16.msrb.mxu1 %v9005_v62  ;;  %v6529_v56 = vor.u32 %v9729_v51, %v6528_v50  ;;  %v6512_v62 = vld [vmem:[%s15620_s1 + $0x88] sm:$0xf]  ;;  %v5186_v27 = vpop.f32.mrf.mxu1  ;;  %v9517_v28 = vor.u32 %v10474_v58, %v9514_v59  ;;  %v9829_v41 = vld [vmem:[%s15620_s1 + $0x3d4] sm:$0xf0] }
 0x18d   :  { %5405 = vmatpush.bf16.msrb.mxu2 %v9133_v63  ;;  %v9725_v63 = vld [vmem:[%s15620_s1 + $0x94] sm:$0xf0]  ;;  %v5187_v30 = vadd.f32 %v5186_v27, %v13010_v44  ;;  %v6624_v36 = vld [vmem:[%s15620_s1 + $0x168] sm:$0xf] }
 0x18e   :  { %5418 = vmatpush.bf16.msrb.mxu3 %v9261_v8  ;;  %v6816_v8 = vld [vmem:[%s15620_s1 + $0x2e8] sm:$0xf]  ;;  %v9753_v44 = vld [vmem:[%s15620_s1 + $0x174] sm:$0xf0] }
 0x18f   :  { %5428 = vmatpush.bf16.msra.mxu0 %v9437_v10  ;;  %5393 = vmatmul.bf16.vlgmr.msrb.gmra.mxu1 %v11739_v4  ;;  %v9801_v10 = vld [vmem:[%s15620_s1 + $0x2f4] sm:$0xf0]  ;;  %v6928_v40 = vld [vmem:[%s15620_s1 + $0x3c8] sm:$0xf]  ;;  %v6625_v45 = vor.u32 %v9753_v44, %v6624_v36 }
 0x190   :  { %5441 = vmatpush.bf16.msra.mxu1 %v9565_v11  ;;  %5406 = vmatmul.bf16.vlgmr.msrb.gmra.mxu2 %v11743_v6  ;;  %v9389_v11 = vor.u32 %v10442_v54, %v9386_v57  ;;  %v6817_v33 = vor.u32 %v9801_v10, %v6816_v8  ;;  %v6480_v51 = vld [vmem:[%s15620_s1 + $0x48] sm:$0xf]  ;;  %v9717_v52 = vld [vmem:[%s15620_s1 + $0x54] sm:$0xf0] }
 0x191   :  { %5450 = vmatpush.bf16.msra.mxu2 %v6561_v24  ;;  %5419 = vmatmul.bf16.vlgmr.msrb.gmra.mxu3 %v11741_v5  ;;  %v6944_v24 = vld [vmem:[%s15620_s1 + $0x3e8] sm:$0xf]  ;;  %v9793_v58 = vld [vmem:[%s15620_s1 + $0x2b4] sm:$0xf0]  ;;  %v6481_v3 = vor.u32 %v9717_v52, %v6480_v51 }
 0x192   :  { %5463 = vmatpush.bf16.msra.mxu3 %v6689_v29  ;;  %v6513_v29 = vor.u32 %v9725_v63, %v6512_v62  ;;  %v6608_v53 = vld [vmem:[%s15620_s1 + $0x148] sm:$0xf]  ;;  %v9745_v27 = vld [vmem:[%s15620_s1 + $0x134] sm:$0xf0] }
 0x193   :  { %5429 = vmatpush.bf16.msra.mxu0 %v9421_v37  ;;  %v6945_v37 = vor.u32 %v9833_v25, %v6944_v24  ;;  %v6784_v57 = vld [vmem:[%s15620_s1 + $0x2a8] sm:$0xf]  ;;  %v9821_v31 = vld [vmem:[%s15620_s1 + $0x394] sm:$0xf0] }
 0x194   :  { %5442 = vmatpush.bf16.msra.mxu1 %v9549_v38  ;;  %v6800_v38 = vld [vmem:[%s15620_s1 + $0x2c8] sm:$0xf]  ;;  %v5212_v54 = vpop.f32.mrf.mxu3  ;;  %v5188_v63 = vpop.f32.mrf.mxu1  ;;  %v6785_v8 = vor.u32 %v9793_v58, %v6784_v57  ;;  %v9785_v51 = vld [vmem:[%s15620_s1 + $0x274] sm:$0xf0] }
 0x195   :  { %5451 = vmatpush.bf16.msra.mxu2 %v6545_v39  ;;  %v9797_v39 = vld [vmem:[%s15620_s1 + $0x2d4] sm:$0xf0]  ;;  %v6912_v59 = vld [vmem:[%s15620_s1 + $0x3a8] sm:$0xf] }
 0x196   :  { %5464 = vmatpush.bf16.msra.mxu3 %v6673_v34  ;;  %v5199_v34 = vpop.f32.mrf.mxu2  ;;  %v6801_v50 = vor.u32 %v9797_v39, %v6800_v38  ;;  %v6464_v10 = vld [vmem:[%s15620_s1 + $0x28] sm:$0xf]  ;;  %v9897_v57 = vld [vmem:[%s15620_s1 + $0x5f4] sm:$0xf0] }
 0x197   :  { %5430 = vmatpush.bf16.msra.mxu0 %v9405_v43  ;;  %v5200_v43 = vadd.f32 %v5199_v34, %v5187_v30  ;;  %v6592_v24 = vld [vmem:[%s15620_s1 + $0x128] sm:$0xf]  ;;  %v10525_v30 = vld [vmem:[#allocation1] sm:$0xff] }
 0x198   :  { %5443 = vmatpush.bf16.msra.mxu1 %v9533_v55  ;;  %v6929_v55 = vor.u32 %v9829_v41, %v6928_v40  ;;  %v6593_v38 = vor.u32 %v9745_v27, %v6592_v24  ;;  %v9709_v40 = vld [vmem:[%s15620_s1 + $0x14] sm:$0xf0]  ;;  %v6576_v41 = vld [vmem:[%s15620_s1 + $0x108] sm:$0xf] }
 0x199   :  { %5452 = vmatpush.bf16.msra.mxu2 %v6529_v56  ;;  %v9749_v56 = vld [vmem:[%s15620_s1 + $0x154] sm:$0xf0]  ;;  %v5213_v62 = vadd.f32 %v5212_v54, %v5200_v43  ;;  %v6880_v52 = vld [vmem:[%s15620_s1 + $0x368] sm:$0xf] }
 0x19a   :  { %5465 = vmatpush.bf16.msra.mxu3 %v6657_v61  ;;  %v9825_v61 = vld [vmem:[%s15620_s1 + $0x3b4] sm:$0xf0]  ;;  %v6609_v32 = vor.u32 %v9749_v56, %v6608_v53  ;;  %v7072_v43 = vld [vmem:[%s15620_s1 + $0x4e8] sm:$0xf] }
 0x19b   :  { %5431 = vmatpush.bf16.msra.mxu0 %v9389_v11  ;;  %v9713_v11 = vld [vmem:[%s15620_s1 + $0x34] sm:$0xf0]  ;;  %v6913_v25 = vor.u32 %v9825_v61, %v6912_v59  ;;  %v7200_v56 = vld [vmem:[%s15620_s1 + $0x5e8] sm:$0xf] }
 0x19c   :  { %5444 = vmatpush.bf16.msra.mxu1 %v9517_v28  ;;  %v6768_v28 = vld [vmem:[%s15620_s1 + $0x288] sm:$0xf]  ;;  %v6465_v35 = vor.u32 %v9713_v11, %v6464_v10  ;;  %v5214_v34 = vpop.f32.mrf.mxu3  ;;  %v9817_v53 = vld [vmem:[%s15620_s1 + $0x374] sm:$0xf0] }
 0x19d   :  { %5453 = vmatpush.bf16.msra.mxu2 %v6513_v29  ;;  %v9789_v29 = vld [vmem:[%s15620_s1 + $0x294] sm:$0xf0]  ;;  %v6881_v61 = vor.u32 %v9817_v53, %v6880_v52  ;;  %v6736_v63 = vld [vmem:[%s15620_s1 + $0x248] sm:$0xf] }
 0x19e   :  { %5466 = vmatpush.bf16.msra.mxu3 %v6641_v23  ;;  %5432 = vmatmul.bf16.vlgmr.msra.gmra.mxu0 %v11745_v7  ;;  %v5225_v23 = vpop.f32.mrf.mxu0  ;;  %v5201_v44 = vpop.f32.mrf.mxu2  ;;  %v6769_v39 = vor.u32 %v9789_v29, %v6768_v28  ;;  %v9865_v54 = vld [vmem:[%s15620_s1 + $0x4f4] sm:$0xf0]  ;;  %v7056_v11 = vld [vmem:[%s15620_s1 + $0x4c8] sm:$0xf] }
 0x19f   :  { %5476 = vmatpush.bf16.msrb.mxu0 %v6817_v33  ;;  %9575 = vmatmul.msk.bf16.vlgmr.msra.gmra.mxu1 %vm4797_vm0, %v10525_v30  ;;  %v6896_v33 = vld [vmem:[%s15620_s1 + $0x388] sm:$0xf]  ;;  %v13207_v36 = vadd.f32 %v5225_v23, %v5213_v62  ;;  %v7073_v62 = vor.u32 %v9865_v54, %v7072_v43  ;;  %v9813_v10 = vld [vmem:[%s15620_s1 + $0x354] sm:$0xf0] }
 0x1a0   :  { %5489 = vmatpush.bf16.msrb.mxu1 %v6945_v37  ;;  %v6448_v37 = vld [vmem:[%s15620_s1 + $0x8] sm:$0xf]  ;;  %v9861_v24 = vld [vmem:[%s15620_s1 + $0x4d4] sm:$0xf0] }
 0x1a1   :  { %5454 = vmatpush.bf16.msra.mxu2 %v6497_v42  ;;  %v9741_v42 = vld [vmem:[%s15620_s1 + $0x114] sm:$0xf0]  ;;  %v7184_v27 = vld [vmem:[%s15620_s1 + $0x5c8] sm:$0xf]  ;;  %v7057_v23 = vor.u32 %v9861_v24, %v7056_v11 }
 0x1a2   :  { %5467 = vmatpush.bf16.msra.mxu3 %v6625_v45  ;;  %v6897_v45 = vor.u32 %v9821_v31, %v6896_v33  ;;  %v6577_v58 = vor.u32 %v9741_v42, %v6576_v41  ;;  %v9893_v28 = vld [vmem:[%s15620_s1 + $0x5d4] sm:$0xf0]  ;;  %v6720_v33 = vld [vmem:[%s15620_s1 + $0x228] sm:$0xf] }
 0x1a3   :  { %5477 = vmatpush.bf16.msrb.mxu0 %v6801_v50  ;;  %v6752_v50 = vld [vmem:[%s15620_s1 + $0x268] sm:$0xf]  ;;  %v9777_v31 = vld [vmem:[%s15620_s1 + $0x234] sm:$0xf0] }
 0x1a4   :  { %5490 = vmatpush.bf16.msrb.mxu1 %v6929_v55  ;;  %v6449_v55 = vor.u32 %v9709_v40, %v6448_v37  ;;  %v6753_v59 = vor.u32 %v9785_v51, %v6752_v50  ;;  %v7185_v37 = vor.u32 %v9893_v28, %v7184_v27  ;;  %v9809_v44 = vld [vmem:[%s15620_s1 + $0x334] sm:$0xf0]  ;;  %v7168_v40 = vld [vmem:[%s15620_s1 + $0x5a8] sm:$0xf]  ;;  %v6721_v42 = vor.u32 %v9777_v31, %v6720_v33 }
 0x1a5   :  { %5455 = vmatpush.bf16.msra.mxu2 %v6481_v3  ;;  %v9781_v3 = vld [vmem:[%s15620_s1 + $0x254] sm:$0xf0]  ;;  %v6704_v34 = vld [vmem:[%s15620_s1 + $0x208] sm:$0xf] }
 0x1a6   :  { %5468 = vmatpush.bf16.msra.mxu3 %v6609_v32  ;;  %v6864_v32 = vld [vmem:[%s15620_s1 + $0x348] sm:$0xf]  ;;  %v6737_v29 = vor.u32 %v9781_v3, %v6736_v63  ;;  %v9889_v41 = vld [vmem:[%s15620_s1 + $0x5b4] sm:$0xf0] }
 0x1a7   :  { %5478 = vmatpush.bf16.msrb.mxu0 %v6785_v8  ;;  %v7201_v8 = vor.u32 %v9897_v57, %v7200_v56  ;;  %v6865_v30 = vor.u32 %v9813_v10, %v6864_v32  ;;  %v9773_v51 = vld [vmem:[%s15620_s1 + $0x214] sm:$0xf0]  ;;  %v6832_v52 = vld [vmem:[%s15620_s1 + $0x308] sm:$0xf]  ;;  %v7169_v43 = vor.u32 %v9889_v41, %v7168_v40 }
 0x1a8   :  { %5491 = vmatpush.bf16.msrb.mxu1 %v6913_v25  ;;  %v5227_v25 = vpop.f32.mrf.mxu0  ;;  %v9805_v53 = vld [vmem:[%s15620_s1 + $0x314] sm:$0xf0]  ;;  %v7024_v54 = vld [vmem:[%s15620_s1 + $0x488] sm:$0xf]  ;;  %v6705_v63 = vor.u32 %v9773_v51, %v6704_v34 }
 0x1a9   :  { %5456 = vmatpush.bf16.msra.mxu2 %v6465_v35  ;;  %v6848_v35 = vld [vmem:[%s15620_s1 + $0x328] sm:$0xf]  ;;  %v9961_v32 = vld [vmem:[%s15620_s1 + $0x7f4] sm:$0xf0] }
 0x1aa   :  { %5469 = vmatpush.bf16.msra.mxu3 %v6593_v38  ;;  %v7040_v38 = vld [vmem:[%s15620_s1 + $0x4a8] sm:$0xf]  ;;  %v9849_v25 = vld [vmem:[%s15620_s1 + $0x474] sm:$0xf0] }
 0x1ab   :  { %5479 = vmatpush.bf16.msrb.mxu0 %v6769_v39  ;;  %v9857_v39 = vld [vmem:[%s15620_s1 + $0x4b4] sm:$0xf0]  ;;  %v7152_v56 = vld [vmem:[%s15620_s1 + $0x588] sm:$0xf] }
 0x1ac   :  { %5492 = vmatpush.bf16.msrb.mxu1 %v6897_v45  ;;  %v6849_v45 = vor.u32 %v9809_v44, %v6848_v35  ;;  %v7041_v50 = vor.u32 %v9857_v39, %v7040_v38  ;;  %v5238_v57 = vpop.f32.mrf.mxu1  ;;  %v7456_v3 = vld [vmem:[%s15620_s1 + $0x7e8] sm:$0xf]  ;;  %v9957_v31 = vld [vmem:[%s15620_s1 + $0x7d4] sm:$0xf0] }
 0x1ad   :  { %5457 = vmatpush.bf16.msra.mxu2 %v6449_v55  ;;  %v9853_v55 = vld [vmem:[%s15620_s1 + $0x494] sm:$0xf0]  ;;  %v7136_v27 = vld [vmem:[%s15620_s1 + $0x568] sm:$0xf]  ;;  %v7457_v28 = vor.u32 %v9961_v32, %v7456_v3 }
 0x1ae   :  { %5470 = vmatpush.bf16.msra.mxu3 %v6577_v58  ;;  %v9885_v58 = vld [vmem:[%s15620_s1 + $0x594] sm:$0xf0]  ;;  %v7025_v10 = vor.u32 %v9853_v55, %v7024_v54  ;;  %v7440_v33 = vld [vmem:[%s15620_s1 + $0x7c8] sm:$0xf] }
 0x1af   :  { %5480 = vmatpush.bf16.msrb.mxu0 %v6753_v59  ;;  %v7328_v59 = vld [vmem:[%s15620_s1 + $0x6e8] sm:$0xf]  ;;  %v7153_v11 = vor.u32 %v9885_v58, %v7152_v56  ;;  %v9845_v41 = vld [vmem:[%s15620_s1 + $0x454] sm:$0xf0] }
 0x1b0   :  { %5493 = vmatpush.bf16.msrb.mxu1 %v6881_v61  ;;  %5458 = vmatmul.bf16.vlgmr.msra.gmra.mxu2 %v10892_v21  ;;  %v9929_v61 = vld [vmem:[%s15620_s1 + $0x6f4] sm:$0xf0]  ;;  %v6992_v40 = vld [vmem:[%s15620_s1 + $0x448] sm:$0xf] }
 0x1b1   :  { %5502 = vmatpush.bf16.msrb.mxu2 %v7073_v62  ;;  %5471 = vmatmul.bf16.vlgmr.msra.gmra.mxu3 %v10903_v26  ;;  %v5239_v62 = vadd.f32 %v5238_v57, %v13207_v36  ;;  %v7329_v24 = vor.u32 %v9929_v61, %v7328_v59  ;;  %v7008_v36 = vld [vmem:[%s15620_s1 + $0x468] sm:$0xf]  ;;  %v9953_v54 = vld [vmem:[%s15620_s1 + $0x7b4] sm:$0xf0]  ;;  %v6993_v56 = vor.u32 %v9845_v41, %v6992_v40 }
 0x1b2   :  { %5515 = vmatpush.bf16.msrb.mxu3 %v7201_v8  ;;  %v6833_v8 = vor.u32 %v9805_v53, %v6832_v52  ;;  %v7009_v35 = vor.u32 %v9849_v25, %v7008_v36  ;;  %v7296_v51 = vld [vmem:[%s15620_s1 + $0x6a8] sm:$0xf]  ;;  %v9921_v52 = vld [vmem:[%s15620_s1 + $0x6b4] sm:$0xf0] }
 0x1b3   :  { %5481 = vmatpush.bf16.msrb.mxu0 %v6737_v29  ;;  %v9881_v29 = vld [vmem:[%s15620_s1 + $0x574] sm:$0xf0]  ;;  %v5251_v44 = vpop.f32.mrf.mxu2  ;;  %v7297_v58 = vor.u32 %v9921_v52, %v7296_v51  ;;  %v6976_v59 = vld [vmem:[%s15620_s1 + $0x428] sm:$0xf] }
 0x1b4   :  { %5494 = vmatpush.bf16.msrb.mxu1 %v6865_v30  ;;  %v7312_v30 = vld [vmem:[%s15620_s1 + $0x6c8] sm:$0xf]  ;;  %v5264_v39 = vpop.f32.mrf.mxu3  ;;  %v5252_v34 = vadd.f32 %v5251_v44, %v5239_v62  ;;  %v5240_v53 = vpop.f32.mrf.mxu1  ;;  %v9841_v61 = vld [vmem:[%s15620_s1 + $0x434] sm:$0xf0] }
 0x1b5   :  { %5503 = vmatpush.bf16.msrb.mxu2 %v7057_v23  ;;  %v9925_v23 = vld [vmem:[%s15620_s1 + $0x6d4] sm:$0xf0]  ;;  %v7104_v62 = vld [vmem:[%s15620_s1 + $0x528] sm:$0xf]  ;;  %v6977_v25 = vor.u32 %v9841_v61, %v6976_v59 }
 0x1b6   :  { %5516 = vmatpush.bf16.msrb.mxu3 %v7185_v37  ;;  %v7137_v37 = vor.u32 %v9881_v29, %v7136_v27  ;;  %v7313_v38 = vor.u32 %v9925_v23, %v7312_v30  ;;  %v5265_v55 = vadd.f32 %v5264_v39, %v5252_v34  ;;  %v9873_v3 = vld [vmem:[%s15620_s1 + $0x534] sm:$0xf0]  ;;  %v7280_v32 = vld [vmem:[%s15620_s1 + $0x688] sm:$0xf] }
 0x1b7   :  { %5482 = vmatpush.bf16.msrb.mxu0 %v6721_v42  ;;  %v7120_v42 = vld [vmem:[%s15620_s1 + $0x548] sm:$0xf]  ;;  %v9837_v30 = vld [vmem:[%s15620_s1 + $0x414] sm:$0xf0] }
 0x1b8   :  { %5495 = vmatpush.bf16.msrb.mxu1 %v6849_v45  ;;  %v7441_v45 = vor.u32 %v9957_v31, %v7440_v33  ;;  %v6960_v27 = vld [vmem:[%s15620_s1 + $0x408] sm:$0xf]  ;;  %v9869_v33 = vld [vmem:[%s15620_s1 + $0x514] sm:$0xf0] }
 0x1b9   :  { %5504 = vmatpush.bf16.msrb.mxu2 %v7041_v50  ;;  %v9877_v50 = vld [vmem:[%s15620_s1 + $0x554] sm:$0xf0]  ;;  %v7088_v23 = vld [vmem:[%s15620_s1 + $0x508] sm:$0xf]  ;;  %v6961_v34 = vor.u32 %v9837_v30, %v6960_v27 }
 0x1ba   :  { %5517 = vmatpush.bf16.msrb.mxu3 %v7169_v43  ;;  %v7424_v43 = vld [vmem:[%s15620_s1 + $0x7a8] sm:$0xf]  ;;  %v7121_v57 = vor.u32 %v9877_v50, %v7120_v42  ;;  %v9945_v40 = vld [vmem:[%s15620_s1 + $0x774] sm:$0xf0]  ;;  %v7089_v51 = vor.u32 %v9869_v33, %v7088_v23 }
 0x1bb   :  { %5483 = vmatpush.bf16.msrb.mxu0 %v6705_v63  ;;  %v7425_v63 = vor.u32 %v9953_v54, %v7424_v43  ;;  %v5253_v31 = vpop.f32.mrf.mxu2  ;;  %v7264_v44 = vld [vmem:[%s15620_s1 + $0x668] sm:$0xf]  ;;  %v9993_v42 = vld [vmem:[%s15620_s1 + $0x8f4] sm:$0xf0] }
 0x1bc   :  { %5496 = vmatpush.bf16.msrb.mxu1 %v6833_v8  ;;  %v9917_v8 = vld [vmem:[%s15620_s1 + $0x694] sm:$0xf0]  ;;  %v7392_v39 = vld [vmem:[%s15620_s1 + $0x768] sm:$0xf] }
 0x1bd   :  { %5505 = vmatpush.bf16.msrb.mxu2 %v7025_v10  ;;  %v5277_v10 = vpop.f32.mrf.mxu0  ;;  %v7281_v29 = vor.u32 %v9917_v8, %v7280_v32  ;;  %v7584_v41 = vld [vmem:[%s15620_s1 + $0x8e8] sm:$0xf]  ;;  %v10025_v50 = vld [vmem:[%s15620_s1 + $0x9f4] sm:$0xf0]  ;;  %v7393_v53 = vor.u32 %v9945_v40, %v7392_v39 }
 0x1be   :  { %5518 = vmatpush.bf16.msrb.mxu3 %v7153_v11  ;;  %5484 = vmatmul.bf16.vlgmr.msrb.gmra.mxu0 %v10890_v20  ;;  %v7408_v11 = vld [vmem:[%s15620_s1 + $0x788] sm:$0xf]  ;;  %v13406_v36 = vadd.f32 %v5277_v10, %v5265_v55  ;;  %v7585_v43 = vor.u32 %v9993_v42, %v7584_v41  ;;  %v9909_v55 = vld [vmem:[%s15620_s1 + $0x654] sm:$0xf0] }
 0x1bf   :  { %5528 = vmatpush.bf16.msra.mxu0 %v7329_v24  ;;  %5497 = vmatmul.bf16.vlgmr.msrb.gmra.mxu1 %v10894_v22  ;;  %v9949_v24 = vld [vmem:[%s15620_s1 + $0x794] sm:$0xf0]  ;;  %v7248_v54 = vld [vmem:[%s15620_s1 + $0x648] sm:$0xf] }
 0x1c0   :  { %5541 = vmatpush.bf16.msra.mxu1 %v7457_v28  ;;  %v7105_v28 = vor.u32 %v9873_v3, %v7104_v62  ;;  %v7568_v59 = vld [vmem:[%s15620_s1 + $0x8c8] sm:$0xf]  ;;  %v9989_v61 = vld [vmem:[%s15620_s1 + $0x8d4] sm:$0xf0]  ;;  %v7249_v32 = vor.u32 %v9909_v55, %v7248_v54 }
 0x1c1   :  { %5506 = vmatpush.bf16.msrb.mxu2 %v7009_v35  ;;  %v5266_v35 = vpop.f32.mrf.mxu3  ;;  %v10021_v3 = vld [vmem:[%s15620_s1 + $0x9d4] sm:$0xf0]  ;;  %v7569_v10 = vor.u32 %v9989_v61, %v7568_v59  ;;  %v7680_v23 = vld [vmem:[%s15620_s1 + $0x9a8] sm:$0xf] }
 0x1c2   :  { %5519 = vmatpush.bf16.msrb.mxu3 %v7137_v37  ;;  %v7409_v37 = vor.u32 %v9949_v24, %v7408_v11  ;;  %v7232_v11 = vld [vmem:[%s15620_s1 + $0x628] sm:$0xf]  ;;  %v9905_v24 = vld [vmem:[%s15620_s1 + $0x634] sm:$0xf0] }
 0x1c3   :  { %5529 = vmatpush.bf16.msra.mxu0 %v7313_v38  ;;  %v9913_v38 = vld [vmem:[%s15620_s1 + $0x674] sm:$0xf0]  ;;  %v7233_v31 = vor.u32 %v9905_v24, %v7232_v11  ;;  %v7216_v35 = vld [vmem:[%s15620_s1 + $0x608] sm:$0xf] }
 0x1c4   :  { %5542 = vmatpush.bf16.msra.mxu1 %v7441_v45  ;;  %v7712_v45 = vld [vmem:[%s15620_s1 + $0x9e8] sm:$0xf]  ;;  %v7265_v52 = vor.u32 %v9913_v38, %v7264_v44  ;;  %v9985_v30 = vld [vmem:[%s15620_s1 + $0x8b4] sm:$0xf0] }
 0x1c5   :  { %5507 = vmatpush.bf16.msrb.mxu2 %v6993_v56  ;;  %v7376_v56 = vld [vmem:[%s15620_s1 + $0x748] sm:$0xf]  ;;  %v5279_v62 = vpop.f32.mrf.mxu0  ;;  %v10017_v33 = vld [vmem:[%s15620_s1 + $0x9b4] sm:$0xf0] }
 0x1c6   :  { %5520 = vmatpush.bf16.msrb.mxu3 %v7121_v57  ;;  %v7713_v57 = vor.u32 %v10025_v50, %v7712_v45  ;;  %v9901_v38 = vld [vmem:[%s15620_s1 + $0x614] sm:$0xf0]  ;;  %v7344_v39 = vld [vmem:[%s15620_s1 + $0x708] sm:$0xf]  ;;  %v7681_v41 = vor.u32 %v10017_v33, %v7680_v23 }
 0x1c7   :  { %5530 = vmatpush.bf16.msra.mxu0 %v7297_v58  ;;  %v9941_v58 = vld [vmem:[%s15620_s1 + $0x754] sm:$0xf0]  ;;  %v7536_v42 = vld [vmem:[%s15620_s1 + $0x888] sm:$0xf]  ;;  %v7217_v54 = vor.u32 %v9901_v38, %v7216_v35 }
 0x1c8   :  { %5543 = vmatpush.bf16.msra.mxu1 %v7425_v63  ;;  %v7696_v63 = vld [vmem:[%s15620_s1 + $0x9c8] sm:$0xf]  ;;  %v7377_v8 = vor.u32 %v9941_v58, %v7376_v56  ;;  %v9933_v40 = vld [vmem:[%s15620_s1 + $0x714] sm:$0xf0] }
 0x1c9   :  { %5508 = vmatpush.bf16.msrb.mxu2 %v6977_v25  ;;  %v7360_v25 = vld [vmem:[%s15620_s1 + $0x728] sm:$0xf]  ;;  %v7697_v27 = vor.u32 %v10021_v3, %v7696_v63  ;;  %v10089_v56 = vld [vmem:[%s15620_s1 + $0xbf4] sm:$0xf0] }
 0x1ca   :  { %5521 = vmatpush.bf16.msrb.mxu3 %v7105_v28  ;;  %v9937_v28 = vld [vmem:[%s15620_s1 + $0x734] sm:$0xf0]  ;;  %v7664_v45 = vld [vmem:[%s15620_s1 + $0x988] sm:$0xf] }
 0x1cb   :  { %5531 = vmatpush.bf16.msra.mxu0 %v7281_v29  ;;  %v7552_v29 = vld [vmem:[%s15620_s1 + $0x8a8] sm:$0xf]  ;;  %v9977_v62 = vld [vmem:[%s15620_s1 + $0x874] sm:$0xf0] }
 0x1cc   :  { %5544 = vmatpush.bf16.msra.mxu1 %v7409_v37  ;;  %v7361_v37 = vor.u32 %v9937_v28, %v7360_v25  ;;  %v7553_v44 = vor.u32 %v9985_v30, %v7552_v29  ;;  %v5290_v50 = vpop.f32.mrf.mxu1  ;;  %v7968_v55 = vld [vmem:[%s15620_s1 + $0xbe8] sm:$0xf]  ;;  %v10085_v24 = vld [vmem:[%s15620_s1 + $0xbd4] sm:$0xf0] }
 0x1cd   :  { %5509 = vmatpush.bf16.msrb.mxu2 %v6961_v34  ;;  %v9981_v34 = vld [vmem:[%s15620_s1 + $0x894] sm:$0xf0]  ;;  %v7648_v63 = vld [vmem:[%s15620_s1 + $0x968] sm:$0xf]  ;;  %v7969_v3 = vor.u32 %v10089_v56, %v7968_v55 }
 0x1ce   :  { %5522 = vmatpush.bf16.msrb.mxu3 %v7089_v51  ;;  %v10013_v51 = vld [vmem:[%s15620_s1 + $0x994] sm:$0xf0]  ;;  %v7537_v58 = vor.u32 %v9981_v34, %v7536_v42  ;;  %v7952_v11 = vld [vmem:[%s15620_s1 + $0xbc8] sm:$0xf] }
 0x1cf   :  { %5532 = vmatpush.bf16.msra.mxu0 %v7265_v52  ;;  %v7840_v52 = vld [vmem:[%s15620_s1 + $0xae8] sm:$0xf]  ;;  %v7665_v59 = vor.u32 %v10013_v51, %v7664_v45  ;;  %v9973_v33 = vld [vmem:[%s15620_s1 + $0x854] sm:$0xf0] }
 0x1d0   :  { %5545 = vmatpush.bf16.msra.mxu1 %v7393_v53  ;;  %5510 = vmatmul.bf16.vlgmr.msrb.gmra.mxu2 %v10985_v0  ;;  %v10057_v53 = vld [vmem:[%s15620_s1 + $0xaf4] sm:$0xf0]  ;;  %v7504_v23 = vld [vmem:[%s15620_s1 + $0x848] sm:$0xf] }
 0x1d1   :  { %5554 = vmatpush.bf16.msra.mxu2 %v7585_v43  ;;  %5523 = vmatmul.bf16.vlgmr.msrb.gmra.mxu3 %v10989_v2  ;;  %v5291_v43 = vadd.f32 %v5290_v50, %v13406_v36  ;;  %v7841_v61 = vor.u32 %v10057_v53, %v7840_v52  ;;  %v7520_v36 = vld [vmem:[%s15620_s1 + $0x868] sm:$0xf]  ;;  %v10081_v42 = vld [vmem:[%s15620_s1 + $0xbb4] sm:$0xf0]  ;;  %v7505_v45 = vor.u32 %v9973_v33, %v7504_v23 }
 0x1d2   :  { %5567 = vmatpush.bf16.msra.mxu3 %v7713_v57  ;;  %v7345_v57 = vor.u32 %v9933_v40, %v7344_v39  ;;  %v7521_v25 = vor.u32 %v9977_v62, %v7520_v36  ;;  %v7808_v38 = vld [vmem:[%s15620_s1 + $0xaa8] sm:$0xf]  ;;  %v10049_v39 = vld [vmem:[%s15620_s1 + $0xab4] sm:$0xf0] }
 0x1d3   :  { %5533 = vmatpush.bf16.msra.mxu0 %v7249_v32  ;;  %v10009_v32 = vld [vmem:[%s15620_s1 + $0x974] sm:$0xf0]  ;;  %v5303_v28 = vpop.f32.mrf.mxu2  ;;  %v7809_v51 = vor.u32 %v10049_v39, %v7808_v38  ;;  %v7488_v52 = vld [vmem:[%s15620_s1 + $0x828] sm:$0xf] }
 0x1d4   :  { %5546 = vmatpush.bf16.msra.mxu1 %v7377_v8  ;;  %v7824_v8 = vld [vmem:[%s15620_s1 + $0xac8] sm:$0xf]  ;;  %v5316_v30 = vpop.f32.mrf.mxu3  ;;  %v5304_v35 = vadd.f32 %v5303_v28, %v5291_v43  ;;  %v5292_v40 = vpop.f32.mrf.mxu1  ;;  %v9969_v53 = vld [vmem:[%s15620_s1 + $0x834] sm:$0xf0] }
 0x1d5   :  { %5555 = vmatpush.bf16.msra.mxu2 %v7569_v10  ;;  %v10053_v10 = vld [vmem:[%s15620_s1 + $0xad4] sm:$0xf0]  ;;  %v7616_v43 = vld [vmem:[%s15620_s1 + $0x928] sm:$0xf]  ;;  %v7489_v62 = vor.u32 %v9969_v53, %v7488_v52 }
 0x1d6   :  { %5568 = vmatpush.bf16.msra.mxu3 %v7697_v27  ;;  %v7649_v27 = vor.u32 %v10009_v32, %v7648_v63  ;;  %v7825_v29 = vor.u32 %v10053_v10, %v7824_v8  ;;  %v5317_v34 = vadd.f32 %v5316_v30, %v5304_v35  ;;  %v10001_v55 = vld [vmem:[%s15620_s1 + $0x934] sm:$0xf0]  ;;  %v7792_v56 = vld [vmem:[%s15620_s1 + $0xa88] sm:$0xf] }
 0x1d7   :  { %5534 = vmatpush.bf16.msra.mxu0 %v7233_v31  ;;  %v7632_v31 = vld [vmem:[%s15620_s1 + $0x948] sm:$0xf]  ;;  %v9965_v8 = vld [vmem:[%s15620_s1 + $0x814] sm:$0xf0] }
 0x1d8   :  { %5547 = vmatpush.bf16.msra.mxu1 %v7361_v37  ;;  %v7953_v37 = vor.u32 %v10085_v24, %v7952_v11  ;;  %v7472_v63 = vld [vmem:[%s15620_s1 + $0x808] sm:$0xf]  ;;  %v9997_v11 = vld [vmem:[%s15620_s1 + $0x914] sm:$0xf0] }
 0x1d9   :  { %5556 = vmatpush.bf16.msra.mxu2 %v7553_v44  ;;  %v10005_v44 = vld [vmem:[%s15620_s1 + $0x954] sm:$0xf0]  ;;  %v7600_v10 = vld [vmem:[%s15620_s1 + $0x908] sm:$0xf]  ;;  %v7473_v35 = vor.u32 %v9965_v8, %v7472_v63 }
 0x1da   :  { %5569 = vmatpush.bf16.msra.mxu3 %v7681_v41  ;;  %v7936_v41 = vld [vmem:[%s15620_s1 + $0xba8] sm:$0xf]  ;;  %v7633_v50 = vor.u32 %v10005_v44, %v7632_v31  ;;  %v10073_v23 = vld [vmem:[%s15620_s1 + $0xb74] sm:$0xf0]  ;;  %v7601_v38 = vor.u32 %v9997_v11, %v7600_v10 }
 0x1db   :  { %5535 = vmatpush.bf16.msra.mxu0 %v7217_v54  ;;  %v7937_v54 = vor.u32 %v10081_v42, %v7936_v41  ;;  %v5305_v24 = vpop.f32.mrf.mxu2  ;;  %v7776_v28 = vld [vmem:[%s15620_s1 + $0xa68] sm:$0xf]  ;;  %v10121_v31 = vld [vmem:[%s15620_s1 + $0xcf4] sm:$0xf0] }
 0x1dc   :  { %5548 = vmatpush.bf16.msra.mxu1 %v7345_v57  ;;  %v10045_v57 = vld [vmem:[%s15620_s1 + $0xa94] sm:$0xf0]  ;;  %v7904_v30 = vld [vmem:[%s15620_s1 + $0xb68] sm:$0xf] }
 0x1dd   :  { %5557 = vmatpush.bf16.msra.mxu2 %v7537_v58  ;;  %v5329_v58 = vpop.f32.mrf.mxu0  ;;  %v7793_v32 = vor.u32 %v10045_v57, %v7792_v56  ;;  %v8096_v33 = vld [vmem:[%s15620_s1 + $0xce8] sm:$0xf]  ;;  %v10153_v44 = vld [vmem:[%s15620_s1 + $0xdf4] sm:$0xf0]  ;;  %v7905_v40 = vor.u32 %v10073_v23, %v7904_v30 }
 0x1de   :  { %5570 = vmatpush.bf16.msra.mxu3 %v7665_v59  ;;  %5536 = vmatmul.bf16.vlgmr.msra.gmra.mxu0 %v10980_v60  ;;  %v7920_v59 = vld [vmem:[%s15620_s1 + $0xb88] sm:$0xf]  ;;  %v13605_v36 = vadd.f32 %v5329_v58, %v5317_v34  ;;  %v8097_v41 = vor.u32 %v10121_v31, %v8096_v33  ;;  %v10037_v34 = vld [vmem:[%s15620_s1 + $0xa54] sm:$0xf0] }
 0x1df   :  { %5580 = vmatpush.bf16.msrb.mxu0 %v7841_v61  ;;  %5549 = vmatmul.bf16.vlgmr.msra.gmra.mxu1 %v10987_v1  ;;  %v10077_v61 = vld [vmem:[%s15620_s1 + $0xb94] sm:$0xf0]  ;;  %v7760_v42 = vld [vmem:[%s15620_s1 + $0xa48] sm:$0xf] }
 0x1e0   :  { %5593 = vmatpush.bf16.msrb.mxu1 %v7969_v3  ;;  %v7617_v3 = vor.u32 %v10001_v55, %v7616_v43  ;;  %v8080_v52 = vld [vmem:[%s15620_s1 + $0xcc8] sm:$0xf]  ;;  %v10117_v53 = vld [vmem:[%s15620_s1 + $0xcd4] sm:$0xf0]  ;;  %v7761_v56 = vor.u32 %v10037_v34, %v7760_v42 }
 0x1e1   :  { %5558 = vmatpush.bf16.msra.mxu2 %v7521_v25  ;;  %v5318_v25 = vpop.f32.mrf.mxu3  ;;  %v10149_v55 = vld [vmem:[%s15620_s1 + $0xdd4] sm:$0xf0]  ;;  %v8081_v58 = vor.u32 %v10117_v53, %v8080_v52  ;;  %v8192_v10 = vld [vmem:[%s15620_s1 + $0xda8] sm:$0xf] }
 0x1e2   :  { %5571 = vmatpush.bf16.msra.mxu3 %v7649_v27  ;;  %v7921_v27 = vor.u32 %v10077_v61, %v7920_v59  ;;  %v7744_v59 = vld [vmem:[%s15620_s1 + $0xa28] sm:$0xf]  ;;  %v10033_v61 = vld [vmem:[%s15620_s1 + $0xa34] sm:$0xf0] }
 0x1e3   :  { %5581 = vmatpush.bf16.msrb.mxu0 %v7825_v29  ;;  %v10041_v29 = vld [vmem:[%s15620_s1 + $0xa74] sm:$0xf0]  ;;  %v7745_v24 = vor.u32 %v10033_v61, %v7744_v59  ;;  %v7728_v25 = vld [vmem:[%s15620_s1 + $0xa08] sm:$0xf] }
 0x1e4   :  { %5594 = vmatpush.bf16.msrb.mxu1 %v7953_v37  ;;  %v8224_v37 = vld [vmem:[%s15620_s1 + $0xde8] sm:$0xf]  ;;  %v7777_v39 = vor.u32 %v10041_v29, %v7776_v28  ;;  %v10113_v8 = vld [vmem:[%s15620_s1 + $0xcb4] sm:$0xf0] }
 0x1e5   :  { %5559 = vmatpush.bf16.msra.mxu2 %v7505_v45  ;;  %v7888_v45 = vld [vmem:[%s15620_s1 + $0xb48] sm:$0xf]  ;;  %v5331_v43 = vpop.f32.mrf.mxu0  ;;  %v10145_v11 = vld [vmem:[%s15620_s1 + $0xdb4] sm:$0xf0] }
 0x1e6   :  { %5572 = vmatpush.bf16.msra.mxu3 %v7633_v50  ;;  %v8225_v50 = vor.u32 %v10153_v44, %v8224_v37  ;;  %v10029_v29 = vld [vmem:[%s15620_s1 + $0xa14] sm:$0xf0]  ;;  %v7856_v30 = vld [vmem:[%s15620_s1 + $0xb08] sm:$0xf]  ;;  %v8193_v33 = vor.u32 %v10145_v11, %v8192_v10 }
 0x1e7   :  { %5582 = vmatpush.bf16.msrb.mxu0 %v7809_v51  ;;  %v10069_v51 = vld [vmem:[%s15620_s1 + $0xb54] sm:$0xf0]  ;;  %v8048_v31 = vld [vmem:[%s15620_s1 + $0xc88] sm:$0xf]  ;;  %v7729_v42 = vor.u32 %v10029_v29, %v7728_v25 }
 0x1e8   :  { %5595 = vmatpush.bf16.msrb.mxu1 %v7937_v54  ;;  %v8208_v54 = vld [vmem:[%s15620_s1 + $0xdc8] sm:$0xf]  ;;  %v7889_v57 = vor.u32 %v10069_v51, %v7888_v45  ;;  %v10061_v23 = vld [vmem:[%s15620_s1 + $0xb14] sm:$0xf0] }
 0x1e9   :  { %5560 = vmatpush.bf16.msra.mxu2 %v7489_v62  ;;  %v7872_v62 = vld [vmem:[%s15620_s1 + $0xb28] sm:$0xf]  ;;  %v8209_v63 = vor.u32 %v10149_v55, %v8208_v54  ;;  %v10217_v45 = vld [vmem:[%s15620_s1 + $0xff4] sm:$0xf0] }
 0x1ea   :  { %5573 = vmatpush.bf16.msra.mxu3 %v7617_v3  ;;  %v10065_v3 = vld [vmem:[%s15620_s1 + $0xb34] sm:$0xf0]  ;;  %v8176_v37 = vld [vmem:[%s15620_s1 + $0xd88] sm:$0xf] }
 0x1eb   :  { %5583 = vmatpush.bf16.msrb.mxu0 %v7793_v32  ;;  %v8064_v32 = vld [vmem:[%s15620_s1 + $0xca8] sm:$0xf]  ;;  %v10105_v43 = vld [vmem:[%s15620_s1 + $0xc74] sm:$0xf0] }
 0x1ec   :  { %5596 = vmatpush.bf16.msrb.mxu1 %v7921_v27  ;;  %v7873_v27 = vor.u32 %v10065_v3, %v7872_v62  ;;  %v8065_v28 = vor.u32 %v10113_v8, %v8064_v32  ;;  %v5342_v44 = vpop.f32.mrf.mxu1  ;;  %v8480_v34 = vld [vmem:[%s15620_s1 + $0xfe8] sm:$0xf]  ;;  %v10213_v61 = vld [vmem:[%s15620_s1 + $0xfd4] sm:$0xf0] }
 0x1ed   :  { %5561 = vmatpush.bf16.msra.mxu2 %v7473_v35  ;;  %v10109_v35 = vld [vmem:[%s15620_s1 + $0xc94] sm:$0xf0]  ;;  %v8160_v54 = vld [vmem:[%s15620_s1 + $0xd68] sm:$0xf]  ;;  %v8481_v55 = vor.u32 %v10217_v45, %v8480_v34 }
 0x1ee   :  { %5574 = vmatpush.bf16.msra.mxu3 %v7601_v38  ;;  %v10141_v38 = vld [vmem:[%s15620_s1 + $0xd94] sm:$0xf0]  ;;  %v8049_v51 = vor.u32 %v10109_v35, %v8048_v31  ;;  %v8464_v59 = vld [vmem:[%s15620_s1 + $0xfc8] sm:$0xf] }
 0x1ef   :  { %5584 = vmatpush.bf16.msrb.mxu0 %v7777_v39  ;;  %v8352_v39 = vld [vmem:[%s15620_s1 + $0xee8] sm:$0xf]  ;;  %v8177_v52 = vor.u32 %v10141_v38, %v8176_v37  ;;  %v10101_v11 = vld [vmem:[%s15620_s1 + $0xc54] sm:$0xf0] }
 0x1f0   :  { %5597 = vmatpush.bf16.msrb.mxu1 %v7905_v40  ;;  %5562 = vmatmul.bf16.vlgmr.msra.gmra.mxu2 %v11235_v12  ;;  %v10185_v40 = vld [vmem:[%s15620_s1 + $0xef4] sm:$0xf0]  ;;  %v8016_v10 = vld [vmem:[%s15620_s1 + $0xc48] sm:$0xf] }
 0x1f1   :  { %5606 = vmatpush.bf16.msrb.mxu2 %v8097_v41  ;;  %5575 = vmatmul.bf16.vlgmr.msra.gmra.mxu3 %v11245_v16  ;;  %v5343_v41 = vadd.f32 %v5342_v44, %v13605_v36  ;;  %v8353_v53 = vor.u32 %v10185_v40, %v8352_v39  ;;  %v8032_v36 = vld [vmem:[%s15620_s1 + $0xc68] sm:$0xf]  ;;  %v10209_v31 = vld [vmem:[%s15620_s1 + $0xfb4] sm:$0xf0]  ;;  %v8017_v37 = vor.u32 %v10101_v11, %v8016_v10 }
 0x1f2   :  { %5619 = vmatpush.bf16.msrb.mxu3 %v8225_v50  ;;  %v7857_v50 = vor.u32 %v10061_v23, %v7856_v30  ;;  %v8033_v62 = vor.u32 %v10105_v43, %v8032_v36  ;;  %v8320_v29 = vld [vmem:[%s15620_s1 + $0xea8] sm:$0xf]  ;;  %v10177_v30 = vld [vmem:[%s15620_s1 + $0xeb4] sm:$0xf0] }
 0x1f3   :  { %5585 = vmatpush.bf16.msrb.mxu0 %v7761_v56  ;;  %v10137_v56 = vld [vmem:[%s15620_s1 + $0xd74] sm:$0xf0]  ;;  %v5355_v3 = vpop.f32.mrf.mxu2  ;;  %v8321_v38 = vor.u32 %v10177_v30, %v8320_v29  ;;  %v8000_v39 = vld [vmem:[%s15620_s1 + $0xc28] sm:$0xf] }
 0x1f4   :  { %5598 = vmatpush.bf16.msrb.mxu1 %v7889_v57  ;;  %v8336_v57 = vld [vmem:[%s15620_s1 + $0xec8] sm:$0xf]  ;;  %v5368_v8 = vpop.f32.mrf.mxu3  ;;  %v5356_v25 = vadd.f32 %v5355_v3, %v5343_v41  ;;  %v5344_v23 = vpop.f32.mrf.mxu1  ;;  %v10097_v40 = vld [vmem:[%s15620_s1 + $0xc34] sm:$0xf0] }
 0x1f5   :  { %5607 = vmatpush.bf16.msrb.mxu2 %v8081_v58  ;;  %v10181_v58 = vld [vmem:[%s15620_s1 + $0xed4] sm:$0xf0]  ;;  %v8128_v41 = vld [vmem:[%s15620_s1 + $0xd28] sm:$0xf]  ;;  %v8001_v43 = vor.u32 %v10097_v40, %v8000_v39 }
 0x1f6   :  { %5620 = vmatpush.bf16.msrb.mxu3 %v8209_v63  ;;  %v8161_v63 = vor.u32 %v10137_v56, %v8160_v54  ;;  %v8337_v32 = vor.u32 %v10181_v58, %v8336_v57  ;;  %v5369_v35 = vadd.f32 %v5368_v8, %v5356_v25  ;;  %v10129_v34 = vld [vmem:[%s15620_s1 + $0xd34] sm:$0xf0]  ;;  %v8304_v45 = vld [vmem:[%s15620_s1 + $0xe88] sm:$0xf] }
 0x1f7   :  { %5586 = vmatpush.bf16.msrb.mxu0 %v7745_v24  ;;  %v8144_v24 = vld [vmem:[%s15620_s1 + $0xd48] sm:$0xf]  ;;  %v10093_v57 = vld [vmem:[%s15620_s1 + $0xc14] sm:$0xf0] }
 0x1f8   :  { %5599 = vmatpush.bf16.msrb.mxu1 %v7873_v27  ;;  %v8465_v27 = vor.u32 %v10213_v61, %v8464_v59  ;;  %v7984_v54 = vld [vmem:[%s15620_s1 + $0xc08] sm:$0xf]  ;;  %v10125_v59 = vld [vmem:[%s15620_s1 + $0xd14] sm:$0xf0] }
 0x1f9   :  { %5608 = vmatpush.bf16.msrb.mxu2 %v8065_v28  ;;  %v10133_v28 = vld [vmem:[%s15620_s1 + $0xd54] sm:$0xf0]  ;;  %v8112_v58 = vld [vmem:[%s15620_s1 + $0xd08] sm:$0xf]  ;;  %v7985_v25 = vor.u32 %v10093_v57, %v7984_v54 }
 0x1fa   :  { %5621 = vmatpush.bf16.msrb.mxu3 %v8193_v33  ;;  %v8448_v33 = vld [vmem:[%s15620_s1 + $0xfa8] sm:$0xf]  ;;  %v8145_v44 = vor.u32 %v10133_v28, %v8144_v24  ;;  %v10201_v10 = vld [vmem:[%s15620_s1 + $0xf74] sm:$0xf0]  ;;  %v8113_v29 = vor.u32 %v10125_v59, %v8112_v58 }
 0x1fb   :  { %5587 = vmatpush.bf16.msrb.mxu0 %v7729_v42  ;;  %v8449_v42 = vor.u32 %v10209_v31, %v8448_v33  ;;  %v5357_v61 = vpop.f32.mrf.mxu2  ;;  %v8288_v3 = vld [vmem:[%s15620_s1 + $0xe68] sm:$0xf]  ;;  %v10249_v24 = vld [vmem:[%s15620_s1 + $0x10f4] sm:$0xf0] }
 0x1fc   :  { %5600 = vmatpush.bf16.msrb.mxu1 %v7857_v50  ;;  %v10173_v50 = vld [vmem:[%s15620_s1 + $0xe94] sm:$0xf0]  ;;  %v8416_v8 = vld [vmem:[%s15620_s1 + $0xf68] sm:$0xf] }
 0x1fd   :  { %5609 = vmatpush.bf16.msrb.mxu2 %v8049_v51  ;;  %v5381_v51 = vpop.f32.mrf.mxu0  ;;  %v8305_v56 = vor.u32 %v10173_v50, %v8304_v45  ;;  %v8608_v11 = vld [vmem:[%s15620_s1 + $0x10e8] sm:$0xf]  ;;  %v10281_v28 = vld [vmem:[%s15620_s1 + $0x11f4] sm:$0xf0]  ;;  %v8417_v23 = vor.u32 %v10201_v10, %v8416_v8 }
 0x1fe   :  { %5622 = vmatpush.bf16.msrb.mxu3 %v8177_v52  ;;  %5588 = vmatmul.bf16.vlgmr.msrb.gmra.mxu0 %v11243_v15  ;;  %v8432_v52 = vld [vmem:[%s15620_s1 + $0xf88] sm:$0xf]  ;;  %v13804_v36 = vadd.f32 %v5381_v51, %v5369_v35  ;;  %v8609_v33 = vor.u32 %v10249_v24, %v8608_v11  ;;  %v10165_v35 = vld [vmem:[%s15620_s1 + $0xe54] sm:$0xf0] }
 0x1ff   :  { %5632 = vmatpush.bf16.msra.mxu0 %v8353_v53  ;;  %5601 = vmatmul.bf16.vlgmr.msrb.gmra.mxu1 %v11247_v17  ;;  %v10205_v53 = vld [vmem:[%s15620_s1 + $0xf94] sm:$0xf0]  ;;  %v8272_v31 = vld [vmem:[%s15620_s1 + $0xe48] sm:$0xf] }
 0x200   :  { %5645 = vmatpush.bf16.msra.mxu1 %v8481_v55  ;;  %v8129_v55 = vor.u32 %v10129_v34, %v8128_v41  ;;  %v8592_v39 = vld [vmem:[%s15620_s1 + $0x10c8] sm:$0xf]  ;;  %v10245_v40 = vld [vmem:[%s15620_s1 + $0x10d4] sm:$0xf0]  ;;  %v8273_v45 = vor.u32 %v10165_v35, %v8272_v31 }
 0x201   :  { %5610 = vmatpush.bf16.msrb.mxu2 %v8033_v62  ;;  %v5370_v62 = vpop.f32.mrf.mxu3  ;;  %v10277_v34 = vld [vmem:[%s15620_s1 + $0x11d4] sm:$0xf0]  ;;  %v8593_v51 = vor.u32 %v10245_v40, %v8592_v39  ;;  %v8704_v58 = vld [vmem:[%s15620_s1 + $0x11a8] sm:$0xf] }
 0x202   :  { %5623 = vmatpush.bf16.msrb.mxu3 %v8161_v63  ;;  %v8433_v63 = vor.u32 %v10205_v53, %v8432_v52  ;;  %v8256_v52 = vld [vmem:[%s15620_s1 + $0xe28] sm:$0xf]  ;;  %v10161_v53 = vld [vmem:[%s15620_s1 + $0xe34] sm:$0xf0] }
 0x203   :  { %5633 = vmatpush.bf16.msra.mxu0 %v8337_v32  ;;  %v10169_v32 = vld [vmem:[%s15620_s1 + $0xe74] sm:$0xf0]  ;;  %v8257_v61 = vor.u32 %v10161_v53, %v8256_v52  ;;  %v8240_v62 = vld [vmem:[%s15620_s1 + $0xe08] sm:$0xf] }
 0x204   :  { %5646 = vmatpush.bf16.msra.mxu1 %v8465_v27  ;;  %v8736_v27 = vld [vmem:[%s15620_s1 + $0x11e8] sm:$0xf]  ;;  %v8289_v30 = vor.u32 %v10169_v32, %v8288_v3  ;;  %v10241_v57 = vld [vmem:[%s15620_s1 + $0x10b4] sm:$0xf0] }
 0x205   :  { %5611 = vmatpush.bf16.msrb.mxu2 %v8017_v37  ;;  %v8400_v37 = vld [vmem:[%s15620_s1 + $0xf48] sm:$0xf]  ;;  %v5383_v41 = vpop.f32.mrf.mxu0  ;;  %v10273_v59 = vld [vmem:[%s15620_s1 + $0x11b4] sm:$0xf0] }
 0x206   :  { %5624 = vmatpush.bf16.msrb.mxu3 %v8145_v44  ;;  %v8737_v44 = vor.u32 %v10281_v28, %v8736_v27  ;;  %v10157_v32 = vld [vmem:[%s15620_s1 + $0xe14] sm:$0xf0]  ;;  %v8368_v8 = vld [vmem:[%s15620_s1 + $0xf08] sm:$0xf]  ;;  %v8705_v11 = vor.u32 %v10273_v59, %v8704_v58 }
 0x207   :  { %5634 = vmatpush.bf16.msra.mxu0 %v8321_v38  ;;  %v10197_v38 = vld [vmem:[%s15620_s1 + $0xf54] sm:$0xf0]  ;;  %v8560_v24 = vld [vmem:[%s15620_s1 + $0x1088] sm:$0xf]  ;;  %v8241_v31 = vor.u32 %v10157_v32, %v8240_v62 }
 0x208   :  { %5647 = vmatpush.bf16.msra.mxu1 %v8449_v42  ;;  %v8720_v42 = vld [vmem:[%s15620_s1 + $0x11c8] sm:$0xf]  ;;  %v8401_v50 = vor.u32 %v10197_v38, %v8400_v37  ;;  %v10189_v10 = vld [vmem:[%s15620_s1 + $0xf14] sm:$0xf0] }
 0x209   :  { %5612 = vmatpush.bf16.msrb.mxu2 %v8001_v43  ;;  %v8384_v43 = vld [vmem:[%s15620_s1 + $0xf28] sm:$0xf]  ;;  %v8721_v54 = vor.u32 %v10277_v34, %v8720_v42  ;;  %v10345_v37 = vld [vmem:[%s15620_s1 + $0x13f4] sm:$0xf0] }
 0x20a   :  { %5625 = vmatpush.bf16.msrb.mxu3 %v8129_v55  ;;  %v10193_v55 = vld [vmem:[%s15620_s1 + $0xf34] sm:$0xf0]  ;;  %v8688_v27 = vld [vmem:[%s15620_s1 + $0x1188] sm:$0xf] }
 0x20b   :  { %5635 = vmatpush.bf16.msra.mxu0 %v8305_v56  ;;  %v8576_v56 = vld [vmem:[%s15620_s1 + $0x10a8] sm:$0xf]  ;;  %v10233_v41 = vld [vmem:[%s15620_s1 + $0x1074] sm:$0xf0] }
 0x20c   :  { %5648 = vmatpush.bf16.msra.mxu1 %v8433_v63  ;;  %v8385_v63 = vor.u32 %v10193_v55, %v8384_v43  ;;  %v8577_v3 = vor.u32 %v10241_v57, %v8576_v56  ;;  %v5394_v28 = vpop.f32.mrf.mxu1  ;;  %v8992_v35 = vld [vmem:[%s15620_s1 + $0x13e8] sm:$0xf]  ;;  %v10341_v53 = vld [vmem:[%s15620_s1 + $0x13d4] sm:$0xf0] }
 0x20d   :  { %5613 = vmatpush.bf16.msrb.mxu2 %v7985_v25  ;;  %v10237_v25 = vld [vmem:[%s15620_s1 + $0x1094] sm:$0xf0]  ;;  %v8672_v42 = vld [vmem:[%s15620_s1 + $0x1168] sm:$0xf]  ;;  %v8993_v34 = vor.u32 %v10345_v37, %v8992_v35 }
 0x20e   :  { %5626 = vmatpush.bf16.msrb.mxu3 %v8113_v29  ;;  %v10269_v29 = vld [vmem:[%s15620_s1 + $0x1194] sm:$0xf0]  ;;  %v8561_v38 = vor.u32 %v10237_v25, %v8560_v24  ;;  %v8976_v52 = vld [vmem:[%s15620_s1 + $0x13c8] sm:$0xf] }
 0x20f   :  { %5636 = vmatpush.bf16.msra.mxu0 %v8289_v30  ;;  %v8864_v30 = vld [vmem:[%s15620_s1 + $0x12e8] sm:$0xf]  ;;  %v8689_v39 = vor.u32 %v10269_v29, %v8688_v27  ;;  %v10229_v59 = vld [vmem:[%s15620_s1 + $0x1054] sm:$0xf0] }
 0x210   :  { %5649 = vmatpush.bf16.msra.mxu1 %v8417_v23  ;;  %5614 = vmatmul.bf16.vlgmr.msrb.gmra.mxu2 %v11409_v46  ;;  %v10313_v23 = vld [vmem:[%s15620_s1 + $0x12f4] sm:$0xf0]  ;;  %v8528_v58 = vld [vmem:[%s15620_s1 + $0x1048] sm:$0xf] }
 0x211   :  { %5658 = vmatpush.bf16.msra.mxu2 %v8609_v33  ;;  %5627 = vmatmul.bf16.vlgmr.msrb.gmra.mxu3 %v11413_v48  ;;  %v5395_v33 = vadd.f32 %v5394_v28, %v13804_v36  ;;  %v8865_v40 = vor.u32 %v10313_v23, %v8864_v30  ;;  %v8544_v36 = vld [vmem:[%s15620_s1 + $0x1068] sm:$0xf]  ;;  %v10261_v32 = vld [vmem:[%s15620_s1 + $0x1154] sm:$0xf0]  ;;  %v8529_v27 = vor.u32 %v10229_v59, %v8528_v58 }
 0x212   :  { %5671 = vmatpush.bf16.msra.mxu3 %v8737_v44  ;;  %v8369_v44 = vor.u32 %v10189_v10, %v8368_v8  ;;  %v8545_v43 = vor.u32 %v10233_v41, %v8544_v36  ;;  %v8832_v8 = vld [vmem:[%s15620_s1 + $0x12a8] sm:$0xf]  ;;  %v10305_v10 = vld [vmem:[%s15620_s1 + $0x12b4] sm:$0xf0] }
 0x213   :  { %5637 = vmatpush.bf16.msra.mxu0 %v8273_v45  ;;  %v10265_v45 = vld [vmem:[%s15620_s1 + $0x1174] sm:$0xf0]  ;;  %v5407_v55 = vpop.f32.mrf.mxu2  ;;  %v8833_v29 = vor.u32 %v10305_v10, %v8832_v8  ;;  %v8512_v30 = vld [vmem:[%s15620_s1 + $0x1028] sm:$0xf] }
 0x214   :  { %5650 = vmatpush.bf16.msra.mxu1 %v8401_v50  ;;  %v8848_v50 = vld [vmem:[%s15620_s1 + $0x12c8] sm:$0xf]  ;;  %v5420_v57 = vpop.f32.mrf.mxu3  ;;  %v5408_v62 = vadd.f32 %v5407_v55, %v5395_v33  ;;  %v10337_v24 = vld [vmem:[%s15620_s1 + $0x13b4] sm:$0xf0] }
 0x215   :  { %5659 = vmatpush.bf16.msra.mxu2 %v8593_v51  ;;  %v10309_v51 = vld [vmem:[%s15620_s1 + $0x12d4] sm:$0xf0]  ;;  %v8640_v33 = vld [vmem:[%s15620_s1 + $0x1128] sm:$0xf] }
 0x216   :  { %5672 = vmatpush.bf16.msra.mxu3 %v8721_v54  ;;  %v8673_v54 = vor.u32 %v10265_v45, %v8672_v42  ;;  %v8849_v56 = vor.u32 %v10309_v51, %v8848_v50  ;;  %v5421_v25 = vadd.f32 %v5420_v57, %v5408_v62  ;;  %v10225_v23 = vld [vmem:[%s15620_s1 + $0x1034] sm:$0xf0]  ;;  %v8816_v37 = vld [vmem:[%s15620_s1 + $0x1288] sm:$0xf] }
 0x217   :  { %5638 = vmatpush.bf16.msra.mxu0 %v8257_v61  ;;  %v8656_v61 = vld [vmem:[%s15620_s1 + $0x1148] sm:$0xf]  ;;  %v10257_v35 = vld [vmem:[%s15620_s1 + $0x1134] sm:$0xf0]  ;;  %v8513_v41 = vor.u32 %v10225_v23, %v8512_v30 }
 0x218   :  { %5651 = vmatpush.bf16.msra.mxu1 %v8385_v63  ;;  %v8977_v63 = vor.u32 %v10341_v53, %v8976_v52  ;;  %v8657_v28 = vor.u32 %v10261_v32, %v8656_v61  ;;  %v8496_v42 = vld [vmem:[%s15620_s1 + $0x1008] sm:$0xf]  ;;  %v10221_v50 = vld [vmem:[%s15620_s1 + $0x1014] sm:$0xf0] }
 0x219   :  { %5660 = vmatpush.bf16.msra.mxu2 %v8577_v3  ;;  %v5396_v3 = vpop.f32.mrf.mxu1  ;;  %v8624_v51 = vld [vmem:[%s15620_s1 + $0x1108] sm:$0xf]  ;;  %v10253_v52 = vld [vmem:[%s15620_s1 + $0x1114] sm:$0xf0] }
 0x21a   :  { %5673 = vmatpush.bf16.msra.mxu3 %v8705_v11  ;;  %v8960_v11 = vld [vmem:[%s15620_s1 + $0x13a8] sm:$0xf]  ;;  %v10329_v58 = vld [vmem:[%s15620_s1 + $0x1374] sm:$0xf0]  ;;  %v8625_v10 = vor.u32 %v10253_v52, %v8624_v51 }
 0x21b   :  { %5639 = vmatpush.bf16.msra.mxu0 %v8241_v31  ;;  %v8961_v31 = vor.u32 %v10337_v24, %v8960_v11  ;;  %v8800_v55 = vld [vmem:[%s15620_s1 + $0x1268] sm:$0xf]  ;;  %v10377_v61 = vld [vmem:[%s15620_s1 + $0x14f4] sm:$0xf0] }
 0x21c   :  { %5652 = vmatpush.bf16.msra.mxu1 %v8369_v44  ;;  %v10301_v44 = vld [vmem:[%s15620_s1 + $0x1294] sm:$0xf0]  ;;  %v5422_v53 = vpop.f32.mrf.mxu3  ;;  %v8928_v57 = vld [vmem:[%s15620_s1 + $0x1368] sm:$0xf] }
 0x21d   :  { %5661 = vmatpush.bf16.msra.mxu2 %v8561_v38  ;;  %v5433_v38 = vpop.f32.mrf.mxu0  ;;  %v8817_v45 = vor.u32 %v10301_v44, %v8816_v37  ;;  %v9120_v59 = vld [vmem:[%s15620_s1 + $0x14e8] sm:$0xf]  ;;  %v10409_v32 = vld [vmem:[%s15620_s1 + $0x15f4] sm:$0xf0]  ;;  %v8929_v24 = vor.u32 %v10329_v58, %v8928_v57 }
 0x21e   :  { %5674 = vmatpush.bf16.msra.mxu3 %v8689_v39  ;;  %5640 = vmatmul.bf16.vlgmr.msra.gmra.mxu0 %v11411_v47  ;;  %v8944_v39 = vld [vmem:[%s15620_s1 + $0x1388] sm:$0xf]  ;;  %v5434_v36 = vadd.f32 %v5433_v38, %v5421_v25  ;;  %v9121_v25 = vor.u32 %v10377_v61, %v9120_v59  ;;  %v10325_v23 = vld [vmem:[%s15620_s1 + $0x1354] sm:$0xf0] }
 0x21f   :  { %5684 = vmatpush.bf16.msrb.mxu0 %v8865_v40  ;;  %5653 = vmatmul.bf16.vlgmr.msra.gmra.mxu1 %v11415_v49  ;;  %v10333_v40 = vld [vmem:[%s15620_s1 + $0x1394] sm:$0xf0]  ;;  %v9248_v3 = vld [vmem:[%s15620_s1 + $0x15e8] sm:$0xf] }
 0x220   :  { %5697 = vmatpush.bf16.msrb.mxu1 %v8993_v34  ;;  %v8641_v34 = vor.u32 %v10257_v35, %v8640_v33  ;;  %v9249_v30 = vor.u32 %v10409_v32, %v9248_v3  ;;  %v9104_v33 = vld [vmem:[%s15620_s1 + $0x14c8] sm:$0xf]  ;;  %v10405_v44 = vld [vmem:[%s15620_s1 + $0x15d4] sm:$0xf0] }
 0x221   :  { %5662 = vmatpush.bf16.msra.mxu2 %v8545_v43  ;;  %v5409_v43 = vpop.f32.mrf.mxu2  ;;  %v5446_v62 = vpop.f32.mrf.mxu1  ;;  %v9232_v37 = vld [vmem:[%s15620_s1 + $0x15c8] sm:$0xf]  ;;  %v10369_v51 = vld [vmem:[%s15620_s1 + $0x14b4] sm:$0xf0] }
 0x222   :  { %5675 = vmatpush.bf16.msra.mxu3 %v8673_v54  ;;  %v8945_v54 = vor.u32 %v10333_v40, %v8944_v39  ;;  %v14039_v8 = vadd.f32 %v5446_v62, %v5434_v36  ;;  %v8768_v36 = vld [vmem:[%s15620_s1 + $0x1228] sm:$0xf]  ;;  %v10401_v53 = vld [vmem:[%s15620_s1 + $0x15b4] sm:$0xf0] }
 0x223   :  { %5685 = vmatpush.bf16.msrb.mxu0 %v8849_v56  ;;  %v10297_v56 = vld [vmem:[%s15620_s1 + $0x1274] sm:$0xf0]  ;;  %v9216_v52 = vld [vmem:[%s15620_s1 + $0x15a8] sm:$0xf] }
 0x224   :  { %5698 = vmatpush.bf16.msrb.mxu1 %v8977_v63  ;;  %v8497_v63 = vor.u32 %v10221_v50, %v8496_v42  ;;  %v8801_v11 = vor.u32 %v10297_v56, %v8800_v55  ;;  %v8896_v42 = vld [vmem:[%s15620_s1 + $0x1328] sm:$0xf]  ;;  %v10285_v58 = vld [vmem:[%s15620_s1 + $0x1214] sm:$0xf0]  ;;  %v9217_v62 = vor.u32 %v10401_v53, %v9216_v52 }
 0x225   :  { %5663 = vmatpush.bf16.msra.mxu2 %v8529_v27  ;;  %v8784_v27 = vld [vmem:[%s15620_s1 + $0x1248] sm:$0xf]  ;;  %v5435_v35 = vpop.f32.mrf.mxu0  ;;  %v10317_v61 = vld [vmem:[%s15620_s1 + $0x1314] sm:$0xf0] }
 0x226   :  { %5676 = vmatpush.bf16.msra.mxu3 %v8657_v28  ;;  %v10293_v28 = vld [vmem:[%s15620_s1 + $0x1254] sm:$0xf0]  ;;  %v9088_v50 = vld [vmem:[%s15620_s1 + $0x14a8] sm:$0xf] }
 0x227   :  { %5686 = vmatpush.bf16.msrb.mxu0 %v8833_v29  ;;  %v8912_v29 = vld [vmem:[%s15620_s1 + $0x1348] sm:$0xf]  ;;  %v8785_v38 = vor.u32 %v10293_v28, %v8784_v27  ;;  %v9089_v57 = vor.u32 %v10369_v51, %v9088_v50  ;;  %v10365_v3 = vld [vmem:[%s15620_s1 + $0x1494] sm:$0xf0] }
 0x228   :  { %5699 = vmatpush.bf16.msrb.mxu1 %v8961_v31  ;;  %v10373_v31 = vld [vmem:[%s15620_s1 + $0x14d4] sm:$0xf0]  ;;  %v8913_v39 = vor.u32 %v10325_v23, %v8912_v29  ;;  %v8752_v55 = vld [vmem:[%s15620_s1 + $0x1208] sm:$0xf] }
 0x229   :  { %5664 = vmatpush.bf16.msra.mxu2 %v8513_v41  ;;  %v9105_v40 = vor.u32 %v10373_v31, %v9104_v33  ;;  %v10289_v41 = vld [vmem:[%s15620_s1 + $0x1234] sm:$0xf0]  ;;  %v5448_v43 = vpop.f32.mrf.mxu1  ;;  %v8880_v59 = vld [vmem:[%s15620_s1 + $0x1308] sm:$0xf] }
 0x22a   :  { %5677 = vmatpush.bf16.msra.mxu3 %v8641_v34  ;;  %v9233_v34 = vor.u32 %v10405_v44, %v9232_v37  ;;  %v9200_v32 = vld [vmem:[%s15620_s1 + $0x1588] sm:$0xf]  ;;  %v10473_v28 = vld [vmem:[%s15620_s1 + $0x17f4] sm:$0xf0]  ;;  %v8881_v29 = vor.u32 %v10317_v61, %v8880_v59  ;;  %v10526_v44 = vld [vmem:[%s15621_s2] sm:$0xf] }
 0x22b   :  { %5687 = vmatpush.bf16.msrb.mxu0 %v8817_v45  ;;  %v10321_v45 = vld [vmem:[%s15620_s1 + $0x1334] sm:$0xf0]  ;;  %v9504_v27 = vld [vmem:[%s15620_s1 + $0x17e8] sm:$0xf] }
 0x22c   :  { %5700 = vmatpush.bf16.msrb.mxu1 %v8945_v54  ;;  %v8769_v54 = vor.u32 %v10289_v41, %v8768_v36  ;;  %v8897_v56 = vor.u32 %v10321_v45, %v8896_v42  ;;  %v9056_v23 = vld [vmem:[%s15620_s1 + $0x1468] sm:$0xf]  ;;  %v10361_v35 = vld [vmem:[%s15620_s1 + $0x1474] sm:$0xf0] }
 0x22d   :  { %5665 = vmatpush.bf16.msra.mxu2 %v8497_v63  ;;  %v9072_v63 = vld [vmem:[%s15620_s1 + $0x1488] sm:$0xf]  ;;  %v10437_v41 = vld [vmem:[%s15620_s1 + $0x16d4] sm:$0xf0]  ;;  %v9057_v45 = vor.u32 %v10361_v35, %v9056_v23 }
 0x22e   :  { %5678 = vmatpush.bf16.msra.mxu3 %v8625_v10  ;;  %v10397_v10 = vld [vmem:[%s15620_s1 + $0x1594] sm:$0xf0]  ;;  %v9184_v37 = vld [vmem:[%s15620_s1 + $0x1568] sm:$0xf] }
 0x22f   :  { %5688 = vmatpush.bf16.msrb.mxu0 %v8801_v11  ;;  %v9376_v11 = vld [vmem:[%s15620_s1 + $0x16e8] sm:$0xf]  ;;  %v9201_v33 = vor.u32 %v10397_v10, %v9200_v32  ;;  %v10357_v43 = vld [vmem:[%s15620_s1 + $0x1454] sm:$0xf0] }
 0x230   :  { %5701 = vmatpush.bf16.msrb.mxu1 %v8929_v24  ;;  %5666 = vmatmul.bf16.vlgmr.msra.gmra.mxu2 %v11646_v9  ;;  %v10441_v24 = vld [vmem:[%s15620_s1 + $0x16f4] sm:$0xf0]  ;;  %v9360_v36 = vld [vmem:[%s15620_s1 + $0x16c8] sm:$0xf] }
 0x231   :  { %5710 = vmatpush.bf16.msrb.mxu2 %v9121_v25  ;;  %5679 = vmatmul.bf16.vlgmr.msra.gmra.mxu3 %v11656_v14  ;;  %v8753_v25 = vor.u32 %v10285_v58, %v8752_v55  ;;  %v9377_v31 = vor.u32 %v10441_v24, %v9376_v11  ;;  %v9488_v42 = vld [vmem:[%s15620_s1 + $0x17c8] sm:$0xf]  ;;  %v9361_v52 = vor.u32 %v10437_v41, %v9360_v36  ;;  %v10389_v58 = vld [vmem:[%s15620_s1 + $0x1554] sm:$0xf0] }
 0x232   :  { %5723 = vmatpush.bf16.msrb.mxu3 %v9249_v30  ;;  %v9073_v30 = vor.u32 %v10365_v3, %v9072_v63  ;;  %v9040_v53 = vld [vmem:[%s15620_s1 + $0x1448] sm:$0xf]  ;;  %v10433_v61 = vld [vmem:[%s15620_s1 + $0x16b4] sm:$0xf0] }
 0x233   :  { %5689 = vmatpush.bf16.msrb.mxu0 %v8785_v38  ;;  %v814_v38 = vperm.slane %v10526_v44, 2  ;;  %v5459_v50 = vpop.f32.mrf.mxu2  ;;  %v9344_v59 = vld [vmem:[%s15620_s1 + $0x16a8] sm:$0xf]  ;;  %v10465_v63 = vld [vmem:[%s15620_s1 + $0x17b4] sm:$0xf0]  ;;  %v9041_v32 = vor.u32 %v10357_v43, %v9040_v53 }
 0x234   :  { %5702 = vmatpush.bf16.msrb.mxu1 %v8913_v39  ;;  %v9505_v39 = vor.u32 %v10473_v28, %v9504_v27  ;;  %v9345_v11 = vor.u32 %v10433_v61, %v9344_v59  ;;  %v9024_v24 = vld [vmem:[%s15620_s1 + $0x1428] sm:$0xf]  ;;  %v10429_v23 = vld [vmem:[%s15620_s1 + $0x1694] sm:$0xf0]  ;;  %v9735_v59 = vld [vmem:[%s15620_s1 + $0xec] sm:$0xf] }
 0x235   :  { %5711 = vmatpush.bf16.msrb.mxu2 %v9105_v40  ;;  %v10393_v40 = vld [vmem:[%s15620_s1 + $0x1574] sm:$0xf0]  ;;  %v5460_v55 = vadd.f32 %v5459_v50, %v814_v38  ;;  %v9152_v27 = vld [vmem:[%s15620_s1 + $0x1528] sm:$0xf]  ;;  %v6562_v61 = vld [vmem:[%s15620_s1 + $0xf8] sm:$0xf0] }
 0x236   :  { %5724 = vmatpush.bf16.msrb.mxu3 %v9233_v34  ;;  %v10469_v34 = vld [vmem:[%s15620_s1 + $0x17d4] sm:$0xf0]  ;;  %v9185_v51 = vor.u32 %v10393_v40, %v9184_v37  ;;  %v9008_v44 = vld [vmem:[%s15620_s1 + $0x1408] sm:$0xf] }
 0x237   :  { %5690 = vmatpush.bf16.msrb.mxu0 %v8769_v54  ;;  %v9168_v54 = vld [vmem:[%s15620_s1 + $0x1548] sm:$0xf]  ;;  %v10425_v53 = vld [vmem:[%s15620_s1 + $0x1674] sm:$0xf0] }
 0x238   :  { %5703 = vmatpush.bf16.msrb.mxu1 %v8897_v56  ;;  %v5472_v56 = vpop.f32.mrf.mxu3  ;;  %v9169_v10 = vor.u32 %v10389_v58, %v9168_v54  ;;  %v9440_v43 = vld [vmem:[%s15620_s1 + $0x1768] sm:$0xf] }
 0x239   :  { %5712 = vmatpush.bf16.msrb.mxu2 %v9089_v57  ;;  %v9489_v57 = vor.u32 %v10469_v34, %v9488_v42  ;;  %v5473_v3 = vadd.f32 %v5472_v56, %v5460_v55  ;;  %v10349_v42 = vld [vmem:[%s15620_s1 + $0x1414] sm:$0xf0]  ;;  %v9136_v34 = vld [vmem:[%s15620_s1 + $0x1508] sm:$0xf] }
 0x23a   :  { %5725 = vmatpush.bf16.msrb.mxu3 %v9217_v62  ;;  %v9472_v62 = vld [vmem:[%s15620_s1 + $0x17a8] sm:$0xf]  ;;  %v10457_v55 = vld [vmem:[%s15620_s1 + $0x1774] sm:$0xf0]  ;;  %v9009_v58 = vor.u32 %v10349_v42, %v9008_v44 }
 0x23b   :  { %5691 = vmatpush.bf16.msrb.mxu0 %v8753_v25  ;;  %v10353_v25 = vld [vmem:[%s15620_s1 + $0x1434] sm:$0xf0]  ;;  %v9473_v28 = vor.u32 %v10465_v63, %v9472_v62  ;;  %v5485_v35 = vpop.f32.mrf.mxu0  ;;  %v5461_v40 = vpop.f32.mrf.mxu2  ;;  %v9568_v56 = vld [vmem:[%s15620_s1 + $0x1868] sm:$0xf] }
 0x23c   :  { %5704 = vmatpush.bf16.msrb.mxu1 %v8881_v29  ;;  %v10385_v29 = vld [vmem:[%s15620_s1 + $0x1534] sm:$0xf0]  ;;  %v9025_v37 = vor.u32 %v10353_v25, %v9024_v24  ;;  %v5486_v38 = vadd.f32 %v5485_v35, %v5473_v3  ;;  %v9441_v3 = vor.u32 %v10457_v55, %v9440_v43  ;;  %v9424_v24 = vld [vmem:[%s15620_s1 + $0x1748] sm:$0xf]  ;;  %v6565_v25 = vor.u32 %v9735_v59, %v6562_v61 }
 0x23d   :  { %5713 = vmatpush.bf16.msrb.mxu2 %v9073_v30  ;;  %v9328_v30 = vld [vmem:[%s15620_s1 + $0x1688] sm:$0xf]  ;;  %v9153_v36 = vor.u32 %v10385_v29, %v9152_v27  ;;  %v10453_v27 = vld [vmem:[%s15620_s1 + $0x1754] sm:$0xf0] }
 0x23e   :  { %5726 = vmatpush.bf16.msrb.mxu3 %v9201_v33  ;;  %5692 = vmatmul.bf16.vlgmr.msrb.gmra.mxu0 %v11654_v13  ;;  %v9456_v33 = vld [vmem:[%s15620_s1 + $0x1788] sm:$0xf]  ;;  %v9329_v41 = vor.u32 %v10429_v23, %v9328_v30  ;;  %v10485_v29 = vld [vmem:[%s15620_s1 + $0x1854] sm:$0xf0]  ;;  %v9731_v23 = vld [vmem:[%s15620_s1 + $0xcc] sm:$0xf] }
 0x23f   :  { %5736 = vmatpush.bf16.msra.mxu0 %v9377_v31  ;;  %5705 = vmatmul.bf16.vlgmr.msrb.gmra.mxu1 %v11658_v18  ;;  %v10461_v31 = vld [vmem:[%s15620_s1 + $0x1794] sm:$0xf0]  ;;  %v9408_v40 = vld [vmem:[%s15620_s1 + $0x1728] sm:$0xf] }
 0x240   :  { %5749 = vmatpush.bf16.msra.mxu1 %v9505_v39  ;;  %v5498_v39 = vpop.f32.mrf.mxu1  ;;  %v5474_v50 = vpop.f32.mrf.mxu3  ;;  %v9536_v42 = vld [vmem:[%s15620_s1 + $0x1828] sm:$0xf]  ;;  %v10477_v61 = vld [vmem:[%s15620_s1 + $0x1814] sm:$0xf0] }
 0x241   :  { %5714 = vmatpush.bf16.msrb.mxu2 %v9057_v45  ;;  %v10381_v45 = vld [vmem:[%s15620_s1 + $0x1514] sm:$0xf0]  ;;  %v14225_v54 = vadd.f32 %v5498_v39, %v5486_v38  ;;  %v9280_v38 = vld [vmem:[%s15620_s1 + $0x1628] sm:$0xf]  ;;  %v6530_v50 = vld [vmem:[%s15620_s1 + $0xb8] sm:$0xf0] }
 0x242   :  { %5727 = vmatpush.bf16.msrb.mxu3 %v9185_v51  ;;  %v9457_v51 = vor.u32 %v10461_v31, %v9456_v33  ;;  %v9137_v62 = vor.u32 %v10381_v45, %v9136_v34  ;;  %v6546_v33 = vld [vmem:[%s15620_s1 + $0xd8] sm:$0xf0]  ;;  %v10417_v39 = vld [vmem:[%s15620_s1 + $0x1634] sm:$0xf0]  ;;  %v9727_v45 = vld [vmem:[%s15620_s1 + $0xac] sm:$0xf] }
 0x243   :  { %5737 = vmatpush.bf16.msra.mxu0 %v9361_v52  ;;  %v9312_v52 = vld [vmem:[%s15620_s1 + $0x1668] sm:$0xf]  ;;  %v5487_v30 = vpop.f32.mrf.mxu0  ;;  %v10481_v34 = vld [vmem:[%s15620_s1 + $0x1834] sm:$0xf0]  ;;  %v6533_v59 = vor.u32 %v9727_v45, %v6530_v50  ;;  %v9715_v50 = vld [vmem:[%s15620_s1 + $0x4c] sm:$0xf] }
 0x244   :  { %5750 = vmatpush.bf16.msra.mxu1 %v9489_v57  ;;  %v10489_v57 = vld [vmem:[%s15620_s1 + $0x1874] sm:$0xf0]  ;;  %v9313_v63 = vor.u32 %v10425_v53, %v9312_v52  ;;  %v9264_v52 = vld [vmem:[%s15620_s1 + $0x1608] sm:$0xf]  ;;  %v9537_v55 = vor.u32 %v10481_v34, %v9536_v42 }
 0x245   :  { %5715 = vmatpush.bf16.msrb.mxu2 %v9041_v32  ;;  %v9569_v32 = vor.u32 %v10489_v57, %v9568_v56  ;;  %v10413_v53 = vld [vmem:[%s15620_s1 + $0x1614] sm:$0xf0]  ;;  %v9392_v56 = vld [vmem:[%s15620_s1 + $0x1708] sm:$0xf] }
 0x246   :  { %5728 = vmatpush.bf16.msrb.mxu3 %v9169_v10  ;;  %v9296_v10 = vld [vmem:[%s15620_s1 + $0x1648] sm:$0xf]  ;;  %v10445_v57 = vld [vmem:[%s15620_s1 + $0x1714] sm:$0xf0] }
 0x247   :  { %5738 = vmatpush.bf16.msra.mxu0 %v9345_v11  ;;  %v10421_v11 = vld [vmem:[%s15620_s1 + $0x1654] sm:$0xf0] }
 0x248   :  { %5751 = vmatpush.bf16.msra.mxu1 %v9473_v28  ;;  %v9552_v28 = vld [vmem:[%s15620_s1 + $0x1848] sm:$0xf]  ;;  %v5500_v31 = vpop.f32.mrf.mxu1  ;;  %v9297_v35 = vor.u32 %v10421_v11, %v9296_v10  ;;  %v9799_v10 = vld [vmem:[%s15620_s1 + $0x2ec] sm:$0xf]  ;;  %v9265_v11 = vor.u32 %v10413_v53, %v9264_v52 }
 0x249   :  { %5716 = vmatpush.bf16.msrb.mxu2 %v9025_v37  ;;  %v9425_v37 = vor.u32 %v10453_v27, %v9424_v24  ;;  %v9553_v44 = vor.u32 %v10485_v29, %v9552_v28  ;;  %v6818_v24 = vld [vmem:[%s15620_s1 + $0x2f8] sm:$0xf0]  ;;  %v9393_v28 = vor.u32 %v10445_v57, %v9392_v56  ;;  %v9759_v56 = vld [vmem:[%s15620_s1 + $0x1ac] sm:$0xf] }
 0x24a   :  { %5729 = vmatpush.bf16.msrb.mxu3 %v9153_v36  ;;  %v6549_v36 = vor.u32 %v9731_v23, %v6546_v33  ;;  %v6946_v27 = vld [vmem:[%s15620_s1 + $0x3f8] sm:$0xf0]  ;;  %v9719_v33 = vld [vmem:[%s15620_s1 + $0x6c] sm:$0xf] }
 0x24b   :  { %5739 = vmatpush.bf16.msra.mxu0 %v9329_v41  ;;  %v10449_v41 = vld [vmem:[%s15620_s1 + $0x1734] sm:$0xf0]  ;;  %v6498_v31 = vld [vmem:[%s15620_s1 + $0x78] sm:$0xf0] }
 0x24c   :  { %5752 = vmatpush.bf16.msra.mxu1 %v9457_v51  ;;  %v9281_v51 = vor.u32 %v10417_v39, %v9280_v38  ;;  %v9409_v43 = vor.u32 %v10449_v41, %v9408_v40  ;;  %v6674_v38 = vld [vmem:[%s15620_s1 + $0x1d8] sm:$0xf0]  ;;  %v9795_v39 = vld [vmem:[%s15620_s1 + $0x2cc] sm:$0xf]  ;;  %v6501_v34 = vor.u32 %v9719_v33, %v6498_v31 }
 0x24d   :  { %5717 = vmatpush.bf16.msrb.mxu2 %v9009_v58  ;;  %v9520_v58 = vld [vmem:[%s15620_s1 + $0x1808] sm:$0xf]  ;;  %v6802_v40 = vld [vmem:[%s15620_s1 + $0x2d8] sm:$0xf0]  ;;  %v9819_v33 = vld [vmem:[%s15620_s1 + $0x38c] sm:$0xf] }
 0x24e   :  { %5730 = vmatpush.bf16.msrb.mxu3 %v9137_v62  ;;  %v9723_v62 = vld [vmem:[%s15620_s1 + $0x8c] sm:$0xf]  ;;  %v9521_v29 = vor.u32 %v10477_v61, %v9520_v58  ;;  %v6930_v41 = vld [vmem:[%s15620_s1 + $0x3d8] sm:$0xf0] }
 0x24f   :  { %5740 = vmatpush.bf16.msra.mxu0 %v9313_v63  ;;  %v6514_v63 = vld [vmem:[%s15620_s1 + $0x98] sm:$0xf0]  ;;  %v9791_v58 = vld [vmem:[%s15620_s1 + $0x2ac] sm:$0xf] }
 0x250   :  { %5753 = vmatpush.bf16.msra.mxu1 %v9441_v3  ;;  %5718 = vmatmul.bf16.vlgmr.msrb.gmra.mxu2 %v11739_v4  ;;  %v9767_v3 = vld [vmem:[%s15620_s1 + $0x1ec] sm:$0xf]  ;;  %v6517_v30 = vor.u32 %v9723_v62, %v6514_v63  ;;  %v6658_v57 = vld [vmem:[%s15620_s1 + $0x1b8] sm:$0xf0] }
 0x251   :  { %5766 = vmatpush.bf16.msra.mxu2 %v9569_v32  ;;  %5731 = vmatmul.bf16.vlgmr.msrb.gmra.mxu3 %v11743_v6  ;;  %v6690_v32 = vld [vmem:[%s15620_s1 + $0x1f8] sm:$0xf0] }
 0x252   :  { %5775 = vmatpush.bf16.msra.mxu3 %v6565_v25  ;;  %v9831_v25 = vld [vmem:[%s15620_s1 + $0x3ec] sm:$0xf]  ;;  %v6693_v23 = vor.u32 %v9767_v3, %v6690_v32  ;;  %v6914_v61 = vld [vmem:[%s15620_s1 + $0x3b8] sm:$0xf0]  ;;  %v6661_v3 = vor.u32 %v9759_v56, %v6658_v57 }
 0x253   :  { %5741 = vmatpush.bf16.msra.mxu0 %v9297_v35  ;;  %v6821_v35 = vor.u32 %v9799_v10, %v6818_v24  ;;  %v5511_v42 = vpop.f32.mrf.mxu2  ;;  %v9711_v32 = vld [vmem:[%s15620_s1 + $0x2c] sm:$0xf]  ;;  %v6466_v10 = vld [vmem:[%s15620_s1 + $0x38] sm:$0xf0] }
 0x254   :  { %5754 = vmatpush.bf16.msra.mxu1 %v9425_v37  ;;  %v6949_v37 = vor.u32 %v9831_v25, %v6946_v27  ;;  %v5512_v52 = vadd.f32 %v5511_v42, %v14225_v54  ;;  %v5524_v53 = vpop.f32.mrf.mxu3  ;;  %v6786_v54 = vld [vmem:[%s15620_s1 + $0x2b8] sm:$0xf0]  ;;  %v9755_v25 = vld [vmem:[%s15620_s1 + $0x18c] sm:$0xf] }
 0x255   :  { %5767 = vmatpush.bf16.msra.mxu2 %v9553_v44  ;;  %v9763_v44 = vld [vmem:[%s15620_s1 + $0x1cc] sm:$0xf]  ;;  %v6642_v27 = vld [vmem:[%s15620_s1 + $0x198] sm:$0xf0] }
 0x256   :  { %5776 = vmatpush.bf16.msra.mxu3 %v6549_v36  ;;  %v9827_v36 = vld [vmem:[%s15620_s1 + $0x3cc] sm:$0xf]  ;;  %v6677_v45 = vor.u32 %v9763_v44, %v6674_v38  ;;  %v5525_v62 = vadd.f32 %v5524_v53, %v5512_v52  ;;  %v6898_v31 = vld [vmem:[%s15620_s1 + $0x398] sm:$0xf0]  ;;  %v6469_v38 = vor.u32 %v9711_v32, %v6466_v10 }
 0x257   :  { %5742 = vmatpush.bf16.msra.mxu0 %v9281_v51  ;;  %v6482_v51 = vld [vmem:[%s15620_s1 + $0x58] sm:$0xf0]  ;;  %v9783_v52 = vld [vmem:[%s15620_s1 + $0x26c] sm:$0xf] }
 0x258   :  { %5755 = vmatpush.bf16.msra.mxu1 %v9409_v43  ;;  %v6805_v43 = vor.u32 %v9795_v39, %v6802_v40  ;;  %v6485_v63 = vor.u32 %v9715_v50, %v6482_v51  ;;  %v6645_v39 = vor.u32 %v9755_v25, %v6642_v27  ;;  %v9707_v40 = vld [vmem:[%s15620_s1 + $0xc] sm:$0xf]  ;;  %v6626_v51 = vld [vmem:[%s15620_s1 + $0x178] sm:$0xf0] }
 0x259   :  { %5768 = vmatpush.bf16.msra.mxu2 %v9537_v55  ;;  %v6933_v55 = vor.u32 %v9827_v36, %v6930_v41  ;;  %v6450_v36 = vld [vmem:[%s15620_s1 + $0x18] sm:$0xf0]  ;;  %v9751_v50 = vld [vmem:[%s15620_s1 + $0x16c] sm:$0xf] }
 0x25a   :  { %5777 = vmatpush.bf16.msra.mxu3 %v6533_v59  ;;  %v9823_v59 = vld [vmem:[%s15620_s1 + $0x3ac] sm:$0xf]  ;;  %v6754_v53 = vld [vmem:[%s15620_s1 + $0x278] sm:$0xf0] }
 0x25b   :  { %5743 = vmatpush.bf16.msra.mxu0 %v9265_v11  ;;  %v6789_v11 = vor.u32 %v9791_v58, %v6786_v54  ;;  %v6917_v24 = vor.u32 %v9823_v59, %v6914_v61  ;;  %v5513_v44 = vpop.f32.mrf.mxu2  ;;  %v9863_v56 = vld [vmem:[%s15620_s1 + $0x4ec] sm:$0xf]  ;;  %v7074_v57 = vld [vmem:[%s15620_s1 + $0x4f8] sm:$0xf0]  ;;  %v6453_v58 = vor.u32 %v9707_v40, %v6450_v36  ;;  %v6629_v54 = vor.u32 %v9751_v50, %v6626_v51 }
 0x25c   :  { %5756 = vmatpush.bf16.msra.mxu1 %v9393_v28  ;;  %v9787_v28 = vld [vmem:[%s15620_s1 + $0x28c] sm:$0xf]  ;;  %v5526_v41 = vpop.f32.mrf.mxu3  ;;  %v6757_v59 = vor.u32 %v9783_v52, %v6754_v53  ;;  %v7077_v32 = vor.u32 %v9863_v56, %v7074_v57  ;;  %v6738_v10 = vld [vmem:[%s15620_s1 + $0x258] sm:$0xf0] }
 0x25d   :  { %5769 = vmatpush.bf16.msra.mxu2 %v9521_v29  ;;  %v10527_v29 = vld [vmem:[#allocation1] sm:$0xff]  ;;  %v9859_v27 = vld [vmem:[%s15620_s1 + $0x4cc] sm:$0xf]  ;;  %v6850_v40 = vld [vmem:[%s15620_s1 + $0x338] sm:$0xf0] }
 0x25e   :  { %5778 = vmatpush.bf16.msra.mxu3 %v6517_v30  ;;  %5744 = vmatmul.bf16.vlgmr.msra.gmra.mxu0 %v11741_v5  ;;  %v5537_v30 = vpop.f32.mrf.mxu0  ;;  %v9855_v36 = vld [vmem:[%s15620_s1 + $0x4ac] sm:$0xf]  ;;  %v7042_v41 = vld [vmem:[%s15620_s1 + $0x4b8] sm:$0xf0] }
 0x25f   :  { %5788 = vmatpush.bf16.msrb.mxu0 %v6693_v23  ;;  %5757 = vmatmul.bf16.vlgmr.msra.gmra.mxu1 %v11745_v7  ;;  %v6770_v23 = vld [vmem:[%s15620_s1 + $0x298] sm:$0xf0]  ;;  %v9771_v53 = vld [vmem:[%s15620_s1 + $0x20c] sm:$0xf] }
 0x260   :  { %5801 = vmatpush.bf16.msrb.mxu1 %v6821_v35  ;;  %9576 = vmatmul.msk.bf16.vlgmr.msra.gmra.mxu2 %vm4797_vm0, %v10527_v29  ;;  %v5538_v35 = vadd.f32 %v5537_v30, %v5525_v62  ;;  %v6773_v42 = vor.u32 %v9787_v28, %v6770_v23  ;;  %v9747_v62 = vld [vmem:[%s15620_s1 + $0x14c] sm:$0xf]  ;;  %v7058_v28 = vld [vmem:[%s15620_s1 + $0x4d8] sm:$0xf0] }
 0x261   :  { %5814 = vmatpush.bf16.msrb.mxu2 %v6949_v37  ;;  %v5550_v37 = vpop.f32.mrf.mxu1  ;;  %v7061_v44 = vor.u32 %v9859_v27, %v7058_v28  ;;  %v6578_v50 = vld [vmem:[%s15620_s1 + $0x118] sm:$0xf0]  ;;  %v9851_v57 = vld [vmem:[%s15620_s1 + $0x48c] sm:$0xf] }
 0x262   :  { %5779 = vmatpush.bf16.msra.mxu3 %v6501_v34  ;;  %v6901_v34 = vor.u32 %v9819_v33, %v6898_v31  ;;  %v9743_v31 = vld [vmem:[%s15620_s1 + $0x12c] sm:$0xf]  ;;  %v6834_v56 = vld [vmem:[%s15620_s1 + $0x318] sm:$0xf0] }
 0x263   :  { %5789 = vmatpush.bf16.msrb.mxu0 %v6677_v45  ;;  %v14416_v45 = vadd.f32 %v5550_v37, %v5538_v35  ;;  %v6594_v35 = vld [vmem:[%s15620_s1 + $0x138] sm:$0xf0]  ;;  %v9775_v37 = vld [vmem:[%s15620_s1 + $0x22c] sm:$0xf] }
 0x264   :  { %5802 = vmatpush.bf16.msrb.mxu1 %v6805_v43  ;;  %v9815_v43 = vld [vmem:[%s15620_s1 + $0x36c] sm:$0xf]  ;;  %v7010_v28 = vld [vmem:[%s15620_s1 + $0x478] sm:$0xf0] }
 0x265   :  { %5815 = vmatpush.bf16.msrb.mxu2 %v6933_v55  ;;  %v6882_v55 = vld [vmem:[%s15620_s1 + $0x378] sm:$0xf0]  ;;  %v9847_v27 = vld [vmem:[%s15620_s1 + $0x46c] sm:$0xf] }
 0x266   :  { %5780 = vmatpush.bf16.msra.mxu3 %v6485_v63  ;;  %v6885_v61 = vor.u32 %v9815_v43, %v6882_v55  ;;  %v6610_v63 = vld [vmem:[%s15620_s1 + $0x158] sm:$0xf0]  ;;  %v5539_v25 = vpop.f32.mrf.mxu0  ;;  %v9803_v43 = vld [vmem:[%s15620_s1 + $0x30c] sm:$0xf]  ;;  %v7045_v55 = vor.u32 %v9855_v36, %v7042_v41 }
 0x267   :  { %5790 = vmatpush.bf16.msrb.mxu0 %v6661_v3  ;;  %v9779_v3 = vld [vmem:[%s15620_s1 + $0x24c] sm:$0xf]  ;;  %v6613_v30 = vor.u32 %v9747_v62, %v6610_v63  ;;  %v7330_v63 = vld [vmem:[%s15620_s1 + $0x6f8] sm:$0xf0] }
 0x268   :  { %5803 = vmatpush.bf16.msrb.mxu1 %v6789_v11  ;;  %v9811_v11 = vld [vmem:[%s15620_s1 + $0x34c] sm:$0xf]  ;;  %v6741_v23 = vor.u32 %v9779_v3, %v6738_v10 }
 0x269   :  { %5816 = vmatpush.bf16.msrb.mxu2 %v6917_v24  ;;  %v6866_v24 = vld [vmem:[%s15620_s1 + $0x358] sm:$0xf0]  ;;  %v5552_v29 = vpop.f32.mrf.mxu1  ;;  %v9959_v3 = vld [vmem:[%s15620_s1 + $0x7ec] sm:$0xf] }
 0x26a   :  { %5781 = vmatpush.bf16.msra.mxu3 %v6469_v38  ;;  %v6869_v33 = vor.u32 %v9811_v11, %v6866_v24  ;;  %v6722_v38 = vld [vmem:[%s15620_s1 + $0x238] sm:$0xf0]  ;;  %v6837_v11 = vor.u32 %v9803_v43, %v6834_v56 }
 0x26b   :  { %5791 = vmatpush.bf16.msrb.mxu0 %v6645_v39  ;;  %v9807_v39 = vld [vmem:[%s15620_s1 + $0x32c] sm:$0xf]  ;;  %v6725_v51 = vor.u32 %v9775_v37, %v6722_v38  ;;  %v7298_v43 = vld [vmem:[%s15620_s1 + $0x6b8] sm:$0xf0] }
 0x26c   :  { %5804 = vmatpush.bf16.msrb.mxu1 %v6773_v42  ;;  %v6597_v42 = vor.u32 %v9743_v31, %v6594_v35  ;;  %v6853_v52 = vor.u32 %v9807_v39, %v6850_v40  ;;  %v9923_v31 = vld [vmem:[%s15620_s1 + $0x6cc] sm:$0xf]  ;;  %v7314_v35 = vld [vmem:[%s15620_s1 + $0x6d8] sm:$0xf0]  ;;  %v7013_v39 = vor.u32 %v9847_v27, %v7010_v28 }
 0x26d   :  { %5817 = vmatpush.bf16.msrb.mxu2 %v6901_v34  ;;  %v9739_v34 = vld [vmem:[%s15620_s1 + $0x10c] sm:$0xf]  ;;  %v7426_v56 = vld [vmem:[%s15620_s1 + $0x7b8] sm:$0xf0] }
 0x26e   :  { %5782 = vmatpush.bf16.msra.mxu3 %v6453_v58  ;;  %v7026_v58 = vld [vmem:[%s15620_s1 + $0x498] sm:$0xf0]  ;;  %v6581_v62 = vor.u32 %v9739_v34, %v6578_v50  ;;  %v9955_v37 = vld [vmem:[%s15620_s1 + $0x7cc] sm:$0xf]  ;;  %v7317_v50 = vor.u32 %v9923_v31, %v7314_v35 }
 0x26f   :  { %5792 = vmatpush.bf16.msrb.mxu0 %v6629_v54  ;;  %v9895_v54 = vld [vmem:[%s15620_s1 + $0x5ec] sm:$0xf]  ;;  %v7029_v24 = vor.u32 %v9851_v57, %v7026_v58  ;;  %v6994_v34 = vld [vmem:[%s15620_s1 + $0x458] sm:$0xf0] }
 0x270   :  { %5805 = vmatpush.bf16.msrb.mxu1 %v6757_v59  ;;  %v7202_v59 = vld [vmem:[%s15620_s1 + $0x5f8] sm:$0xf0] }
 0x271   :  { %5818 = vmatpush.bf16.msrb.mxu2 %v6885_v61  ;;  %5783 = vmatmul.bf16.vlgmr.msra.gmra.mxu3 %v10892_v21  ;;  %v6706_v21 = vld [vmem:[%s15620_s1 + $0x218] sm:$0xf0]  ;;  %v9927_v61 = vld [vmem:[%s15620_s1 + $0x6ec] sm:$0xf]  ;;  %v7205_v25 = vor.u32 %v9895_v54, %v7202_v59 }
 0x272   :  { %5827 = vmatpush.bf16.msrb.mxu3 %v7077_v32  ;;  %v7458_v32 = vld [vmem:[%s15620_s1 + $0x7f8] sm:$0xf0]  ;;  %v6709_v10 = vor.u32 %v9771_v53, %v6706_v21  ;;  %v7333_v29 = vor.u32 %v9927_v61, %v7330_v63  ;;  %v9919_v53 = vld [vmem:[%s15620_s1 + $0x6ac] sm:$0xf] }
 0x273   :  { %5793 = vmatpush.bf16.msrb.mxu0 %v6613_v30  ;;  %v7461_v30 = vor.u32 %v9959_v3, %v7458_v32  ;;  %v5563_v38 = vpop.f32.mrf.mxu2  ;;  %v9839_v54 = vld [vmem:[%s15620_s1 + $0x42c] sm:$0xf]  ;;  %v6978_v59 = vld [vmem:[%s15620_s1 + $0x438] sm:$0xf0]  ;;  %v7301_v61 = vor.u32 %v9919_v53, %v7298_v43 }
 0x274   :  { %5806 = vmatpush.bf16.msrb.mxu1 %v6741_v23  ;;  %v9891_v23 = vld [vmem:[%s15620_s1 + $0x5cc] sm:$0xf]  ;;  %v5564_v40 = vadd.f32 %v5563_v38, %v14416_v45  ;;  %v5576_v41 = vpop.f32.mrf.mxu3  ;;  %v7170_v45 = vld [vmem:[%s15620_s1 + $0x5b8] sm:$0xf0]  ;;  %v6981_v27 = vor.u32 %v9839_v54, %v6978_v59 }
 0x275   :  { %5819 = vmatpush.bf16.msrb.mxu2 %v6869_v33  ;;  %v7186_v33 = vld [vmem:[%s15620_s1 + $0x5d8] sm:$0xf0]  ;;  %v9947_v32 = vld [vmem:[%s15620_s1 + $0x78c] sm:$0xf] }
 0x276   :  { %5828 = vmatpush.bf16.msrb.mxu3 %v7061_v44  ;;  %v7442_v44 = vld [vmem:[%s15620_s1 + $0x7d8] sm:$0xf0]  ;;  %v7189_v36 = vor.u32 %v9891_v23, %v7186_v33  ;;  %v5577_v21 = vadd.f32 %v5576_v41, %v5564_v40  ;;  %v9911_v38 = vld [vmem:[%s15620_s1 + $0x66c] sm:$0xf] }
 0x277   :  { %5794 = vmatpush.bf16.msrb.mxu0 %v6597_v42  ;;  %v9843_v42 = vld [vmem:[%s15620_s1 + $0x44c] sm:$0xf]  ;;  %v7282_v3 = vld [vmem:[%s15620_s1 + $0x698] sm:$0xf0] }
 0x278   :  { %5807 = vmatpush.bf16.msrb.mxu1 %v6725_v51  ;;  %v7445_v51 = vor.u32 %v9955_v37, %v7442_v44  ;;  %v6997_v57 = vor.u32 %v9843_v42, %v6994_v34  ;;  %v9879_v37 = vld [vmem:[%s15620_s1 + $0x56c] sm:$0xf]  ;;  %v7138_v44 = vld [vmem:[%s15620_s1 + $0x578] sm:$0xf0] }
 0x279   :  { %5820 = vmatpush.bf16.msrb.mxu2 %v6853_v52  ;;  %v9887_v52 = vld [vmem:[%s15620_s1 + $0x5ac] sm:$0xf]  ;;  %v7586_v42 = vld [vmem:[%s15620_s1 + $0x8f8] sm:$0xf0] }
 0x27a   :  { %5829 = vmatpush.bf16.msrb.mxu3 %v7045_v55  ;;  %v9951_v55 = vld [vmem:[%s15620_s1 + $0x7ac] sm:$0xf]  ;;  %v7173_v58 = vor.u32 %v9887_v52, %v7170_v45  ;;  %v7122_v53 = vld [vmem:[%s15620_s1 + $0x558] sm:$0xf0] }
 0x27b   :  { %5795 = vmatpush.bf16.msrb.mxu0 %v6581_v62  ;;  %v9915_v62 = vld [vmem:[%s15620_s1 + $0x68c] sm:$0xf]  ;;  %v5589_v63 = vpop.f32.mrf.mxu0  ;;  %v7570_v59 = vld [vmem:[%s15620_s1 + $0x8d8] sm:$0xf0] }
 0x27c   :  { %5808 = vmatpush.bf16.msrb.mxu1 %v6709_v10  ;;  %v7410_v10 = vld [vmem:[%s15620_s1 + $0x798] sm:$0xf0]  ;;  %v5578_v23 = vpop.f32.mrf.mxu3  ;;  %v7285_v33 = vor.u32 %v9915_v62, %v7282_v3  ;;  %v9943_v40 = vld [vmem:[%s15620_s1 + $0x76c] sm:$0xf] }
 0x27d   :  { %5821 = vmatpush.bf16.msrb.mxu2 %v6837_v11  ;;  %v5590_v11 = vadd.f32 %v5589_v63, %v5577_v21  ;;  %v7413_v31 = vor.u32 %v9947_v32, %v7410_v10  ;;  %v9991_v41 = vld [vmem:[%s15620_s1 + $0x8ec] sm:$0xf]  ;;  %v7106_v63 = vld [vmem:[%s15620_s1 + $0x538] sm:$0xf0] }
 0x27e   :  { %5830 = vmatpush.bf16.msrb.mxu3 %v7029_v24  ;;  %5796 = vmatmul.bf16.vlgmr.msrb.gmra.mxu0 %v10903_v26  ;;  %v7154_v26 = vld [vmem:[%s15620_s1 + $0x598] sm:$0xf0]  ;;  %v5602_v24 = vpop.f32.mrf.mxu1  ;;  %v9875_v45 = vld [vmem:[%s15620_s1 + $0x54c] sm:$0xf]  ;;  %v7589_v43 = vor.u32 %v9991_v41, %v7586_v42 }
 0x27f   :  { %5840 = vmatpush.bf16.msra.mxu0 %v7205_v25  ;;  %5809 = vmatmul.bf16.vlgmr.msrb.gmra.mxu1 %v10890_v20  ;;  %v9883_v20 = vld [vmem:[%s15620_s1 + $0x58c] sm:$0xf]  ;;  %v5565_v25 = vpop.f32.mrf.mxu2  ;;  %v14615_v35 = vadd.f32 %v5602_v24, %v5590_v11  ;;  %v7234_v10 = vld [vmem:[%s15620_s1 + $0x638] sm:$0xf0] }
 0x280   :  { %5853 = vmatpush.bf16.msra.mxu1 %v7333_v29  ;;  %5822 = vmatmul.bf16.vlgmr.msrb.gmra.mxu2 %v10894_v22  ;;  %v7429_v22 = vor.u32 %v9951_v55, %v7426_v56  ;;  %v7157_v28 = vor.u32 %v9883_v20, %v7154_v26  ;;  %v9835_v29 = vld [vmem:[%s15620_s1 + $0x40c] sm:$0xf]  ;;  %v7250_v55 = vld [vmem:[%s15620_s1 + $0x658] sm:$0xf0] }
 0x281   :  { %5866 = vmatpush.bf16.msra.mxu2 %v7461_v30  ;;  %v6962_v30 = vld [vmem:[%s15620_s1 + $0x418] sm:$0xf0]  ;;  %v9907_v21 = vld [vmem:[%s15620_s1 + $0x64c] sm:$0xf] }
 0x282   :  { %5831 = vmatpush.bf16.msrb.mxu3 %v7013_v39  ;;  %v7266_v39 = vld [vmem:[%s15620_s1 + $0x678] sm:$0xf0]  ;;  %v6965_v34 = vor.u32 %v9835_v29, %v6962_v30  ;;  %v9939_v56 = vld [vmem:[%s15620_s1 + $0x74c] sm:$0xf]  ;;  %v7253_v20 = vor.u32 %v9907_v21, %v7250_v55 }
 0x283   :  { %5841 = vmatpush.bf16.msra.mxu0 %v7189_v36  ;;  %v7394_v36 = vld [vmem:[%s15620_s1 + $0x778] sm:$0xf0]  ;;  %v9987_v54 = vld [vmem:[%s15620_s1 + $0x8cc] sm:$0xf] }
 0x284   :  { %5854 = vmatpush.bf16.msra.mxu1 %v7317_v50  ;;  %v7141_v50 = vor.u32 %v9879_v37, %v7138_v44  ;;  %v7397_v52 = vor.u32 %v9943_v40, %v7394_v36  ;;  %v9871_v62 = vld [vmem:[%s15620_s1 + $0x52c] sm:$0xf]  ;;  %v7573_v32 = vor.u32 %v9987_v54, %v7570_v59  ;;  %v7362_v24 = vld [vmem:[%s15620_s1 + $0x738] sm:$0xf0] }
 0x285   :  { %5867 = vmatpush.bf16.msra.mxu2 %v7445_v51  ;;  %v7269_v51 = vor.u32 %v9911_v38, %v7266_v39  ;;  %v9903_v3 = vld [vmem:[%s15620_s1 + $0x62c] sm:$0xf]  ;;  %v7090_v30 = vld [vmem:[%s15620_s1 + $0x518] sm:$0xf0] }
 0x286   :  { %5832 = vmatpush.bf16.msrb.mxu3 %v6997_v57  ;;  %v7378_v57 = vld [vmem:[%s15620_s1 + $0x758] sm:$0xf0]  ;;  %v9935_v11 = vld [vmem:[%s15620_s1 + $0x72c] sm:$0xf] }
 0x287   :  { %5842 = vmatpush.bf16.msra.mxu0 %v7173_v58  ;;  %v5591_v58 = vpop.f32.mrf.mxu0  ;;  %v7381_v26 = vor.u32 %v9939_v56, %v7378_v57  ;;  %v9983_v25 = vld [vmem:[%s15620_s1 + $0x8ac] sm:$0xf]  ;;  %v7365_v23 = vor.u32 %v9935_v11, %v7362_v24  ;;  %v7346_v38 = vld [vmem:[%s15620_s1 + $0x718] sm:$0xf0] }
 0x288   :  { %5855 = vmatpush.bf16.msra.mxu1 %v7301_v61  ;;  %v5604_v61 = vpop.f32.mrf.mxu1  ;;  %v9867_v29 = vld [vmem:[%s15620_s1 + $0x50c] sm:$0xf]  ;;  %v7538_v40 = vld [vmem:[%s15620_s1 + $0x898] sm:$0xf0] }
 0x289   :  { %5868 = vmatpush.bf16.msra.mxu2 %v7429_v22  ;;  %v7125_v22 = vor.u32 %v9875_v45, %v7122_v53  ;;  %v9931_v37 = vld [vmem:[%s15620_s1 + $0x70c] sm:$0xf]  ;;  %v7714_v41 = vld [vmem:[%s15620_s1 + $0x9f8] sm:$0xf0] }
 0x28a   :  { %5833 = vmatpush.bf16.msrb.mxu3 %v6981_v27  ;;  %v7554_v27 = vld [vmem:[%s15620_s1 + $0x8b8] sm:$0xf0]  ;;  %v9979_v39 = vld [vmem:[%s15620_s1 + $0x88c] sm:$0xf]  ;;  %v7349_v53 = vor.u32 %v9931_v37, %v7346_v38 }
 0x28b   :  { %5843 = vmatpush.bf16.msra.mxu0 %v7157_v28  ;;  %v7109_v28 = vor.u32 %v9871_v62, %v7106_v63  ;;  %v7557_v44 = vor.u32 %v9983_v25, %v7554_v27  ;;  %v10023_v36 = vld [vmem:[%s15620_s1 + $0x9ec] sm:$0xf]  ;;  %v7541_v21 = vor.u32 %v9979_v39, %v7538_v40  ;;  %v7522_v56 = vld [vmem:[%s15620_s1 + $0x878] sm:$0xf0] }
 0x28c   :  { %5856 = vmatpush.bf16.msra.mxu1 %v7285_v33  ;;  %v9899_v33 = vld [vmem:[%s15620_s1 + $0x60c] sm:$0xf]  ;;  %v7698_v59 = vld [vmem:[%s15620_s1 + $0x9d8] sm:$0xf0] }
 0x28d   :  { %5869 = vmatpush.bf16.msra.mxu2 %v7413_v31  ;;  %v7218_v31 = vld [vmem:[%s15620_s1 + $0x618] sm:$0xf0]  ;;  %v10055_v42 = vld [vmem:[%s15620_s1 + $0xaec] sm:$0xf] }
 0x28e   :  { %5834 = vmatpush.bf16.msrb.mxu3 %v6965_v34  ;;  %v7093_v34 = vor.u32 %v9867_v29, %v7090_v30  ;;  %v7221_v45 = vor.u32 %v9899_v33, %v7218_v31  ;;  %v9975_v55 = vld [vmem:[%s15620_s1 + $0x86c] sm:$0xf]  ;;  %v7506_v24 = vld [vmem:[%s15620_s1 + $0x858] sm:$0xf0] }
 0x28f   :  { %5844 = vmatpush.bf16.msra.mxu0 %v7141_v50  ;;  %v7842_v50 = vld [vmem:[%s15620_s1 + $0xaf8] sm:$0xf0]  ;;  %v10019_v54 = vld [vmem:[%s15620_s1 + $0x9cc] sm:$0xf]  ;;  %v7525_v63 = vor.u32 %v9975_v55, %v7522_v56 }
 0x290   :  { %5857 = vmatpush.bf16.msra.mxu1 %v7269_v51  ;;  %v10087_v51 = vld [vmem:[%s15620_s1 + $0xbec] sm:$0xf]  ;;  %v7845_v57 = vor.u32 %v10055_v42, %v7842_v50  ;;  %v7938_v33 = vld [vmem:[%s15620_s1 + $0xbb8] sm:$0xf0] }
 0x291   :  { %5870 = vmatpush.bf16.msra.mxu2 %v7397_v52  ;;  %5835 = vmatmul.bf16.vlgmr.msrb.gmra.mxu3 %v10985_v0  ;;  %v7237_v0 = vor.u32 %v9903_v3, %v7234_v10  ;;  %v7970_v52 = vld [vmem:[%s15620_s1 + $0xbf8] sm:$0xf0]  ;;  %v10051_v61 = vld [vmem:[%s15620_s1 + $0xacc] sm:$0xf] }
 0x292   :  { %5879 = vmatpush.bf16.msra.mxu3 %v7589_v43  ;;  %v7717_v43 = vor.u32 %v10023_v36, %v7714_v41  ;;  %v7973_v58 = vor.u32 %v10087_v51, %v7970_v52  ;;  %v9971_v11 = vld [vmem:[%s15620_s1 + $0x84c] sm:$0xf]  ;;  %v7490_v37 = vld [vmem:[%s15620_s1 + $0x838] sm:$0xf0] }
 0x293   :  { %5845 = vmatpush.bf16.msra.mxu0 %v7125_v22  ;;  %v7826_v22 = vld [vmem:[%s15620_s1 + $0xad8] sm:$0xf0]  ;;  %v5615_v62 = vpop.f32.mrf.mxu2  ;;  %v10047_v29 = vld [vmem:[%s15620_s1 + $0xaac] sm:$0xf] }
 0x294   :  { %5858 = vmatpush.bf16.msra.mxu1 %v7253_v20  ;;  %v10083_v20 = vld [vmem:[%s15620_s1 + $0xbcc] sm:$0xf]  ;;  %v5616_v3 = vadd.f32 %v5615_v62, %v14615_v35  ;;  %v5628_v10 = vpop.f32.mrf.mxu3  ;;  %v7829_v25 = vor.u32 %v10051_v61, %v7826_v22  ;;  %v7682_v35 = vld [vmem:[%s15620_s1 + $0x9b8] sm:$0xf0] }
 0x295   :  { %5871 = vmatpush.bf16.msra.mxu2 %v7381_v26  ;;  %v7954_v26 = vld [vmem:[%s15620_s1 + $0xbd8] sm:$0xf0]  ;;  %v10043_v40 = vld [vmem:[%s15620_s1 + $0xa8c] sm:$0xf] }
 0x296   :  { %5880 = vmatpush.bf16.msra.mxu3 %v7573_v32  ;;  %v7701_v32 = vor.u32 %v10019_v54, %v7698_v59  ;;  %v7957_v27 = vor.u32 %v10083_v20, %v7954_v26  ;;  %v5629_v30 = vadd.f32 %v5628_v10, %v5616_v3  ;;  %v7666_v39 = vld [vmem:[%s15620_s1 + $0x998] sm:$0xf0]  ;;  %v10075_v42 = vld [vmem:[%s15620_s1 + $0xb8c] sm:$0xf] }
 0x297   :  { %5846 = vmatpush.bf16.msra.mxu0 %v7109_v28  ;;  %v10015_v28 = vld [vmem:[%s15620_s1 + $0x9ac] sm:$0xf]  ;;  %v7794_v41 = vld [vmem:[%s15620_s1 + $0xa98] sm:$0xf0] }
 0x298   :  { %5859 = vmatpush.bf16.msra.mxu1 %v7237_v0  ;;  %v7810_v0 = vld [vmem:[%s15620_s1 + $0xab8] sm:$0xf0]  ;;  %v7685_v31 = vor.u32 %v10015_v28, %v7682_v35  ;;  %v7797_v56 = vor.u32 %v10043_v40, %v7794_v41  ;;  %v10007_v54 = vld [vmem:[%s15620_s1 + $0x96c] sm:$0xf] }
 0x299   :  { %5872 = vmatpush.bf16.msra.mxu2 %v7365_v23  ;;  %v10079_v23 = vld [vmem:[%s15620_s1 + $0xbac] sm:$0xf]  ;;  %v7650_v59 = vld [vmem:[%s15620_s1 + $0x978] sm:$0xf0] }
 0x29a   :  { %5881 = vmatpush.bf16.msra.mxu3 %v7557_v44  ;;  %v7813_v44 = vor.u32 %v10047_v29, %v7810_v0  ;;  %v7941_v38 = vor.u32 %v10079_v23, %v7938_v33  ;;  %v10039_v61 = vld [vmem:[%s15620_s1 + $0xa6c] sm:$0xf]  ;;  %v7778_v22 = vld [vmem:[%s15620_s1 + $0xa78] sm:$0xf0] }
 0x29b   :  { %5847 = vmatpush.bf16.msra.mxu0 %v7093_v34  ;;  %v5641_v36 = vpop.f32.mrf.mxu0  ;;  %v7922_v34 = vld [vmem:[%s15620_s1 + $0xb98] sm:$0xf0]  ;;  %v5617_v52 = vpop.f32.mrf.mxu2  ;;  %v10071_v20 = vld [vmem:[%s15620_s1 + $0xb6c] sm:$0xf]  ;;  %v7781_v10 = vor.u32 %v10039_v61, %v7778_v22 }
 0x29c   :  { %5860 = vmatpush.bf16.msra.mxu1 %v7221_v45  ;;  %v5642_v50 = vadd.f32 %v5641_v36, %v5629_v30  ;;  %v5654_v51 = vpop.f32.mrf.mxu1  ;;  %v5630_v55 = vpop.f32.mrf.mxu3  ;;  %v7906_v26 = vld [vmem:[%s15620_s1 + $0xb78] sm:$0xf0]  ;;  %v10119_v62 = vld [vmem:[%s15620_s1 + $0xcec] sm:$0xf] }
 0x29d   :  { %5873 = vmatpush.bf16.msra.mxu2 %v7349_v53  ;;  %v7762_v35 = vld [vmem:[%s15620_s1 + $0xa58] sm:$0xf0]  ;;  %v10067_v29 = vld [vmem:[%s15620_s1 + $0xb4c] sm:$0xf] }
 0x29e   :  { %5882 = vmatpush.bf16.msra.mxu3 %v7541_v21  ;;  %5848 = vmatmul.bf16.vlgmr.msra.gmra.mxu0 %v10989_v2  ;;  %v9967_v2 = vld [vmem:[%s15620_s1 + $0x82c] sm:$0xf]  ;;  %v7890_v30 = vld [vmem:[%s15620_s1 + $0xb58] sm:$0xf0] }
 0x29f   :  { %5892 = vmatpush.bf16.msrb.mxu0 %v7717_v43  ;;  %5861 = vmatmul.bf16.vlgmr.msra.gmra.mxu1 %v10980_v60  ;;  %v10011_v60 = vld [vmem:[%s15620_s1 + $0x98c] sm:$0xf]  ;;  %v7493_v45 = vor.u32 %v9967_v2, %v7490_v37  ;;  %v7474_v43 = vld [vmem:[%s15620_s1 + $0x818] sm:$0xf0]  ;;  %v7893_v37 = vor.u32 %v10067_v29, %v7890_v30 }
 0x2a0   :  { %5905 = vmatpush.bf16.msrb.mxu1 %v7845_v57  ;;  %5874 = vmatmul.bf16.vlgmr.msra.gmra.mxu2 %v10987_v1  ;;  %v7509_v1 = vor.u32 %v9971_v11, %v7506_v24  ;;  %v7669_v53 = vor.u32 %v10011_v60, %v7666_v39  ;;  %v9963_v21 = vld [vmem:[%s15620_s1 + $0x80c] sm:$0xf]  ;;  %v7925_v57 = vor.u32 %v10075_v42, %v7922_v34  ;;  %v8082_v33 = vld [vmem:[%s15620_s1 + $0xcd8] sm:$0xf0] }
 0x2a1   :  { %5918 = vmatpush.bf16.msrb.mxu2 %v7973_v58  ;;  %v14814_v58 = vadd.f32 %v5654_v51, %v5642_v50  ;;  %v7477_v3 = vor.u32 %v9963_v21, %v7474_v43  ;;  %v7909_v11 = vor.u32 %v10071_v20, %v7906_v26  ;;  %v10003_v24 = vld [vmem:[%s15620_s1 + $0x94c] sm:$0xf]  ;;  %v7746_v40 = vld [vmem:[%s15620_s1 + $0xa38] sm:$0xf0] }
 0x2a2   :  { %5883 = vmatpush.bf16.msra.mxu3 %v7525_v63  ;;  %v8098_v63 = vld [vmem:[%s15620_s1 + $0xcf8] sm:$0xf0]  ;;  %v10115_v23 = vld [vmem:[%s15620_s1 + $0xccc] sm:$0xf] }
 0x2a3   :  { %5893 = vmatpush.bf16.msrb.mxu0 %v7701_v32  ;;  %v7653_v32 = vor.u32 %v10007_v54, %v7650_v59  ;;  %v8101_v28 = vor.u32 %v10119_v62, %v8098_v63  ;;  %v5643_v0 = vpop.f32.mrf.mxu0  ;;  %v10031_v60 = vld [vmem:[%s15620_s1 + $0xa2c] sm:$0xf]  ;;  %v8085_v39 = vor.u32 %v10115_v23, %v8082_v33  ;;  %v7874_v41 = vld [vmem:[%s15620_s1 + $0xb38] sm:$0xf0] }
 0x2a4   :  { %5906 = vmatpush.bf16.msrb.mxu1 %v7829_v25  ;;  %v7634_v25 = vld [vmem:[%s15620_s1 + $0x958] sm:$0xf0]  ;;  %v10063_v36 = vld [vmem:[%s15620_s1 + $0xb2c] sm:$0xf] }
 0x2a5   :  { %5919 = vmatpush.bf16.msrb.mxu2 %v7957_v27  ;;  %v10035_v27 = vld [vmem:[%s15620_s1 + $0xa4c] sm:$0xf]  ;;  %v8066_v34 = vld [vmem:[%s15620_s1 + $0xcb8] sm:$0xf0] }
 0x2a6   :  { %5884 = vmatpush.bf16.msra.mxu3 %v7509_v1  ;;  %v5656_v1 = vpop.f32.mrf.mxu1  ;;  %v7765_v2 = vor.u32 %v10035_v27, %v7762_v35  ;;  %v10111_v42 = vld [vmem:[%s15620_s1 + $0xcac] sm:$0xf]  ;;  %v7602_v52 = vld [vmem:[%s15620_s1 + $0x918] sm:$0xf0] }
 0x2a7   :  { %5894 = vmatpush.bf16.msrb.mxu0 %v7685_v31  ;;  %v7637_v31 = vor.u32 %v10003_v24, %v7634_v25  ;;  %v9995_v51 = vld [vmem:[%s15620_s1 + $0x90c] sm:$0xf]  ;;  %v7730_v21 = vld [vmem:[%s15620_s1 + $0xa18] sm:$0xf0]  ;;  %v8069_v55 = vor.u32 %v10111_v42, %v8066_v34 }
 0x2a8   :  { %5907 = vmatpush.bf16.msrb.mxu1 %v7813_v44  ;;  %v9999_v44 = vld [vmem:[%s15620_s1 + $0x92c] sm:$0xf]  ;;  %v8050_v54 = vld [vmem:[%s15620_s1 + $0xc98] sm:$0xf0]  ;;  %v7605_v20 = vor.u32 %v9995_v51, %v7602_v52 }
 0x2a9   :  { %5920 = vmatpush.bf16.msrb.mxu2 %v7941_v38  ;;  %v7618_v38 = vld [vmem:[%s15620_s1 + $0x938] sm:$0xf0]  ;;  %v10059_v43 = vld [vmem:[%s15620_s1 + $0xb0c] sm:$0xf] }
 0x2aa   :  { %5885 = vmatpush.bf16.msra.mxu3 %v7493_v45  ;;  %v7621_v50 = vor.u32 %v9999_v44, %v7618_v38  ;;  %v7877_v45 = vor.u32 %v10063_v36, %v7874_v41  ;;  %v10151_v59 = vld [vmem:[%s15620_s1 + $0xdec] sm:$0xf]  ;;  %v8226_v61 = vld [vmem:[%s15620_s1 + $0xdf8] sm:$0xf0] }
 0x2ab   :  { %5895 = vmatpush.bf16.msrb.mxu0 %v7669_v53  ;;  %v10027_v53 = vld [vmem:[%s15620_s1 + $0xa0c] sm:$0xf]  ;;  %v8354_v26 = vld [vmem:[%s15620_s1 + $0xef8] sm:$0xf0] }
 0x2ac   :  { %5908 = vmatpush.bf16.msrb.mxu1 %v7797_v56  ;;  %v7858_v56 = vld [vmem:[%s15620_s1 + $0xb18] sm:$0xf0]  ;;  %v10183_v22 = vld [vmem:[%s15620_s1 + $0xeec] sm:$0xf] }
 0x2ad   :  { %5921 = vmatpush.bf16.msrb.mxu2 %v7925_v57  ;;  %v10107_v57 = vld [vmem:[%s15620_s1 + $0xc8c] sm:$0xf]  ;;  %v8482_v63 = vld [vmem:[%s15620_s1 + $0xff8] sm:$0xf0]  ;;  %v8357_v27 = vor.u32 %v10183_v22, %v8354_v26 }
 0x2ae   :  { %5886 = vmatpush.bf16.msra.mxu3 %v7477_v3  ;;  %v10215_v62 = vld [vmem:[%s15620_s1 + $0xfec] sm:$0xf]  ;;  %v7733_v3 = vor.u32 %v10027_v53, %v7730_v21  ;;  %v8034_v25 = vld [vmem:[%s15620_s1 + $0xc78] sm:$0xf0] }
 0x2af   :  { %5896 = vmatpush.bf16.msrb.mxu0 %v7653_v32  ;;  %v7861_v32 = vor.u32 %v10059_v43, %v7858_v56  ;;  %v10103_v24 = vld [vmem:[%s15620_s1 + $0xc6c] sm:$0xf]  ;;  %v8210_v29 = vld [vmem:[%s15620_s1 + $0xdd8] sm:$0xf0] }
 0x2b0   :  { %5909 = vmatpush.bf16.msrb.mxu1 %v7781_v10  ;;  %v8053_v10 = vor.u32 %v10107_v57, %v8050_v54  ;;  %v10147_v35 = vld [vmem:[%s15620_s1 + $0xdcc] sm:$0xf]  ;;  %v8338_v0 = vld [vmem:[%s15620_s1 + $0xed8] sm:$0xf0] }
 0x2b1   :  { %5922 = vmatpush.bf16.msrb.mxu2 %v7909_v11  ;;  %5887 = vmatmul.bf16.vlgmr.msra.gmra.mxu3 %v11235_v12  ;;  %v7749_v12 = vor.u32 %v10031_v60, %v7746_v40  ;;  %v8229_v11 = vor.u32 %v10151_v59, %v8226_v61  ;;  %v10179_v30 = vld [vmem:[%s15620_s1 + $0xecc] sm:$0xf]  ;;  %v8466_v33 = vld [vmem:[%s15620_s1 + $0xfd8] sm:$0xf0] }
 0x2b2   :  { %5931 = vmatpush.bf16.msrb.mxu3 %v8101_v28  ;;  %v8485_v28 = vor.u32 %v10215_v62, %v8482_v63  ;;  %v10211_v23 = vld [vmem:[%s15620_s1 + $0xfcc] sm:$0xf]  ;;  %v8018_v60 = vld [vmem:[%s15620_s1 + $0xc58] sm:$0xf0] }
 0x2b3   :  { %5897 = vmatpush.bf16.msrb.mxu0 %v7637_v31  ;;  %v5667_v1 = vpop.f32.mrf.mxu2  ;;  %v8037_v31 = vor.u32 %v10103_v24, %v8034_v25  ;;  %v10099_v38 = vld [vmem:[%s15620_s1 + $0xc4c] sm:$0xf]  ;;  %v8469_v40 = vor.u32 %v10211_v23, %v8466_v33  ;;  %v8322_v34 = vld [vmem:[%s15620_s1 + $0xeb8] sm:$0xf0] }
 0x2b4   :  { %5910 = vmatpush.bf16.msrb.mxu1 %v7765_v2  ;;  %v5668_v2 = vadd.f32 %v5667_v1, %v14814_v58  ;;  %v5680_v44 = vpop.f32.mrf.mxu3  ;;  %v10143_v36 = vld [vmem:[%s15620_s1 + $0xdac] sm:$0xf]  ;;  %v8194_v58 = vld [vmem:[%s15620_s1 + $0xdb8] sm:$0xf0] }
 0x2b5   :  { %5923 = vmatpush.bf16.msrb.mxu2 %v7893_v37  ;;  %v8213_v37 = vor.u32 %v10147_v35, %v8210_v29  ;;  %v10175_v41 = vld [vmem:[%s15620_s1 + $0xeac] sm:$0xf]  ;;  %v8450_v51 = vld [vmem:[%s15620_s1 + $0xfb8] sm:$0xf0]  ;;  %v8197_v52 = vor.u32 %v10143_v36, %v8194_v58 }
 0x2b6   :  { %5932 = vmatpush.bf16.msrb.mxu3 %v8085_v39  ;;  %v8341_v39 = vor.u32 %v10179_v30, %v8338_v0  ;;  %v5681_v42 = vadd.f32 %v5680_v44, %v5668_v2  ;;  %v8178_v21 = vld [vmem:[%s15620_s1 + $0xd98] sm:$0xf0]  ;;  %v10171_v43 = vld [vmem:[%s15620_s1 + $0xe8c] sm:$0xf] }
 0x2b7   :  { %5898 = vmatpush.bf16.msrb.mxu0 %v7621_v50  ;;  %v10207_v50 = vld [vmem:[%s15620_s1 + $0xfac] sm:$0xf]  ;;  %v8306_v56 = vld [vmem:[%s15620_s1 + $0xe98] sm:$0xf0] }
 0x2b8   :  { %5911 = vmatpush.bf16.msrb.mxu1 %v7749_v12  ;;  %v8002_v12 = vld [vmem:[%s15620_s1 + $0xc38] sm:$0xf0]  ;;  %v8453_v53 = vor.u32 %v10207_v50, %v8450_v51  ;;  %v10203_v57 = vld [vmem:[%s15620_s1 + $0xf8c] sm:$0xf] }
 0x2b9   :  { %5924 = vmatpush.bf16.msrb.mxu2 %v7877_v45  ;;  %v8325_v45 = vor.u32 %v10175_v41, %v8322_v34  ;;  %v8434_v54 = vld [vmem:[%s15620_s1 + $0xf98] sm:$0xf0]  ;;  %v10091_v62 = vld [vmem:[%s15620_s1 + $0xc0c] sm:$0xf] }
 0x2ba   :  { %5933 = vmatpush.bf16.msrb.mxu3 %v8069_v55  ;;  %v7986_v63 = vld [vmem:[%s15620_s1 + $0xc18] sm:$0xf0]  ;;  %v10135_v24 = vld [vmem:[%s15620_s1 + $0xd6c] sm:$0xf] }
 0x2bb   :  { %5899 = vmatpush.bf16.msrb.mxu0 %v7605_v20  ;;  %v5693_v55 = vpop.f32.mrf.mxu0  ;;  %v5669_v22 = vpop.f32.mrf.mxu2  ;;  %v8162_v25 = vld [vmem:[%s15620_s1 + $0xd78] sm:$0xf0]  ;;  %v10199_v35 = vld [vmem:[%s15620_s1 + $0xf6c] sm:$0xf]  ;;  %v7989_v23 = vor.u32 %v10091_v62, %v7986_v63 }
 0x2bc   :  { %5912 = vmatpush.bf16.msrb.mxu1 %v7733_v3  ;;  %v5694_v59 = vadd.f32 %v5693_v55, %v5681_v42  ;;  %v5706_v61 = vpop.f32.mrf.mxu1  ;;  %v5682_v3 = vpop.f32.mrf.mxu3  ;;  %v8418_v29 = vld [vmem:[%s15620_s1 + $0xf78] sm:$0xf0]  ;;  %v10247_v30 = vld [vmem:[%s15620_s1 + $0x10ec] sm:$0xf]  ;;  %v8165_v33 = vor.u32 %v10135_v24, %v8162_v25 }
 0x2bd   :  { %5925 = vmatpush.bf16.msrb.mxu2 %v7861_v32  ;;  %v8309_v32 = vor.u32 %v10171_v43, %v8306_v56  ;;  %v8610_v0 = vld [vmem:[%s15620_s1 + $0x10f8] sm:$0xf0]  ;;  %v10131_v2 = vld [vmem:[%s15620_s1 + $0xd4c] sm:$0xf] }
 0x2be   :  { %5934 = vmatpush.bf16.msrb.mxu3 %v8053_v10  ;;  %5900 = vmatmul.bf16.vlgmr.msrb.gmra.mxu0 %v11245_v16  ;;  %v8021_v16 = vor.u32 %v10099_v38, %v8018_v60  ;;  %v8437_v10 = vor.u32 %v10203_v57, %v8434_v54  ;;  %v10163_v44 = vld [vmem:[%s15620_s1 + $0xe4c] sm:$0xf]  ;;  %v8613_v38 = vor.u32 %v10247_v30, %v8610_v0  ;;  %v8274_v60 = vld [vmem:[%s15620_s1 + $0xe58] sm:$0xf0] }
 0x2bf   :  { %5944 = vmatpush.bf16.msra.mxu0 %v8229_v11  ;;  %5913 = vmatmul.bf16.vlgmr.msrb.gmra.mxu1 %v11243_v15  ;;  %v10139_v15 = vld [vmem:[%s15620_s1 + $0xd8c] sm:$0xf]  ;;  %v15013_v11 = vadd.f32 %v5706_v61, %v5694_v59  ;;  %v8594_v41 = vld [vmem:[%s15620_s1 + $0x10d8] sm:$0xf0]  ;;  %v8277_v50 = vor.u32 %v10163_v44, %v8274_v60 }
 0x2c0   :  { %5957 = vmatpush.bf16.msra.mxu1 %v8357_v27  ;;  %5926 = vmatmul.bf16.vlgmr.msrb.gmra.mxu2 %v11247_v17  ;;  %v10095_v17 = vld [vmem:[%s15620_s1 + $0xc2c] sm:$0xf]  ;;  %v8181_v26 = vor.u32 %v10139_v15, %v8178_v21  ;;  %v8386_v15 = vld [vmem:[%s15620_s1 + $0xf38] sm:$0xf0] }
 0x2c1   :  { %5970 = vmatpush.bf16.msra.mxu2 %v8485_v28  ;;  %v8005_v20 = vor.u32 %v10095_v17, %v8002_v12  ;;  %v10167_v27 = vld [vmem:[%s15620_s1 + $0xe6c] sm:$0xf]  ;;  %v8290_v28 = vld [vmem:[%s15620_s1 + $0xe78] sm:$0xf0] }
 0x2c2   :  { %5935 = vmatpush.bf16.msrb.mxu3 %v8037_v31  ;;  %v8293_v1 = vor.u32 %v10167_v27, %v8290_v28  ;;  %v8421_v31 = vor.u32 %v10199_v35, %v8418_v29  ;;  %v10243_v58 = vld [vmem:[%s15620_s1 + $0x10cc] sm:$0xf]  ;;  %v8578_v43 = vld [vmem:[%s15620_s1 + $0x10b8] sm:$0xf0] }
 0x2c3   :  { %5945 = vmatpush.bf16.msra.mxu0 %v8213_v37  ;;  %v8146_v37 = vld [vmem:[%s15620_s1 + $0xd58] sm:$0xf0]  ;;  %v5695_v36 = vpop.f32.mrf.mxu0  ;;  %v10159_v17 = vld [vmem:[%s15620_s1 + $0xe2c] sm:$0xf]  ;;  %v8597_v12 = vor.u32 %v10243_v58, %v8594_v41 }
 0x2c4   :  { %5958 = vmatpush.bf16.msra.mxu1 %v8341_v39  ;;  %v10195_v39 = vld [vmem:[%s15620_s1 + $0xf4c] sm:$0xf]  ;;  %v5708_v42 = vpop.f32.mrf.mxu1  ;;  %v8149_v34 = vor.u32 %v10131_v2, %v8146_v37  ;;  %v8114_v57 = vld [vmem:[%s15620_s1 + $0xd18] sm:$0xf0] }
 0x2c5   :  { %5971 = vmatpush.bf16.msra.mxu2 %v8469_v40  ;;  %v8402_v40 = vld [vmem:[%s15620_s1 + $0xf58] sm:$0xf0]  ;;  %v10239_v21 = vld [vmem:[%s15620_s1 + $0x10ac] sm:$0xf] }
 0x2c6   :  { %5936 = vmatpush.bf16.msrb.mxu3 %v8021_v16  ;;  %v8405_v51 = vor.u32 %v10195_v39, %v8402_v40  ;;  %v10127_v16 = vld [vmem:[%s15620_s1 + $0xd2c] sm:$0xf]  ;;  %v8242_v61 = vld [vmem:[%s15620_s1 + $0xe18] sm:$0xf0] }
 0x2c7   :  { %5946 = vmatpush.bf16.msra.mxu0 %v8197_v52  ;;  %v8130_v52 = vld [vmem:[%s15620_s1 + $0xd38] sm:$0xf0]  ;;  %v10123_v56 = vld [vmem:[%s15620_s1 + $0xd0c] sm:$0xf] }
 0x2c8   :  { %5959 = vmatpush.bf16.msra.mxu1 %v8325_v45  ;;  %v8258_v45 = vld [vmem:[%s15620_s1 + $0xe38] sm:$0xf0]  ;;  %v8133_v55 = vor.u32 %v10127_v16, %v8130_v52  ;;  %v10155_v59 = vld [vmem:[%s15620_s1 + $0xe0c] sm:$0xf]  ;;  %v8117_v24 = vor.u32 %v10123_v56, %v8114_v57 }
 0x2c9   :  { %5972 = vmatpush.bf16.msra.mxu2 %v8453_v53  ;;  %v10191_v53 = vld [vmem:[%s15620_s1 + $0xf2c] sm:$0xf]  ;;  %v8562_v63 = vld [vmem:[%s15620_s1 + $0x1098] sm:$0xf0]  ;;  %v8245_v35 = vor.u32 %v10155_v59, %v8242_v61 }
 0x2ca   :  { %5937 = vmatpush.bf16.msrb.mxu3 %v8005_v20  ;;  %v8389_v54 = vor.u32 %v10191_v53, %v8386_v15  ;;  %v10187_v22 = vld [vmem:[%s15620_s1 + $0xf0c] sm:$0xf]  ;;  %v8581_v20 = vor.u32 %v10239_v21, %v8578_v43  ;;  %v8866_v25 = vld [vmem:[%s15620_s1 + $0x12f8] sm:$0xf0] }
 0x2cb   :  { %5947 = vmatpush.bf16.msra.mxu0 %v8181_v26  ;;  %v8370_v26 = vld [vmem:[%s15620_s1 + $0xf18] sm:$0xf0]  ;;  %v10235_v62 = vld [vmem:[%s15620_s1 + $0x108c] sm:$0xf] }
 0x2cc   :  { %5960 = vmatpush.bf16.msra.mxu1 %v8309_v32  ;;  %v10279_v3 = vld [vmem:[%s15620_s1 + $0x11ec] sm:$0xf]  ;;  %v8738_v32 = vld [vmem:[%s15620_s1 + $0x11f8] sm:$0xf0]  ;;  %v8373_v29 = vor.u32 %v10187_v22, %v8370_v26  ;;  %v8565_v30 = vor.u32 %v10235_v62, %v8562_v63 }
 0x2cd   :  { %5973 = vmatpush.bf16.msra.mxu2 %v8437_v10  ;;  %v10311_v10 = vld [vmem:[%s15620_s1 + $0x12ec] sm:$0xf]  ;;  %v8994_v28 = vld [vmem:[%s15620_s1 + $0x13f8] sm:$0xf0]  ;;  %v8741_v0 = vor.u32 %v10279_v3, %v8738_v32 }
 0x2ce   :  { %5938 = vmatpush.bf16.msrb.mxu3 %v7989_v23  ;;  %v10343_v27 = vld [vmem:[%s15620_s1 + $0x13ec] sm:$0xf]  ;;  %v8722_v37 = vld [vmem:[%s15620_s1 + $0x11d8] sm:$0xf0] }
 0x2cf   :  { %5948 = vmatpush.bf16.msra.mxu0 %v8165_v33  ;;  %v10231_v23 = vld [vmem:[%s15620_s1 + $0x106c] sm:$0xf]  ;;  %v8546_v33 = vld [vmem:[%s15620_s1 + $0x1078] sm:$0xf0] }
 0x2d0   :  { %5961 = vmatpush.bf16.msra.mxu1 %v8293_v1  ;;  %v8869_v1 = vor.u32 %v10311_v10, %v8866_v25  ;;  %v10275_v2 = vld [vmem:[%s15620_s1 + $0x11cc] sm:$0xf]  ;;  %v8978_v39 = vld [vmem:[%s15620_s1 + $0x13d8] sm:$0xf0]  ;;  %v8549_v36 = vor.u32 %v10231_v23, %v8546_v33 }
 0x2d1   :  { %5974 = vmatpush.bf16.msra.mxu2 %v8421_v31  ;;  %5939 = vmatmul.bf16.vlgmr.msrb.gmra.mxu3 %v11409_v46  ;;  %v8261_v46 = vor.u32 %v10159_v17, %v8258_v45  ;;  %v8997_v31 = vor.u32 %v10343_v27, %v8994_v28  ;;  %v10307_v44 = vld [vmem:[%s15620_s1 + $0x12cc] sm:$0xf]  ;;  %v8725_v41 = vor.u32 %v10275_v2, %v8722_v37  ;;  %v8834_v45 = vld [vmem:[%s15620_s1 + $0x12b8] sm:$0xf0] }
 0x2d2   :  { %5983 = vmatpush.bf16.msra.mxu3 %v8613_v38  ;;  %v8850_v38 = vld [vmem:[%s15620_s1 + $0x12d8] sm:$0xf0]  ;;  %v10339_v60 = vld [vmem:[%s15620_s1 + $0x13cc] sm:$0xf] }
 0x2d3   :  { %5949 = vmatpush.bf16.msra.mxu0 %v8149_v34  ;;  %v5719_v40 = vpop.f32.mrf.mxu2  ;;  %v10227_v34 = vld [vmem:[%s15620_s1 + $0x104c] sm:$0xf]  ;;  %v8981_v16 = vor.u32 %v10339_v60, %v8978_v39  ;;  %v8962_v15 = vld [vmem:[%s15620_s1 + $0x13b8] sm:$0xf0] }
 0x2d4   :  { %5962 = vmatpush.bf16.msra.mxu1 %v8277_v50  ;;  %v5720_v58 = vadd.f32 %v5719_v40, %v15013_v11  ;;  %v5732_v42 = vpop.f32.mrf.mxu3  ;;  %v8530_v50 = vld [vmem:[%s15620_s1 + $0x1058] sm:$0xf0]  ;;  %v10271_v52 = vld [vmem:[%s15620_s1 + $0x11ac] sm:$0xf] }
 0x2d5   :  { %5975 = vmatpush.bf16.msra.mxu2 %v8405_v51  ;;  %v8853_v51 = vor.u32 %v10307_v44, %v8850_v38  ;;  %v8706_v11 = vld [vmem:[%s15620_s1 + $0x11b8] sm:$0xf0]  ;;  %v10303_v17 = vld [vmem:[%s15620_s1 + $0x12ac] sm:$0xf] }
 0x2d6   :  { %5984 = vmatpush.bf16.msra.mxu3 %v8597_v12  ;;  %v5733_v12 = vadd.f32 %v5732_v42, %v5720_v58  ;;  %v10335_v53 = vld [vmem:[%s15620_s1 + $0x13ac] sm:$0xf]  ;;  %v8709_v21 = vor.u32 %v10271_v52, %v8706_v11  ;;  %v8514_v43 = vld [vmem:[%s15620_s1 + $0x1038] sm:$0xf0] }
 0x2d7   :  { %5950 = vmatpush.bf16.msra.mxu0 %v8133_v55  ;;  %v8837_v55 = vor.u32 %v10303_v17, %v8834_v45  ;;  %v8965_v56 = vor.u32 %v10335_v53, %v8962_v15  ;;  %v8690_v57 = vld [vmem:[%s15620_s1 + $0x1198] sm:$0xf0]  ;;  %v10331_v59 = vld [vmem:[%s15620_s1 + $0x138c] sm:$0xf] }
 0x2d8   :  { %5963 = vmatpush.bf16.msra.mxu1 %v8261_v46  ;;  %v10299_v46 = vld [vmem:[%s15620_s1 + $0x128c] sm:$0xf]  ;;  %v8946_v61 = vld [vmem:[%s15620_s1 + $0x1398] sm:$0xf0] }
 0x2d9   :  { %5976 = vmatpush.bf16.msra.mxu2 %v8389_v54  ;;  %v8818_v54 = vld [vmem:[%s15620_s1 + $0x1298] sm:$0xf0]  ;;  %v10219_v32 = vld [vmem:[%s15620_s1 + $0x100c] sm:$0xf]  ;;  %v8949_v27 = vor.u32 %v10331_v59, %v8946_v61 }
 0x2da   :  { %5985 = vmatpush.bf16.msra.mxu3 %v8581_v20  ;;  %v8498_v10 = vld [vmem:[%s15620_s1 + $0x1018] sm:$0xf0]  ;;  %v8821_v25 = vor.u32 %v10299_v46, %v8818_v54  ;;  %v10263_v28 = vld [vmem:[%s15620_s1 + $0x116c] sm:$0xf] }
 0x2db   :  { %5951 = vmatpush.bf16.msra.mxu0 %v8117_v24  ;;  %v5745_v22 = vpop.f32.mrf.mxu0  ;;  %v5721_v20 = vpop.f32.mrf.mxu2  ;;  %v10327_v23 = vld [vmem:[%s15620_s1 + $0x136c] sm:$0xf]  ;;  %v8930_v33 = vld [vmem:[%s15620_s1 + $0x1378] sm:$0xf0]  ;;  %v8501_v2 = vor.u32 %v10219_v32, %v8498_v10 }
 0x2dc   :  { %5964 = vmatpush.bf16.msra.mxu1 %v8245_v35  ;;  %v5746_v26 = vadd.f32 %v5745_v22, %v5733_v12  ;;  %v5758_v3 = vpop.f32.mrf.mxu1  ;;  %v5734_v24 = vpop.f32.mrf.mxu3  ;;  %v8674_v35 = vld [vmem:[%s15620_s1 + $0x1178] sm:$0xf0]  ;;  %v8933_v38 = vor.u32 %v10327_v23, %v8930_v33  ;;  %v10259_v60 = vld [vmem:[%s15620_s1 + $0x114c] sm:$0xf] }
 0x2dd   :  { %5977 = vmatpush.bf16.msra.mxu2 %v8373_v29  ;;  %v10295_v29 = vld [vmem:[%s15620_s1 + $0x126c] sm:$0xf]  ;;  %v8677_v37 = vor.u32 %v10263_v28, %v8674_v35  ;;  %v8658_v39 = vld [vmem:[%s15620_s1 + $0x1158] sm:$0xf0] }
 0x2de   :  { %5986 = vmatpush.bf16.msra.mxu3 %v8565_v30  ;;  %5952 = vmatmul.bf16.vlgmr.msra.gmra.mxu0 %v11413_v48  ;;  %v8533_v48 = vor.u32 %v10227_v34, %v8530_v50  ;;  %v5759_v30 = vadd.f32 %v5758_v3, %v5746_v26  ;;  %v10291_v40 = vld [vmem:[%s15620_s1 + $0x124c] sm:$0xf]  ;;  %v8786_v58 = vld [vmem:[%s15620_s1 + $0x1258] sm:$0xf0] }
 0x2df   :  { %5996 = vmatpush.bf16.msrb.mxu0 %v8741_v0  ;;  %5965 = vmatmul.bf16.vlgmr.msra.gmra.mxu1 %v11411_v47  ;;  %v10267_v47 = vld [vmem:[%s15620_s1 + $0x118c] sm:$0xf]  ;;  %v8802_v0 = vld [vmem:[%s15620_s1 + $0x1278] sm:$0xf0]  ;;  %v8789_v17 = vor.u32 %v10291_v40, %v8786_v58 }
 0x2e0   :  { %6009 = vmatpush.bf16.msrb.mxu1 %v8869_v1  ;;  %5978 = vmatmul.bf16.vlgmr.msra.gmra.mxu2 %v11415_v49  ;;  %v10223_v49 = vld [vmem:[%s15620_s1 + $0x102c] sm:$0xf]  ;;  %v8693_v63 = vor.u32 %v10267_v47, %v8690_v57  ;;  %v8805_v44 = vor.u32 %v10295_v29, %v8802_v0  ;;  %v8914_v42 = vld [vmem:[%s15620_s1 + $0x1358] sm:$0xf0] }
 0x2e1   :  { %6022 = vmatpush.bf16.msrb.mxu2 %v8997_v31  ;;  %v8517_v62 = vor.u32 %v10223_v49, %v8514_v43  ;;  %v10375_v1 = vld [vmem:[%s15620_s1 + $0x14ec] sm:$0xf]  ;;  %v9122_v31 = vld [vmem:[%s15620_s1 + $0x14f8] sm:$0xf0] }
 0x2e2   :  { %5987 = vmatpush.bf16.msra.mxu3 %v8549_v36  ;;  %v9125_v36 = vor.u32 %v10375_v1, %v9122_v31  ;;  %v10371_v34 = vld [vmem:[%s15620_s1 + $0x14cc] sm:$0xf]  ;;  %v9106_v50 = vld [vmem:[%s15620_s1 + $0x14d8] sm:$0xf0] }
 0x2e3   :  { %5997 = vmatpush.bf16.msrb.mxu0 %v8725_v41  ;;  %v10323_v41 = vld [vmem:[%s15620_s1 + $0x134c] sm:$0xf]  ;;  %v5771_v11 = vpop.f32.mrf.mxu2  ;;  %v8642_v53 = vld [vmem:[%s15620_s1 + $0x1138] sm:$0xf0] }
 0x2e4   :  { %6010 = vmatpush.bf16.msrb.mxu1 %v8853_v51  ;;  %v5747_v51 = vpop.f32.mrf.mxu0  ;;  %v5760_v52 = vpop.f32.mrf.mxu1  ;;  %v8917_v12 = vor.u32 %v10323_v41, %v8914_v42  ;;  %v10255_v45 = vld [vmem:[%s15620_s1 + $0x112c] sm:$0xf]  ;;  %v8770_v49 = vld [vmem:[%s15620_s1 + $0x1238] sm:$0xf0] }
 0x2e5   :  { %6023 = vmatpush.bf16.msrb.mxu2 %v8981_v16  ;;  %v8661_v16 = vor.u32 %v10259_v60, %v8658_v39  ;;  %v10287_v15 = vld [vmem:[%s15620_s1 + $0x122c] sm:$0xf]  ;;  %v9090_v47 = vld [vmem:[%s15620_s1 + $0x14b8] sm:$0xf0]  ;;  %v8645_v57 = vor.u32 %v10255_v45, %v8642_v53 }
 0x2e6   :  { %5988 = vmatpush.bf16.msra.mxu3 %v8533_v48  ;;  %v15269_v48 = vadd.f32 %v5771_v11, %v5759_v30  ;;  %v10319_v43 = vld [vmem:[%s15620_s1 + $0x132c] sm:$0xf]  ;;  %v8626_v54 = vld [vmem:[%s15620_s1 + $0x1118] sm:$0xf0] }
 0x2e7   :  { %5998 = vmatpush.bf16.msrb.mxu0 %v8709_v21  ;;  %v9109_v21 = vor.u32 %v10371_v34, %v9106_v50  ;;  %v10251_v46 = vld [vmem:[%s15620_s1 + $0x110c] sm:$0xf]  ;;  %v8754_v22 = vld [vmem:[%s15620_s1 + $0x1218] sm:$0xf0]  ;;  %v10528_v50 = vld [vmem:[%s15621_s2] sm:$0xf] }
 0x2e8   :  { %6011 = vmatpush.bf16.msrb.mxu1 %v8837_v55  ;;  %v8898_v55 = vld [vmem:[%s15620_s1 + $0x1338] sm:$0xf0]  ;;  %v10283_v61 = vld [vmem:[%s15620_s1 + $0x120c] sm:$0xf]  ;;  %v815_v51 = vperm.slane %v10528_v50, 3 }
 0x2e9   :  { %6024 = vmatpush.bf16.msrb.mxu2 %v8965_v56  ;;  %v10367_v56 = vld [vmem:[%s15620_s1 + $0x14ac] sm:$0xf]  ;;  %v8901_v59 = vor.u32 %v10319_v43, %v8898_v55  ;;  %v9074_v3 = vld [vmem:[%s15620_s1 + $0x1498] sm:$0xf0]  ;;  %v8757_v29 = vor.u32 %v10283_v61, %v8754_v22 }
 0x2ea   :  { %5989 = vmatpush.bf16.msra.mxu3 %v8517_v62  ;;  %v10315_v20 = vld [vmem:[%s15620_s1 + $0x130c] sm:$0xf]  ;;  %v9093_v26 = vor.u32 %v10367_v56, %v9090_v47  ;;  %v8882_v62 = vld [vmem:[%s15620_s1 + $0x1318] sm:$0xf0] }
 0x2eb   :  { %5999 = vmatpush.bf16.msrb.mxu0 %v8693_v63  ;;  %v10363_v63 = vld [vmem:[%s15620_s1 + $0x148c] sm:$0xf]  ;;  %v9250_v10 = vld [vmem:[%s15620_s1 + $0x15f8] sm:$0xf0]  ;;  %v8885_v30 = vor.u32 %v10315_v20, %v8882_v62  ;;  %v5773_v0 = vpop.f32.mrf.mxu2 }
 0x2ec   :  { %6012 = vmatpush.bf16.msrb.mxu1 %v8821_v25  ;;  %v10407_v32 = vld [vmem:[%s15620_s1 + $0x15ec] sm:$0xf]  ;;  %v8629_v25 = vor.u32 %v10251_v46, %v8626_v54  ;;  %v9506_v35 = vld [vmem:[%s15620_s1 + $0x17f8] sm:$0xf0]  ;;  %v9077_v23 = vor.u32 %v10363_v63, %v9074_v3 }
 0x2ed   :  { %6025 = vmatpush.bf16.msrb.mxu2 %v8949_v27  ;;  %v10439_v24 = vld [vmem:[%s15620_s1 + $0x16ec] sm:$0xf]  ;;  %v9378_v27 = vld [vmem:[%s15620_s1 + $0x16f8] sm:$0xf0]  ;;  %v9253_v33 = vor.u32 %v10407_v32, %v9250_v10 }
 0x2ee   :  { %5990 = vmatpush.bf16.msra.mxu3 %v8501_v2  ;;  %v10471_v28 = vld [vmem:[%s15620_s1 + $0x17ec] sm:$0xf]  ;;  %v9058_v31 = vld [vmem:[%s15620_s1 + $0x1478] sm:$0xf0]  ;;  %v9381_v2 = vor.u32 %v10439_v24, %v9378_v27 }
 0x2ef   :  { %6000 = vmatpush.bf16.msrb.mxu0 %v8677_v37  ;;  %v10359_v1 = vld [vmem:[%s15620_s1 + $0x146c] sm:$0xf]  ;;  %v9509_v37 = vor.u32 %v10471_v28, %v9506_v35  ;;  %v9362_v39 = vld [vmem:[%s15620_s1 + $0x16d8] sm:$0xf0] }
 0x2f0   :  { %6013 = vmatpush.bf16.msrb.mxu1 %v8805_v44  ;;  %v10403_v44 = vld [vmem:[%s15620_s1 + $0x15cc] sm:$0xf]  ;;  %v9061_v58 = vor.u32 %v10359_v1, %v9058_v31  ;;  %v9042_v34 = vld [vmem:[%s15620_s1 + $0x1458] sm:$0xf0] }
 0x2f1   :  { %6026 = vmatpush.bf16.msrb.mxu2 %v8933_v38  ;;  %5991 = vmatmul.bf16.vlgmr.msra.gmra.mxu3 %v11646_v9  ;;  %v8773_v9 = vor.u32 %v10287_v15, %v8770_v49  ;;  %v9234_v38 = vld [vmem:[%s15620_s1 + $0x15d8] sm:$0xf0]  ;;  %v10435_v60 = vld [vmem:[%s15620_s1 + $0x16cc] sm:$0xf] }
 0x2f2   :  { %6035 = vmatpush.bf16.msrb.mxu3 %v9125_v36  ;;  %v10467_v40 = vld [vmem:[%s15620_s1 + $0x17cc] sm:$0xf]  ;;  %v9490_v36 = vld [vmem:[%s15620_s1 + $0x17d8] sm:$0xf0]  ;;  %v9237_v41 = vor.u32 %v10403_v44, %v9234_v38  ;;  %v9365_v52 = vor.u32 %v10435_v60, %v9362_v39 }
 0x2f3   :  { %6001 = vmatpush.bf16.msrb.mxu0 %v8661_v16  ;;  %v10355_v42 = vld [vmem:[%s15620_s1 + $0x144c] sm:$0xf]  ;;  %v9493_v11 = vor.u32 %v10467_v40, %v9490_v36  ;;  %v9346_v53 = vld [vmem:[%s15620_s1 + $0x16b8] sm:$0xf0] }
 0x2f4   :  { %6014 = vmatpush.bf16.msrb.mxu1 %v8789_v17  ;;  %v5784_v16 = vpop.f32.mrf.mxu3  ;;  %v10399_v17 = vld [vmem:[%s15620_s1 + $0x15ac] sm:$0xf]  ;;  %v9045_v49 = vor.u32 %v10355_v42, %v9042_v34  ;;  %v9026_v43 = vld [vmem:[%s15620_s1 + $0x1438] sm:$0xf0] }
 0x2f5   :  { %6027 = vmatpush.bf16.msrb.mxu2 %v8917_v12  ;;  %v9218_v12 = vld [vmem:[%s15620_s1 + $0x15b8] sm:$0xf0]  ;;  %v10431_v45 = vld [vmem:[%s15620_s1 + $0x16ac] sm:$0xf]  ;;  %v5785_v55 = vadd.f32 %v5784_v16, %v815_v51 }
 0x2f6   :  { %6036 = vmatpush.bf16.msrb.mxu3 %v9109_v21  ;;  %v10463_v15 = vld [vmem:[%s15620_s1 + $0x17ac] sm:$0xf]  ;;  %v9474_v21 = vld [vmem:[%s15620_s1 + $0x17b8] sm:$0xf0]  ;;  %v9349_v56 = vor.u32 %v10431_v45, %v9346_v53 }
 0x2f7   :  { %6002 = vmatpush.bf16.msrb.mxu0 %v8645_v57  ;;  %v9477_v47 = vor.u32 %v10463_v15, %v9474_v21  ;;  %v9202_v57 = vld [vmem:[%s15620_s1 + $0x1598] sm:$0xf0]  ;;  %v10427_v46 = vld [vmem:[%s15620_s1 + $0x168c] sm:$0xf] }
 0x2f8   :  { %6015 = vmatpush.bf16.msrb.mxu1 %v8773_v9  ;;  %v9330_v54 = vld [vmem:[%s15620_s1 + $0x1698] sm:$0xf0]  ;;  %v10459_v9 = vld [vmem:[%s15620_s1 + $0x178c] sm:$0xf] }
 0x2f9   :  { %6028 = vmatpush.bf16.msrb.mxu2 %v8901_v59  ;;  %v9458_v59 = vld [vmem:[%s15620_s1 + $0x1798] sm:$0xf0]  ;;  %v9333_v10 = vor.u32 %v10427_v46, %v9330_v54  ;;  %v10423_v28 = vld [vmem:[%s15620_s1 + $0x166c] sm:$0xf] }
 0x2fa   :  { %6037 = vmatpush.bf16.msrb.mxu3 %v9093_v26  ;;  %v10347_v26 = vld [vmem:[%s15620_s1 + $0x140c] sm:$0xf]  ;;  %v9010_v62 = vld [vmem:[%s15620_s1 + $0x1418] sm:$0xf0]  ;;  %v9461_v24 = vor.u32 %v10459_v9, %v9458_v59 }
 0x2fb   :  { %6003 = vmatpush.bf16.msrb.mxu0 %v8629_v25  ;;  %v5797_v61 = vpop.f32.mrf.mxu0  ;;  %v10391_v25 = vld [vmem:[%s15620_s1 + $0x156c] sm:$0xf]  ;;  %v9186_v27 = vld [vmem:[%s15620_s1 + $0x1578] sm:$0xf0]  ;;  %v9013_v1 = vor.u32 %v10347_v26, %v9010_v62 }
 0x2fc   :  { %6016 = vmatpush.bf16.msrb.mxu1 %v8757_v29  ;;  %v5798_v63 = vadd.f32 %v5797_v61, %v5785_v55  ;;  %v5810_v3 = vpop.f32.mrf.mxu1  ;;  %v5786_v32 = vpop.f32.mrf.mxu3  ;;  %v9314_v35 = vld [vmem:[%s15620_s1 + $0x1678] sm:$0xf0]  ;;  %v10455_v29 = vld [vmem:[%s15620_s1 + $0x176c] sm:$0xf]  ;;  %v9189_v31 = vor.u32 %v10391_v25, %v9186_v27  ;;  %v10496_v25 = vld [vmem:[%s15622_s3 + $0x30] sm:$0xff] }
 0x2fd   :  { %6029 = vmatpush.bf16.msrb.mxu2 %v8885_v30  ;;  %v9442_v30 = vld [vmem:[%s15620_s1 + $0x1778] sm:$0xf0]  ;;  %v10387_v44 = vld [vmem:[%s15620_s1 + $0x154c] sm:$0xf]  ;;  %v10504_v27 = vld [vmem:[%s15622_s3 + $0x70] sm:$0xff] }
 0x2fe   :  { %6038 = vmatpush.bf16.msrb.mxu3 %v9077_v23  ;;  %6004 = vmatmul.bf16.vlgmr.msrb.gmra.mxu0 %v11656_v14  ;;  %v9221_v14 = vor.u32 %v10399_v17, %v9218_v12  ;;  %v5811_v0 = vadd.f32 %v5810_v3, %v5798_v63  ;;  %v10487_v23 = vld [vmem:[%s15620_s1 + $0x186c] sm:$0xf]  ;;  %v9170_v38 = vld [vmem:[%s15620_s1 + $0x1558] sm:$0xf0] }
 0x2ff   :  { %6048 = vmatpush.bf16.msra.mxu0 %v9253_v33  ;;  %6017 = vmatmul.bf16.vlgmr.msrb.gmra.mxu1 %v11654_v13  ;;  %v10395_v13 = vld [vmem:[%s15620_s1 + $0x158c] sm:$0xf]  ;;  %v9570_v33 = vld [vmem:[%s15620_s1 + $0x1878] sm:$0xf0]  ;;  %v9173_v16 = vor.u32 %v10387_v44, %v9170_v38 }
 0x300   :  { %6061 = vmatpush.bf16.msra.mxu1 %v9381_v2  ;;  %6030 = vmatmul.bf16.vlgmr.msrb.gmra.mxu2 %v11658_v18  ;;  %v10351_v18 = vld [vmem:[%s15620_s1 + $0x142c] sm:$0xf]  ;;  %v9205_v20 = vor.u32 %v10395_v13, %v9202_v57  ;;  %v9317_v2 = vor.u32 %v10423_v28, %v9314_v35  ;;  %v9573_v40 = vor.u32 %v10487_v23, %v9570_v33  ;;  %v9298_v36 = vld [vmem:[%s15620_s1 + $0x1658] sm:$0xf0]  ;;  %v10512_v35 = vld [vmem:[%s15622_s3 + $0xb0] sm:$0xff] }
 0x301   :  { %6074 = vmatpush.bf16.msra.mxu2 %v9509_v37  ;;  %v9029_v22 = vor.u32 %v10351_v18, %v9026_v43  ;;  %v9445_v37 = vor.u32 %v10455_v29, %v9442_v30  ;;  %v10419_v60 = vld [vmem:[%s15620_s1 + $0x164c] sm:$0xf]  ;;  %v9554_v50 = vld [vmem:[%s15620_s1 + $0x1858] sm:$0xf0]  ;;  %v10529_v23 = vld [vmem:[#allocation1] sm:$0xff] }
 0x302   :  { %6039 = vmatpush.bf16.msrb.mxu3 %v9061_v58  ;;  %v10451_v58 = vld [vmem:[%s15620_s1 + $0x174c] sm:$0xf]  ;;  %v9154_v45 = vld [vmem:[%s15620_s1 + $0x1538] sm:$0xf0]  ;;  %v10494_v33 = vld [vmem:[%s15622_s3 + $0x20] sm:$0xff] }
 0x303   :  { %6049 = vmatpush.bf16.msra.mxu0 %v9237_v41  ;;  %v5823_v39 = vpop.f32.mrf.mxu2  ;;  %v9426_v41 = vld [vmem:[%s15620_s1 + $0x1758] sm:$0xf0]  ;;  %v10483_v34 = vld [vmem:[%s15620_s1 + $0x184c] sm:$0xf]  ;;  %v5799_v51 = vpop.f32.mrf.mxu0 }
 0x304   :  { %6062 = vmatpush.bf16.msra.mxu1 %v9365_v52  ;;  %v5824_v42 = vadd.f32 %v5823_v39, %v5811_v0  ;;  %v5812_v52 = vpop.f32.mrf.mxu1  ;;  %v9429_v17 = vor.u32 %v10451_v58, %v9426_v41  ;;  %v10383_v12 = vld [vmem:[%s15620_s1 + $0x152c] sm:$0xf]  ;;  %v9557_v15 = vor.u32 %v10483_v34, %v9554_v50  ;;  %v9282_v21 = vld [vmem:[%s15620_s1 + $0x1638] sm:$0xf0]  ;;  %v10492_v41 = vld [vmem:[%s15622_s3 + $0x10] sm:$0xff] }
 0x305   :  { %6075 = vmatpush.bf16.msra.mxu2 %v9493_v11  ;;  %v9301_v11 = vor.u32 %v10419_v60, %v9298_v36  ;;  %v10415_v53 = vld [vmem:[%s15620_s1 + $0x162c] sm:$0xf]  ;;  %v9538_v43 = vld [vmem:[%s15620_s1 + $0x1838] sm:$0xf0]  ;;  %v9157_v55 = vor.u32 %v10383_v12, %v9154_v45  ;;  %v10508_v50 = vld [vmem:[%s15622_s3 + $0x90] sm:$0xff]  ;;  %v6100_v45 = vmax.f32 %v12836_v19, 0.0 }
 0x306   :  { %6040 = vmatpush.bf16.msrb.mxu3 %v9045_v49  ;;  %v10447_v49 = vld [vmem:[%s15620_s1 + $0x172c] sm:$0xf]  ;;  %v9266_v9 = vld [vmem:[%s15620_s1 + $0x1618] sm:$0xf0]  ;;  %v10498_v12 = vld [vmem:[%s15622_s3 + $0x40] sm:$0xff] }
 0x307   :  { %6050 = vmatpush.bf16.msra.mxu0 %v9221_v14  ;;  %v9410_v14 = vld [vmem:[%s15620_s1 + $0x1738] sm:$0xf0]  ;;  %v10479_v18 = vld [vmem:[%s15620_s1 + $0x182c] sm:$0xf] }
 0x308   :  { %6063 = vmatpush.bf16.msra.mxu1 %v9349_v56  ;;  %v9285_v56 = vor.u32 %v10415_v53, %v9282_v21  ;;  %v10379_v13 = vld [vmem:[%s15620_s1 + $0x150c] sm:$0xf]  ;;  %v9541_v54 = vor.u32 %v10479_v18, %v9538_v43  ;;  %v9394_v61 = vld [vmem:[%s15620_s1 + $0x1718] sm:$0xf0]  ;;  %v6101_v53 = vmax.f32 %v14039_v8, 0.0  ;;  %v6102_v21 = vmax.f32 %v15269_v48, 0.0 }
 0x309   :  { %6076 = vmatpush.bf16.msra.mxu2 %v9477_v47  ;;  %v9413_v47 = vor.u32 %v10447_v49, %v9410_v14  ;;  %v10411_v57 = vld [vmem:[%s15620_s1 + $0x160c] sm:$0xf]  ;;  %v9522_v26 = vld [vmem:[%s15620_s1 + $0x1818] sm:$0xf0]  ;;  %v6104_v49 = vpack.c.bf16 %v6100_v45, %v6100_v45 }
 0x30a   :  { %6041 = vmatpush.bf16.msrb.mxu3 %v9029_v22  ;;  %v10443_v59 = vld [vmem:[%s15620_s1 + $0x170c] sm:$0xf]  ;;  %v9269_v62 = vor.u32 %v10411_v57, %v9266_v9  ;;  %v10497_v3 = vld [vmem:[%s15622_s3 + $0x38] sm:$0xff]  ;;  %v6105_v14 = vpack.c.bf16 %v6101_v53, %v6101_v53  ;;  %v6106_v18 = vpack.c.bf16 %v6102_v21, %v6102_v21 }
 0x30b   :  { %6051 = vmatpush.bf16.msra.mxu0 %v9205_v20  ;;  %v5825_v46 = vpop.f32.mrf.mxu2  ;;  %v10475_v20 = vld [vmem:[%s15620_s1 + $0x180c] sm:$0xf]  ;;  %v9397_v63 = vor.u32 %v10443_v59, %v9394_v61  ;;  %v10505_v32 = vld [vmem:[%s15622_s3 + $0x78] sm:$0xff] }
 0x30c   :  { %6064 = vmatpush.bf16.msra.mxu1 %v9333_v10  ;;  %v10513_v10 = vld [vmem:[%s15622_s3 + $0xb8] sm:$0xff]  ;;  %v10495_v30 = vld [vmem:[%s15622_s3 + $0x28] sm:$0xff] }
 0x30d   :  { %6077 = vmatpush.bf16.msra.mxu2 %v9461_v24  ;;  %v9525_v24 = vor.u32 %v10475_v20, %v9522_v26  ;;  %v10503_v0 = vld [vmem:[%s15622_s3 + $0x68] sm:$0xff]  ;;  %v10493_v38 = vld [vmem:[%s15622_s3 + $0x18] sm:$0xff] }
 0x30e   :  { %6042 = vmatpush.bf16.msrb.mxu3 %v9013_v1  ;;  %v10502_v1 = vld [vmem:[%s15622_s3 + $0x60] sm:$0xff]  ;;  %v10501_v60 = vld [vmem:[%s15622_s3 + $0x58] sm:$0xff]  ;;  %v10491_v51 = vld [vmem:[%s15622_s3 + $0x8] sm:$0xff] }
 0x30f   :  { %6052 = vmatpush.bf16.msra.mxu0 %v9189_v31  ;;  %v10509_v39 = vld [vmem:[%s15622_s3 + $0x98] sm:$0xff]  ;;  %v10507_v52 = vld [vmem:[%s15622_s3 + $0x88] sm:$0xff] }
 0x310   :  { %6065 = vmatpush.bf16.msra.mxu1 %v9317_v2  ;;  %v10521_v20 = vld [vmem:[%s15622_s3 + $0xf8] sm:$0xff] }
 0x311   :  { %6078 = vmatpush.bf16.msra.mxu2 %v9445_v37  ;;  %6043 = vmatmul.bf16.vlgmr.msrb.gmra.mxu3 %v11739_v4  ;;  %v9138_v4 = vld [vmem:[%s15620_s1 + $0x1518] sm:$0xf0]  ;;  %v10510_v37 = vld [vmem:[%s15622_s3 + $0xa0] sm:$0xff] }
 0x312   :  { %6091 = vmatpush.bf16.msra.mxu3 %v9573_v40  ;;  %v9141_v22 = vor.u32 %v10379_v13, %v9138_v4 }
 0x313   :  { %6053 = vmatpush.bf16.msra.mxu0 %v9173_v16  ;;  %v10499_v16 = vld [vmem:[%s15622_s3 + $0x48] sm:$0xff] }
 0x314   :  { %6066 = vmatpush.bf16.msra.mxu1 %v9301_v11  ;;  %v5836_v28 = vpop.f32.mrf.mxu3 }
 0x315   :  { %6079 = vmatpush.bf16.msra.mxu2 %v9429_v17  ;;  %v5837_v29 = vadd.f32 %v5836_v28, %v5824_v42  ;;  %v10500_v42 = vld [vmem:[%s15622_s3 + $0x50] sm:$0xff]  ;;  %v10490_v17 = vld [vmem:[%s15622_s3] sm:$0xff] }
 0x316   :  { %6092 = vmatpush.bf16.msra.mxu3 %v9557_v15  ;;  %v10506_v15 = vld [vmem:[%s15622_s3 + $0x80] sm:$0xff] }
 0x317   :  { %6054 = vmatpush.bf16.msra.mxu0 %v9157_v55 }
 0x318   :  { %6067 = vmatpush.bf16.msra.mxu1 %v9285_v56 }
 0x319   :  { %6080 = vmatpush.bf16.msra.mxu2 %v9413_v47 }
 0x31a   :  { %6093 = vmatpush.bf16.msra.mxu3 %v9541_v54 }
 0x31b   :  { %6055 = vmatpush.bf16.msra.mxu0 %v9141_v22 }
 0x31c   :  { %6068 = vmatpush.bf16.msra.mxu1 %v9269_v62  ;;  %v5862_v31 = vpop.f32.mrf.mxu1  ;;  %v5838_v2 = vpop.f32.mrf.mxu3  ;;  %v10520_v62 = vld [vmem:[%s15622_s3 + $0xf0] sm:$0xff] }
 0x31d   :  { %6081 = vmatpush.bf16.msra.mxu2 %v9397_v63 }
 0x31e   :  { %6094 = vmatpush.bf16.msra.mxu3 %v9525_v24  ;;  %6056 = vmatmul.bf16.vlgmr.msra.gmra.mxu0 %v11743_v6  ;;  %v5849_v6 = vpop.f32.mrf.mxu0  ;;  %v10518_v24 = vld [vmem:[%s15622_s3 + $0xe0] sm:$0xff] }
 0x31f   :  { %6368 = vmatpush.bf16.msrb.mxu0 %v10497_v3  ;;  %6069 = vmatmul.bf16.vlgmr.msra.gmra.mxu1 %v11741_v5  ;;  %v10511_v5 = vld [vmem:[%s15622_s3 + $0xa8] sm:$0xff] }
 0x320   :  { %6381 = vmatpush.bf16.msrb.mxu1 %v10505_v32  ;;  %6082 = vmatmul.bf16.vlgmr.msra.gmra.mxu2 %v11745_v7  ;;  %v5850_v7 = vadd.f32 %v5849_v6, %v5837_v29 }
 0x321   :  { %6394 = vmatpush.bf16.msrb.mxu2 %v10513_v10  ;;  %9577 = vmatmul.msk.bf16.vlgmr.msra.gmra.mxu3 %vm4797_vm0, %v10529_v23  ;;  %v10519_v10 = vld [vmem:[%s15622_s3 + $0xe8] sm:$0xff] }
 0x322   :  { %v5863_v44 = vadd.f32 %v5862_v31, %v5850_v7  ;;  %6407 = vmatpush.bf16.msrb.mxu3 %v10521_v20  ;;  %v10515_v23 = vld [vmem:[%s15622_s3 + $0xc8] sm:$0xff] }
 0x323   :  { %6369 = vmatpush.bf16.msrb.mxu0 %v10496_v25  ;;  %v5875_v40 = vpop.f32.mrf.mxu2 }
 0x324   :  { %6382 = vmatpush.bf16.msrb.mxu1 %v10504_v27  ;;  %v5876_v36 = vadd.f32 %v5875_v40, %v5863_v44  ;;  %v5864_v34 = vpop.f32.mrf.mxu1  ;;  %v10517_v27 = vld [vmem:[%s15622_s3 + $0xd8] sm:$0xff] }
 0x325   :  { %6395 = vmatpush.bf16.msrb.mxu2 %v10512_v35 }
 0x326   :  { %v5851_v58 = vpop.f32.mrf.mxu0  ;;  %6408 = vmatpush.bf16.msrb.mxu3 %v10520_v62 }
 0x327   :  { %6370 = vmatpush.bf16.msrb.mxu0 %v10495_v30  ;;  %v10516_v30 = vld [vmem:[%s15622_s3 + $0xd0] sm:$0xff] }
 0x328   :  { %6383 = vmatpush.bf16.msrb.mxu1 %v10503_v0 }
 0x329   :  { %6396 = vmatpush.bf16.msrb.mxu2 %v10511_v5 }
 0x32a   :  { %6409 = vmatpush.bf16.msrb.mxu3 %v10519_v10 }
 0x32b   :  { %6371 = vmatpush.bf16.msrb.mxu0 %v10494_v33  ;;  %v5877_v11 = vpop.f32.mrf.mxu2  ;;  %v10514_v33 = vld [vmem:[%s15622_s3 + $0xc0] sm:$0xff] }
 0x32c   :  { %6384 = vmatpush.bf16.msrb.mxu1 %v10502_v1 }
 0x32d   :  { %6397 = vmatpush.bf16.msrb.mxu2 %v10510_v37 }
 0x32e   :  { %6410 = vmatpush.bf16.msrb.mxu3 %v10518_v24 }
 0x32f   :  { %6372 = vmatpush.bf16.msrb.mxu0 %v10493_v38 }
 0x330   :  { %6385 = vmatpush.bf16.msrb.mxu1 %v10501_v60 }
 0x331   :  { %6398 = vmatpush.bf16.msrb.mxu2 %v10509_v39 }
 0x332   :  { %6411 = vmatpush.bf16.msrb.mxu3 %v10517_v27 }
 0x333   :  { %6373 = vmatpush.bf16.msrb.mxu0 %v10492_v41 }
 0x334   :  { %6386 = vmatpush.bf16.msrb.mxu1 %v10500_v42  ;;  %v5888_v43 = vpop.f32.mrf.mxu3 }
 0x335   :  { %6399 = vmatpush.bf16.msrb.mxu2 %v10508_v50  ;;  %v5889_v55 = vadd.f32 %v5888_v43, %v5876_v36 }
 0x336   :  { %6412 = vmatpush.bf16.msrb.mxu3 %v10516_v30 }
 0x337   :  { %6374 = vmatpush.bf16.msrb.mxu0 %v10491_v51 }
 0x338   :  { %6387 = vmatpush.bf16.msrb.mxu1 %v10499_v16 }
 0x339   :  { %6400 = vmatpush.bf16.msrb.mxu2 %v10507_v52 }
 0x33a   :  { %6413 = vmatpush.bf16.msrb.mxu3 %v10515_v23 }
 0x33b   :  { %6375 = vmatpush.bf16.msrb.mxu0 %v10490_v17  ;;  %v5901_v19 = vpop.f32.mrf.mxu0 }
 0x33c   :  { %6388 = vmatpush.bf16.msrb.mxu1 %v10498_v12  ;;  %v5902_v8 = vadd.f32 %v5901_v19, %v5889_v55  ;;  %v5914_v56 = vpop.f32.mrf.mxu1  ;;  %v5890_v47 = vpop.f32.mrf.mxu3 }
 0x33d   :  { %6401 = vmatpush.bf16.msrb.mxu2 %v10506_v15 }
 0x33e   :  { %6376 = vmatmul.bf16.vlgmr.msrb.gmra.mxu0 %v6104_v49  ;;  %v5915_v13 = vadd.f32 %v5914_v56, %v5902_v8  ;;  %6414 = vmatpush.bf16.msrb.mxu3 %v10514_v33  ;;  %v10523_v49 = vld [vmem:[%s15623_s4] ss:$0 sm:$0xff] }
 0x33f   :  { %6389 = vmatmul.bf16.vlgmr.msrb.gmra.mxu1 %v6105_v14 }
 0x340   :  { %6402 = vmatmul.bf16.vlgmr.msrb.gmra.mxu2 %v6106_v18 }
 0x343   :  { %v5927_v4 = vpop.f32.mrf.mxu2  ;;  %v5903_v46 = vpop.f32.mrf.mxu0 }
 0x344   :  { %v5928_v57 = vadd.f32 %v5927_v4, %v5915_v13  ;;  %v5916_v48 = vpop.f32.mrf.mxu1 }
 0x34b   :  { %v5929_v54 = vpop.f32.mrf.mxu2 }
 0x354   :  { %v5940_v9 = vpop.f32.mrf.mxu3 }
 0x355   :  { %v5941_v7 = vadd.f32 %v5940_v9, %v5928_v57 }
 0x35b   :  { %v5953_v59 = vpop.f32.mrf.mxu0 }
 0x35c   :  { %v5966_v61 = vpop.f32.mrf.mxu1  ;;  %v5942_v22 = vpop.f32.mrf.mxu3  ;;  %v5954_v1 = vadd.f32 %v5953_v59, %v5941_v7 }
 0x35e   :  { %v5967_v2 = vadd.f32 %v5966_v61, %v5954_v1 }
 0x363   :  { %v5979_v26 = vpop.f32.mrf.mxu2  ;;  %v5955_v63 = vpop.f32.mrf.mxu0 }
 0x364   :  { %v5968_v3 = vpop.f32.mrf.mxu1  ;;  %v5980_v37 = vadd.f32 %v5979_v26, %v5967_v2 }
 0x36b   :  { %v5981_v32 = vpop.f32.mrf.mxu2 }
 0x374   :  { %v5992_v25 = vpop.f32.mrf.mxu3 }
 0x375   :  { %v5993_v44 = vadd.f32 %v5992_v25, %v5980_v37 }
 0x37b   :  { %v6005_v28 = vpop.f32.mrf.mxu0 }
 0x37c   :  { %v6018_v35 = vpop.f32.mrf.mxu1  ;;  %v5994_v29 = vpop.f32.mrf.mxu3  ;;  %v6006_v38 = vadd.f32 %v6005_v28, %v5993_v44 }
 0x37e   :  { %v6019_v39 = vadd.f32 %v6018_v35, %v6006_v38 }
 0x383   :  { %v6031_v0 = vpop.f32.mrf.mxu2  ;;  %v6007_v5 = vpop.f32.mrf.mxu0 }
 0x384   :  { %v6020_v6 = vpop.f32.mrf.mxu1  ;;  %v6032_v40 = vadd.f32 %v6031_v0, %v6019_v39 }
 0x38b   :  { %v6033_v31 = vpop.f32.mrf.mxu2 }
 0x394   :  { %v6044_v60 = vpop.f32.mrf.mxu3 }
 0x395   :  { %v6045_v36 = vadd.f32 %v6044_v60, %v6032_v40 }
 0x39b   :  { %v6057_v58 = vpop.f32.mrf.mxu0 }
 0x39c   :  { %v6070_v41 = vpop.f32.mrf.mxu1  ;;  %v6046_v42 = vpop.f32.mrf.mxu3  ;;  %v6058_v34 = vadd.f32 %v6057_v58, %v6045_v36 }
 0x39e   :  { %v6071_v50 = vadd.f32 %v6070_v41, %v6058_v34 }
 0x3a3   :  { %v6083_v51 = vpop.f32.mrf.mxu2  ;;  %v6059_v52 = vpop.f32.mrf.mxu0 }
 0x3a4   :  { %v6084_v16 = vadd.f32 %v6083_v51, %v6071_v50  ;;  %v6072_v11 = vpop.f32.mrf.mxu1  ;;  %v6096_v17 = vpop.f32.mrf.mxu3 }
 0x3a6   :  { %v6097_v12 = vadd.f32 %v6096_v17, %v6084_v16 }
 0x3a8   :  { %v6103_v45 = vmax.f32 %v6097_v12, 0.0 }
 0x3aa   :  { %v6107_v53 = vpack.c.bf16 %v6103_v45, %v6103_v45 }
 0x3ab   :  { %v6085_v15 = vpop.f32.mrf.mxu2 }
 0x3ac   :  { %6415 = vmatmul.bf16.vlgmr.msrb.gmra.mxu3 %v6107_v53  ;;  %v6098_v21 = vpop.f32.mrf.mxu3 }
 0x3bb   :  { %v6377_v14 = vpop.f32.mrf.mxu0 }
 0x3bc   :  { %v6390_v18 = vpop.f32.mrf.mxu1  ;;  %v6378_v43 = vadd.f32 %v10523_v49, %v6377_v14 }
 0x3be   :  { %v6391_v55 = vadd.f32 %v6390_v18, %v6378_v43 }
 0x3c3   :  { %v6403_v19 = vpop.f32.mrf.mxu2  ;;  %v6379_v56 = vpop.f32.mrf.mxu0 }
 0x3c4   :  { %v6404_v8 = vadd.f32 %v6403_v19, %v6391_v55  ;;  %v6392_v47 = vpop.f32.mrf.mxu1 }
 0x3cb   :  { %v6405_v13 = vpop.f32.mrf.mxu2 }
 0x42f   :  { %v6416_v4 = vpop.f32.mrf.mxu3 }
 0x430   :  { %v6417_v57 = vadd.f32 %v6416_v4, %v6404_v8 }
 0x432   :  { %6421 = vst.msk [vmem:[#allocation2] sm:$0x3] %vm6420_vm1, %v6417_v57 }
 0x433   :  { %6432 = dma.vmem_to_hbm [thread:$0]  %s6428_s6, 32, %s6430_s9, [#allocation3]  }
 0x437   :  { %v6418_v46 = vpop.f32.mrf.mxu3 }
 0x438   :  { %10554 = dma.done.wait [#allocation3], 32  }
 0x439   :  { %10555 = vsyncadd [#allocation3], 4294967264 }
 0x43a   :  { %6437 = vsyncpa [#allocation3], 1 }

</bundles_post_ra>
